<compile_context>
chip_gen: v6e
topology: v6e:2x2x1
jax: 0.10.0
libtpu: 0.0.40
codegen_flags: <defaults>
</compile_context>

<pallas_src>
import functools

import jax
import jax.numpy as jnp
from jax.experimental import pallas as pl
from jax.experimental.pallas import tpu as pltpu

EPS = 1e-5                 # LayerNorm & BatchNorm eps (PyTorch defaults)
MM_DTYPE = jnp.bfloat16    # MXU operand dtype (accumulation stays f32)


# ----------------------------- in-kernel helpers ------------------------------
def _ln(x, g, b):
    mu = jnp.mean(x, axis=-1, keepdims=True)
    var = jnp.mean(jnp.square(x - mu), axis=-1, keepdims=True)
    return (x - mu) * jax.lax.rsqrt(var + EPS) * g + b


def _silu(x):
    return x * jax.nn.sigmoid(x)


# --------------------------------- kernels ------------------------------------
def stage1_kernel(x_ref,
                  f_g, f_b, f_w1, f_b1, f_w2, f_b2,
                  a_g, a_b, wq, bq, wk, bk, wv, bv,
                  x1_ref, q_ref, k_ref, v_ref):
    # Fused: x1 = x + 0.5*FFN1(LN(x))   (0.5 folded into f_w2/f_b2)
    #        q,k,v = LN_attn(x1) @ W{q,k,v} + b   (1/sqrt(hd) folded into wq/bq)
    B, tt, C = x_ref.shape
    x = x_ref[...].reshape(B * tt, C)

    h = _silu(jnp.dot(_ln(x, f_g[...], f_b[...]).astype(MM_DTYPE), f_w1[...],
                      preferred_element_type=jnp.float32) + f_b1[...])
    x1 = x + jnp.dot(h.astype(MM_DTYPE), f_w2[...],
                     preferred_element_type=jnp.float32) + f_b2[...]
    x1_ref[...] = x1.reshape(B, tt, C)

    xn = _ln(x1, a_g[...], a_b[...]).astype(MM_DTYPE)
    q_ref[...] = (jnp.dot(xn, wq[...], preferred_element_type=jnp.float32)
                  + bq[...]).astype(MM_DTYPE).reshape(B, tt, C)
    k_ref[...] = (jnp.dot(xn, wk[...], preferred_element_type=jnp.float32)
                  + bk[...]).astype(MM_DTYPE).reshape(B, tt, C)
    v_ref[...] = (jnp.dot(xn, wv[...], preferred_element_type=jnp.float32)
                  + bv[...]).astype(MM_DTYPE).reshape(B, tt, C)


def attn_kernel(x1_ref, q_ref, k_ref, v_ref, wo_ref, bo_ref, x2_ref, *, n_heads):
    # One batch element per grid step: x2 = x1 + MHA_out_proj(softmax(q k^T) v).
    # The per-head concat is folded into the output projection (sum of per-head matmuls),
    # so no in-kernel concatenate / reshape is needed.
    # TODO(synk): for very long T a flash-style KV-tiled online softmax would avoid the
    # (T, T) per-head score tensor; at Conformer-scale T it fits VMEM processed head-by-head.
    _, T, C = q_ref.shape
    hd = C // n_heads
    q = q_ref[0]                     # (T, C) bf16, scale already folded into Wq/bq
    k = k_ref[0]
    v = v_ref[0]
    wo = wo_ref[...]                 # (C, C) bf16

    acc = jnp.zeros((T, C), jnp.float32) + bo_ref[...]
    for h in range(n_heads):
        sl = slice(h * hd, (h + 1) * hd)
        s = jax.lax.dot_general(q[:, sl], k[:, sl], (((1,), (1,)), ((), ())),
                                preferred_element_type=jnp.float32)          # (T, T)
        m = jnp.max(s, axis=-1, keepdims=True)
        e = jnp.exp(s - m)
        p = e * pl.reciprocal(jnp.sum(e, axis=-1, keepdims=True), approx=True)
        oh = jnp.dot(p.astype(MM_DTYPE), v[:, sl], preferred_element_type=jnp.float32)
        acc = acc + jnp.dot(oh.astype(MM_DTYPE), wo[sl, :],
                            preferred_element_type=jnp.float32)
    x2_ref[0] = x1_ref[0] + acc


def stage3_kernel(x2_ref,
                  c_g, c_b, pw1_w, pw1_b, dw_ref, db_ref,
                  bn_g, bn_b, bn_m, bn_v, pw2_w, pw2_b,
                  f_g, f_b, f_w1, f_b1, f_w2, f_b2,
                  post_g, post_b,
                  y_ref, conv_buf, *, ksize):
    # Fused: conv module (+residual) -> ffm2 (+residual, 0.5 folded) -> post-LayerNorm.
    # The GLU activation z stays in VMEM; the depthwise conv runs along the leading B axis.
    B, tt, C = x2_ref.shape
    inner = dw_ref.shape[1]
    pad = (ksize - 1) // 2

    x2 = x2_ref[...]
    x2f = x2.reshape(B * tt, C)

    # conv module front: LN -> pointwise 1x1 (C -> 2*inner) -> GLU over channels
    zz = jnp.dot(_ln(x2f, c_g[...], c_b[...]).astype(MM_DTYPE), pw1_w[...],
                 preferred_element_type=jnp.float32) + pw1_b[...]
    z = zz[:, :inner] * jax.nn.sigmoid(zz[:, inner:])
    z3 = z.reshape(B, tt, inner)

    # depthwise conv along B (leading axis); zero padding folded in by skipping OOB taps
    dw = dw_ref[...]                 # (ksize, inner) f32
    db = db_ref[...]                 # (1, inner)
    for n in range(B):
        acc = jnp.zeros((tt, inner), jnp.float32) + db
        for k in range(ksize):
            m = n + k - pad
            if 0 <= m < B:           # taps hitting the zero padding contribute nothing
                acc = acc + z3[m] * dw[k]
        conv_buf[n] = acc
    c = conv_buf[...].reshape(B * tt, inner)

    # BatchNorm1d (eval mode, running stats) + SiLU
    # TODO(synk): training-mode BatchNorm batch statistics are not reproduced.
    c = (c - bn_m[...]) * (bn_g[...] * jax.lax.rsqrt(bn_v[...] + EPS)) + bn_b[...]
    c = _silu(c)

    # pointwise 1x1 (inner -> C) + residual
    x3 = x2f + jnp.dot(c.astype(MM_DTYPE), pw2_w[...],
                       preferred_element_type=jnp.float32) + pw2_b[...]

    # ffm2 (0.5 folded into f_w2/f_b2) + residual
    h = _silu(jnp.dot(_ln(x3, f_g[...], f_b[...]).astype(MM_DTYPE), f_w1[...],
                      preferred_element_type=jnp.float32) + f_b1[...])
    x4 = x3 + jnp.dot(h.astype(MM_DTYPE), f_w2[...],
                      preferred_element_type=jnp.float32) + f_b2[...]

    # post norm
    y_ref[...] = _ln(x4, post_g[...], post_b[...]).reshape(B, tt, C)


# ------------------------------ pallas_call glue -------------------------------
def _pick_tile(n, cap=64):
    # largest tile <= cap that divides n and is (8,128)-legal as the second-minor block dim
    for t in range(min(n, cap), 0, -1):
        if n % t == 0 and (t % 8 == 0 or t == n):
            return t
    return n


def conformer_block(x, p, *, n_heads=8, ksize=31):
    T, B, C = x.shape
    assert C % n_heads == 0
    inner = p['ccm']['dw'].shape[1]
    tt = _pick_tile(T)
    nT = T // tt
    cparams = pltpu.CompilerParams(dimension_semantics=("parallel",))

    def aspec():
        return pl.BlockSpec((B, tt, C), lambda j: (0, j, 0))

    def wspec(arr):
        return pl.BlockSpec(arr.shape, lambda j: (0, 0))   # resident weight block

    xb = jnp.transpose(x, (1, 0, 2))   # (B, T, C): boundary layout change only

    # ---- stage 1: ffm1 (+residual) fused with attention pre-LN + Q/K/V projections ----
    f1, at = p['ffm1'], p['attn']
    w_s1 = (f1['ln_g'], f1['ln_b'], f1['w1'], f1['b1'], f1['w2'], f1['b2'],
            at['ln_g'], at['ln_b'], at['wq'], at['bq'], at['wk'], at['bk'],
            at['wv'], at['bv'])
    x1, q, k, v = pl.pallas_call(
        stage1_kernel,
        grid=(nT,),
        in_specs=[aspec()] + [wspec(w) for w in w_s1],
        out_specs=(aspec(), aspec(), aspec(), aspec()),
        out_shape=(jax.ShapeDtypeStruct((B, T, C), jnp.float32),
                   jax.ShapeDtypeStruct((B, T, C), MM_DTYPE),
                   jax.ShapeDtypeStruct((B, T, C), MM_DTYPE),
                   jax.ShapeDtypeStruct((B, T, C), MM_DTYPE)),
        compiler_params=cparams,
    )(xb, *w_s1)

    # ---- stage 2: multi-head self-attention over T + out-proj + residual (grid over B) ----
    bspec = pl.BlockSpec((1, T, C), lambda b: (b, 0, 0))
    x2 = pl.pallas_call(
        functools.partial(attn_kernel, n_heads=n_heads),
        grid=(B,),
        in_specs=[bspec, bspec, bspec, bspec, wspec(at['wo']), wspec(at['bo'])],
        out_specs=pl.BlockSpec((1, T, C), lambda b: (b, 0, 0)),
        out_shape=jax.ShapeDtypeStruct((B, T, C), jnp.float32),
        compiler_params=cparams,
    )(x1, q, k, v, at['wo'], at['bo'])

    # ---- stage 3: conv module (+residual) + ffm2 (+residual) + post-norm ----
    cc, f2 = p['ccm'], p['ffm2']
    w_s3 = (cc['ln_g'], cc['ln_b'], cc['w1'], cc['b1'], cc['dw'], cc['db'],
            cc['bn_g'], cc['bn_b'], cc['bn_m'], cc['bn_v'], cc['w2'], cc['b2'],
            f2['ln_g'], f2['ln_b'], f2['w1'], f2['b1'], f2['w2'], f2['b2'],
            p['post_g'], p['post_b'])
    y = pl.pallas_call(
        functools.partial(stage3_kernel, ksize=ksize),
        grid=(nT,),
        in_specs=[aspec()] + [wspec(w) for w in w_s3],
        out_specs=aspec(),
        out_shape=jax.ShapeDtypeStruct((B, T, C), jnp.float32),
        scratch_shapes=[pltpu.VMEM((B, tt, inner), jnp.float32)],
        compiler_params=cparams,
    )(x2, *w_s3)

    return jnp.transpose(y, (1, 0, 2))   # back to (T, B, C)


# ------------------------------ parameter setup --------------------------------
def make_params(key, C, *, n_heads=8, ffm_mult=4, exp=2, ksize=31):
    Hff = C * ffm_mult
    inner = C * exp
    hd = C // n_heads
    keys = iter(jax.random.split(key, 64))

    def w(shape, scale=0.1):
        return (scale * jax.random.normal(next(keys), shape)).astype(jnp.float32)

    def ffm():
        # 0.5 residual scale folded into the second linear
        return dict(ln_g=jnp.ones((1, C), jnp.float32), ln_b=jnp.zeros((1, C), jnp.float32),
                    w1=w((C, Hff)).astype(MM_DTYPE), b1=w((1, Hff), 0.02),
                    w2=(0.5 * w((Hff, C))).astype(MM_DTYPE), b2=0.5 * w((1, C), 0.02))

    scale = 1.0 / float(hd) ** 0.5   # 1/sqrt(head_dim) folded into Wq/bq
    return dict(
        ffm1=ffm(),
        attn=dict(ln_g=jnp.ones((1, C), jnp.float32), ln_b=jnp.zeros((1, C), jnp.float32),
                  wq=(scale * w((C, C))).astype(MM_DTYPE), bq=scale * w((1, C), 0.02),
                  wk=w((C, C)).astype(MM_DTYPE), bk=w((1, C), 0.02),
                  wv=w((C, C)).astype(MM_DTYPE), bv=w((1, C), 0.02),
                  wo=w((C, C)).astype(MM_DTYPE), bo=w((1, C), 0.02)),
        ccm=dict(ln_g=jnp.ones((1, C), jnp.float32), ln_b=jnp.zeros((1, C), jnp.float32),
                 w1=w((C, 2 * inner)).astype(MM_DTYPE), b1=w((1, 2 * inner), 0.02),
                 dw=w((ksize, inner)), db=w((1, inner), 0.02),
                 bn_g=jnp.ones((1, inner), jnp.float32), bn_b=jnp.zeros((1, inner), jnp.float32),
                 bn_m=jnp.zeros((1, inner), jnp.float32), bn_v=jnp.ones((1, inner), jnp.float32),
                 w2=w((inner, C)).astype(MM_DTYPE), b2=w((1, C), 0.02)),
        ffm2=ffm(),
        post_g=jnp.ones((1, C), jnp.float32),
        post_b=jnp.zeros((1, C), jnp.float32),
    )


if __name__ == "__main__":
    key = jax.random.PRNGKey(0)
    kx, kp = jax.random.split(key)

    # small shapes: dim=32 (divisible by n_heads=8), T=16 (attention axis), B=8 (attention batch
    # / depthwise-conv length axis, exactly as the PyTorch module composes them).
    T, B, C = 16, 8, 32
    x = jax.random.normal(kx, (T, B, C), dtype=jnp.float32)
    params = make_params(kp, C, n_heads=8, ffm_mult=4, exp=2, ksize=31)

    fwd = jax.jit(functools.partial(conformer_block, n_heads=8, ksize=31))
    y = fwd(x, params)
    y = jax.block_until_ready(y)

    assert y.shape == (T, B, C) and y.dtype == jnp.float32
    assert bool(jnp.all(jnp.isfinite(y)))
    print("KERNEL_OK")
</pallas_src>

<mosaic_0001>
module attributes {stable_mosaic.version = 11 : i64} {
  func.func @attn_kernel(%arg0: i32, %arg1: memref<1x16x32xf32, #tpu.memory_space<vmem>>, %arg2: memref<1x16x32xbf16, #tpu.memory_space<vmem>>, %arg3: memref<1x16x32xbf16, #tpu.memory_space<vmem>>, %arg4: memref<1x16x32xbf16, #tpu.memory_space<vmem>>, %arg5: memref<32x32xbf16, #tpu.memory_space<vmem>>, %arg6: memref<1x32xf32, #tpu.memory_space<vmem>>, %arg7: memref<1x16x32xf32, #tpu.memory_space<vmem>>) attributes {dimension_semantics = [#tpu.dimension_semantics<parallel>], iteration_bounds = array<i64: 8>, scalar_prefetch = 0 : i64, scratch_operands = 0 : i64, tpu.core_type = #tpu.core_type<tc>, window_params = [{transform_indices = @transform_0, window_bounds = array<i64: 1, 16, 32>}, {transform_indices = @transform_1, window_bounds = array<i64: 1, 16, 32>}, {transform_indices = @transform_2, window_bounds = array<i64: 1, 16, 32>}, {transform_indices = @transform_3, window_bounds = array<i64: 1, 16, 32>}, {pipeline_mode = #tpu.pipeline_mode<synchronous>, transform_indices = @transform_4, window_bounds = array<i64: 32, 32>}, {pipeline_mode = #tpu.pipeline_mode<synchronous>, transform_indices = @transform_5, window_bounds = array<i64: 1, 32>}, {transform_indices = @transform_6, window_bounds = array<i64: 1, 16, 32>}]} {
    %c0 = arith.constant 0 : index
    %c0_0 = arith.constant 0 : index
    %c0_1 = arith.constant 0 : index
    %0 = vector.load %arg2[%c0, %c0_0, %c0_1] : memref<1x16x32xbf16, #tpu.memory_space<vmem>>, vector<1x16x32xbf16>
    %1 = vector.shape_cast %0 : vector<1x16x32xbf16> to vector<16x32xbf16>
    %c0_2 = arith.constant 0 : index
    %c0_3 = arith.constant 0 : index
    %c0_4 = arith.constant 0 : index
    %2 = vector.load %arg3[%c0_2, %c0_3, %c0_4] : memref<1x16x32xbf16, #tpu.memory_space<vmem>>, vector<1x16x32xbf16>
    %3 = vector.shape_cast %2 : vector<1x16x32xbf16> to vector<16x32xbf16>
    %c0_5 = arith.constant 0 : index
    %c0_6 = arith.constant 0 : index
    %c0_7 = arith.constant 0 : index
    %4 = vector.load %arg4[%c0_5, %c0_6, %c0_7] : memref<1x16x32xbf16, #tpu.memory_space<vmem>>, vector<1x16x32xbf16>
    %5 = vector.shape_cast %4 : vector<1x16x32xbf16> to vector<16x32xbf16>
    %c0_8 = arith.constant 0 : index
    %c0_9 = arith.constant 0 : index
    %6 = vector.load %arg5[%c0_8, %c0_9] : memref<32x32xbf16, #tpu.memory_space<vmem>>, vector<32x32xbf16>
    %cst = arith.constant 0.000000e+00 : f32
    %7 = vector.broadcast %cst : f32 to vector<16x32xf32>
    %c0_10 = arith.constant 0 : index
    %c0_11 = arith.constant 0 : index
    %8 = vector.load %arg6[%c0_10, %c0_11] : memref<1x32xf32, #tpu.memory_space<vmem>>, vector<1x32xf32>
    %9 = vector.broadcast %8 : vector<1x32xf32> to vector<16x32xf32>
    %10 = arith.addf %7, %9 : vector<16x32xf32>
    %11 = vector.extract_strided_slice %1 {offsets = [0, 0], sizes = [16, 4], strides = [1, 1]} : vector<16x32xbf16> to vector<16x4xbf16>
    %12 = vector.extract_strided_slice %3 {offsets = [0, 0], sizes = [16, 4], strides = [1, 1]} : vector<16x32xbf16> to vector<16x4xbf16>
    %cst_12 = arith.constant dense<0.000000e+00> : vector<16x16xf32>
    %13 = tpu.matmul %11, %12, %cst_12 {dimension_numbers = #tpu.dot_dimension_numbers<[1], [1], [0], [0], [0, 0, 1, 0], [], []>} : vector<16x4xbf16>, vector<16x4xbf16>, vector<16x16xf32> -> vector<16x16xf32>
    %cst_13 = arith.constant dense<0xFF800000> : vector<16xf32>
    %14 = vector.multi_reduction <maximumf>, %13, %cst_13 [1] : vector<16x16xf32> to vector<16xf32>
    %15 = vector.shape_cast %14 : vector<16xf32> to vector<16x1xf32>
    %16 = vector.broadcast %15 : vector<16x1xf32> to vector<16x16xf32>
    %17 = arith.subf %13, %16 : vector<16x16xf32>
    %18 = math.exp %17 : vector<16x16xf32>
    %cst_14 = arith.constant dense<0.000000e+00> : vector<16xf32>
    %19 = vector.multi_reduction <add>, %18, %cst_14 [1] : vector<16x16xf32> to vector<16xf32>
    %20 = vector.shape_cast %19 : vector<16xf32> to vector<16x1xf32>
    %21 = tpu.reciprocal %20 {approx = true} : vector<16x1xf32> -> vector<16x1xf32>
    %22 = vector.broadcast %21 : vector<16x1xf32> to vector<16x16xf32>
    %23 = arith.mulf %18, %22 : vector<16x16xf32>
    %24 = arith.truncf %23 : vector<16x16xf32> to vector<16x16xbf16>
    %25 = vector.extract_strided_slice %5 {offsets = [0, 0], sizes = [16, 4], strides = [1, 1]} : vector<16x32xbf16> to vector<16x4xbf16>
    %cst_15 = arith.constant dense<0.000000e+00> : vector<16x4xf32>
    %26 = tpu.matmul %24, %25, %cst_15 {dimension_numbers = #tpu.dot_dimension_numbers<[1], [0], [0], [1], [0, 0, 1, 1], [], []>} : vector<16x16xbf16>, vector<16x4xbf16>, vector<16x4xf32> -> vector<16x4xf32>
    %27 = arith.truncf %26 : vector<16x4xf32> to vector<16x4xbf16>
    %28 = vector.extract_strided_slice %6 {offsets = [0, 0], sizes = [4, 32], strides = [1, 1]} : vector<32x32xbf16> to vector<4x32xbf16>
    %cst_16 = arith.constant dense<0.000000e+00> : vector<16x32xf32>
    %29 = tpu.matmul %27, %28, %cst_16 {dimension_numbers = #tpu.dot_dimension_numbers<[1], [0], [0], [1], [0, 0, 1, 1], [], []>} : vector<16x4xbf16>, vector<4x32xbf16>, vector<16x32xf32> -> vector<16x32xf32>
    %30 = arith.addf %10, %29 : vector<16x32xf32>
    %31 = vector.extract_strided_slice %1 {offsets = [0, 4], sizes = [16, 4], strides = [1, 1]} : vector<16x32xbf16> to vector<16x4xbf16>
    %32 = vector.extract_strided_slice %3 {offsets = [0, 4], sizes = [16, 4], strides = [1, 1]} : vector<16x32xbf16> to vector<16x4xbf16>
    %cst_17 = arith.constant dense<0.000000e+00> : vector<16x16xf32>
    %33 = tpu.matmul %31, %32, %cst_17 {dimension_numbers = #tpu.dot_dimension_numbers<[1], [1], [0], [0], [0, 0, 1, 0], [], []>} : vector<16x4xbf16>, vector<16x4xbf16>, vector<16x16xf32> -> vector<16x16xf32>
    %cst_18 = arith.constant dense<0xFF800000> : vector<16xf32>
    %34 = vector.multi_reduction <maximumf>, %33, %cst_18 [1] : vector<16x16xf32> to vector<16xf32>
    %35 = vector.shape_cast %34 : vector<16xf32> to vector<16x1xf32>
    %36 = vector.broadcast %35 : vector<16x1xf32> to vector<16x16xf32>
    %37 = arith.subf %33, %36 : vector<16x16xf32>
    %38 = math.exp %37 : vector<16x16xf32>
    %cst_19 = arith.constant dense<0.000000e+00> : vector<16xf32>
    %39 = vector.multi_reduction <add>, %38, %cst_19 [1] : vector<16x16xf32> to vector<16xf32>
    %40 = vector.shape_cast %39 : vector<16xf32> to vector<16x1xf32>
    %41 = tpu.reciprocal %40 {approx = true} : vector<16x1xf32> -> vector<16x1xf32>
    %42 = vector.broadcast %41 : vector<16x1xf32> to vector<16x16xf32>
    %43 = arith.mulf %38, %42 : vector<16x16xf32>
    %44 = arith.truncf %43 : vector<16x16xf32> to vector<16x16xbf16>
    %45 = vector.extract_strided_slice %5 {offsets = [0, 4], sizes = [16, 4], strides = [1, 1]} : vector<16x32xbf16> to vector<16x4xbf16>
    %cst_20 = arith.constant dense<0.000000e+00> : vector<16x4xf32>
    %46 = tpu.matmul %44, %45, %cst_20 {dimension_numbers = #tpu.dot_dimension_numbers<[1], [0], [0], [1], [0, 0, 1, 1], [], []>} : vector<16x16xbf16>, vector<16x4xbf16>, vector<16x4xf32> -> vector<16x4xf32>
    %47 = arith.truncf %46 : vector<16x4xf32> to vector<16x4xbf16>
    %48 = vector.extract_strided_slice %6 {offsets = [4, 0], sizes = [4, 32], strides = [1, 1]} : vector<32x32xbf16> to vector<4x32xbf16>
    %cst_21 = arith.constant dense<0.000000e+00> : vector<16x32xf32>
    %49 = tpu.matmul %47, %48, %cst_21 {dimension_numbers = #tpu.dot_dimension_numbers<[1], [0], [0], [1], [0, 0, 1, 1], [], []>} : vector<16x4xbf16>, vector<4x32xbf16>, vector<16x32xf32> -> vector<16x32xf32>
    %50 = arith.addf %30, %49 : vector<16x32xf32>
    %51 = vector.extract_strided_slice %1 {offsets = [0, 8], sizes = [16, 4], strides = [1, 1]} : vector<16x32xbf16> to vector<16x4xbf16>
    %52 = vector.extract_strided_slice %3 {offsets = [0, 8], sizes = [16, 4], strides = [1, 1]} : vector<16x32xbf16> to vector<16x4xbf16>
    %cst_22 = arith.constant dense<0.000000e+00> : vector<16x16xf32>
    %53 = tpu.matmul %51, %52, %cst_22 {dimension_numbers = #tpu.dot_dimension_numbers<[1], [1], [0], [0], [0, 0, 1, 0], [], []>} : vector<16x4xbf16>, vector<16x4xbf16>, vector<16x16xf32> -> vector<16x16xf32>
    %cst_23 = arith.constant dense<0xFF800000> : vector<16xf32>
    %54 = vector.multi_reduction <maximumf>, %53, %cst_23 [1] : vector<16x16xf32> to vector<16xf32>
    %55 = vector.shape_cast %54 : vector<16xf32> to vector<16x1xf32>
    %56 = vector.broadcast %55 : vector<16x1xf32> to vector<16x16xf32>
    %57 = arith.subf %53, %56 : vector<16x16xf32>
    %58 = math.exp %57 : vector<16x16xf32>
    %cst_24 = arith.constant dense<0.000000e+00> : vector<16xf32>
    %59 = vector.multi_reduction <add>, %58, %cst_24 [1] : vector<16x16xf32> to vector<16xf32>
    %60 = vector.shape_cast %59 : vector<16xf32> to vector<16x1xf32>
    %61 = tpu.reciprocal %60 {approx = true} : vector<16x1xf32> -> vector<16x1xf32>
    %62 = vector.broadcast %61 : vector<16x1xf32> to vector<16x16xf32>
    %63 = arith.mulf %58, %62 : vector<16x16xf32>
    %64 = arith.truncf %63 : vector<16x16xf32> to vector<16x16xbf16>
    %65 = vector.extract_strided_slice %5 {offsets = [0, 8], sizes = [16, 4], strides = [1, 1]} : vector<16x32xbf16> to vector<16x4xbf16>
    %cst_25 = arith.constant dense<0.000000e+00> : vector<16x4xf32>
    %66 = tpu.matmul %64, %65, %cst_25 {dimension_numbers = #tpu.dot_dimension_numbers<[1], [0], [0], [1], [0, 0, 1, 1], [], []>} : vector<16x16xbf16>, vector<16x4xbf16>, vector<16x4xf32> -> vector<16x4xf32>
    %67 = arith.truncf %66 : vector<16x4xf32> to vector<16x4xbf16>
    %68 = vector.extract_strided_slice %6 {offsets = [8, 0], sizes = [4, 32], strides = [1, 1]} : vector<32x32xbf16> to vector<4x32xbf16>
    %cst_26 = arith.constant dense<0.000000e+00> : vector<16x32xf32>
    %69 = tpu.matmul %67, %68, %cst_26 {dimension_numbers = #tpu.dot_dimension_numbers<[1], [0], [0], [1], [0, 0, 1, 1], [], []>} : vector<16x4xbf16>, vector<4x32xbf16>, vector<16x32xf32> -> vector<16x32xf32>
    %70 = arith.addf %50, %69 : vector<16x32xf32>
    %71 = vector.extract_strided_slice %1 {offsets = [0, 12], sizes = [16, 4], strides = [1, 1]} : vector<16x32xbf16> to vector<16x4xbf16>
    %72 = vector.extract_strided_slice %3 {offsets = [0, 12], sizes = [16, 4], strides = [1, 1]} : vector<16x32xbf16> to vector<16x4xbf16>
    %cst_27 = arith.constant dense<0.000000e+00> : vector<16x16xf32>
    %73 = tpu.matmul %71, %72, %cst_27 {dimension_numbers = #tpu.dot_dimension_numbers<[1], [1], [0], [0], [0, 0, 1, 0], [], []>} : vector<16x4xbf16>, vector<16x4xbf16>, vector<16x16xf32> -> vector<16x16xf32>
    %cst_28 = arith.constant dense<0xFF800000> : vector<16xf32>
    %74 = vector.multi_reduction <maximumf>, %73, %cst_28 [1] : vector<16x16xf32> to vector<16xf32>
    %75 = vector.shape_cast %74 : vector<16xf32> to vector<16x1xf32>
    %76 = vector.broadcast %75 : vector<16x1xf32> to vector<16x16xf32>
    %77 = arith.subf %73, %76 : vector<16x16xf32>
    %78 = math.exp %77 : vector<16x16xf32>
    %cst_29 = arith.constant dense<0.000000e+00> : vector<16xf32>
    %79 = vector.multi_reduction <add>, %78, %cst_29 [1] : vector<16x16xf32> to vector<16xf32>
    %80 = vector.shape_cast %79 : vector<16xf32> to vector<16x1xf32>
    %81 = tpu.reciprocal %80 {approx = true} : vector<16x1xf32> -> vector<16x1xf32>
    %82 = vector.broadcast %81 : vector<16x1xf32> to vector<16x16xf32>
    %83 = arith.mulf %78, %82 : vector<16x16xf32>
    %84 = arith.truncf %83 : vector<16x16xf32> to vector<16x16xbf16>
    %85 = vector.extract_strided_slice %5 {offsets = [0, 12], sizes = [16, 4], strides = [1, 1]} : vector<16x32xbf16> to vector<16x4xbf16>
    %cst_30 = arith.constant dense<0.000000e+00> : vector<16x4xf32>
    %86 = tpu.matmul %84, %85, %cst_30 {dimension_numbers = #tpu.dot_dimension_numbers<[1], [0], [0], [1], [0, 0, 1, 1], [], []>} : vector<16x16xbf16>, vector<16x4xbf16>, vector<16x4xf32> -> vector<16x4xf32>
    %87 = arith.truncf %86 : vector<16x4xf32> to vector<16x4xbf16>
    %88 = vector.extract_strided_slice %6 {offsets = [12, 0], sizes = [4, 32], strides = [1, 1]} : vector<32x32xbf16> to vector<4x32xbf16>
    %cst_31 = arith.constant dense<0.000000e+00> : vector<16x32xf32>
    %89 = tpu.matmul %87, %88, %cst_31 {dimension_numbers = #tpu.dot_dimension_numbers<[1], [0], [0], [1], [0, 0, 1, 1], [], []>} : vector<16x4xbf16>, vector<4x32xbf16>, vector<16x32xf32> -> vector<16x32xf32>
    %90 = arith.addf %70, %89 : vector<16x32xf32>
    %91 = vector.extract_strided_slice %1 {offsets = [0, 16], sizes = [16, 4], strides = [1, 1]} : vector<16x32xbf16> to vector<16x4xbf16>
    %92 = vector.extract_strided_slice %3 {offsets = [0, 16], sizes = [16, 4], strides = [1, 1]} : vector<16x32xbf16> to vector<16x4xbf16>
    %cst_32 = arith.constant dense<0.000000e+00> : vector<16x16xf32>
    %93 = tpu.matmul %91, %92, %cst_32 {dimension_numbers = #tpu.dot_dimension_numbers<[1], [1], [0], [0], [0, 0, 1, 0], [], []>} : vector<16x4xbf16>, vector<16x4xbf16>, vector<16x16xf32> -> vector<16x16xf32>
    %cst_33 = arith.constant dense<0xFF800000> : vector<16xf32>
    %94 = vector.multi_reduction <maximumf>, %93, %cst_33 [1] : vector<16x16xf32> to vector<16xf32>
    %95 = vector.shape_cast %94 : vector<16xf32> to vector<16x1xf32>
    %96 = vector.broadcast %95 : vector<16x1xf32> to vector<16x16xf32>
    %97 = arith.subf %93, %96 : vector<16x16xf32>
    %98 = math.exp %97 : vector<16x16xf32>
    %cst_34 = arith.constant dense<0.000000e+00> : vector<16xf32>
    %99 = vector.multi_reduction <add>, %98, %cst_34 [1] : vector<16x16xf32> to vector<16xf32>
    %100 = vector.shape_cast %99 : vector<16xf32> to vector<16x1xf32>
    %101 = tpu.reciprocal %100 {approx = true} : vector<16x1xf32> -> vector<16x1xf32>
    %102 = vector.broadcast %101 : vector<16x1xf32> to vector<16x16xf32>
    %103 = arith.mulf %98, %102 : vector<16x16xf32>
    %104 = arith.truncf %103 : vector<16x16xf32> to vector<16x16xbf16>
    %105 = vector.extract_strided_slice %5 {offsets = [0, 16], sizes = [16, 4], strides = [1, 1]} : vector<16x32xbf16> to vector<16x4xbf16>
    %cst_35 = arith.constant dense<0.000000e+00> : vector<16x4xf32>
    %106 = tpu.matmul %104, %105, %cst_35 {dimension_numbers = #tpu.dot_dimension_numbers<[1], [0], [0], [1], [0, 0, 1, 1], [], []>} : vector<16x16xbf16>, vector<16x4xbf16>, vector<16x4xf32> -> vector<16x4xf32>
    %107 = arith.truncf %106 : vector<16x4xf32> to vector<16x4xbf16>
    %108 = vector.extract_strided_slice %6 {offsets = [16, 0], sizes = [4, 32], strides = [1, 1]} : vector<32x32xbf16> to vector<4x32xbf16>
    %cst_36 = arith.constant dense<0.000000e+00> : vector<16x32xf32>
    %109 = tpu.matmul %107, %108, %cst_36 {dimension_numbers = #tpu.dot_dimension_numbers<[1], [0], [0], [1], [0, 0, 1, 1], [], []>} : vector<16x4xbf16>, vector<4x32xbf16>, vector<16x32xf32> -> vector<16x32xf32>
    %110 = arith.addf %90, %109 : vector<16x32xf32>
    %111 = vector.extract_strided_slice %1 {offsets = [0, 20], sizes = [16, 4], strides = [1, 1]} : vector<16x32xbf16> to vector<16x4xbf16>
    %112 = vector.extract_strided_slice %3 {offsets = [0, 20], sizes = [16, 4], strides = [1, 1]} : vector<16x32xbf16> to vector<16x4xbf16>
    %cst_37 = arith.constant dense<0.000000e+00> : vector<16x16xf32>
    %113 = tpu.matmul %111, %112, %cst_37 {dimension_numbers = #tpu.dot_dimension_numbers<[1], [1], [0], [0], [0, 0, 1, 0], [], []>} : vector<16x4xbf16>, vector<16x4xbf16>, vector<16x16xf32> -> vector<16x16xf32>
    %cst_38 = arith.constant dense<0xFF800000> : vector<16xf32>
    %114 = vector.multi_reduction <maximumf>, %113, %cst_38 [1] : vector<16x16xf32> to vector<16xf32>
    %115 = vector.shape_cast %114 : vector<16xf32> to vector<16x1xf32>
    %116 = vector.broadcast %115 : vector<16x1xf32> to vector<16x16xf32>
    %117 = arith.subf %113, %116 : vector<16x16xf32>
    %118 = math.exp %117 : vector<16x16xf32>
    %cst_39 = arith.constant dense<0.000000e+00> : vector<16xf32>
    %119 = vector.multi_reduction <add>, %118, %cst_39 [1] : vector<16x16xf32> to vector<16xf32>
    %120 = vector.shape_cast %119 : vector<16xf32> to vector<16x1xf32>
    %121 = tpu.reciprocal %120 {approx = true} : vector<16x1xf32> -> vector<16x1xf32>
    %122 = vector.broadcast %121 : vector<16x1xf32> to vector<16x16xf32>
    %123 = arith.mulf %118, %122 : vector<16x16xf32>
    %124 = arith.truncf %123 : vector<16x16xf32> to vector<16x16xbf16>
    %125 = vector.extract_strided_slice %5 {offsets = [0, 20], sizes = [16, 4], strides = [1, 1]} : vector<16x32xbf16> to vector<16x4xbf16>
    %cst_40 = arith.constant dense<0.000000e+00> : vector<16x4xf32>
    %126 = tpu.matmul %124, %125, %cst_40 {dimension_numbers = #tpu.dot_dimension_numbers<[1], [0], [0], [1], [0, 0, 1, 1], [], []>} : vector<16x16xbf16>, vector<16x4xbf16>, vector<16x4xf32> -> vector<16x4xf32>
    %127 = arith.truncf %126 : vector<16x4xf32> to vector<16x4xbf16>
    %128 = vector.extract_strided_slice %6 {offsets = [20, 0], sizes = [4, 32], strides = [1, 1]} : vector<32x32xbf16> to vector<4x32xbf16>
    %cst_41 = arith.constant dense<0.000000e+00> : vector<16x32xf32>
    %129 = tpu.matmul %127, %128, %cst_41 {dimension_numbers = #tpu.dot_dimension_numbers<[1], [0], [0], [1], [0, 0, 1, 1], [], []>} : vector<16x4xbf16>, vector<4x32xbf16>, vector<16x32xf32> -> vector<16x32xf32>
    %130 = arith.addf %110, %129 : vector<16x32xf32>
    %131 = vector.extract_strided_slice %1 {offsets = [0, 24], sizes = [16, 4], strides = [1, 1]} : vector<16x32xbf16> to vector<16x4xbf16>
    %132 = vector.extract_strided_slice %3 {offsets = [0, 24], sizes = [16, 4], strides = [1, 1]} : vector<16x32xbf16> to vector<16x4xbf16>
    %cst_42 = arith.constant dense<0.000000e+00> : vector<16x16xf32>
    %133 = tpu.matmul %131, %132, %cst_42 {dimension_numbers = #tpu.dot_dimension_numbers<[1], [1], [0], [0], [0, 0, 1, 0], [], []>} : vector<16x4xbf16>, vector<16x4xbf16>, vector<16x16xf32> -> vector<16x16xf32>
    %cst_43 = arith.constant dense<0xFF800000> : vector<16xf32>
    %134 = vector.multi_reduction <maximumf>, %133, %cst_43 [1] : vector<16x16xf32> to vector<16xf32>
    %135 = vector.shape_cast %134 : vector<16xf32> to vector<16x1xf32>
    %136 = vector.broadcast %135 : vector<16x1xf32> to vector<16x16xf32>
    %137 = arith.subf %133, %136 : vector<16x16xf32>
    %138 = math.exp %137 : vector<16x16xf32>
    %cst_44 = arith.constant dense<0.000000e+00> : vector<16xf32>
    %139 = vector.multi_reduction <add>, %138, %cst_44 [1] : vector<16x16xf32> to vector<16xf32>
    %140 = vector.shape_cast %139 : vector<16xf32> to vector<16x1xf32>
    %141 = tpu.reciprocal %140 {approx = true} : vector<16x1xf32> -> vector<16x1xf32>
    %142 = vector.broadcast %141 : vector<16x1xf32> to vector<16x16xf32>
    %143 = arith.mulf %138, %142 : vector<16x16xf32>
    %144 = arith.truncf %143 : vector<16x16xf32> to vector<16x16xbf16>
    %145 = vector.extract_strided_slice %5 {offsets = [0, 24], sizes = [16, 4], strides = [1, 1]} : vector<16x32xbf16> to vector<16x4xbf16>
    %cst_45 = arith.constant dense<0.000000e+00> : vector<16x4xf32>
    %146 = tpu.matmul %144, %145, %cst_45 {dimension_numbers = #tpu.dot_dimension_numbers<[1], [0], [0], [1], [0, 0, 1, 1], [], []>} : vector<16x16xbf16>, vector<16x4xbf16>, vector<16x4xf32> -> vector<16x4xf32>
    %147 = arith.truncf %146 : vector<16x4xf32> to vector<16x4xbf16>
    %148 = vector.extract_strided_slice %6 {offsets = [24, 0], sizes = [4, 32], strides = [1, 1]} : vector<32x32xbf16> to vector<4x32xbf16>
    %cst_46 = arith.constant dense<0.000000e+00> : vector<16x32xf32>
    %149 = tpu.matmul %147, %148, %cst_46 {dimension_numbers = #tpu.dot_dimension_numbers<[1], [0], [0], [1], [0, 0, 1, 1], [], []>} : vector<16x4xbf16>, vector<4x32xbf16>, vector<16x32xf32> -> vector<16x32xf32>
    %150 = arith.addf %130, %149 : vector<16x32xf32>
    %151 = vector.extract_strided_slice %1 {offsets = [0, 28], sizes = [16, 4], strides = [1, 1]} : vector<16x32xbf16> to vector<16x4xbf16>
    %152 = vector.extract_strided_slice %3 {offsets = [0, 28], sizes = [16, 4], strides = [1, 1]} : vector<16x32xbf16> to vector<16x4xbf16>
    %cst_47 = arith.constant dense<0.000000e+00> : vector<16x16xf32>
    %153 = tpu.matmul %151, %152, %cst_47 {dimension_numbers = #tpu.dot_dimension_numbers<[1], [1], [0], [0], [0, 0, 1, 0], [], []>} : vector<16x4xbf16>, vector<16x4xbf16>, vector<16x16xf32> -> vector<16x16xf32>
    %cst_48 = arith.constant dense<0xFF800000> : vector<16xf32>
    %154 = vector.multi_reduction <maximumf>, %153, %cst_48 [1] : vector<16x16xf32> to vector<16xf32>
    %155 = vector.shape_cast %154 : vector<16xf32> to vector<16x1xf32>
    %156 = vector.broadcast %155 : vector<16x1xf32> to vector<16x16xf32>
    %157 = arith.subf %153, %156 : vector<16x16xf32>
    %158 = math.exp %157 : vector<16x16xf32>
    %cst_49 = arith.constant dense<0.000000e+00> : vector<16xf32>
    %159 = vector.multi_reduction <add>, %158, %cst_49 [1] : vector<16x16xf32> to vector<16xf32>
    %160 = vector.shape_cast %159 : vector<16xf32> to vector<16x1xf32>
    %161 = tpu.reciprocal %160 {approx = true} : vector<16x1xf32> -> vector<16x1xf32>
    %162 = vector.broadcast %161 : vector<16x1xf32> to vector<16x16xf32>
    %163 = arith.mulf %158, %162 : vector<16x16xf32>
    %164 = arith.truncf %163 : vector<16x16xf32> to vector<16x16xbf16>
    %165 = vector.extract_strided_slice %5 {offsets = [0, 28], sizes = [16, 4], strides = [1, 1]} : vector<16x32xbf16> to vector<16x4xbf16>
    %cst_50 = arith.constant dense<0.000000e+00> : vector<16x4xf32>
    %166 = tpu.matmul %164, %165, %cst_50 {dimension_numbers = #tpu.dot_dimension_numbers<[1], [0], [0], [1], [0, 0, 1, 1], [], []>} : vector<16x16xbf16>, vector<16x4xbf16>, vector<16x4xf32> -> vector<16x4xf32>
    %167 = arith.truncf %166 : vector<16x4xf32> to vector<16x4xbf16>
    %168 = vector.extract_strided_slice %6 {offsets = [28, 0], sizes = [4, 32], strides = [1, 1]} : vector<32x32xbf16> to vector<4x32xbf16>
    %cst_51 = arith.constant dense<0.000000e+00> : vector<16x32xf32>
    %169 = tpu.matmul %167, %168, %cst_51 {dimension_numbers = #tpu.dot_dimension_numbers<[1], [0], [0], [1], [0, 0, 1, 1], [], []>} : vector<16x4xbf16>, vector<4x32xbf16>, vector<16x32xf32> -> vector<16x32xf32>
    %170 = arith.addf %150, %169 : vector<16x32xf32>
    %c0_52 = arith.constant 0 : index
    %c0_53 = arith.constant 0 : index
    %c0_54 = arith.constant 0 : index
    %171 = vector.load %arg1[%c0_52, %c0_53, %c0_54] : memref<1x16x32xf32, #tpu.memory_space<vmem>>, vector<1x16x32xf32>
    %172 = vector.shape_cast %171 : vector<1x16x32xf32> to vector<16x32xf32>
    %173 = arith.addf %172, %170 : vector<16x32xf32>
    %c0_55 = arith.constant 0 : index
    %c0_56 = arith.constant 0 : index
    %c0_57 = arith.constant 0 : index
    %174 = vector.load %arg7[%c0_55, %c0_56, %c0_57] : memref<1x16x32xf32, #tpu.memory_space<vmem>>, vector<1x16x32xf32>
    %175 = vector.shape_cast %174 : vector<1x16x32xf32> to vector<16x32xf32>
    %176 = vector.shape_cast %173 : vector<16x32xf32> to vector<1x16x32xf32>
    tpu.vector_store %arg7[%c0_55, %c0_56, %c0_57], %176 {strides = array<i32>} : memref<1x16x32xf32, #tpu.memory_space<vmem>>, vector<1x16x32xf32>,
    return
  }
  func.func @transform_0(%arg0: i32) -> (i32, i32, i32) {
    %c0_i32 = arith.constant 0 : i32
    %c0_i32_0 = arith.constant 0 : i32
    %c0_i32_1 = arith.constant 0 : i32
    return %arg0, %c0_i32, %c0_i32_0 : i32, i32, i32
  }
  func.func @transform_1(%arg0: i32) -> (i32, i32, i32) {
    %c0_i32 = arith.constant 0 : i32
    %c0_i32_0 = arith.constant 0 : i32
    %c0_i32_1 = arith.constant 0 : i32
    return %arg0, %c0_i32, %c0_i32_0 : i32, i32, i32
  }
  func.func @transform_2(%arg0: i32) -> (i32, i32, i32) {
    %c0_i32 = arith.constant 0 : i32
    %c0_i32_0 = arith.constant 0 : i32
    %c0_i32_1 = arith.constant 0 : i32
    return %arg0, %c0_i32, %c0_i32_0 : i32, i32, i32
  }
  func.func @transform_3(%arg0: i32) -> (i32, i32, i32) {
    %c0_i32 = arith.constant 0 : i32
    %c0_i32_0 = arith.constant 0 : i32
    %c0_i32_1 = arith.constant 0 : i32
    return %arg0, %c0_i32, %c0_i32_0 : i32, i32, i32
  }
  func.func @transform_4(%arg0: i32) -> (i32, i32) {
    %c0_i32 = arith.constant 0 : i32
    %c0_i32_0 = arith.constant 0 : i32
    %c0_i32_1 = arith.constant 0 : i32
    return %c0_i32, %c0_i32_0 : i32, i32
  }
  func.func @transform_5(%arg0: i32) -> (i32, i32) {
    %c0_i32 = arith.constant 0 : i32
    %c0_i32_0 = arith.constant 0 : i32
    %c0_i32_1 = arith.constant 0 : i32
    return %c0_i32, %c0_i32_0 : i32, i32
  }
  func.func @transform_6(%arg0: i32) -> (i32, i32, i32) {
    %c0_i32 = arith.constant 0 : i32
    %c0_i32_0 = arith.constant 0 : i32
    %c0_i32_1 = arith.constant 0 : i32
    return %arg0, %c0_i32, %c0_i32_0 : i32, i32, i32
  }
}

module attributes {stable_mosaic.version = 11 : i64} {
  func.func @stage1_kernel(%arg0: i32, %arg1: memref<8x16x32xf32, #tpu.memory_space<vmem>>, %arg2: memref<1x32xf32, #tpu.memory_space<vmem>>, %arg3: memref<1x32xf32, #tpu.memory_space<vmem>>, %arg4: memref<32x128xbf16, #tpu.memory_space<vmem>>, %arg5: memref<1x128xf32, #tpu.memory_space<vmem>>, %arg6: memref<128x32xbf16, #tpu.memory_space<vmem>>, %arg7: memref<1x32xf32, #tpu.memory_space<vmem>>, %arg8: memref<1x32xf32, #tpu.memory_space<vmem>>, %arg9: memref<1x32xf32, #tpu.memory_space<vmem>>, %arg10: memref<32x32xbf16, #tpu.memory_space<vmem>>, %arg11: memref<1x32xf32, #tpu.memory_space<vmem>>, %arg12: memref<32x32xbf16, #tpu.memory_space<vmem>>, %arg13: memref<1x32xf32, #tpu.memory_space<vmem>>, %arg14: memref<32x32xbf16, #tpu.memory_space<vmem>>, %arg15: memref<1x32xf32, #tpu.memory_space<vmem>>, %arg16: memref<8x16x32xf32, #tpu.memory_space<vmem>>, %arg17: memref<8x16x32xbf16, #tpu.memory_space<vmem>>, %arg18: memref<8x16x32xbf16, #tpu.memory_space<vmem>>, %arg19: memref<8x16x32xbf16, #tpu.memory_space<vmem>>) attributes {dimension_semantics = [#tpu.dimension_semantics<parallel>], iteration_bounds = array<i64: 1>, scalar_prefetch = 0 : i64, scratch_operands = 0 : i64, tpu.core_type = #tpu.core_type<tc>, window_params = [{transform_indices = @transform_0, window_bounds = array<i64: 8, 16, 32>}, {pipeline_mode = #tpu.pipeline_mode<synchronous>, transform_indices = @transform_1, window_bounds = array<i64: 1, 32>}, {pipeline_mode = #tpu.pipeline_mode<synchronous>, transform_indices = @transform_2, window_bounds = array<i64: 1, 32>}, {pipeline_mode = #tpu.pipeline_mode<synchronous>, transform_indices = @transform_3, window_bounds = array<i64: 32, 128>}, {pipeline_mode = #tpu.pipeline_mode<synchronous>, transform_indices = @transform_4, window_bounds = array<i64: 1, 128>}, {pipeline_mode = #tpu.pipeline_mode<synchronous>, transform_indices = @transform_5, window_bounds = array<i64: 128, 32>}, {pipeline_mode = #tpu.pipeline_mode<synchronous>, transform_indices = @transform_6, window_bounds = array<i64: 1, 32>}, {pipeline_mode = #tpu.pipeline_mode<synchronous>, transform_indices = @transform_7, window_bounds = array<i64: 1, 32>}, {pipeline_mode = #tpu.pipeline_mode<synchronous>, transform_indices = @transform_8, window_bounds = array<i64: 1, 32>}, {pipeline_mode = #tpu.pipeline_mode<synchronous>, transform_indices = @transform_9, window_bounds = array<i64: 32, 32>}, {pipeline_mode = #tpu.pipeline_mode<synchronous>, transform_indices = @transform_10, window_bounds = array<i64: 1, 32>}, {pipeline_mode = #tpu.pipeline_mode<synchronous>, transform_indices = @transform_11, window_bounds = array<i64: 32, 32>}, {pipeline_mode = #tpu.pipeline_mode<synchronous>, transform_indices = @transform_12, window_bounds = array<i64: 1, 32>}, {pipeline_mode = #tpu.pipeline_mode<synchronous>, transform_indices = @transform_13, window_bounds = array<i64: 32, 32>}, {pipeline_mode = #tpu.pipeline_mode<synchronous>, transform_indices = @transform_14, window_bounds = array<i64: 1, 32>}, {transform_indices = @transform_15, window_bounds = array<i64: 8, 16, 32>}, {transform_indices = @transform_16, window_bounds = array<i64: 8, 16, 32>}, {transform_indices = @transform_17, window_bounds = array<i64: 8, 16, 32>}, {transform_indices = @transform_18, window_bounds = array<i64: 8, 16, 32>}]} {
    %c0 = arith.constant 0 : index
    %c0_0 = arith.constant 0 : index
    %c0_1 = arith.constant 0 : index
    %0 = vector.load %arg1[%c0, %c0_0, %c0_1] : memref<8x16x32xf32, #tpu.memory_space<vmem>>, vector<8x16x32xf32>
    %1 = vector.shape_cast %0 : vector<8x16x32xf32> to vector<128x32xf32>
    %c0_2 = arith.constant 0 : index
    %c0_3 = arith.constant 0 : index
    %2 = vector.load %arg2[%c0_2, %c0_3] : memref<1x32xf32, #tpu.memory_space<vmem>>, vector<1x32xf32>
    %c0_4 = arith.constant 0 : index
    %c0_5 = arith.constant 0 : index
    %3 = vector.load %arg3[%c0_4, %c0_5] : memref<1x32xf32, #tpu.memory_space<vmem>>, vector<1x32xf32>
    %cst = arith.constant dense<0.000000e+00> : vector<128xf32>
    %4 = vector.multi_reduction <add>, %1, %cst [1] : vector<128x32xf32> to vector<128xf32>
    %5 = vector.shape_cast %4 : vector<128xf32> to vector<128x1xf32>
    %cst_6 = arith.constant 3.200000e+01 : f32
    %6 = vector.broadcast %cst_6 : f32 to vector<128x1xf32>
    %7 = arith.divf %5, %6 : vector<128x1xf32>
    %8 = vector.broadcast %7 : vector<128x1xf32> to vector<128x32xf32>
    %9 = arith.subf %1, %8 : vector<128x32xf32>
    %10 = arith.mulf %9, %9 : vector<128x32xf32>
    %cst_7 = arith.constant dense<0.000000e+00> : vector<128xf32>
    %11 = vector.multi_reduction <add>, %10, %cst_7 [1] : vector<128x32xf32> to vector<128xf32>
    %12 = vector.shape_cast %11 : vector<128xf32> to vector<128x1xf32>
    %cst_8 = arith.constant 3.200000e+01 : f32
    %13 = vector.broadcast %cst_8 : f32 to vector<128x1xf32>
    %14 = arith.divf %12, %13 : vector<128x1xf32>
    %15 = vector.broadcast %7 : vector<128x1xf32> to vector<128x32xf32>
    %16 = arith.subf %1, %15 : vector<128x32xf32>
    %cst_9 = arith.constant 9.99999974E-6 : f32
    %17 = vector.broadcast %cst_9 : f32 to vector<128x1xf32>
    %18 = arith.addf %14, %17 : vector<128x1xf32>
    %19 = math.rsqrt %18 : vector<128x1xf32>
    %20 = vector.broadcast %19 : vector<128x1xf32> to vector<128x32xf32>
    %21 = arith.mulf %16, %20 : vector<128x32xf32>
    %22 = vector.broadcast %2 : vector<1x32xf32> to vector<128x32xf32>
    %23 = arith.mulf %21, %22 : vector<128x32xf32>
    %24 = vector.broadcast %3 : vector<1x32xf32> to vector<128x32xf32>
    %25 = arith.addf %23, %24 : vector<128x32xf32>
    %26 = arith.truncf %25 : vector<128x32xf32> to vector<128x32xbf16>
    %c0_10 = arith.constant 0 : index
    %c0_11 = arith.constant 0 : index
    %27 = vector.load %arg4[%c0_10, %c0_11] : memref<32x128xbf16, #tpu.memory_space<vmem>>, vector<32x128xbf16>
    %cst_12 = arith.constant dense<0.000000e+00> : vector<128x128xf32>
    %28 = tpu.matmul %26, %27, %cst_12 {dimension_numbers = #tpu.dot_dimension_numbers<[1], [0], [0], [1], [0, 0, 1, 1], [], []>} : vector<128x32xbf16>, vector<32x128xbf16>, vector<128x128xf32> -> vector<128x128xf32>
    %c0_13 = arith.constant 0 : index
    %c0_14 = arith.constant 0 : index
    %29 = vector.load %arg5[%c0_13, %c0_14] : memref<1x128xf32, #tpu.memory_space<vmem>>, vector<1x128xf32>
    %30 = vector.broadcast %29 : vector<1x128xf32> to vector<128x128xf32>
    %31 = arith.addf %28, %30 : vector<128x128xf32>
    %32 = arith.negf %31 : vector<128x128xf32>
    %33 = math.exp %32 : vector<128x128xf32>
    %cst_15 = arith.constant 1.000000e+00 : f32
    %34 = vector.broadcast %cst_15 : f32 to vector<128x128xf32>
    %35 = arith.addf %34, %33 : vector<128x128xf32>
    %36 = arith.divf %34, %35 : vector<128x128xf32>
    %37 = arith.mulf %31, %36 : vector<128x128xf32>
    %38 = arith.truncf %37 : vector<128x128xf32> to vector<128x128xbf16>
    %c0_16 = arith.constant 0 : index
    %c0_17 = arith.constant 0 : index
    %39 = vector.load %arg6[%c0_16, %c0_17] : memref<128x32xbf16, #tpu.memory_space<vmem>>, vector<128x32xbf16>
    %cst_18 = arith.constant dense<0.000000e+00> : vector<128x32xf32>
    %40 = tpu.matmul %38, %39, %cst_18 {dimension_numbers = #tpu.dot_dimension_numbers<[1], [0], [0], [1], [0, 0, 1, 1], [], []>} : vector<128x128xbf16>, vector<128x32xbf16>, vector<128x32xf32> -> vector<128x32xf32>
    %41 = arith.addf %1, %40 : vector<128x32xf32>
    %c0_19 = arith.constant 0 : index
    %c0_20 = arith.constant 0 : index
    %42 = vector.load %arg7[%c0_19, %c0_20] : memref<1x32xf32, #tpu.memory_space<vmem>>, vector<1x32xf32>
    %43 = vector.broadcast %42 : vector<1x32xf32> to vector<128x32xf32>
    %44 = arith.addf %41, %43 : vector<128x32xf32>
    %45 = vector.shape_cast %44 : vector<128x32xf32> to vector<8x16x32xf32>
    %c0_21 = arith.constant 0 : index
    %c0_22 = arith.constant 0 : index
    %c0_23 = arith.constant 0 : index
    %46 = vector.load %arg16[%c0_21, %c0_22, %c0_23] : memref<8x16x32xf32, #tpu.memory_space<vmem>>, vector<8x16x32xf32>
    tpu.vector_store %arg16[%c0_21, %c0_22, %c0_23], %45 {strides = array<i32>} : memref<8x16x32xf32, #tpu.memory_space<vmem>>, vector<8x16x32xf32>,
    %c0_24 = arith.constant 0 : index
    %c0_25 = arith.constant 0 : index
    %47 = vector.load %arg8[%c0_24, %c0_25] : memref<1x32xf32, #tpu.memory_space<vmem>>, vector<1x32xf32>
    %c0_26 = arith.constant 0 : index
    %c0_27 = arith.constant 0 : index
    %48 = vector.load %arg9[%c0_26, %c0_27] : memref<1x32xf32, #tpu.memory_space<vmem>>, vector<1x32xf32>
    %cst_28 = arith.constant dense<0.000000e+00> : vector<128xf32>
    %49 = vector.multi_reduction <add>, %44, %cst_28 [1] : vector<128x32xf32> to vector<128xf32>
    %50 = vector.shape_cast %49 : vector<128xf32> to vector<128x1xf32>
    %cst_29 = arith.constant 3.200000e+01 : f32
    %51 = vector.broadcast %cst_29 : f32 to vector<128x1xf32>
    %52 = arith.divf %50, %51 : vector<128x1xf32>
    %53 = vector.broadcast %52 : vector<128x1xf32> to vector<128x32xf32>
    %54 = arith.subf %44, %53 : vector<128x32xf32>
    %55 = arith.mulf %54, %54 : vector<128x32xf32>
    %cst_30 = arith.constant dense<0.000000e+00> : vector<128xf32>
    %56 = vector.multi_reduction <add>, %55, %cst_30 [1] : vector<128x32xf32> to vector<128xf32>
    %57 = vector.shape_cast %56 : vector<128xf32> to vector<128x1xf32>
    %cst_31 = arith.constant 3.200000e+01 : f32
    %58 = vector.broadcast %cst_31 : f32 to vector<128x1xf32>
    %59 = arith.divf %57, %58 : vector<128x1xf32>
    %60 = vector.broadcast %52 : vector<128x1xf32> to vector<128x32xf32>
    %61 = arith.subf %44, %60 : vector<128x32xf32>
    %cst_32 = arith.constant 9.99999974E-6 : f32
    %62 = vector.broadcast %cst_32 : f32 to vector<128x1xf32>
    %63 = arith.addf %59, %62 : vector<128x1xf32>
    %64 = math.rsqrt %63 : vector<128x1xf32>
    %65 = vector.broadcast %64 : vector<128x1xf32> to vector<128x32xf32>
    %66 = arith.mulf %61, %65 : vector<128x32xf32>
    %67 = vector.broadcast %47 : vector<1x32xf32> to vector<128x32xf32>
    %68 = arith.mulf %66, %67 : vector<128x32xf32>
    %69 = vector.broadcast %48 : vector<1x32xf32> to vector<128x32xf32>
    %70 = arith.addf %68, %69 : vector<128x32xf32>
    %71 = arith.truncf %70 : vector<128x32xf32> to vector<128x32xbf16>
    %c0_33 = arith.constant 0 : index
    %c0_34 = arith.constant 0 : index
    %72 = vector.load %arg10[%c0_33, %c0_34] : memref<32x32xbf16, #tpu.memory_space<vmem>>, vector<32x32xbf16>
    %cst_35 = arith.constant dense<0.000000e+00> : vector<128x32xf32>
    %73 = tpu.matmul %71, %72, %cst_35 {dimension_numbers = #tpu.dot_dimension_numbers<[1], [0], [0], [1], [0, 0, 1, 1], [], []>} : vector<128x32xbf16>, vector<32x32xbf16>, vector<128x32xf32> -> vector<128x32xf32>
    %c0_36 = arith.constant 0 : index
    %c0_37 = arith.constant 0 : index
    %74 = vector.load %arg11[%c0_36, %c0_37] : memref<1x32xf32, #tpu.memory_space<vmem>>, vector<1x32xf32>
    %75 = vector.broadcast %74 : vector<1x32xf32> to vector<128x32xf32>
    %76 = arith.addf %73, %75 : vector<128x32xf32>
    %77 = arith.truncf %76 : vector<128x32xf32> to vector<128x32xbf16>
    %78 = vector.shape_cast %77 : vector<128x32xbf16> to vector<8x16x32xbf16>
    %c0_38 = arith.constant 0 : index
    %c0_39 = arith.constant 0 : index
    %c0_40 = arith.constant 0 : index
    %79 = vector.load %arg17[%c0_38, %c0_39, %c0_40] : memref<8x16x32xbf16, #tpu.memory_space<vmem>>, vector<8x16x32xbf16>
    tpu.vector_store %arg17[%c0_38, %c0_39, %c0_40], %78 {strides = array<i32>} : memref<8x16x32xbf16, #tpu.memory_space<vmem>>, vector<8x16x32xbf16>,
    %c0_41 = arith.constant 0 : index
    %c0_42 = arith.constant 0 : index
    %80 = vector.load %arg12[%c0_41, %c0_42] : memref<32x32xbf16, #tpu.memory_space<vmem>>, vector<32x32xbf16>
    %cst_43 = arith.constant dense<0.000000e+00> : vector<128x32xf32>
    %81 = tpu.matmul %71, %80, %cst_43 {dimension_numbers = #tpu.dot_dimension_numbers<[1], [0], [0], [1], [0, 0, 1, 1], [], []>} : vector<128x32xbf16>, vector<32x32xbf16>, vector<128x32xf32> -> vector<128x32xf32>
    %c0_44 = arith.constant 0 : index
    %c0_45 = arith.constant 0 : index
    %82 = vector.load %arg13[%c0_44, %c0_45] : memref<1x32xf32, #tpu.memory_space<vmem>>, vector<1x32xf32>
    %83 = vector.broadcast %82 : vector<1x32xf32> to vector<128x32xf32>
    %84 = arith.addf %81, %83 : vector<128x32xf32>
    %85 = arith.truncf %84 : vector<128x32xf32> to vector<128x32xbf16>
    %86 = vector.shape_cast %85 : vector<128x32xbf16> to vector<8x16x32xbf16>
    %c0_46 = arith.constant 0 : index
    %c0_47 = arith.constant 0 : index
    %c0_48 = arith.constant 0 : index
    %87 = vector.load %arg18[%c0_46, %c0_47, %c0_48] : memref<8x16x32xbf16, #tpu.memory_space<vmem>>, vector<8x16x32xbf16>
    tpu.vector_store %arg18[%c0_46, %c0_47, %c0_48], %86 {strides = array<i32>} : memref<8x16x32xbf16, #tpu.memory_space<vmem>>, vector<8x16x32xbf16>,
    %c0_49 = arith.constant 0 : index
    %c0_50 = arith.constant 0 : index
    %88 = vector.load %arg14[%c0_49, %c0_50] : memref<32x32xbf16, #tpu.memory_space<vmem>>, vector<32x32xbf16>
    %cst_51 = arith.constant dense<0.000000e+00> : vector<128x32xf32>
    %89 = tpu.matmul %71, %88, %cst_51 {dimension_numbers = #tpu.dot_dimension_numbers<[1], [0], [0], [1], [0, 0, 1, 1], [], []>} : vector<128x32xbf16>, vector<32x32xbf16>, vector<128x32xf32> -> vector<128x32xf32>
    %c0_52 = arith.constant 0 : index
    %c0_53 = arith.constant 0 : index
    %90 = vector.load %arg15[%c0_52, %c0_53] : memref<1x32xf32, #tpu.memory_space<vmem>>, vector<1x32xf32>
    %91 = vector.broadcast %90 : vector<1x32xf32> to vector<128x32xf32>
    %92 = arith.addf %89, %91 : vector<128x32xf32>
    %93 = arith.truncf %92 : vector<128x32xf32> to vector<128x32xbf16>
    %94 = vector.shape_cast %93 : vector<128x32xbf16> to vector<8x16x32xbf16>
    %c0_54 = arith.constant 0 : index
    %c0_55 = arith.constant 0 : index
    %c0_56 = arith.constant 0 : index
    %95 = vector.load %arg19[%c0_54, %c0_55, %c0_56] : memref<8x16x32xbf16, #tpu.memory_space<vmem>>, vector<8x16x32xbf16>
    tpu.vector_store %arg19[%c0_54, %c0_55, %c0_56], %94 {strides = array<i32>} : memref<8x16x32xbf16, #tpu.memory_space<vmem>>, vector<8x16x32xbf16>,
    return
  }
  func.func @transform_0(%arg0: i32) -> (i32, i32, i32) {
    %c0_i32 = arith.constant 0 : i32
    %c0_i32_0 = arith.constant 0 : i32
    %c0_i32_1 = arith.constant 0 : i32
    return %c0_i32, %arg0, %c0_i32_0 : i32, i32, i32
  }
  func.func @transform_1(%arg0: i32) -> (i32, i32) {
    %c0_i32 = arith.constant 0 : i32
    %c0_i32_0 = arith.constant 0 : i32
    %c0_i32_1 = arith.constant 0 : i32
    return %c0_i32, %c0_i32_0 : i32, i32
  }
  func.func @transform_2(%arg0: i32) -> (i32, i32) {
    %c0_i32 = arith.constant 0 : i32
    %c0_i32_0 = arith.constant 0 : i32
    %c0_i32_1 = arith.constant 0 : i32
    return %c0_i32, %c0_i32_0 : i32, i32
  }
  func.func @transform_3(%arg0: i32) -> (i32, i32) {
    %c0_i32 = arith.constant 0 : i32
    %c0_i32_0 = arith.constant 0 : i32
    %c0_i32_1 = arith.constant 0 : i32
    return %c0_i32, %c0_i32_0 : i32, i32
  }
  func.func @transform_4(%arg0: i32) -> (i32, i32) {
    %c0_i32 = arith.constant 0 : i32
    %c0_i32_0 = arith.constant 0 : i32
    %c0_i32_1 = arith.constant 0 : i32
    return %c0_i32, %c0_i32_0 : i32, i32
  }
  func.func @transform_5(%arg0: i32) -> (i32, i32) {
    %c0_i32 = arith.constant 0 : i32
    %c0_i32_0 = arith.constant 0 : i32
    %c0_i32_1 = arith.constant 0 : i32
    return %c0_i32, %c0_i32_0 : i32, i32
  }
  func.func @transform_6(%arg0: i32) -> (i32, i32) {
    %c0_i32 = arith.constant 0 : i32
    %c0_i32_0 = arith.constant 0 : i32
    %c0_i32_1 = arith.constant 0 : i32
    return %c0_i32, %c0_i32_0 : i32, i32
  }
  func.func @transform_7(%arg0: i32) -> (i32, i32) {
    %c0_i32 = arith.constant 0 : i32
    %c0_i32_0 = arith.constant 0 : i32
    %c0_i32_1 = arith.constant 0 : i32
    return %c0_i32, %c0_i32_0 : i32, i32
  }
  func.func @transform_8(%arg0: i32) -> (i32, i32) {
    %c0_i32 = arith.constant 0 : i32
    %c0_i32_0 = arith.constant 0 : i32
    %c0_i32_1 = arith.constant 0 : i32
    return %c0_i32, %c0_i32_0 : i32, i32
  }
  func.func @transform_9(%arg0: i32) -> (i32, i32) {
    %c0_i32 = arith.constant 0 : i32
    %c0_i32_0 = arith.constant 0 : i32
    %c0_i32_1 = arith.constant 0 : i32
    return %c0_i32, %c0_i32_0 : i32, i32
  }
  func.func @transform_10(%arg0: i32) -> (i32, i32) {
    %c0_i32 = arith.constant 0 : i32
    %c0_i32_0 = arith.constant 0 : i32
    %c0_i32_1 = arith.constant 0 : i32
    return %c0_i32, %c0_i32_0 : i32, i32
  }
  func.func @transform_11(%arg0: i32) -> (i32, i32) {
    %c0_i32 = arith.constant 0 : i32
    %c0_i32_0 = arith.constant 0 : i32
    %c0_i32_1 = arith.constant 0 : i32
    return %c0_i32, %c0_i32_0 : i32, i32
  }
  func.func @transform_12(%arg0: i32) -> (i32, i32) {
    %c0_i32 = arith.constant 0 : i32
    %c0_i32_0 = arith.constant 0 : i32
    %c0_i32_1 = arith.constant 0 : i32
    return %c0_i32, %c0_i32_0 : i32, i32
  }
  func.func @transform_13(%arg0: i32) -> (i32, i32) {
    %c0_i32 = arith.constant 0 : i32
    %c0_i32_0 = arith.constant 0 : i32
    %c0_i32_1 = arith.constant 0 : i32
    return %c0_i32, %c0_i32_0 : i32, i32
  }
  func.func @transform_14(%arg0: i32) -> (i32, i32) {
    %c0_i32 = arith.constant 0 : i32
    %c0_i32_0 = arith.constant 0 : i32
    %c0_i32_1 = arith.constant 0 : i32
    return %c0_i32, %c0_i32_0 : i32, i32
  }
  func.func @transform_15(%arg0: i32) -> (i32, i32, i32) {
    %c0_i32 = arith.constant 0 : i32
    %c0_i32_0 = arith.constant 0 : i32
    %c0_i32_1 = arith.constant 0 : i32
    return %c0_i32, %arg0, %c0_i32_0 : i32, i32, i32
  }
  func.func @transform_16(%arg0: i32) -> (i32, i32, i32) {
    %c0_i32 = arith.constant 0 : i32
    %c0_i32_0 = arith.constant 0 : i32
    %c0_i32_1 = arith.constant 0 : i32
    return %c0_i32, %arg0, %c0_i32_0 : i32, i32, i32
  }
  func.func @transform_17(%arg0: i32) -> (i32, i32, i32) {
    %c0_i32 = arith.constant 0 : i32
    %c0_i32_0 = arith.constant 0 : i32
    %c0_i32_1 = arith.constant 0 : i32
    return %c0_i32, %arg0, %c0_i32_0 : i32, i32, i32
  }
  func.func @transform_18(%arg0: i32) -> (i32, i32, i32) {
    %c0_i32 = arith.constant 0 : i32
    %c0_i32_0 = arith.constant 0 : i32
    %c0_i32_1 = arith.constant 0 : i32
    return %c0_i32, %arg0, %c0_i32_0 : i32, i32, i32
  }
}

module attributes {stable_mosaic.version = 11 : i64} {
  func.func @stage3_kernel(%arg0: i32, %arg1: memref<8x16x32xf32, #tpu.memory_space<vmem>>, %arg2: memref<1x32xf32, #tpu.memory_space<vmem>>, %arg3: memref<1x32xf32, #tpu.memory_space<vmem>>, %arg4: memref<32x128xbf16, #tpu.memory_space<vmem>>, %arg5: memref<1x128xf32, #tpu.memory_space<vmem>>, %arg6: memref<31x64xf32, #tpu.memory_space<vmem>>, %arg7: memref<1x64xf32, #tpu.memory_space<vmem>>, %arg8: memref<1x64xf32, #tpu.memory_space<vmem>>, %arg9: memref<1x64xf32, #tpu.memory_space<vmem>>, %arg10: memref<1x64xf32, #tpu.memory_space<vmem>>, %arg11: memref<1x64xf32, #tpu.memory_space<vmem>>, %arg12: memref<64x32xbf16, #tpu.memory_space<vmem>>, %arg13: memref<1x32xf32, #tpu.memory_space<vmem>>, %arg14: memref<1x32xf32, #tpu.memory_space<vmem>>, %arg15: memref<1x32xf32, #tpu.memory_space<vmem>>, %arg16: memref<32x128xbf16, #tpu.memory_space<vmem>>, %arg17: memref<1x128xf32, #tpu.memory_space<vmem>>, %arg18: memref<128x32xbf16, #tpu.memory_space<vmem>>, %arg19: memref<1x32xf32, #tpu.memory_space<vmem>>, %arg20: memref<1x32xf32, #tpu.memory_space<vmem>>, %arg21: memref<1x32xf32, #tpu.memory_space<vmem>>, %arg22: memref<8x16x32xf32, #tpu.memory_space<vmem>>, %arg23: memref<8x16x64xf32, #tpu.memory_space<vmem>>) attributes {dimension_semantics = [#tpu.dimension_semantics<parallel>], iteration_bounds = array<i64: 1>, scalar_prefetch = 0 : i64, scratch_operands = 1 : i64, tpu.core_type = #tpu.core_type<tc>, window_params = [{transform_indices = @transform_0, window_bounds = array<i64: 8, 16, 32>}, {pipeline_mode = #tpu.pipeline_mode<synchronous>, transform_indices = @transform_1, window_bounds = array<i64: 1, 32>}, {pipeline_mode = #tpu.pipeline_mode<synchronous>, transform_indices = @transform_2, window_bounds = array<i64: 1, 32>}, {pipeline_mode = #tpu.pipeline_mode<synchronous>, transform_indices = @transform_3, window_bounds = array<i64: 32, 128>}, {pipeline_mode = #tpu.pipeline_mode<synchronous>, transform_indices = @transform_4, window_bounds = array<i64: 1, 128>}, {pipeline_mode = #tpu.pipeline_mode<synchronous>, transform_indices = @transform_5, window_bounds = array<i64: 31, 64>}, {pipeline_mode = #tpu.pipeline_mode<synchronous>, transform_indices = @transform_6, window_bounds = array<i64: 1, 64>}, {pipeline_mode = #tpu.pipeline_mode<synchronous>, transform_indices = @transform_7, window_bounds = array<i64: 1, 64>}, {pipeline_mode = #tpu.pipeline_mode<synchronous>, transform_indices = @transform_8, window_bounds = array<i64: 1, 64>}, {pipeline_mode = #tpu.pipeline_mode<synchronous>, transform_indices = @transform_9, window_bounds = array<i64: 1, 64>}, {pipeline_mode = #tpu.pipeline_mode<synchronous>, transform_indices = @transform_10, window_bounds = array<i64: 1, 64>}, {pipeline_mode = #tpu.pipeline_mode<synchronous>, transform_indices = @transform_11, window_bounds = array<i64: 64, 32>}, {pipeline_mode = #tpu.pipeline_mode<synchronous>, transform_indices = @transform_12, window_bounds = array<i64: 1, 32>}, {pipeline_mode = #tpu.pipeline_mode<synchronous>, transform_indices = @transform_13, window_bounds = array<i64: 1, 32>}, {pipeline_mode = #tpu.pipeline_mode<synchronous>, transform_indices = @transform_14, window_bounds = array<i64: 1, 32>}, {pipeline_mode = #tpu.pipeline_mode<synchronous>, transform_indices = @transform_15, window_bounds = array<i64: 32, 128>}, {pipeline_mode = #tpu.pipeline_mode<synchronous>, transform_indices = @transform_16, window_bounds = array<i64: 1, 128>}, {pipeline_mode = #tpu.pipeline_mode<synchronous>, transform_indices = @transform_17, window_bounds = array<i64: 128, 32>}, {pipeline_mode = #tpu.pipeline_mode<synchronous>, transform_indices = @transform_18, window_bounds = array<i64: 1, 32>}, {pipeline_mode = #tpu.pipeline_mode<synchronous>, transform_indices = @transform_19, window_bounds = array<i64: 1, 32>}, {pipeline_mode = #tpu.pipeline_mode<synchronous>, transform_indices = @transform_20, window_bounds = array<i64: 1, 32>}, {transform_indices = @transform_21, window_bounds = array<i64: 8, 16, 32>}]} {
    %c0 = arith.constant 0 : index
    %c0_0 = arith.constant 0 : index
    %c0_1 = arith.constant 0 : index
    %0 = vector.load %arg1[%c0, %c0_0, %c0_1] : memref<8x16x32xf32, #tpu.memory_space<vmem>>, vector<8x16x32xf32>
    %1 = vector.shape_cast %0 : vector<8x16x32xf32> to vector<128x32xf32>
    %c0_2 = arith.constant 0 : index
    %c0_3 = arith.constant 0 : index
    %2 = vector.load %arg2[%c0_2, %c0_3] : memref<1x32xf32, #tpu.memory_space<vmem>>, vector<1x32xf32>
    %c0_4 = arith.constant 0 : index
    %c0_5 = arith.constant 0 : index
    %3 = vector.load %arg3[%c0_4, %c0_5] : memref<1x32xf32, #tpu.memory_space<vmem>>, vector<1x32xf32>
    %cst = arith.constant dense<0.000000e+00> : vector<128xf32>
    %4 = vector.multi_reduction <add>, %1, %cst [1] : vector<128x32xf32> to vector<128xf32>
    %5 = vector.shape_cast %4 : vector<128xf32> to vector<128x1xf32>
    %cst_6 = arith.constant 3.200000e+01 : f32
    %6 = vector.broadcast %cst_6 : f32 to vector<128x1xf32>
    %7 = arith.divf %5, %6 : vector<128x1xf32>
    %8 = vector.broadcast %7 : vector<128x1xf32> to vector<128x32xf32>
    %9 = arith.subf %1, %8 : vector<128x32xf32>
    %10 = arith.mulf %9, %9 : vector<128x32xf32>
    %cst_7 = arith.constant dense<0.000000e+00> : vector<128xf32>
    %11 = vector.multi_reduction <add>, %10, %cst_7 [1] : vector<128x32xf32> to vector<128xf32>
    %12 = vector.shape_cast %11 : vector<128xf32> to vector<128x1xf32>
    %cst_8 = arith.constant 3.200000e+01 : f32
    %13 = vector.broadcast %cst_8 : f32 to vector<128x1xf32>
    %14 = arith.divf %12, %13 : vector<128x1xf32>
    %15 = vector.broadcast %7 : vector<128x1xf32> to vector<128x32xf32>
    %16 = arith.subf %1, %15 : vector<128x32xf32>
    %cst_9 = arith.constant 9.99999974E-6 : f32
    %17 = vector.broadcast %cst_9 : f32 to vector<128x1xf32>
    %18 = arith.addf %14, %17 : vector<128x1xf32>
    %19 = math.rsqrt %18 : vector<128x1xf32>
    %20 = vector.broadcast %19 : vector<128x1xf32> to vector<128x32xf32>
    %21 = arith.mulf %16, %20 : vector<128x32xf32>
    %22 = vector.broadcast %2 : vector<1x32xf32> to vector<128x32xf32>
    %23 = arith.mulf %21, %22 : vector<128x32xf32>
    %24 = vector.broadcast %3 : vector<1x32xf32> to vector<128x32xf32>
    %25 = arith.addf %23, %24 : vector<128x32xf32>
    %26 = arith.truncf %25 : vector<128x32xf32> to vector<128x32xbf16>
    %c0_10 = arith.constant 0 : index
    %c0_11 = arith.constant 0 : index
    %27 = vector.load %arg4[%c0_10, %c0_11] : memref<32x128xbf16, #tpu.memory_space<vmem>>, vector<32x128xbf16>
    %cst_12 = arith.constant dense<0.000000e+00> : vector<128x128xf32>
    %28 = tpu.matmul %26, %27, %cst_12 {dimension_numbers = #tpu.dot_dimension_numbers<[1], [0], [0], [1], [0, 0, 1, 1], [], []>} : vector<128x32xbf16>, vector<32x128xbf16>, vector<128x128xf32> -> vector<128x128xf32>
    %c0_13 = arith.constant 0 : index
    %c0_14 = arith.constant 0 : index
    %29 = vector.load %arg5[%c0_13, %c0_14] : memref<1x128xf32, #tpu.memory_space<vmem>>, vector<1x128xf32>
    %30 = vector.broadcast %29 : vector<1x128xf32> to vector<128x128xf32>
    %31 = arith.addf %28, %30 : vector<128x128xf32>
    %32 = vector.extract_strided_slice %31 {offsets = [0, 0], sizes = [128, 64], strides = [1, 1]} : vector<128x128xf32> to vector<128x64xf32>
    %33 = vector.extract_strided_slice %31 {offsets = [0, 64], sizes = [128, 64], strides = [1, 1]} : vector<128x128xf32> to vector<128x64xf32>
    %34 = arith.negf %33 : vector<128x64xf32>
    %35 = math.exp %34 : vector<128x64xf32>
    %cst_15 = arith.constant 1.000000e+00 : f32
    %36 = vector.broadcast %cst_15 : f32 to vector<128x64xf32>
    %37 = arith.addf %36, %35 : vector<128x64xf32>
    %38 = arith.divf %36, %37 : vector<128x64xf32>
    %39 = arith.mulf %32, %38 : vector<128x64xf32>
    %40 = vector.shape_cast %39 : vector<128x64xf32> to vector<8x16x64xf32>
    %c0_16 = arith.constant 0 : index
    %c0_17 = arith.constant 0 : index
    %41 = vector.load %arg6[%c0_16, %c0_17] : memref<31x64xf32, #tpu.memory_space<vmem>>, vector<31x64xf32>
    %c0_18 = arith.constant 0 : index
    %c0_19 = arith.constant 0 : index
    %42 = vector.load %arg7[%c0_18, %c0_19] : memref<1x64xf32, #tpu.memory_space<vmem>>, vector<1x64xf32>
    %cst_20 = arith.constant 0.000000e+00 : f32
    %43 = vector.broadcast %cst_20 : f32 to vector<16x64xf32>
    %44 = vector.broadcast %42 : vector<1x64xf32> to vector<16x64xf32>
    %45 = arith.addf %43, %44 : vector<16x64xf32>
    %46 = vector.extract_strided_slice %40 {offsets = [0, 0, 0], sizes = [1, 16, 64], strides = [1, 1, 1]} : vector<8x16x64xf32> to vector<1x16x64xf32>
    %47 = vector.shape_cast %46 : vector<1x16x64xf32> to vector<16x64xf32>
    %48 = vector.extract_strided_slice %41 {offsets = [15, 0], sizes = [1, 64], strides = [1, 1]} : vector<31x64xf32> to vector<1x64xf32>
    %49 = vector.shape_cast %48 : vector<1x64xf32> to vector<64xf32>
    %50 = vector.shape_cast %49 : vector<64xf32> to vector<1x64xf32>
    %51 = vector.broadcast %50 : vector<1x64xf32> to vector<16x64xf32>
    %52 = arith.mulf %47, %51 : vector<16x64xf32>
    %53 = arith.addf %45, %52 : vector<16x64xf32>
    %54 = vector.extract_strided_slice %40 {offsets = [1, 0, 0], sizes = [1, 16, 64], strides = [1, 1, 1]} : vector<8x16x64xf32> to vector<1x16x64xf32>
    %55 = vector.shape_cast %54 : vector<1x16x64xf32> to vector<16x64xf32>
    %56 = vector.extract_strided_slice %41 {offsets = [16, 0], sizes = [1, 64], strides = [1, 1]} : vector<31x64xf32> to vector<1x64xf32>
    %57 = vector.shape_cast %56 : vector<1x64xf32> to vector<64xf32>
    %58 = vector.shape_cast %57 : vector<64xf32> to vector<1x64xf32>
    %59 = vector.broadcast %58 : vector<1x64xf32> to vector<16x64xf32>
    %60 = arith.mulf %55, %59 : vector<16x64xf32>
    %61 = arith.addf %53, %60 : vector<16x64xf32>
    %62 = vector.extract_strided_slice %40 {offsets = [2, 0, 0], sizes = [1, 16, 64], strides = [1, 1, 1]} : vector<8x16x64xf32> to vector<1x16x64xf32>
    %63 = vector.shape_cast %62 : vector<1x16x64xf32> to vector<16x64xf32>
    %64 = vector.extract_strided_slice %41 {offsets = [17, 0], sizes = [1, 64], strides = [1, 1]} : vector<31x64xf32> to vector<1x64xf32>
    %65 = vector.shape_cast %64 : vector<1x64xf32> to vector<64xf32>
    %66 = vector.shape_cast %65 : vector<64xf32> to vector<1x64xf32>
    %67 = vector.broadcast %66 : vector<1x64xf32> to vector<16x64xf32>
    %68 = arith.mulf %63, %67 : vector<16x64xf32>
    %69 = arith.addf %61, %68 : vector<16x64xf32>
    %70 = vector.extract_strided_slice %40 {offsets = [3, 0, 0], sizes = [1, 16, 64], strides = [1, 1, 1]} : vector<8x16x64xf32> to vector<1x16x64xf32>
    %71 = vector.shape_cast %70 : vector<1x16x64xf32> to vector<16x64xf32>
    %72 = vector.extract_strided_slice %41 {offsets = [18, 0], sizes = [1, 64], strides = [1, 1]} : vector<31x64xf32> to vector<1x64xf32>
    %73 = vector.shape_cast %72 : vector<1x64xf32> to vector<64xf32>
    %74 = vector.shape_cast %73 : vector<64xf32> to vector<1x64xf32>
    %75 = vector.broadcast %74 : vector<1x64xf32> to vector<16x64xf32>
    %76 = arith.mulf %71, %75 : vector<16x64xf32>
    %77 = arith.addf %69, %76 : vector<16x64xf32>
    %78 = vector.extract_strided_slice %40 {offsets = [4, 0, 0], sizes = [1, 16, 64], strides = [1, 1, 1]} : vector<8x16x64xf32> to vector<1x16x64xf32>
    %79 = vector.shape_cast %78 : vector<1x16x64xf32> to vector<16x64xf32>
    %80 = vector.extract_strided_slice %41 {offsets = [19, 0], sizes = [1, 64], strides = [1, 1]} : vector<31x64xf32> to vector<1x64xf32>
    %81 = vector.shape_cast %80 : vector<1x64xf32> to vector<64xf32>
    %82 = vector.shape_cast %81 : vector<64xf32> to vector<1x64xf32>
    %83 = vector.broadcast %82 : vector<1x64xf32> to vector<16x64xf32>
    %84 = arith.mulf %79, %83 : vector<16x64xf32>
    %85 = arith.addf %77, %84 : vector<16x64xf32>
    %86 = vector.extract_strided_slice %40 {offsets = [5, 0, 0], sizes = [1, 16, 64], strides = [1, 1, 1]} : vector<8x16x64xf32> to vector<1x16x64xf32>
    %87 = vector.shape_cast %86 : vector<1x16x64xf32> to vector<16x64xf32>
    %88 = vector.extract_strided_slice %41 {offsets = [20, 0], sizes = [1, 64], strides = [1, 1]} : vector<31x64xf32> to vector<1x64xf32>
    %89 = vector.shape_cast %88 : vector<1x64xf32> to vector<64xf32>
    %90 = vector.shape_cast %89 : vector<64xf32> to vector<1x64xf32>
    %91 = vector.broadcast %90 : vector<1x64xf32> to vector<16x64xf32>
    %92 = arith.mulf %87, %91 : vector<16x64xf32>
    %93 = arith.addf %85, %92 : vector<16x64xf32>
    %94 = vector.extract_strided_slice %40 {offsets = [6, 0, 0], sizes = [1, 16, 64], strides = [1, 1, 1]} : vector<8x16x64xf32> to vector<1x16x64xf32>
    %95 = vector.shape_cast %94 : vector<1x16x64xf32> to vector<16x64xf32>
    %96 = vector.extract_strided_slice %41 {offsets = [21, 0], sizes = [1, 64], strides = [1, 1]} : vector<31x64xf32> to vector<1x64xf32>
    %97 = vector.shape_cast %96 : vector<1x64xf32> to vector<64xf32>
    %98 = vector.shape_cast %97 : vector<64xf32> to vector<1x64xf32>
    %99 = vector.broadcast %98 : vector<1x64xf32> to vector<16x64xf32>
    %100 = arith.mulf %95, %99 : vector<16x64xf32>
    %101 = arith.addf %93, %100 : vector<16x64xf32>
    %102 = vector.extract_strided_slice %40 {offsets = [7, 0, 0], sizes = [1, 16, 64], strides = [1, 1, 1]} : vector<8x16x64xf32> to vector<1x16x64xf32>
    %103 = vector.shape_cast %102 : vector<1x16x64xf32> to vector<16x64xf32>
    %104 = vector.extract_strided_slice %41 {offsets = [22, 0], sizes = [1, 64], strides = [1, 1]} : vector<31x64xf32> to vector<1x64xf32>
    %105 = vector.shape_cast %104 : vector<1x64xf32> to vector<64xf32>
    %106 = vector.shape_cast %105 : vector<64xf32> to vector<1x64xf32>
    %107 = vector.broadcast %106 : vector<1x64xf32> to vector<16x64xf32>
    %108 = arith.mulf %103, %107 : vector<16x64xf32>
    %109 = arith.addf %101, %108 : vector<16x64xf32>
    %c0_21 = arith.constant 0 : index
    %c0_22 = arith.constant 0 : index
    %c0_23 = arith.constant 0 : index
    %110 = vector.load %arg23[%c0_21, %c0_22, %c0_23] : memref<8x16x64xf32, #tpu.memory_space<vmem>>, vector<1x16x64xf32>
    %111 = vector.shape_cast %110 : vector<1x16x64xf32> to vector<16x64xf32>
    %112 = vector.shape_cast %109 : vector<16x64xf32> to vector<1x16x64xf32>
    tpu.vector_store %arg23[%c0_21, %c0_22, %c0_23], %112 {strides = array<i32>} : memref<8x16x64xf32, #tpu.memory_space<vmem>>, vector<1x16x64xf32>,
    %cst_24 = arith.constant 0.000000e+00 : f32
    %113 = vector.broadcast %cst_24 : f32 to vector<16x64xf32>
    %114 = vector.broadcast %42 : vector<1x64xf32> to vector<16x64xf32>
    %115 = arith.addf %113, %114 : vector<16x64xf32>
    %116 = vector.extract_strided_slice %40 {offsets = [0, 0, 0], sizes = [1, 16, 64], strides = [1, 1, 1]} : vector<8x16x64xf32> to vector<1x16x64xf32>
    %117 = vector.shape_cast %116 : vector<1x16x64xf32> to vector<16x64xf32>
    %118 = vector.extract_strided_slice %41 {offsets = [14, 0], sizes = [1, 64], strides = [1, 1]} : vector<31x64xf32> to vector<1x64xf32>
    %119 = vector.shape_cast %118 : vector<1x64xf32> to vector<64xf32>
    %120 = vector.shape_cast %119 : vector<64xf32> to vector<1x64xf32>
    %121 = vector.broadcast %120 : vector<1x64xf32> to vector<16x64xf32>
    %122 = arith.mulf %117, %121 : vector<16x64xf32>
    %123 = arith.addf %115, %122 : vector<16x64xf32>
    %124 = vector.extract_strided_slice %40 {offsets = [1, 0, 0], sizes = [1, 16, 64], strides = [1, 1, 1]} : vector<8x16x64xf32> to vector<1x16x64xf32>
    %125 = vector.shape_cast %124 : vector<1x16x64xf32> to vector<16x64xf32>
    %126 = vector.extract_strided_slice %41 {offsets = [15, 0], sizes = [1, 64], strides = [1, 1]} : vector<31x64xf32> to vector<1x64xf32>
    %127 = vector.shape_cast %126 : vector<1x64xf32> to vector<64xf32>
    %128 = vector.shape_cast %127 : vector<64xf32> to vector<1x64xf32>
    %129 = vector.broadcast %128 : vector<1x64xf32> to vector<16x64xf32>
    %130 = arith.mulf %125, %129 : vector<16x64xf32>
    %131 = arith.addf %123, %130 : vector<16x64xf32>
    %132 = vector.extract_strided_slice %40 {offsets = [2, 0, 0], sizes = [1, 16, 64], strides = [1, 1, 1]} : vector<8x16x64xf32> to vector<1x16x64xf32>
    %133 = vector.shape_cast %132 : vector<1x16x64xf32> to vector<16x64xf32>
    %134 = vector.extract_strided_slice %41 {offsets = [16, 0], sizes = [1, 64], strides = [1, 1]} : vector<31x64xf32> to vector<1x64xf32>
    %135 = vector.shape_cast %134 : vector<1x64xf32> to vector<64xf32>
    %136 = vector.shape_cast %135 : vector<64xf32> to vector<1x64xf32>
    %137 = vector.broadcast %136 : vector<1x64xf32> to vector<16x64xf32>
    %138 = arith.mulf %133, %137 : vector<16x64xf32>
    %139 = arith.addf %131, %138 : vector<16x64xf32>
    %140 = vector.extract_strided_slice %40 {offsets = [3, 0, 0], sizes = [1, 16, 64], strides = [1, 1, 1]} : vector<8x16x64xf32> to vector<1x16x64xf32>
    %141 = vector.shape_cast %140 : vector<1x16x64xf32> to vector<16x64xf32>
    %142 = vector.extract_strided_slice %41 {offsets = [17, 0], sizes = [1, 64], strides = [1, 1]} : vector<31x64xf32> to vector<1x64xf32>
    %143 = vector.shape_cast %142 : vector<1x64xf32> to vector<64xf32>
    %144 = vector.shape_cast %143 : vector<64xf32> to vector<1x64xf32>
    %145 = vector.broadcast %144 : vector<1x64xf32> to vector<16x64xf32>
    %146 = arith.mulf %141, %145 : vector<16x64xf32>
    %147 = arith.addf %139, %146 : vector<16x64xf32>
    %148 = vector.extract_strided_slice %40 {offsets = [4, 0, 0], sizes = [1, 16, 64], strides = [1, 1, 1]} : vector<8x16x64xf32> to vector<1x16x64xf32>
    %149 = vector.shape_cast %148 : vector<1x16x64xf32> to vector<16x64xf32>
    %150 = vector.extract_strided_slice %41 {offsets = [18, 0], sizes = [1, 64], strides = [1, 1]} : vector<31x64xf32> to vector<1x64xf32>
    %151 = vector.shape_cast %150 : vector<1x64xf32> to vector<64xf32>
    %152 = vector.shape_cast %151 : vector<64xf32> to vector<1x64xf32>
    %153 = vector.broadcast %152 : vector<1x64xf32> to vector<16x64xf32>
    %154 = arith.mulf %149, %153 : vector<16x64xf32>
    %155 = arith.addf %147, %154 : vector<16x64xf32>
    %156 = vector.extract_strided_slice %40 {offsets = [5, 0, 0], sizes = [1, 16, 64], strides = [1, 1, 1]} : vector<8x16x64xf32> to vector<1x16x64xf32>
    %157 = vector.shape_cast %156 : vector<1x16x64xf32> to vector<16x64xf32>
    %158 = vector.extract_strided_slice %41 {offsets = [19, 0], sizes = [1, 64], strides = [1, 1]} : vector<31x64xf32> to vector<1x64xf32>
    %159 = vector.shape_cast %158 : vector<1x64xf32> to vector<64xf32>
    %160 = vector.shape_cast %159 : vector<64xf32> to vector<1x64xf32>
    %161 = vector.broadcast %160 : vector<1x64xf32> to vector<16x64xf32>
    %162 = arith.mulf %157, %161 : vector<16x64xf32>
    %163 = arith.addf %155, %162 : vector<16x64xf32>
    %164 = vector.extract_strided_slice %40 {offsets = [6, 0, 0], sizes = [1, 16, 64], strides = [1, 1, 1]} : vector<8x16x64xf32> to vector<1x16x64xf32>
    %165 = vector.shape_cast %164 : vector<1x16x64xf32> to vector<16x64xf32>
    %166 = vector.extract_strided_slice %41 {offsets = [20, 0], sizes = [1, 64], strides = [1, 1]} : vector<31x64xf32> to vector<1x64xf32>
    %167 = vector.shape_cast %166 : vector<1x64xf32> to vector<64xf32>
    %168 = vector.shape_cast %167 : vector<64xf32> to vector<1x64xf32>
    %169 = vector.broadcast %168 : vector<1x64xf32> to vector<16x64xf32>
    %170 = arith.mulf %165, %169 : vector<16x64xf32>
    %171 = arith.addf %163, %170 : vector<16x64xf32>
    %172 = vector.extract_strided_slice %40 {offsets = [7, 0, 0], sizes = [1, 16, 64], strides = [1, 1, 1]} : vector<8x16x64xf32> to vector<1x16x64xf32>
    %173 = vector.shape_cast %172 : vector<1x16x64xf32> to vector<16x64xf32>
    %174 = vector.extract_strided_slice %41 {offsets = [21, 0], sizes = [1, 64], strides = [1, 1]} : vector<31x64xf32> to vector<1x64xf32>
    %175 = vector.shape_cast %174 : vector<1x64xf32> to vector<64xf32>
    %176 = vector.shape_cast %175 : vector<64xf32> to vector<1x64xf32>
    %177 = vector.broadcast %176 : vector<1x64xf32> to vector<16x64xf32>
    %178 = arith.mulf %173, %177 : vector<16x64xf32>
    %179 = arith.addf %171, %178 : vector<16x64xf32>
    %c1 = arith.constant 1 : index
    %c0_25 = arith.constant 0 : index
    %c0_26 = arith.constant 0 : index
    %180 = vector.load %arg23[%c1, %c0_25, %c0_26] : memref<8x16x64xf32, #tpu.memory_space<vmem>>, vector<1x16x64xf32>
    %181 = vector.shape_cast %180 : vector<1x16x64xf32> to vector<16x64xf32>
    %182 = vector.shape_cast %179 : vector<16x64xf32> to vector<1x16x64xf32>
    tpu.vector_store %arg23[%c1, %c0_25, %c0_26], %182 {strides = array<i32>} : memref<8x16x64xf32, #tpu.memory_space<vmem>>, vector<1x16x64xf32>,
    %cst_27 = arith.constant 0.000000e+00 : f32
    %183 = vector.broadcast %cst_27 : f32 to vector<16x64xf32>
    %184 = vector.broadcast %42 : vector<1x64xf32> to vector<16x64xf32>
    %185 = arith.addf %183, %184 : vector<16x64xf32>
    %186 = vector.extract_strided_slice %40 {offsets = [0, 0, 0], sizes = [1, 16, 64], strides = [1, 1, 1]} : vector<8x16x64xf32> to vector<1x16x64xf32>
    %187 = vector.shape_cast %186 : vector<1x16x64xf32> to vector<16x64xf32>
    %188 = vector.extract_strided_slice %41 {offsets = [13, 0], sizes = [1, 64], strides = [1, 1]} : vector<31x64xf32> to vector<1x64xf32>
    %189 = vector.shape_cast %188 : vector<1x64xf32> to vector<64xf32>
    %190 = vector.shape_cast %189 : vector<64xf32> to vector<1x64xf32>
    %191 = vector.broadcast %190 : vector<1x64xf32> to vector<16x64xf32>
    %192 = arith.mulf %187, %191 : vector<16x64xf32>
    %193 = arith.addf %185, %192 : vector<16x64xf32>
    %194 = vector.extract_strided_slice %40 {offsets = [1, 0, 0], sizes = [1, 16, 64], strides = [1, 1, 1]} : vector<8x16x64xf32> to vector<1x16x64xf32>
    %195 = vector.shape_cast %194 : vector<1x16x64xf32> to vector<16x64xf32>
    %196 = vector.extract_strided_slice %41 {offsets = [14, 0], sizes = [1, 64], strides = [1, 1]} : vector<31x64xf32> to vector<1x64xf32>
    %197 = vector.shape_cast %196 : vector<1x64xf32> to vector<64xf32>
    %198 = vector.shape_cast %197 : vector<64xf32> to vector<1x64xf32>
    %199 = vector.broadcast %198 : vector<1x64xf32> to vector<16x64xf32>
    %200 = arith.mulf %195, %199 : vector<16x64xf32>
    %201 = arith.addf %193, %200 : vector<16x64xf32>
    %202 = vector.extract_strided_slice %40 {offsets = [2, 0, 0], sizes = [1, 16, 64], strides = [1, 1, 1]} : vector<8x16x64xf32> to vector<1x16x64xf32>
    %203 = vector.shape_cast %202 : vector<1x16x64xf32> to vector<16x64xf32>
    %204 = vector.extract_strided_slice %41 {offsets = [15, 0], sizes = [1, 64], strides = [1, 1]} : vector<31x64xf32> to vector<1x64xf32>
    %205 = vector.shape_cast %204 : vector<1x64xf32> to vector<64xf32>
    %206 = vector.shape_cast %205 : vector<64xf32> to vector<1x64xf32>
    %207 = vector.broadcast %206 : vector<1x64xf32> to vector<16x64xf32>
    %208 = arith.mulf %203, %207 : vector<16x64xf32>
    %209 = arith.addf %201, %208 : vector<16x64xf32>
    %210 = vector.extract_strided_slice %40 {offsets = [3, 0, 0], sizes = [1, 16, 64], strides = [1, 1, 1]} : vector<8x16x64xf32> to vector<1x16x64xf32>
    %211 = vector.shape_cast %210 : vector<1x16x64xf32> to vector<16x64xf32>
    %212 = vector.extract_strided_slice %41 {offsets = [16, 0], sizes = [1, 64], strides = [1, 1]} : vector<31x64xf32> to vector<1x64xf32>
    %213 = vector.shape_cast %212 : vector<1x64xf32> to vector<64xf32>
    %214 = vector.shape_cast %213 : vector<64xf32> to vector<1x64xf32>
    %215 = vector.broadcast %214 : vector<1x64xf32> to vector<16x64xf32>
    %216 = arith.mulf %211, %215 : vector<16x64xf32>
    %217 = arith.addf %209, %216 : vector<16x64xf32>
    %218 = vector.extract_strided_slice %40 {offsets = [4, 0, 0], sizes = [1, 16, 64], strides = [1, 1, 1]} : vector<8x16x64xf32> to vector<1x16x64xf32>
    %219 = vector.shape_cast %218 : vector<1x16x64xf32> to vector<16x64xf32>
    %220 = vector.extract_strided_slice %41 {offsets = [17, 0], sizes = [1, 64], strides = [1, 1]} : vector<31x64xf32> to vector<1x64xf32>
    %221 = vector.shape_cast %220 : vector<1x64xf32> to vector<64xf32>
    %222 = vector.shape_cast %221 : vector<64xf32> to vector<1x64xf32>
    %223 = vector.broadcast %222 : vector<1x64xf32> to vector<16x64xf32>
    %224 = arith.mulf %219, %223 : vector<16x64xf32>
    %225 = arith.addf %217, %224 : vector<16x64xf32>
    %226 = vector.extract_strided_slice %40 {offsets = [5, 0, 0], sizes = [1, 16, 64], strides = [1, 1, 1]} : vector<8x16x64xf32> to vector<1x16x64xf32>
    %227 = vector.shape_cast %226 : vector<1x16x64xf32> to vector<16x64xf32>
    %228 = vector.extract_strided_slice %41 {offsets = [18, 0], sizes = [1, 64], strides = [1, 1]} : vector<31x64xf32> to vector<1x64xf32>
    %229 = vector.shape_cast %228 : vector<1x64xf32> to vector<64xf32>
    %230 = vector.shape_cast %229 : vector<64xf32> to vector<1x64xf32>
    %231 = vector.broadcast %230 : vector<1x64xf32> to vector<16x64xf32>
    %232 = arith.mulf %227, %231 : vector<16x64xf32>
    %233 = arith.addf %225, %232 : vector<16x64xf32>
    %234 = vector.extract_strided_slice %40 {offsets = [6, 0, 0], sizes = [1, 16, 64], strides = [1, 1, 1]} : vector<8x16x64xf32> to vector<1x16x64xf32>
    %235 = vector.shape_cast %234 : vector<1x16x64xf32> to vector<16x64xf32>
    %236 = vector.extract_strided_slice %41 {offsets = [19, 0], sizes = [1, 64], strides = [1, 1]} : vector<31x64xf32> to vector<1x64xf32>
    %237 = vector.shape_cast %236 : vector<1x64xf32> to vector<64xf32>
    %238 = vector.shape_cast %237 : vector<64xf32> to vector<1x64xf32>
    %239 = vector.broadcast %238 : vector<1x64xf32> to vector<16x64xf32>
    %240 = arith.mulf %235, %239 : vector<16x64xf32>
    %241 = arith.addf %233, %240 : vector<16x64xf32>
    %242 = vector.extract_strided_slice %40 {offsets = [7, 0, 0], sizes = [1, 16, 64], strides = [1, 1, 1]} : vector<8x16x64xf32> to vector<1x16x64xf32>
    %243 = vector.shape_cast %242 : vector<1x16x64xf32> to vector<16x64xf32>
    %244 = vector.extract_strided_slice %41 {offsets = [20, 0], sizes = [1, 64], strides = [1, 1]} : vector<31x64xf32> to vector<1x64xf32>
    %245 = vector.shape_cast %244 : vector<1x64xf32> to vector<64xf32>
    %246 = vector.shape_cast %245 : vector<64xf32> to vector<1x64xf32>
    %247 = vector.broadcast %246 : vector<1x64xf32> to vector<16x64xf32>
    %248 = arith.mulf %243, %247 : vector<16x64xf32>
    %249 = arith.addf %241, %248 : vector<16x64xf32>
    %c2 = arith.constant 2 : index
    %c0_28 = arith.constant 0 : index
    %c0_29 = arith.constant 0 : index
    %250 = vector.load %arg23[%c2, %c0_28, %c0_29] : memref<8x16x64xf32, #tpu.memory_space<vmem>>, vector<1x16x64xf32>
    %251 = vector.shape_cast %250 : vector<1x16x64xf32> to vector<16x64xf32>
    %252 = vector.shape_cast %249 : vector<16x64xf32> to vector<1x16x64xf32>
    tpu.vector_store %arg23[%c2, %c0_28, %c0_29], %252 {strides = array<i32>} : memref<8x16x64xf32, #tpu.memory_space<vmem>>, vector<1x16x64xf32>,
    %cst_30 = arith.constant 0.000000e+00 : f32
    %253 = vector.broadcast %cst_30 : f32 to vector<16x64xf32>
    %254 = vector.broadcast %42 : vector<1x64xf32> to vector<16x64xf32>
    %255 = arith.addf %253, %254 : vector<16x64xf32>
    %256 = vector.extract_strided_slice %40 {offsets = [0, 0, 0], sizes = [1, 16, 64], strides = [1, 1, 1]} : vector<8x16x64xf32> to vector<1x16x64xf32>
    %257 = vector.shape_cast %256 : vector<1x16x64xf32> to vector<16x64xf32>
    %258 = vector.extract_strided_slice %41 {offsets = [12, 0], sizes = [1, 64], strides = [1, 1]} : vector<31x64xf32> to vector<1x64xf32>
    %259 = vector.shape_cast %258 : vector<1x64xf32> to vector<64xf32>
    %260 = vector.shape_cast %259 : vector<64xf32> to vector<1x64xf32>
    %261 = vector.broadcast %260 : vector<1x64xf32> to vector<16x64xf32>
    %262 = arith.mulf %257, %261 : vector<16x64xf32>
    %263 = arith.addf %255, %262 : vector<16x64xf32>
    %264 = vector.extract_strided_slice %40 {offsets = [1, 0, 0], sizes = [1, 16, 64], strides = [1, 1, 1]} : vector<8x16x64xf32> to vector<1x16x64xf32>
    %265 = vector.shape_cast %264 : vector<1x16x64xf32> to vector<16x64xf32>
    %266 = vector.extract_strided_slice %41 {offsets = [13, 0], sizes = [1, 64], strides = [1, 1]} : vector<31x64xf32> to vector<1x64xf32>
    %267 = vector.shape_cast %266 : vector<1x64xf32> to vector<64xf32>
    %268 = vector.shape_cast %267 : vector<64xf32> to vector<1x64xf32>
    %269 = vector.broadcast %268 : vector<1x64xf32> to vector<16x64xf32>
    %270 = arith.mulf %265, %269 : vector<16x64xf32>
    %271 = arith.addf %263, %270 : vector<16x64xf32>
    %272 = vector.extract_strided_slice %40 {offsets = [2, 0, 0], sizes = [1, 16, 64], strides = [1, 1, 1]} : vector<8x16x64xf32> to vector<1x16x64xf32>
    %273 = vector.shape_cast %272 : vector<1x16x64xf32> to vector<16x64xf32>
    %274 = vector.extract_strided_slice %41 {offsets = [14, 0], sizes = [1, 64], strides = [1, 1]} : vector<31x64xf32> to vector<1x64xf32>
    %275 = vector.shape_cast %274 : vector<1x64xf32> to vector<64xf32>
    %276 = vector.shape_cast %275 : vector<64xf32> to vector<1x64xf32>
    %277 = vector.broadcast %276 : vector<1x64xf32> to vector<16x64xf32>
    %278 = arith.mulf %273, %277 : vector<16x64xf32>
    %279 = arith.addf %271, %278 : vector<16x64xf32>
    %280 = vector.extract_strided_slice %40 {offsets = [3, 0, 0], sizes = [1, 16, 64], strides = [1, 1, 1]} : vector<8x16x64xf32> to vector<1x16x64xf32>
    %281 = vector.shape_cast %280 : vector<1x16x64xf32> to vector<16x64xf32>
    %282 = vector.extract_strided_slice %41 {offsets = [15, 0], sizes = [1, 64], strides = [1, 1]} : vector<31x64xf32> to vector<1x64xf32>
    %283 = vector.shape_cast %282 : vector<1x64xf32> to vector<64xf32>
    %284 = vector.shape_cast %283 : vector<64xf32> to vector<1x64xf32>
    %285 = vector.broadcast %284 : vector<1x64xf32> to vector<16x64xf32>
    %286 = arith.mulf %281, %285 : vector<16x64xf32>
    %287 = arith.addf %279, %286 : vector<16x64xf32>
    %288 = vector.extract_strided_slice %40 {offsets = [4, 0, 0], sizes = [1, 16, 64], strides = [1, 1, 1]} : vector<8x16x64xf32> to vector<1x16x64xf32>
    %289 = vector.shape_cast %288 : vector<1x16x64xf32> to vector<16x64xf32>
    %290 = vector.extract_strided_slice %41 {offsets = [16, 0], sizes = [1, 64], strides = [1, 1]} : vector<31x64xf32> to vector<1x64xf32>
    %291 = vector.shape_cast %290 : vector<1x64xf32> to vector<64xf32>
    %292 = vector.shape_cast %291 : vector<64xf32> to vector<1x64xf32>
    %293 = vector.broadcast %292 : vector<1x64xf32> to vector<16x64xf32>
    %294 = arith.mulf %289, %293 : vector<16x64xf32>
    %295 = arith.addf %287, %294 : vector<16x64xf32>
    %296 = vector.extract_strided_slice %40 {offsets = [5, 0, 0], sizes = [1, 16, 64], strides = [1, 1, 1]} : vector<8x16x64xf32> to vector<1x16x64xf32>
    %297 = vector.shape_cast %296 : vector<1x16x64xf32> to vector<16x64xf32>
    %298 = vector.extract_strided_slice %41 {offsets = [17, 0], sizes = [1, 64], strides = [1, 1]} : vector<31x64xf32> to vector<1x64xf32>
    %299 = vector.shape_cast %298 : vector<1x64xf32> to vector<64xf32>
    %300 = vector.shape_cast %299 : vector<64xf32> to vector<1x64xf32>
    %301 = vector.broadcast %300 : vector<1x64xf32> to vector<16x64xf32>
    %302 = arith.mulf %297, %301 : vector<16x64xf32>
    %303 = arith.addf %295, %302 : vector<16x64xf32>
    %304 = vector.extract_strided_slice %40 {offsets = [6, 0, 0], sizes = [1, 16, 64], strides = [1, 1, 1]} : vector<8x16x64xf32> to vector<1x16x64xf32>
    %305 = vector.shape_cast %304 : vector<1x16x64xf32> to vector<16x64xf32>
    %306 = vector.extract_strided_slice %41 {offsets = [18, 0], sizes = [1, 64], strides = [1, 1]} : vector<31x64xf32> to vector<1x64xf32>
    %307 = vector.shape_cast %306 : vector<1x64xf32> to vector<64xf32>
    %308 = vector.shape_cast %307 : vector<64xf32> to vector<1x64xf32>
    %309 = vector.broadcast %308 : vector<1x64xf32> to vector<16x64xf32>
    %310 = arith.mulf %305, %309 : vector<16x64xf32>
    %311 = arith.addf %303, %310 : vector<16x64xf32>
    %312 = vector.extract_strided_slice %40 {offsets = [7, 0, 0], sizes = [1, 16, 64], strides = [1, 1, 1]} : vector<8x16x64xf32> to vector<1x16x64xf32>
    %313 = vector.shape_cast %312 : vector<1x16x64xf32> to vector<16x64xf32>
    %314 = vector.extract_strided_slice %41 {offsets = [19, 0], sizes = [1, 64], strides = [1, 1]} : vector<31x64xf32> to vector<1x64xf32>
    %315 = vector.shape_cast %314 : vector<1x64xf32> to vector<64xf32>
    %316 = vector.shape_cast %315 : vector<64xf32> to vector<1x64xf32>
    %317 = vector.broadcast %316 : vector<1x64xf32> to vector<16x64xf32>
    %318 = arith.mulf %313, %317 : vector<16x64xf32>
    %319 = arith.addf %311, %318 : vector<16x64xf32>
    %c3 = arith.constant 3 : index
    %c0_31 = arith.constant 0 : index
    %c0_32 = arith.constant 0 : index
    %320 = vector.load %arg23[%c3, %c0_31, %c0_32] : memref<8x16x64xf32, #tpu.memory_space<vmem>>, vector<1x16x64xf32>
    %321 = vector.shape_cast %320 : vector<1x16x64xf32> to vector<16x64xf32>
    %322 = vector.shape_cast %319 : vector<16x64xf32> to vector<1x16x64xf32>
    tpu.vector_store %arg23[%c3, %c0_31, %c0_32], %322 {strides = array<i32>} : memref<8x16x64xf32, #tpu.memory_space<vmem>>, vector<1x16x64xf32>,
    %cst_33 = arith.constant 0.000000e+00 : f32
    %323 = vector.broadcast %cst_33 : f32 to vector<16x64xf32>
    %324 = vector.broadcast %42 : vector<1x64xf32> to vector<16x64xf32>
    %325 = arith.addf %323, %324 : vector<16x64xf32>
    %326 = vector.extract_strided_slice %40 {offsets = [0, 0, 0], sizes = [1, 16, 64], strides = [1, 1, 1]} : vector<8x16x64xf32> to vector<1x16x64xf32>
    %327 = vector.shape_cast %326 : vector<1x16x64xf32> to vector<16x64xf32>
    %328 = vector.extract_strided_slice %41 {offsets = [11, 0], sizes = [1, 64], strides = [1, 1]} : vector<31x64xf32> to vector<1x64xf32>
    %329 = vector.shape_cast %328 : vector<1x64xf32> to vector<64xf32>
    %330 = vector.shape_cast %329 : vector<64xf32> to vector<1x64xf32>
    %331 = vector.broadcast %330 : vector<1x64xf32> to vector<16x64xf32>
    %332 = arith.mulf %327, %331 : vector<16x64xf32>
    %333 = arith.addf %325, %332 : vector<16x64xf32>
    %334 = vector.extract_strided_slice %40 {offsets = [1, 0, 0], sizes = [1, 16, 64], strides = [1, 1, 1]} : vector<8x16x64xf32> to vector<1x16x64xf32>
    %335 = vector.shape_cast %334 : vector<1x16x64xf32> to vector<16x64xf32>
    %336 = vector.extract_strided_slice %41 {offsets = [12, 0], sizes = [1, 64], strides = [1, 1]} : vector<31x64xf32> to vector<1x64xf32>
    %337 = vector.shape_cast %336 : vector<1x64xf32> to vector<64xf32>
    %338 = vector.shape_cast %337 : vector<64xf32> to vector<1x64xf32>
    %339 = vector.broadcast %338 : vector<1x64xf32> to vector<16x64xf32>
    %340 = arith.mulf %335, %339 : vector<16x64xf32>
    %341 = arith.addf %333, %340 : vector<16x64xf32>
    %342 = vector.extract_strided_slice %40 {offsets = [2, 0, 0], sizes = [1, 16, 64], strides = [1, 1, 1]} : vector<8x16x64xf32> to vector<1x16x64xf32>
    %343 = vector.shape_cast %342 : vector<1x16x64xf32> to vector<16x64xf32>
    %344 = vector.extract_strided_slice %41 {offsets = [13, 0], sizes = [1, 64], strides = [1, 1]} : vector<31x64xf32> to vector<1x64xf32>
    %345 = vector.shape_cast %344 : vector<1x64xf32> to vector<64xf32>
    %346 = vector.shape_cast %345 : vector<64xf32> to vector<1x64xf32>
    %347 = vector.broadcast %346 : vector<1x64xf32> to vector<16x64xf32>
    %348 = arith.mulf %343, %347 : vector<16x64xf32>
    %349 = arith.addf %341, %348 : vector<16x64xf32>
    %350 = vector.extract_strided_slice %40 {offsets = [3, 0, 0], sizes = [1, 16, 64], strides = [1, 1, 1]} : vector<8x16x64xf32> to vector<1x16x64xf32>
    %351 = vector.shape_cast %350 : vector<1x16x64xf32> to vector<16x64xf32>
    %352 = vector.extract_strided_slice %41 {offsets = [14, 0], sizes = [1, 64], strides = [1, 1]} : vector<31x64xf32> to vector<1x64xf32>
    %353 = vector.shape_cast %352 : vector<1x64xf32> to vector<64xf32>
    %354 = vector.shape_cast %353 : vector<64xf32> to vector<1x64xf32>
    %355 = vector.broadcast %354 : vector<1x64xf32> to vector<16x64xf32>
    %356 = arith.mulf %351, %355 : vector<16x64xf32>
    %357 = arith.addf %349, %356 : vector<16x64xf32>
    %358 = vector.extract_strided_slice %40 {offsets = [4, 0, 0], sizes = [1, 16, 64], strides = [1, 1, 1]} : vector<8x16x64xf32> to vector<1x16x64xf32>
    %359 = vector.shape_cast %358 : vector<1x16x64xf32> to vector<16x64xf32>
    %360 = vector.extract_strided_slice %41 {offsets = [15, 0], sizes = [1, 64], strides = [1, 1]} : vector<31x64xf32> to vector<1x64xf32>
    %361 = vector.shape_cast %360 : vector<1x64xf32> to vector<64xf32>
    %362 = vector.shape_cast %361 : vector<64xf32> to vector<1x64xf32>
    %363 = vector.broadcast %362 : vector<1x64xf32> to vector<16x64xf32>
    %364 = arith.mulf %359, %363 : vector<16x64xf32>
    %365 = arith.addf %357, %364 : vector<16x64xf32>
    %366 = vector.extract_strided_slice %40 {offsets = [5, 0, 0], sizes = [1, 16, 64], strides = [1, 1, 1]} : vector<8x16x64xf32> to vector<1x16x64xf32>
    %367 = vector.shape_cast %366 : vector<1x16x64xf32> to vector<16x64xf32>
    %368 = vector.extract_strided_slice %41 {offsets = [16, 0], sizes = [1, 64], strides = [1, 1]} : vector<31x64xf32> to vector<1x64xf32>
    %369 = vector.shape_cast %368 : vector<1x64xf32> to vector<64xf32>
    %370 = vector.shape_cast %369 : vector<64xf32> to vector<1x64xf32>
    %371 = vector.broadcast %370 : vector<1x64xf32> to vector<16x64xf32>
    %372 = arith.mulf %367, %371 : vector<16x64xf32>
    %373 = arith.addf %365, %372 : vector<16x64xf32>
    %374 = vector.extract_strided_slice %40 {offsets = [6, 0, 0], sizes = [1, 16, 64], strides = [1, 1, 1]} : vector<8x16x64xf32> to vector<1x16x64xf32>
    %375 = vector.shape_cast %374 : vector<1x16x64xf32> to vector<16x64xf32>
    %376 = vector.extract_strided_slice %41 {offsets = [17, 0], sizes = [1, 64], strides = [1, 1]} : vector<31x64xf32> to vector<1x64xf32>
    %377 = vector.shape_cast %376 : vector<1x64xf32> to vector<64xf32>
    %378 = vector.shape_cast %377 : vector<64xf32> to vector<1x64xf32>
    %379 = vector.broadcast %378 : vector<1x64xf32> to vector<16x64xf32>
    %380 = arith.mulf %375, %379 : vector<16x64xf32>
    %381 = arith.addf %373, %380 : vector<16x64xf32>
    %382 = vector.extract_strided_slice %40 {offsets = [7, 0, 0], sizes = [1, 16, 64], strides = [1, 1, 1]} : vector<8x16x64xf32> to vector<1x16x64xf32>
    %383 = vector.shape_cast %382 : vector<1x16x64xf32> to vector<16x64xf32>
    %384 = vector.extract_strided_slice %41 {offsets = [18, 0], sizes = [1, 64], strides = [1, 1]} : vector<31x64xf32> to vector<1x64xf32>
    %385 = vector.shape_cast %384 : vector<1x64xf32> to vector<64xf32>
    %386 = vector.shape_cast %385 : vector<64xf32> to vector<1x64xf32>
    %387 = vector.broadcast %386 : vector<1x64xf32> to vector<16x64xf32>
    %388 = arith.mulf %383, %387 : vector<16x64xf32>
    %389 = arith.addf %381, %388 : vector<16x64xf32>
    %c4 = arith.constant 4 : index
    %c0_34 = arith.constant 0 : index
    %c0_35 = arith.constant 0 : index
    %390 = vector.load %arg23[%c4, %c0_34, %c0_35] : memref<8x16x64xf32, #tpu.memory_space<vmem>>, vector<1x16x64xf32>
    %391 = vector.shape_cast %390 : vector<1x16x64xf32> to vector<16x64xf32>
    %392 = vector.shape_cast %389 : vector<16x64xf32> to vector<1x16x64xf32>
    tpu.vector_store %arg23[%c4, %c0_34, %c0_35], %392 {strides = array<i32>} : memref<8x16x64xf32, #tpu.memory_space<vmem>>, vector<1x16x64xf32>,
    %cst_36 = arith.constant 0.000000e+00 : f32
    %393 = vector.broadcast %cst_36 : f32 to vector<16x64xf32>
    %394 = vector.broadcast %42 : vector<1x64xf32> to vector<16x64xf32>
    %395 = arith.addf %393, %394 : vector<16x64xf32>
    %396 = vector.extract_strided_slice %40 {offsets = [0, 0, 0], sizes = [1, 16, 64], strides = [1, 1, 1]} : vector<8x16x64xf32> to vector<1x16x64xf32>
    %397 = vector.shape_cast %396 : vector<1x16x64xf32> to vector<16x64xf32>
    %398 = vector.extract_strided_slice %41 {offsets = [10, 0], sizes = [1, 64], strides = [1, 1]} : vector<31x64xf32> to vector<1x64xf32>
    %399 = vector.shape_cast %398 : vector<1x64xf32> to vector<64xf32>
    %400 = vector.shape_cast %399 : vector<64xf32> to vector<1x64xf32>
    %401 = vector.broadcast %400 : vector<1x64xf32> to vector<16x64xf32>
    %402 = arith.mulf %397, %401 : vector<16x64xf32>
    %403 = arith.addf %395, %402 : vector<16x64xf32>
    %404 = vector.extract_strided_slice %40 {offsets = [1, 0, 0], sizes = [1, 16, 64], strides = [1, 1, 1]} : vector<8x16x64xf32> to vector<1x16x64xf32>
    %405 = vector.shape_cast %404 : vector<1x16x64xf32> to vector<16x64xf32>
    %406 = vector.extract_strided_slice %41 {offsets = [11, 0], sizes = [1, 64], strides = [1, 1]} : vector<31x64xf32> to vector<1x64xf32>
    %407 = vector.shape_cast %406 : vector<1x64xf32> to vector<64xf32>
    %408 = vector.shape_cast %407 : vector<64xf32> to vector<1x64xf32>
    %409 = vector.broadcast %408 : vector<1x64xf32> to vector<16x64xf32>
    %410 = arith.mulf %405, %409 : vector<16x64xf32>
    %411 = arith.addf %403, %410 : vector<16x64xf32>
    %412 = vector.extract_strided_slice %40 {offsets = [2, 0, 0], sizes = [1, 16, 64], strides = [1, 1, 1]} : vector<8x16x64xf32> to vector<1x16x64xf32>
    %413 = vector.shape_cast %412 : vector<1x16x64xf32> to vector<16x64xf32>
    %414 = vector.extract_strided_slice %41 {offsets = [12, 0], sizes = [1, 64], strides = [1, 1]} : vector<31x64xf32> to vector<1x64xf32>
    %415 = vector.shape_cast %414 : vector<1x64xf32> to vector<64xf32>
    %416 = vector.shape_cast %415 : vector<64xf32> to vector<1x64xf32>
    %417 = vector.broadcast %416 : vector<1x64xf32> to vector<16x64xf32>
    %418 = arith.mulf %413, %417 : vector<16x64xf32>
    %419 = arith.addf %411, %418 : vector<16x64xf32>
    %420 = vector.extract_strided_slice %40 {offsets = [3, 0, 0], sizes = [1, 16, 64], strides = [1, 1, 1]} : vector<8x16x64xf32> to vector<1x16x64xf32>
    %421 = vector.shape_cast %420 : vector<1x16x64xf32> to vector<16x64xf32>
    %422 = vector.extract_strided_slice %41 {offsets = [13, 0], sizes = [1, 64], strides = [1, 1]} : vector<31x64xf32> to vector<1x64xf32>
    %423 = vector.shape_cast %422 : vector<1x64xf32> to vector<64xf32>
    %424 = vector.shape_cast %423 : vector<64xf32> to vector<1x64xf32>
    %425 = vector.broadcast %424 : vector<1x64xf32> to vector<16x64xf32>
    %426 = arith.mulf %421, %425 : vector<16x64xf32>
    %427 = arith.addf %419, %426 : vector<16x64xf32>
    %428 = vector.extract_strided_slice %40 {offsets = [4, 0, 0], sizes = [1, 16, 64], strides = [1, 1, 1]} : vector<8x16x64xf32> to vector<1x16x64xf32>
    %429 = vector.shape_cast %428 : vector<1x16x64xf32> to vector<16x64xf32>
    %430 = vector.extract_strided_slice %41 {offsets = [14, 0], sizes = [1, 64], strides = [1, 1]} : vector<31x64xf32> to vector<1x64xf32>
    %431 = vector.shape_cast %430 : vector<1x64xf32> to vector<64xf32>
    %432 = vector.shape_cast %431 : vector<64xf32> to vector<1x64xf32>
    %433 = vector.broadcast %432 : vector<1x64xf32> to vector<16x64xf32>
    %434 = arith.mulf %429, %433 : vector<16x64xf32>
    %435 = arith.addf %427, %434 : vector<16x64xf32>
    %436 = vector.extract_strided_slice %40 {offsets = [5, 0, 0], sizes = [1, 16, 64], strides = [1, 1, 1]} : vector<8x16x64xf32> to vector<1x16x64xf32>
    %437 = vector.shape_cast %436 : vector<1x16x64xf32> to vector<16x64xf32>
    %438 = vector.extract_strided_slice %41 {offsets = [15, 0], sizes = [1, 64], strides = [1, 1]} : vector<31x64xf32> to vector<1x64xf32>
    %439 = vector.shape_cast %438 : vector<1x64xf32> to vector<64xf32>
    %440 = vector.shape_cast %439 : vector<64xf32> to vector<1x64xf32>
    %441 = vector.broadcast %440 : vector<1x64xf32> to vector<16x64xf32>
    %442 = arith.mulf %437, %441 : vector<16x64xf32>
    %443 = arith.addf %435, %442 : vector<16x64xf32>
    %444 = vector.extract_strided_slice %40 {offsets = [6, 0, 0], sizes = [1, 16, 64], strides = [1, 1, 1]} : vector<8x16x64xf32> to vector<1x16x64xf32>
    %445 = vector.shape_cast %444 : vector<1x16x64xf32> to vector<16x64xf32>
    %446 = vector.extract_strided_slice %41 {offsets = [16, 0], sizes = [1, 64], strides = [1, 1]} : vector<31x64xf32> to vector<1x64xf32>
    %447 = vector.shape_cast %446 : vector<1x64xf32> to vector<64xf32>
    %448 = vector.shape_cast %447 : vector<64xf32> to vector<1x64xf32>
    %449 = vector.broadcast %448 : vector<1x64xf32> to vector<16x64xf32>
    %450 = arith.mulf %445, %449 : vector<16x64xf32>
    %451 = arith.addf %443, %450 : vector<16x64xf32>
    %452 = vector.extract_strided_slice %40 {offsets = [7, 0, 0], sizes = [1, 16, 64], strides = [1, 1, 1]} : vector<8x16x64xf32> to vector<1x16x64xf32>
    %453 = vector.shape_cast %452 : vector<1x16x64xf32> to vector<16x64xf32>
    %454 = vector.extract_strided_slice %41 {offsets = [17, 0], sizes = [1, 64], strides = [1, 1]} : vector<31x64xf32> to vector<1x64xf32>
    %455 = vector.shape_cast %454 : vector<1x64xf32> to vector<64xf32>
    %456 = vector.shape_cast %455 : vector<64xf32> to vector<1x64xf32>
    %457 = vector.broadcast %456 : vector<1x64xf32> to vector<16x64xf32>
    %458 = arith.mulf %453, %457 : vector<16x64xf32>
    %459 = arith.addf %451, %458 : vector<16x64xf32>
    %c5 = arith.constant 5 : index
    %c0_37 = arith.constant 0 : index
    %c0_38 = arith.constant 0 : index
    %460 = vector.load %arg23[%c5, %c0_37, %c0_38] : memref<8x16x64xf32, #tpu.memory_space<vmem>>, vector<1x16x64xf32>
    %461 = vector.shape_cast %460 : vector<1x16x64xf32> to vector<16x64xf32>
    %462 = vector.shape_cast %459 : vector<16x64xf32> to vector<1x16x64xf32>
    tpu.vector_store %arg23[%c5, %c0_37, %c0_38], %462 {strides = array<i32>} : memref<8x16x64xf32, #tpu.memory_space<vmem>>, vector<1x16x64xf32>,
    %cst_39 = arith.constant 0.000000e+00 : f32
    %463 = vector.broadcast %cst_39 : f32 to vector<16x64xf32>
    %464 = vector.broadcast %42 : vector<1x64xf32> to vector<16x64xf32>
    %465 = arith.addf %463, %464 : vector<16x64xf32>
    %466 = vector.extract_strided_slice %40 {offsets = [0, 0, 0], sizes = [1, 16, 64], strides = [1, 1, 1]} : vector<8x16x64xf32> to vector<1x16x64xf32>
    %467 = vector.shape_cast %466 : vector<1x16x64xf32> to vector<16x64xf32>
    %468 = vector.extract_strided_slice %41 {offsets = [9, 0], sizes = [1, 64], strides = [1, 1]} : vector<31x64xf32> to vector<1x64xf32>
    %469 = vector.shape_cast %468 : vector<1x64xf32> to vector<64xf32>
    %470 = vector.shape_cast %469 : vector<64xf32> to vector<1x64xf32>
    %471 = vector.broadcast %470 : vector<1x64xf32> to vector<16x64xf32>
    %472 = arith.mulf %467, %471 : vector<16x64xf32>
    %473 = arith.addf %465, %472 : vector<16x64xf32>
    %474 = vector.extract_strided_slice %40 {offsets = [1, 0, 0], sizes = [1, 16, 64], strides = [1, 1, 1]} : vector<8x16x64xf32> to vector<1x16x64xf32>
    %475 = vector.shape_cast %474 : vector<1x16x64xf32> to vector<16x64xf32>
    %476 = vector.extract_strided_slice %41 {offsets = [10, 0], sizes = [1, 64], strides = [1, 1]} : vector<31x64xf32> to vector<1x64xf32>
    %477 = vector.shape_cast %476 : vector<1x64xf32> to vector<64xf32>
    %478 = vector.shape_cast %477 : vector<64xf32> to vector<1x64xf32>
    %479 = vector.broadcast %478 : vector<1x64xf32> to vector<16x64xf32>
    %480 = arith.mulf %475, %479 : vector<16x64xf32>
    %481 = arith.addf %473, %480 : vector<16x64xf32>
    %482 = vector.extract_strided_slice %40 {offsets = [2, 0, 0], sizes = [1, 16, 64], strides = [1, 1, 1]} : vector<8x16x64xf32> to vector<1x16x64xf32>
    %483 = vector.shape_cast %482 : vector<1x16x64xf32> to vector<16x64xf32>
    %484 = vector.extract_strided_slice %41 {offsets = [11, 0], sizes = [1, 64], strides = [1, 1]} : vector<31x64xf32> to vector<1x64xf32>
    %485 = vector.shape_cast %484 : vector<1x64xf32> to vector<64xf32>
    %486 = vector.shape_cast %485 : vector<64xf32> to vector<1x64xf32>
    %487 = vector.broadcast %486 : vector<1x64xf32> to vector<16x64xf32>
    %488 = arith.mulf %483, %487 : vector<16x64xf32>
    %489 = arith.addf %481, %488 : vector<16x64xf32>
    %490 = vector.extract_strided_slice %40 {offsets = [3, 0, 0], sizes = [1, 16, 64], strides = [1, 1, 1]} : vector<8x16x64xf32> to vector<1x16x64xf32>
    %491 = vector.shape_cast %490 : vector<1x16x64xf32> to vector<16x64xf32>
    %492 = vector.extract_strided_slice %41 {offsets = [12, 0], sizes = [1, 64], strides = [1, 1]} : vector<31x64xf32> to vector<1x64xf32>
    %493 = vector.shape_cast %492 : vector<1x64xf32> to vector<64xf32>
    %494 = vector.shape_cast %493 : vector<64xf32> to vector<1x64xf32>
    %495 = vector.broadcast %494 : vector<1x64xf32> to vector<16x64xf32>
    %496 = arith.mulf %491, %495 : vector<16x64xf32>
    %497 = arith.addf %489, %496 : vector<16x64xf32>
    %498 = vector.extract_strided_slice %40 {offsets = [4, 0, 0], sizes = [1, 16, 64], strides = [1, 1, 1]} : vector<8x16x64xf32> to vector<1x16x64xf32>
    %499 = vector.shape_cast %498 : vector<1x16x64xf32> to vector<16x64xf32>
    %500 = vector.extract_strided_slice %41 {offsets = [13, 0], sizes = [1, 64], strides = [1, 1]} : vector<31x64xf32> to vector<1x64xf32>
    %501 = vector.shape_cast %500 : vector<1x64xf32> to vector<64xf32>
    %502 = vector.shape_cast %501 : vector<64xf32> to vector<1x64xf32>
    %503 = vector.broadcast %502 : vector<1x64xf32> to vector<16x64xf32>
    %504 = arith.mulf %499, %503 : vector<16x64xf32>
    %505 = arith.addf %497, %504 : vector<16x64xf32>
    %506 = vector.extract_strided_slice %40 {offsets = [5, 0, 0], sizes = [1, 16, 64], strides = [1, 1, 1]} : vector<8x16x64xf32> to vector<1x16x64xf32>
    %507 = vector.shape_cast %506 : vector<1x16x64xf32> to vector<16x64xf32>
    %508 = vector.extract_strided_slice %41 {offsets = [14, 0], sizes = [1, 64], strides = [1, 1]} : vector<31x64xf32> to vector<1x64xf32>
    %509 = vector.shape_cast %508 : vector<1x64xf32> to vector<64xf32>
    %510 = vector.shape_cast %509 : vector<64xf32> to vector<1x64xf32>
    %511 = vector.broadcast %510 : vector<1x64xf32> to vector<16x64xf32>
    %512 = arith.mulf %507, %511 : vector<16x64xf32>
    %513 = arith.addf %505, %512 : vector<16x64xf32>
    %514 = vector.extract_strided_slice %40 {offsets = [6, 0, 0], sizes = [1, 16, 64], strides = [1, 1, 1]} : vector<8x16x64xf32> to vector<1x16x64xf32>
    %515 = vector.shape_cast %514 : vector<1x16x64xf32> to vector<16x64xf32>
    %516 = vector.extract_strided_slice %41 {offsets = [15, 0], sizes = [1, 64], strides = [1, 1]} : vector<31x64xf32> to vector<1x64xf32>
    %517 = vector.shape_cast %516 : vector<1x64xf32> to vector<64xf32>
    %518 = vector.shape_cast %517 : vector<64xf32> to vector<1x64xf32>
    %519 = vector.broadcast %518 : vector<1x64xf32> to vector<16x64xf32>
    %520 = arith.mulf %515, %519 : vector<16x64xf32>
    %521 = arith.addf %513, %520 : vector<16x64xf32>
    %522 = vector.extract_strided_slice %40 {offsets = [7, 0, 0], sizes = [1, 16, 64], strides = [1, 1, 1]} : vector<8x16x64xf32> to vector<1x16x64xf32>
    %523 = vector.shape_cast %522 : vector<1x16x64xf32> to vector<16x64xf32>
    %524 = vector.extract_strided_slice %41 {offsets = [16, 0], sizes = [1, 64], strides = [1, 1]} : vector<31x64xf32> to vector<1x64xf32>
    %525 = vector.shape_cast %524 : vector<1x64xf32> to vector<64xf32>
    %526 = vector.shape_cast %525 : vector<64xf32> to vector<1x64xf32>
    %527 = vector.broadcast %526 : vector<1x64xf32> to vector<16x64xf32>
    %528 = arith.mulf %523, %527 : vector<16x64xf32>
    %529 = arith.addf %521, %528 : vector<16x64xf32>
    %c6 = arith.constant 6 : index
    %c0_40 = arith.constant 0 : index
    %c0_41 = arith.constant 0 : index
    %530 = vector.load %arg23[%c6, %c0_40, %c0_41] : memref<8x16x64xf32, #tpu.memory_space<vmem>>, vector<1x16x64xf32>
    %531 = vector.shape_cast %530 : vector<1x16x64xf32> to vector<16x64xf32>
    %532 = vector.shape_cast %529 : vector<16x64xf32> to vector<1x16x64xf32>
    tpu.vector_store %arg23[%c6, %c0_40, %c0_41], %532 {strides = array<i32>} : memref<8x16x64xf32, #tpu.memory_space<vmem>>, vector<1x16x64xf32>,
    %cst_42 = arith.constant 0.000000e+00 : f32
    %533 = vector.broadcast %cst_42 : f32 to vector<16x64xf32>
    %534 = vector.broadcast %42 : vector<1x64xf32> to vector<16x64xf32>
    %535 = arith.addf %533, %534 : vector<16x64xf32>
    %536 = vector.extract_strided_slice %40 {offsets = [0, 0, 0], sizes = [1, 16, 64], strides = [1, 1, 1]} : vector<8x16x64xf32> to vector<1x16x64xf32>
    %537 = vector.shape_cast %536 : vector<1x16x64xf32> to vector<16x64xf32>
    %538 = vector.extract_strided_slice %41 {offsets = [8, 0], sizes = [1, 64], strides = [1, 1]} : vector<31x64xf32> to vector<1x64xf32>
    %539 = vector.shape_cast %538 : vector<1x64xf32> to vector<64xf32>
    %540 = vector.shape_cast %539 : vector<64xf32> to vector<1x64xf32>
    %541 = vector.broadcast %540 : vector<1x64xf32> to vector<16x64xf32>
    %542 = arith.mulf %537, %541 : vector<16x64xf32>
    %543 = arith.addf %535, %542 : vector<16x64xf32>
    %544 = vector.extract_strided_slice %40 {offsets = [1, 0, 0], sizes = [1, 16, 64], strides = [1, 1, 1]} : vector<8x16x64xf32> to vector<1x16x64xf32>
    %545 = vector.shape_cast %544 : vector<1x16x64xf32> to vector<16x64xf32>
    %546 = vector.extract_strided_slice %41 {offsets = [9, 0], sizes = [1, 64], strides = [1, 1]} : vector<31x64xf32> to vector<1x64xf32>
    %547 = vector.shape_cast %546 : vector<1x64xf32> to vector<64xf32>
    %548 = vector.shape_cast %547 : vector<64xf32> to vector<1x64xf32>
    %549 = vector.broadcast %548 : vector<1x64xf32> to vector<16x64xf32>
    %550 = arith.mulf %545, %549 : vector<16x64xf32>
    %551 = arith.addf %543, %550 : vector<16x64xf32>
    %552 = vector.extract_strided_slice %40 {offsets = [2, 0, 0], sizes = [1, 16, 64], strides = [1, 1, 1]} : vector<8x16x64xf32> to vector<1x16x64xf32>
    %553 = vector.shape_cast %552 : vector<1x16x64xf32> to vector<16x64xf32>
    %554 = vector.extract_strided_slice %41 {offsets = [10, 0], sizes = [1, 64], strides = [1, 1]} : vector<31x64xf32> to vector<1x64xf32>
    %555 = vector.shape_cast %554 : vector<1x64xf32> to vector<64xf32>
    %556 = vector.shape_cast %555 : vector<64xf32> to vector<1x64xf32>
    %557 = vector.broadcast %556 : vector<1x64xf32> to vector<16x64xf32>
    %558 = arith.mulf %553, %557 : vector<16x64xf32>
    %559 = arith.addf %551, %558 : vector<16x64xf32>
    %560 = vector.extract_strided_slice %40 {offsets = [3, 0, 0], sizes = [1, 16, 64], strides = [1, 1, 1]} : vector<8x16x64xf32> to vector<1x16x64xf32>
    %561 = vector.shape_cast %560 : vector<1x16x64xf32> to vector<16x64xf32>
    %562 = vector.extract_strided_slice %41 {offsets = [11, 0], sizes = [1, 64], strides = [1, 1]} : vector<31x64xf32> to vector<1x64xf32>
    %563 = vector.shape_cast %562 : vector<1x64xf32> to vector<64xf32>
    %564 = vector.shape_cast %563 : vector<64xf32> to vector<1x64xf32>
    %565 = vector.broadcast %564 : vector<1x64xf32> to vector<16x64xf32>
    %566 = arith.mulf %561, %565 : vector<16x64xf32>
    %567 = arith.addf %559, %566 : vector<16x64xf32>
    %568 = vector.extract_strided_slice %40 {offsets = [4, 0, 0], sizes = [1, 16, 64], strides = [1, 1, 1]} : vector<8x16x64xf32> to vector<1x16x64xf32>
    %569 = vector.shape_cast %568 : vector<1x16x64xf32> to vector<16x64xf32>
    %570 = vector.extract_strided_slice %41 {offsets = [12, 0], sizes = [1, 64], strides = [1, 1]} : vector<31x64xf32> to vector<1x64xf32>
    %571 = vector.shape_cast %570 : vector<1x64xf32> to vector<64xf32>
    %572 = vector.shape_cast %571 : vector<64xf32> to vector<1x64xf32>
    %573 = vector.broadcast %572 : vector<1x64xf32> to vector<16x64xf32>
    %574 = arith.mulf %569, %573 : vector<16x64xf32>
    %575 = arith.addf %567, %574 : vector<16x64xf32>
    %576 = vector.extract_strided_slice %40 {offsets = [5, 0, 0], sizes = [1, 16, 64], strides = [1, 1, 1]} : vector<8x16x64xf32> to vector<1x16x64xf32>
    %577 = vector.shape_cast %576 : vector<1x16x64xf32> to vector<16x64xf32>
    %578 = vector.extract_strided_slice %41 {offsets = [13, 0], sizes = [1, 64], strides = [1, 1]} : vector<31x64xf32> to vector<1x64xf32>
    %579 = vector.shape_cast %578 : vector<1x64xf32> to vector<64xf32>
    %580 = vector.shape_cast %579 : vector<64xf32> to vector<1x64xf32>
    %581 = vector.broadcast %580 : vector<1x64xf32> to vector<16x64xf32>
    %582 = arith.mulf %577, %581 : vector<16x64xf32>
    %583 = arith.addf %575, %582 : vector<16x64xf32>
    %584 = vector.extract_strided_slice %40 {offsets = [6, 0, 0], sizes = [1, 16, 64], strides = [1, 1, 1]} : vector<8x16x64xf32> to vector<1x16x64xf32>
    %585 = vector.shape_cast %584 : vector<1x16x64xf32> to vector<16x64xf32>
    %586 = vector.extract_strided_slice %41 {offsets = [14, 0], sizes = [1, 64], strides = [1, 1]} : vector<31x64xf32> to vector<1x64xf32>
    %587 = vector.shape_cast %586 : vector<1x64xf32> to vector<64xf32>
    %588 = vector.shape_cast %587 : vector<64xf32> to vector<1x64xf32>
    %589 = vector.broadcast %588 : vector<1x64xf32> to vector<16x64xf32>
    %590 = arith.mulf %585, %589 : vector<16x64xf32>
    %591 = arith.addf %583, %590 : vector<16x64xf32>
    %592 = vector.extract_strided_slice %40 {offsets = [7, 0, 0], sizes = [1, 16, 64], strides = [1, 1, 1]} : vector<8x16x64xf32> to vector<1x16x64xf32>
    %593 = vector.shape_cast %592 : vector<1x16x64xf32> to vector<16x64xf32>
    %594 = vector.extract_strided_slice %41 {offsets = [15, 0], sizes = [1, 64], strides = [1, 1]} : vector<31x64xf32> to vector<1x64xf32>
    %595 = vector.shape_cast %594 : vector<1x64xf32> to vector<64xf32>
    %596 = vector.shape_cast %595 : vector<64xf32> to vector<1x64xf32>
    %597 = vector.broadcast %596 : vector<1x64xf32> to vector<16x64xf32>
    %598 = arith.mulf %593, %597 : vector<16x64xf32>
    %599 = arith.addf %591, %598 : vector<16x64xf32>
    %c7 = arith.constant 7 : index
    %c0_43 = arith.constant 0 : index
    %c0_44 = arith.constant 0 : index
    %600 = vector.load %arg23[%c7, %c0_43, %c0_44] : memref<8x16x64xf32, #tpu.memory_space<vmem>>, vector<1x16x64xf32>
    %601 = vector.shape_cast %600 : vector<1x16x64xf32> to vector<16x64xf32>
    %602 = vector.shape_cast %599 : vector<16x64xf32> to vector<1x16x64xf32>
    tpu.vector_store %arg23[%c7, %c0_43, %c0_44], %602 {strides = array<i32>} : memref<8x16x64xf32, #tpu.memory_space<vmem>>, vector<1x16x64xf32>,
    %c0_45 = arith.constant 0 : index
    %c0_46 = arith.constant 0 : index
    %c0_47 = arith.constant 0 : index
    %603 = vector.load %arg23[%c0_45, %c0_46, %c0_47] : memref<8x16x64xf32, #tpu.memory_space<vmem>>, vector<8x16x64xf32>
    %604 = vector.shape_cast %603 : vector<8x16x64xf32> to vector<128x64xf32>
    %c0_48 = arith.constant 0 : index
    %c0_49 = arith.constant 0 : index
    %605 = vector.load %arg10[%c0_48, %c0_49] : memref<1x64xf32, #tpu.memory_space<vmem>>, vector<1x64xf32>
    %606 = vector.broadcast %605 : vector<1x64xf32> to vector<128x64xf32>
    %607 = arith.subf %604, %606 : vector<128x64xf32>
    %c0_50 = arith.constant 0 : index
    %c0_51 = arith.constant 0 : index
    %608 = vector.load %arg8[%c0_50, %c0_51] : memref<1x64xf32, #tpu.memory_space<vmem>>, vector<1x64xf32>
    %c0_52 = arith.constant 0 : index
    %c0_53 = arith.constant 0 : index
    %609 = vector.load %arg11[%c0_52, %c0_53] : memref<1x64xf32, #tpu.memory_space<vmem>>, vector<1x64xf32>
    %cst_54 = arith.constant 9.99999974E-6 : f32
    %610 = vector.broadcast %cst_54 : f32 to vector<1x64xf32>
    %611 = arith.addf %609, %610 : vector<1x64xf32>
    %612 = math.rsqrt %611 : vector<1x64xf32>
    %613 = arith.mulf %608, %612 : vector<1x64xf32>
    %614 = vector.broadcast %613 : vector<1x64xf32> to vector<128x64xf32>
    %615 = arith.mulf %607, %614 : vector<128x64xf32>
    %c0_55 = arith.constant 0 : index
    %c0_56 = arith.constant 0 : index
    %616 = vector.load %arg9[%c0_55, %c0_56] : memref<1x64xf32, #tpu.memory_space<vmem>>, vector<1x64xf32>
    %617 = vector.broadcast %616 : vector<1x64xf32> to vector<128x64xf32>
    %618 = arith.addf %615, %617 : vector<128x64xf32>
    %619 = arith.negf %618 : vector<128x64xf32>
    %620 = math.exp %619 : vector<128x64xf32>
    %cst_57 = arith.constant 1.000000e+00 : f32
    %621 = vector.broadcast %cst_57 : f32 to vector<128x64xf32>
    %622 = arith.addf %621, %620 : vector<128x64xf32>
    %623 = arith.divf %621, %622 : vector<128x64xf32>
    %624 = arith.mulf %618, %623 : vector<128x64xf32>
    %625 = arith.truncf %624 : vector<128x64xf32> to vector<128x64xbf16>
    %c0_58 = arith.constant 0 : index
    %c0_59 = arith.constant 0 : index
    %626 = vector.load %arg12[%c0_58, %c0_59] : memref<64x32xbf16, #tpu.memory_space<vmem>>, vector<64x32xbf16>
    %cst_60 = arith.constant dense<0.000000e+00> : vector<128x32xf32>
    %627 = tpu.matmul %625, %626, %cst_60 {dimension_numbers = #tpu.dot_dimension_numbers<[1], [0], [0], [1], [0, 0, 1, 1], [], []>} : vector<128x64xbf16>, vector<64x32xbf16>, vector<128x32xf32> -> vector<128x32xf32>
    %628 = arith.addf %1, %627 : vector<128x32xf32>
    %c0_61 = arith.constant 0 : index
    %c0_62 = arith.constant 0 : index
    %629 = vector.load %arg13[%c0_61, %c0_62] : memref<1x32xf32, #tpu.memory_space<vmem>>, vector<1x32xf32>
    %630 = vector.broadcast %629 : vector<1x32xf32> to vector<128x32xf32>
    %631 = arith.addf %628, %630 : vector<128x32xf32>
    %c0_63 = arith.constant 0 : index
    %c0_64 = arith.constant 0 : index
    %632 = vector.load %arg14[%c0_63, %c0_64] : memref<1x32xf32, #tpu.memory_space<vmem>>, vector<1x32xf32>
    %c0_65 = arith.constant 0 : index
    %c0_66 = arith.constant 0 : index
    %633 = vector.load %arg15[%c0_65, %c0_66] : memref<1x32xf32, #tpu.memory_space<vmem>>, vector<1x32xf32>
    %cst_67 = arith.constant dense<0.000000e+00> : vector<128xf32>
    %634 = vector.multi_reduction <add>, %631, %cst_67 [1] : vector<128x32xf32> to vector<128xf32>
    %635 = vector.shape_cast %634 : vector<128xf32> to vector<128x1xf32>
    %cst_68 = arith.constant 3.200000e+01 : f32
    %636 = vector.broadcast %cst_68 : f32 to vector<128x1xf32>
    %637 = arith.divf %635, %636 : vector<128x1xf32>
    %638 = vector.broadcast %637 : vector<128x1xf32> to vector<128x32xf32>
    %639 = arith.subf %631, %638 : vector<128x32xf32>
    %640 = arith.mulf %639, %639 : vector<128x32xf32>
    %cst_69 = arith.constant dense<0.000000e+00> : vector<128xf32>
    %641 = vector.multi_reduction <add>, %640, %cst_69 [1] : vector<128x32xf32> to vector<128xf32>
    %642 = vector.shape_cast %641 : vector<128xf32> to vector<128x1xf32>
    %cst_70 = arith.constant 3.200000e+01 : f32
    %643 = vector.broadcast %cst_70 : f32 to vector<128x1xf32>
    %644 = arith.divf %642, %643 : vector<128x1xf32>
    %645 = vector.broadcast %637 : vector<128x1xf32> to vector<128x32xf32>
    %646 = arith.subf %631, %645 : vector<128x32xf32>
    %cst_71 = arith.constant 9.99999974E-6 : f32
    %647 = vector.broadcast %cst_71 : f32 to vector<128x1xf32>
    %648 = arith.addf %644, %647 : vector<128x1xf32>
    %649 = math.rsqrt %648 : vector<128x1xf32>
    %650 = vector.broadcast %649 : vector<128x1xf32> to vector<128x32xf32>
    %651 = arith.mulf %646, %650 : vector<128x32xf32>
    %652 = vector.broadcast %632 : vector<1x32xf32> to vector<128x32xf32>
    %653 = arith.mulf %651, %652 : vector<128x32xf32>
    %654 = vector.broadcast %633 : vector<1x32xf32> to vector<128x32xf32>
    %655 = arith.addf %653, %654 : vector<128x32xf32>
    %656 = arith.truncf %655 : vector<128x32xf32> to vector<128x32xbf16>
    %c0_72 = arith.constant 0 : index
    %c0_73 = arith.constant 0 : index
    %657 = vector.load %arg16[%c0_72, %c0_73] : memref<32x128xbf16, #tpu.memory_space<vmem>>, vector<32x128xbf16>
    %cst_74 = arith.constant dense<0.000000e+00> : vector<128x128xf32>
    %658 = tpu.matmul %656, %657, %cst_74 {dimension_numbers = #tpu.dot_dimension_numbers<[1], [0], [0], [1], [0, 0, 1, 1], [], []>} : vector<128x32xbf16>, vector<32x128xbf16>, vector<128x128xf32> -> vector<128x128xf32>
    %c0_75 = arith.constant 0 : index
    %c0_76 = arith.constant 0 : index
    %659 = vector.load %arg17[%c0_75, %c0_76] : memref<1x128xf32, #tpu.memory_space<vmem>>, vector<1x128xf32>
    %660 = vector.broadcast %659 : vector<1x128xf32> to vector<128x128xf32>
    %661 = arith.addf %658, %660 : vector<128x128xf32>
    %662 = arith.negf %661 : vector<128x128xf32>
    %663 = math.exp %662 : vector<128x128xf32>
    %cst_77 = arith.constant 1.000000e+00 : f32
    %664 = vector.broadcast %cst_77 : f32 to vector<128x128xf32>
    %665 = arith.addf %664, %663 : vector<128x128xf32>
    %666 = arith.divf %664, %665 : vector<128x128xf32>
    %667 = arith.mulf %661, %666 : vector<128x128xf32>
    %668 = arith.truncf %667 : vector<128x128xf32> to vector<128x128xbf16>
    %c0_78 = arith.constant 0 : index
    %c0_79 = arith.constant 0 : index
    %669 = vector.load %arg18[%c0_78, %c0_79] : memref<128x32xbf16, #tpu.memory_space<vmem>>, vector<128x32xbf16>
    %cst_80 = arith.constant dense<0.000000e+00> : vector<128x32xf32>
    %670 = tpu.matmul %668, %669, %cst_80 {dimension_numbers = #tpu.dot_dimension_numbers<[1], [0], [0], [1], [0, 0, 1, 1], [], []>} : vector<128x128xbf16>, vector<128x32xbf16>, vector<128x32xf32> -> vector<128x32xf32>
    %671 = arith.addf %631, %670 : vector<128x32xf32>
    %c0_81 = arith.constant 0 : index
    %c0_82 = arith.constant 0 : index
    %672 = vector.load %arg19[%c0_81, %c0_82] : memref<1x32xf32, #tpu.memory_space<vmem>>, vector<1x32xf32>
    %673 = vector.broadcast %672 : vector<1x32xf32> to vector<128x32xf32>
    %674 = arith.addf %671, %673 : vector<128x32xf32>
    %c0_83 = arith.constant 0 : index
    %c0_84 = arith.constant 0 : index
    %675 = vector.load %arg20[%c0_83, %c0_84] : memref<1x32xf32, #tpu.memory_space<vmem>>, vector<1x32xf32>
    %c0_85 = arith.constant 0 : index
    %c0_86 = arith.constant 0 : index
    %676 = vector.load %arg21[%c0_85, %c0_86] : memref<1x32xf32, #tpu.memory_space<vmem>>, vector<1x32xf32>
    %cst_87 = arith.constant dense<0.000000e+00> : vector<128xf32>
    %677 = vector.multi_reduction <add>, %674, %cst_87 [1] : vector<128x32xf32> to vector<128xf32>
    %678 = vector.shape_cast %677 : vector<128xf32> to vector<128x1xf32>
    %cst_88 = arith.constant 3.200000e+01 : f32
    %679 = vector.broadcast %cst_88 : f32 to vector<128x1xf32>
    %680 = arith.divf %678, %679 : vector<128x1xf32>
    %681 = vector.broadcast %680 : vector<128x1xf32> to vector<128x32xf32>
    %682 = arith.subf %674, %681 : vector<128x32xf32>
    %683 = arith.mulf %682, %682 : vector<128x32xf32>
    %cst_89 = arith.constant dense<0.000000e+00> : vector<128xf32>
    %684 = vector.multi_reduction <add>, %683, %cst_89 [1] : vector<128x32xf32> to vector<128xf32>
    %685 = vector.shape_cast %684 : vector<128xf32> to vector<128x1xf32>
    %cst_90 = arith.constant 3.200000e+01 : f32
    %686 = vector.broadcast %cst_90 : f32 to vector<128x1xf32>
    %687 = arith.divf %685, %686 : vector<128x1xf32>
    %688 = vector.broadcast %680 : vector<128x1xf32> to vector<128x32xf32>
    %689 = arith.subf %674, %688 : vector<128x32xf32>
    %cst_91 = arith.constant 9.99999974E-6 : f32
    %690 = vector.broadcast %cst_91 : f32 to vector<128x1xf32>
    %691 = arith.addf %687, %690 : vector<128x1xf32>
    %692 = math.rsqrt %691 : vector<128x1xf32>
    %693 = vector.broadcast %692 : vector<128x1xf32> to vector<128x32xf32>
    %694 = arith.mulf %689, %693 : vector<128x32xf32>
    %695 = vector.broadcast %675 : vector<1x32xf32> to vector<128x32xf32>
    %696 = arith.mulf %694, %695 : vector<128x32xf32>
    %697 = vector.broadcast %676 : vector<1x32xf32> to vector<128x32xf32>
    %698 = arith.addf %696, %697 : vector<128x32xf32>
    %699 = vector.shape_cast %698 : vector<128x32xf32> to vector<8x16x32xf32>
    %c0_92 = arith.constant 0 : index
    %c0_93 = arith.constant 0 : index
    %c0_94 = arith.constant 0 : index
    %700 = vector.load %arg22[%c0_92, %c0_93, %c0_94] : memref<8x16x32xf32, #tpu.memory_space<vmem>>, vector<8x16x32xf32>
    tpu.vector_store %arg22[%c0_92, %c0_93, %c0_94], %699 {strides = array<i32>} : memref<8x16x32xf32, #tpu.memory_space<vmem>>, vector<8x16x32xf32>,
    return
  }
  func.func @transform_0(%arg0: i32) -> (i32, i32, i32) {
    %c0_i32 = arith.constant 0 : i32
    %c0_i32_0 = arith.constant 0 : i32
    %c0_i32_1 = arith.constant 0 : i32
    return %c0_i32, %arg0, %c0_i32_0 : i32, i32, i32
  }
  func.func @transform_1(%arg0: i32) -> (i32, i32) {
    %c0_i32 = arith.constant 0 : i32
    %c0_i32_0 = arith.constant 0 : i32
    %c0_i32_1 = arith.constant 0 : i32
    return %c0_i32, %c0_i32_0 : i32, i32
  }
  func.func @transform_2(%arg0: i32) -> (i32, i32) {
    %c0_i32 = arith.constant 0 : i32
    %c0_i32_0 = arith.constant 0 : i32
    %c0_i32_1 = arith.constant 0 : i32
    return %c0_i32, %c0_i32_0 : i32, i32
  }
  func.func @transform_3(%arg0: i32) -> (i32, i32) {
    %c0_i32 = arith.constant 0 : i32
    %c0_i32_0 = arith.constant 0 : i32
    %c0_i32_1 = arith.constant 0 : i32
    return %c0_i32, %c0_i32_0 : i32, i32
  }
  func.func @transform_4(%arg0: i32) -> (i32, i32) {
    %c0_i32 = arith.constant 0 : i32
    %c0_i32_0 = arith.constant 0 : i32
    %c0_i32_1 = arith.constant 0 : i32
    return %c0_i32, %c0_i32_0 : i32, i32
  }
  func.func @transform_5(%arg0: i32) -> (i32, i32) {
    %c0_i32 = arith.constant 0 : i32
    %c0_i32_0 = arith.constant 0 : i32
    %c0_i32_1 = arith.constant 0 : i32
    return %c0_i32, %c0_i32_0 : i32, i32
  }
  func.func @transform_6(%arg0: i32) -> (i32, i32) {
    %c0_i32 = arith.constant 0 : i32
    %c0_i32_0 = arith.constant 0 : i32
    %c0_i32_1 = arith.constant 0 : i32
    return %c0_i32, %c0_i32_0 : i32, i32
  }
  func.func @transform_7(%arg0: i32) -> (i32, i32) {
    %c0_i32 = arith.constant 0 : i32
    %c0_i32_0 = arith.constant 0 : i32
    %c0_i32_1 = arith.constant 0 : i32
    return %c0_i32, %c0_i32_0 : i32, i32
  }
  func.func @transform_8(%arg0: i32) -> (i32, i32) {
    %c0_i32 = arith.constant 0 : i32
    %c0_i32_0 = arith.constant 0 : i32
    %c0_i32_1 = arith.constant 0 : i32
    return %c0_i32, %c0_i32_0 : i32, i32
  }
  func.func @transform_9(%arg0: i32) -> (i32, i32) {
    %c0_i32 = arith.constant 0 : i32
    %c0_i32_0 = arith.constant 0 : i32
    %c0_i32_1 = arith.constant 0 : i32
    return %c0_i32, %c0_i32_0 : i32, i32
  }
  func.func @transform_10(%arg0: i32) -> (i32, i32) {
    %c0_i32 = arith.constant 0 : i32
    %c0_i32_0 = arith.constant 0 : i32
    %c0_i32_1 = arith.constant 0 : i32
    return %c0_i32, %c0_i32_0 : i32, i32
  }
  func.func @transform_11(%arg0: i32) -> (i32, i32) {
    %c0_i32 = arith.constant 0 : i32
    %c0_i32_0 = arith.constant 0 : i32
    %c0_i32_1 = arith.constant 0 : i32
    return %c0_i32, %c0_i32_0 : i32, i32
  }
  func.func @transform_12(%arg0: i32) -> (i32, i32) {
    %c0_i32 = arith.constant 0 : i32
    %c0_i32_0 = arith.constant 0 : i32
    %c0_i32_1 = arith.constant 0 : i32
    return %c0_i32, %c0_i32_0 : i32, i32
  }
  func.func @transform_13(%arg0: i32) -> (i32, i32) {
    %c0_i32 = arith.constant 0 : i32
    %c0_i32_0 = arith.constant 0 : i32
    %c0_i32_1 = arith.constant 0 : i32
    return %c0_i32, %c0_i32_0 : i32, i32
  }
  func.func @transform_14(%arg0: i32) -> (i32, i32) {
    %c0_i32 = arith.constant 0 : i32
    %c0_i32_0 = arith.constant 0 : i32
    %c0_i32_1 = arith.constant 0 : i32
    return %c0_i32, %c0_i32_0 : i32, i32
  }
  func.func @transform_15(%arg0: i32) -> (i32, i32) {
    %c0_i32 = arith.constant 0 : i32
    %c0_i32_0 = arith.constant 0 : i32
    %c0_i32_1 = arith.constant 0 : i32
    return %c0_i32, %c0_i32_0 : i32, i32
  }
  func.func @transform_16(%arg0: i32) -> (i32, i32) {
    %c0_i32 = arith.constant 0 : i32
    %c0_i32_0 = arith.constant 0 : i32
    %c0_i32_1 = arith.constant 0 : i32
    return %c0_i32, %c0_i32_0 : i32, i32
  }
  func.func @transform_17(%arg0: i32) -> (i32, i32) {
    %c0_i32 = arith.constant 0 : i32
    %c0_i32_0 = arith.constant 0 : i32
    %c0_i32_1 = arith.constant 0 : i32
    return %c0_i32, %c0_i32_0 : i32, i32
  }
  func.func @transform_18(%arg0: i32) -> (i32, i32) {
    %c0_i32 = arith.constant 0 : i32
    %c0_i32_0 = arith.constant 0 : i32
    %c0_i32_1 = arith.constant 0 : i32
    return %c0_i32, %c0_i32_0 : i32, i32
  }
  func.func @transform_19(%arg0: i32) -> (i32, i32) {
    %c0_i32 = arith.constant 0 : i32
    %c0_i32_0 = arith.constant 0 : i32
    %c0_i32_1 = arith.constant 0 : i32
    return %c0_i32, %c0_i32_0 : i32, i32
  }
  func.func @transform_20(%arg0: i32) -> (i32, i32) {
    %c0_i32 = arith.constant 0 : i32
    %c0_i32_0 = arith.constant 0 : i32
    %c0_i32_1 = arith.constant 0 : i32
    return %c0_i32, %c0_i32_0 : i32, i32
  }
  func.func @transform_21(%arg0: i32) -> (i32, i32, i32) {
    %c0_i32 = arith.constant 0 : i32
    %c0_i32_0 = arith.constant 0 : i32
    %c0_i32_1 = arith.constant 0 : i32
    return %c0_i32, %arg0, %c0_i32_0 : i32, i32, i32
  }
}

</mosaic_0001>

<bundles_post_ra>
// kernel: conformer_block.4
= control target key start
LH: loop header
LB: loop body
LE: loop exit
PB: predicated region body
PF: predicated region fallthrough
CT: control target
= control target key end

     0   :  { %s2211_s21 = smov 0   ;;  %s2484_s0 = inlined_call_operand.vmem [shape: f32[8,16,32], index: 0, kind: input, shape index: {}]   ;;  %s2485_s1 = inlined_call_operand.vmem [shape: bf16[8,16,32], index: 1, kind: input, shape index: {}]   ;;  %s2486_s2 = inlined_call_operand.vmem [shape: bf16[8,16,32], index: 2, kind: input, shape index: {}]   ;;  %s2487_s3 = inlined_call_operand.vmem [shape: bf16[8,16,32], index: 3, kind: input, shape index: {}]   ;;  %s2488_s4 = inlined_call_operand.vmem [shape: bf16[32,32], index: 4, kind: input, shape index: {}]   ;;  %s2489_s5 = inlined_call_operand.vmem [shape: f32[1,32], index: 5, kind: input, shape index: {}]   ;;  %s2490_s6 = inlined_call_operand.vmem [shape: f32[8,16,32], index: 6, kind: output, shape index: {}]  }
   0x1 LB: > { %s1825_s22 = sadd.s32 4294967295, %s2165_s21   ;;  %p1829_p0 = scmp.ge.s32.totalorder %s2165_s21, 1  ;;  %s2165_s21 = sphi %s2211_s21, %s16_s21  }
   0x2   : > { %p242_p1 = scmp.lt.s32.totalorder %s2165_s21, 9 }
   0x4   : > { %p243_p2 = pnand %p1829_p0, %p242_p1 }
   0x5   : > { %p287_p3 = scmp.lt.s32.totalorder (!%p243_p2), %s1825_s22, 7  ;;  %s2169_s30 = smov (!%p243_p2), 124  }
   0x6   : > { %246 = sbr.rel (%p243_p2) target bundleno = 4256 (0x10a0), region = 44  ;;  %s2170_s10 = smov (!%p243_p2), 120  }
   0x7   : > { %s2171_s13 = smov (!%p243_p2), 116   ;;  %s2172_s18 = smov (!%p243_p2), 112  }
   0x8   : > { %s2173_s19 = smov (!%p243_p2), 108   ;;  %s2174_s24 = smov (!%p243_p2), 104  }
   0x9   : > { %s2175_s25 = smov (!%p243_p2), 100  }
   0xb   : > { %v2167_v0 = vmov 0.0   ;;  %vm2168_vm0 = vmmov 0   ;;  %s2492_s22 = smov (!%p287_p3, %s1825_s22), 7  ;;  %vm341_vm1 = vcmask 31744   ;;  %vm389_vm2 = vcmask 130048  }
   0xc   : > { %1927 = vmatprep.subr.bf16.mxu0 %v2167_v0  ;;  %1929 = vmatprep.mubr.msk.bf16.mxu0 %vm2168_vm0, %v2167_v0  ;;  %s2228_s23 = sshll.u32 %s2492_s22, 3  ;;  %v319_v47 = vld [vmem:[%s2488_s4] sm:$0xf]  ;;  %vm467_vm3 = vcmask 1041408   ;;  %s1874_s28 = sshll.u32 %s2492_s22, 4  ;;  %vm1731_vm4 = vcmask 261120  }
   0xd   : > { %1933 = vmatprep.subr.bf16.mxu1 %v2167_v0  ;;  %1935 = vmatprep.mubr.msk.bf16.mxu1 %vm2168_vm0, %v2167_v0  ;;  %s301_s26 = scalar_lea.vmem %s2486_s2, %s2228_s23  ;;  %s296_s29 = scalar_lea.vmem %s2485_s1, %s2228_s23  ;;  %v469_v48 = vsel %vm467_vm3, %v319_v47, 0 }
   0xe   : > { %v2234_v1 = vld [vmem:[%s301_s26] sm:$0xff]   ;;  %s306_s9 = scalar_lea.vmem %s2487_s3, %s2228_s23  ;;  %s291_s7 = scalar_lea.vmem %s2484_s0, %s1874_s28 }
   0xf   : > { %v346_v2 = vsel %vm341_vm1, %v2234_v1, 0  ;;  %516 = vrot.lane.b32.xlu0 %v2234_v1, %s2169_s30  ;;  %v2244_v3 = vld [vmem:[%s296_s29] sm:$0xff]  }
  0x10   : > { %1928 = vmatpush3.bf16.xpose.msra.mxu0 %v346_v2  ;;  %v2268_v29 = vld [vmem:[%s306_s9] sm:$0xff]  }
  0x11   : > { %1945 = vmatprep.subr.bf16.mxu0 %v2167_v0  ;;  %1934 = vmatpush3.bf16.msra.mxu1 %v2268_v29 }
  0x12   : > { %1939 = vmatprep.subr.bf16.mxu1 %v2167_v0 }
  0x13   : > { %514 = vrot.lane.b32.xlu0 %v2244_v3, %s2169_s30 }
  0x17   : > { %1930 = vmatmul.mubr.msk.bf16.vlgmr.msra.gmra.mxu0 %vm341_vm1, %v2244_v3 }
  0x18   : > { %1947 = vmatprep.mubr.msk.bf16.mxu0 %vm2168_vm0, %v2167_v0 }
  0x81   : > { %v517_v4 = vpop.permute.xlu0 %516 }
  0x82   : > { %v522_v5 = vsel %vm341_vm1, %v517_v4, 0  ;;  %v1849_v4 = vcombine.low %v319_v47, %v319_v47 }
  0x83   : > { %1946 = vmatpush3.bf16.xpose.msra.mxu0 %v522_v5 }
  0x84   : > { %1957 = vmatprep.subr.bf16.mxu0 %v2167_v0  ;;  %v639_v5 = vrot.slane %v1849_v4, 2 }
  0x85   : > { %v515_v6 = vpop.permute.xlu0 %514 }
  0x8a   : > { %1948 = vmatmul.mubr.msk.bf16.vlgmr.msra.gmra.mxu0 %vm341_vm1, %v515_v6  ;;  %v644_v6 = vsel %vm467_vm3, %v639_v5, 0 }
  0x8b   : > { %1959 = vmatprep.mubr.msk.bf16.mxu0 %vm2168_vm0, %v2167_v0  ;;  %1958 = vmatpush3.bf16.msra.mxu0 %v644_v6 }
  0x8c   : > { %1969 = vmatprep.subr.bf16.mxu0 %v2167_v0 }
  0xd7   : > { %v382_v7 = vpop.f32.mrf.mxu0 }
  0xd8   : > { %v390_v8 = vsel %vm389_vm2, %v382_v7, -inf }
  0xd9   : > { %391 = vmax.xlane.f32.xlu1 %v390_v8  ;;  %v1931_v9 = vpop.f32.mrf.mxu0 }
  0xdb   : > { %v385_v10 = vpop.f32.mrf.mxu0 }
  0xdc   : > { %v393_v11 = vsel %vm389_vm2, %v385_v10, -inf }
  0xdd   : > { %394 = vmax.xlane.f32.xlu1 %v393_v11  ;;  %v1932_v12 = vpop.f32.mrf.mxu0 }
 0x14a   : > { %v558_v13 = vpop.f32.mrf.mxu0 }
 0x14b   : > { %v565_v27 = vsel %vm389_vm2, %v558_v13, -inf }
 0x14c   : > { %v1949_v14 = vpop.f32.mrf.mxu0 }
 0x14e   : > { %v561_v15 = vpop.f32.mrf.mxu0 }
 0x14f   : > { %v568_v28 = vsel %vm389_vm2, %v561_v15, -inf }
 0x150   : > { %v1950_v16 = vpop.f32.mrf.mxu0 }
 0x162   : > { %v392_v17 = vpop.xlane.xlu1 %391 }
 0x163   : > { %v396_v18 = vsub.f32 %v382_v7, %v392_v17 }
 0x165   : > { %v398_v19 = vmul.f32 1.442695, %v396_v18 }
 0x166   : > { %v395_v20 = vpop.xlane.xlu1 %394 }
 0x167   : > { %2095 = vpow2.f32 %v398_v19  ;;  %v397_v21 = vsub.f32 %v385_v10, %v395_v20 }
 0x169   : > { %v400_v22 = vmul.f32 1.442695, %v397_v21 }
 0x16b   : > { %2097 = vpow2.f32 %v400_v22 }
 0x174   : > { %v2096_v23 = vpop.eup %2095 }
 0x175   : > { %v402_v24 = vsel %vm389_vm2, %v2096_v23, 0.0 }
 0x176   : > { %403 = vadd.xlane.f32.xlu0 %v402_v24 }
 0x178   : > { %v2098_v25 = vpop.eup %2097 }
 0x179   : > { %v405_v26 = vsel %vm389_vm2, %v2098_v25, 0.0 }
 0x17a   : > { %406 = vadd.xlane.f32.xlu1 %v405_v26 }
 0x17e   : > { %566 = vmax.xlane.f32.xlu1 %v565_v27 }
 0x182   : > { %569 = vmax.xlane.f32.xlu1 %v568_v28 }
 0x18c   : > { %691 = vrot.lane.b32.xlu0 %v2234_v1, %s2170_s10 }
 0x1ff   : > { %v404_v30 = vpop.xlane.xlu0 %403 }
 0x200   : > { %2099 = vrcp.f32 %v404_v30 }
 0x203   : > { %v407_v31 = vpop.xlane.xlu1 %406  ;;  %v692_v60 = vpop.permute.xlu0 %691 }
 0x204   : > { %2101 = vrcp.f32 %v407_v31  ;;  %v697_v62 = vsel %vm341_vm1, %v692_v60, 0 }
 0x207   : > { %v567_v32 = vpop.xlane.xlu1 %566 }
 0x208   : > { %v571_v33 = vsub.f32 %v558_v13, %v567_v32 }
 0x20a   : > { %v573_v34 = vmul.f32 1.442695, %v571_v33 }
 0x20b   : > { %v570_v35 = vpop.xlane.xlu1 %569 }
 0x20c   : > { %2103 = vpow2.f32 %v573_v34  ;;  %v572_v36 = vsub.f32 %v561_v15, %v570_v35  ;;  %v1840_v34 = vld [vmem:[%s2489_s5] ss:$0 sm:$0xff] }
 0x20d   : > { %v2100_v38 = vpop.eup %2099 }
 0x20e   : > { %v575_v37 = vmul.f32 1.442695, %v572_v36  ;;  %v410_v40 = vmul.f32 %v2100_v38, %v2096_v23 }
 0x210   : > { %2105 = vpow2.f32 %v575_v37 }
 0x211   : > { %v2102_v39 = vpop.eup %2101 }
 0x212   : > { %v411_v41 = vmul.f32 %v2102_v39, %v2098_v25 }
 0x214   : > { %v412_v42 = vpack.c.bf16 %v411_v41, %v410_v40 }
 0x216   : > { %1936 = vmatmul.mubr.msk.bf16.vlgmr.msra.gmra.mxu1 %vm389_vm2, %v412_v42 }
 0x217   : > { %1941 = vmatprep.mubr.msk.bf16.mxu1 %vm2168_vm0, %v2167_v0  ;;  %1940 = vmatpush3.bf16.msra.mxu1 %v469_v48 }
 0x218   : > { %1951 = vmatprep.subr.bf16.mxu1 %v2167_v0 }
 0x219   : > { %v2104_v43 = vpop.eup %2103 }
 0x21a   : > { %v577_v44 = vsel %vm389_vm2, %v2104_v43, 0.0 }
 0x21b   : > { %578 = vadd.xlane.f32.xlu1 %v577_v44 }
 0x21d   : > { %v2106_v45 = vpop.eup %2105 }
 0x21e   : > { %v580_v46 = vsel %vm389_vm2, %v2106_v45, 0.0 }
 0x21f   : > { %581 = vadd.xlane.f32.xlu1 %v580_v46 }
 0x230   : > { %588 = vrot.lane.b32.xlu1 %v2268_v29, %s2169_s30 }
 0x234   : > { %689 = vrot.lane.b32.xlu1 %v2244_v3, %s2170_s10 }
 0x2a4   : > { %v579_v49 = vpop.xlane.xlu1 %578 }
 0x2a8   : > { %v582_v50 = vpop.xlane.xlu1 %581 }
 0x2a9   : > { %2107 = vrcp.f32 %v582_v50 }
 0x2aa   : > { %2109 = vrcp.f32 %v579_v49 }
 0x2ac   : > { %v589_v55 = vpop.permute.xlu1 %588 }
 0x2b0   : > { %v690_v2 = vpop.permute.xlu1 %689 }
 0x2b6   : > { %v2108_v56 = vpop.eup %2107 }
 0x2b7   : > { %v2110_v58 = vpop.eup %2109  ;;  %v586_v59 = vmul.f32 %v2108_v56, %v2106_v45 }
 0x2b8   : > { %v585_v61 = vmul.f32 %v2110_v58, %v2104_v43 }
 0x2ba   : > { %v587_v63 = vpack.c.bf16 %v586_v59, %v585_v61 }
 0x2d6   : > { %v456_v51 = vpop.f32.mrf.mxu1 }
 0x2d8   : > { %v1937_v52 = vpop.f32.mrf.mxu1 }
 0x2da   : > { %v459_v53 = vpop.f32.mrf.mxu1 }
 0x2db   : > { %v463_v54 = vpack.c.bf16 %v459_v53, %v456_v51  ;;  %v2334_v53 = vld [vmem:[%s2488_s4 + $0x4] sm:$0xf] }
 0x2dc   : > { %v1938_v57 = vpop.f32.mrf.mxu1 }
 0x2dd   : > { %1942 = vmatmul.mubr.msk.bf16.vlgmr.msra.gmra.mxu1 %vm341_vm1, %v463_v54  ;;  %v815_v54 = vsel %vm467_vm3, %v2334_v53, 0 }
 0x2de   : > { %1952 = vmatpush3.bf16.msra.mxu1 %v589_v55  ;;  %1953 = vmatprep.mubr.msk.bf16.mxu1 %vm2168_vm0, %v2167_v0 }
 0x2df   : > { %1963 = vmatprep.subr.bf16.mxu1 %v2167_v0 }
 0x2e5   : > { %1954 = vmatmul.mubr.msk.bf16.vlgmr.msra.gmra.mxu1 %vm389_vm2, %v587_v63 }
 0x2e6   : > { %1964 = vmatpush3.bf16.xpose.msra.mxu1 %v697_v62  ;;  %1965 = vmatprep.mubr.msk.bf16.mxu1 %vm2168_vm0, %v2167_v0 }
 0x2e7   : > { %1975 = vmatprep.subr.bf16.mxu1 %v2167_v0 }
 0x2ed   : > { %1966 = vmatmul.mubr.msk.bf16.vlgmr.msra.gmra.mxu1 %vm341_vm1, %v690_v2 }
 0x2ee   : > { %1977 = vmatprep.mubr.msk.bf16.mxu1 %vm2168_vm0, %v2167_v0  ;;  %1976 = vmatpush3.bf16.msra.mxu1 %v815_v54 }
 0x2ef   : > { %1987 = vmatprep.subr.bf16.mxu1 %v2167_v0 }
 0x39d   : > { %v505_v7 = vpop.f32.mrf.mxu1 }
 0x39e   : > { %v512_v35 = vadd.f32 %v1840_v34, %v505_v7 }
 0x39f   : > { %v1943_v8 = vpop.f32.mrf.mxu1 }
 0x3a1   : > { %v508_v9 = vpop.f32.mrf.mxu1 }
 0x3a2   : > { %v513_v39 = vadd.f32 %v1840_v34, %v508_v9 }
 0x3a3   : > { %v1944_v10 = vpop.f32.mrf.mxu1 }
 0x3a5   : > { %v628_v11 = vpop.f32.mrf.mxu1 }
 0x3a7   : > { %v1955_v12 = vpop.f32.mrf.mxu1 }
 0x3a9   : > { %v631_v13 = vpop.f32.mrf.mxu1 }
 0x3aa   : > { %v635_v14 = vpack.c.bf16 %v631_v13, %v628_v11 }
 0x3ab   : > { %v1956_v15 = vpop.f32.mrf.mxu1 }
 0x3ac   : > { %1960 = vmatmul.mubr.msk.bf16.vlgmr.msra.gmra.mxu0 %vm341_vm1, %v635_v14 }
 0x3ad   : > { %v733_v16 = vpop.f32.mrf.mxu1  ;;  %1971 = vmatprep.mubr.msk.bf16.mxu0 %vm2168_vm0, %v2167_v0 }
 0x3ae   : > { %v740_v17 = vsel %vm389_vm2, %v733_v16, -inf }
 0x3af   : > { %741 = vmax.xlane.f32.xlu1 %v740_v17  ;;  %v1967_v18 = vpop.f32.mrf.mxu1 }
 0x3b1   : > { %v736_v19 = vpop.f32.mrf.mxu1 }
 0x3b2   : > { %v743_v20 = vsel %vm389_vm2, %v736_v19, -inf }
 0x3b3   : > { %744 = vmax.xlane.f32.xlu0 %v743_v20  ;;  %v1968_v21 = vpop.f32.mrf.mxu1 }
 0x3c9   : > { %763 = vrot.lane.b32.xlu0 %v2268_v29, %s2170_s10  ;;  %s311_s10 = scalar_lea.vmem %s2490_s6, %s1874_s28 }
 0x438   : > { %v742_v22 = vpop.xlane.xlu1 %741 }
 0x439   : > { %v746_v23 = vsub.f32 %v733_v16, %v742_v22 }
 0x43b   : > { %v748_v24 = vmul.f32 1.442695, %v746_v23 }
 0x43c   : > { %v745_v25 = vpop.xlane.xlu0 %744 }
 0x43d   : > { %2111 = vpow2.f32 %v748_v24  ;;  %v747_v26 = vsub.f32 %v736_v19, %v745_v25 }
 0x43f   : > { %v750_v27 = vmul.f32 1.442695, %v747_v26 }
 0x440   : > { %v764_v33 = vpop.permute.xlu0 %763 }
 0x441   : > { %2113 = vpow2.f32 %v750_v27  ;;  %1970 = vmatpush3.bf16.msra.mxu0 %v764_v33  ;;  %v1856_v33 = vcombine.low %v2334_v53, %v2334_v53 }
 0x442   : > { %1981 = vmatprep.subr.bf16.mxu0 %v2167_v0 }
 0x443   : > { %v985_v34 = vrot.slane %v1856_v33, 2 }
 0x44a   : > { %v2112_v28 = vpop.eup %2111 }
 0x44b   : > { %v752_v30 = vsel %vm389_vm2, %v2112_v28, 0.0 }
 0x44c   : > { %753 = vadd.xlane.f32.xlu1 %v752_v30 }
 0x44e   : > { %v2114_v31 = vpop.eup %2113 }
 0x44f   : > { %v755_v32 = vsel %vm389_vm2, %v2114_v31, 0.0 }
 0x450   : > { %756 = vadd.xlane.f32.xlu1 %v755_v32 }
 0x461   : > { %862 = vrot.lane.b32.xlu1 %v2234_v1, %s2171_s13 }
 0x465   : > { %860 = vrot.lane.b32.xlu1 %v2244_v3, %s2171_s13 }
 0x46c   : > { %v680_v36 = vpop.f32.mrf.mxu0 }
 0x46d   : > { %v2319_v37 = vadd.f32 %v680_v36, %v512_v35  ;;  %v990_v35 = vsel %vm467_vm3, %v985_v34, 0 }
 0x46e   : > { %v1961_v38 = vpop.f32.mrf.mxu0 }
 0x470   : > { %v683_v40 = vpop.f32.mrf.mxu0 }
 0x471   : > { %v2321_v41 = vadd.f32 %v683_v40, %v513_v39 }
 0x472   : > { %v1962_v42 = vpop.f32.mrf.mxu0 }
 0x4d5   : > { %v754_v43 = vpop.xlane.xlu1 %753 }
 0x4d6   : > { %2115 = vrcp.f32 %v754_v43 }
 0x4d9   : > { %v757_v44 = vpop.xlane.xlu1 %756 }
 0x4da   : > { %2117 = vrcp.f32 %v757_v44 }
 0x4dd   : > { %v863_v47 = vpop.permute.xlu1 %862 }
 0x4de   : > { %v868_v50 = vsel %vm341_vm1, %v863_v47, 0 }
 0x4e1   : > { %v861_v52 = vpop.permute.xlu1 %860 }
 0x4e3   : > { %v2116_v45 = vpop.eup %2115 }
 0x4e4   : > { %v760_v48 = vmul.f32 %v2116_v45, %v2112_v28 }
 0x4e7   : > { %v2118_v46 = vpop.eup %2117 }
 0x4e8   : > { %v761_v49 = vmul.f32 %v2118_v46, %v2114_v31 }
 0x4ea   : > { %v762_v51 = vpack.c.bf16 %v761_v49, %v760_v48 }
 0x4ec   : > { %1972 = vmatmul.mubr.msk.bf16.vlgmr.msra.gmra.mxu0 %vm389_vm2, %v762_v51 }
 0x4ed   : > { %1982 = vmatpush3.bf16.xpose.msra.mxu0 %v868_v50  ;;  %1983 = vmatprep.mubr.msk.bf16.mxu0 %vm2168_vm0, %v2167_v0 }
 0x4ee   : > { %1993 = vmatprep.subr.bf16.mxu0 %v2167_v0 }
 0x4f4   : > { %1984 = vmatmul.mubr.msk.bf16.vlgmr.msra.gmra.mxu0 %vm341_vm1, %v861_v52 }
 0x4f5   : > { %1995 = vmatprep.mubr.msk.bf16.mxu0 %vm2168_vm0, %v2167_v0  ;;  %1994 = vmatpush3.bf16.msra.mxu0 %v990_v35 }
 0x4f6   : > { %2005 = vmatprep.subr.bf16.mxu0 %v2167_v0 }
 0x5ac   : > { %v803_v55 = vpop.f32.mrf.mxu0 }
 0x5ae   : > { %v1973_v56 = vpop.f32.mrf.mxu0 }
 0x5b0   : > { %v806_v57 = vpop.f32.mrf.mxu0 }
 0x5b1   : > { %v810_v58 = vpack.c.bf16 %v806_v57, %v803_v55 }
 0x5b2   : > { %v1974_v59 = vpop.f32.mrf.mxu0 }
 0x5b3   : > { %1978 = vmatmul.mubr.msk.bf16.vlgmr.msra.gmra.mxu1 %vm341_vm1, %v810_v58 }
 0x5b4   : > { %v904_v60 = vpop.f32.mrf.mxu0  ;;  %1989 = vmatprep.mubr.msk.bf16.mxu1 %vm2168_vm0, %v2167_v0 }
 0x5b5   : > { %v911_v61 = vsel %vm389_vm2, %v904_v60, -inf }
 0x5b6   : > { %912 = vmax.xlane.f32.xlu0 %v911_v61  ;;  %v1985_v62 = vpop.f32.mrf.mxu0 }
 0x5b8   : > { %v907_v63 = vpop.f32.mrf.mxu0 }
 0x5b9   : > { %v914_v2 = vsel %vm389_vm2, %v907_v63, -inf }
 0x5ba   : > { %915 = vmax.xlane.f32.xlu1 %v914_v2  ;;  %v1986_v4 = vpop.f32.mrf.mxu0 }
 0x5cb   : > { %934 = vrot.lane.b32.xlu1 %v2268_v29, %s2171_s13 }
 0x5cf   : > { %1035 = vrot.lane.b32.xlu1 %v2244_v3, %s2172_s18 }
 0x63f   : > { %v913_v5 = vpop.xlane.xlu0 %912 }
 0x640   : > { %v917_v6 = vsub.f32 %v904_v60, %v913_v5 }
 0x642   : > { %v919_v7 = vmul.f32 1.442695, %v917_v6 }
 0x643   : > { %v916_v8 = vpop.xlane.xlu1 %915 }
 0x644   : > { %2119 = vpow2.f32 %v919_v7  ;;  %v918_v9 = vsub.f32 %v907_v63, %v916_v8 }
 0x646   : > { %v921_v10 = vmul.f32 1.442695, %v918_v9 }
 0x647   : > { %v935_v15 = vpop.permute.xlu1 %934 }
 0x648   : > { %2121 = vpow2.f32 %v921_v10  ;;  %1988 = vmatpush3.bf16.msra.mxu1 %v935_v15 }
 0x649   : > { %1999 = vmatprep.subr.bf16.mxu1 %v2167_v0 }
 0x64b   : > { %v1036_v32 = vpop.permute.xlu1 %1035 }
 0x651   : > { %v2120_v11 = vpop.eup %2119 }
 0x652   : > { %v923_v12 = vsel %vm389_vm2, %v2120_v11, 0.0 }
 0x653   : > { %924 = vadd.xlane.f32.xlu0 %v923_v12 }
 0x655   : > { %v2122_v13 = vpop.eup %2121 }
 0x656   : > { %v926_v14 = vsel %vm389_vm2, %v2122_v13, 0.0 }
 0x657   : > { %927 = vadd.xlane.f32.xlu0 %v926_v14 }
 0x66d   : > { %1037 = vrot.lane.b32.xlu0 %v2234_v1, %s2172_s18 }
 0x673   : > { %v851_v16 = vpop.f32.mrf.mxu1 }
 0x674   : > { %v858_v17 = vadd.f32 %v851_v16, %v2319_v37 }
 0x675   : > { %v1979_v18 = vpop.f32.mrf.mxu1 }
 0x677   : > { %v854_v19 = vpop.f32.mrf.mxu1 }
 0x678   : > { %v859_v20 = vadd.f32 %v854_v19, %v2321_v41 }
 0x679   : > { %v1980_v21 = vpop.f32.mrf.mxu1 }
 0x6dc   : > { %v925_v22 = vpop.xlane.xlu0 %924 }
 0x6dd   : > { %2123 = vrcp.f32 %v925_v22 }
 0x6e0   : > { %v928_v23 = vpop.xlane.xlu0 %927 }
 0x6e1   : > { %2125 = vrcp.f32 %v928_v23 }
 0x6e4   : > { %v1038_v26 = vpop.permute.xlu0 %1037 }
 0x6e5   : > { %v1043_v30 = vsel %vm341_vm1, %v1038_v26, 0 }
 0x6ea   : > { %v2124_v24 = vpop.eup %2123 }
 0x6eb   : > { %v931_v27 = vmul.f32 %v2124_v24, %v2120_v11 }
 0x6ee   : > { %v2126_v25 = vpop.eup %2125 }
 0x6ef   : > { %v932_v28 = vmul.f32 %v2126_v25, %v2122_v13  ;;  %v2396_v13 = vld [vmem:[%s2488_s4 + $0x8] sm:$0xf] }
 0x6f0   : > { %v1161_v14 = vsel %vm467_vm3, %v2396_v13, 0 }
 0x6f1   : > { %v933_v31 = vpack.c.bf16 %v932_v28, %v931_v27 }
 0x6f3   : > { %1990 = vmatmul.mubr.msk.bf16.vlgmr.msra.gmra.mxu1 %vm389_vm2, %v933_v31 }
 0x6f4   : > { %2000 = vmatpush3.bf16.xpose.msra.mxu1 %v1043_v30  ;;  %2001 = vmatprep.mubr.msk.bf16.mxu1 %vm2168_vm0, %v2167_v0 }
 0x6f5   : > { %2011 = vmatprep.subr.bf16.mxu1 %v2167_v0 }
 0x6fb   : > { %2002 = vmatmul.mubr.msk.bf16.vlgmr.msra.gmra.mxu1 %vm341_vm1, %v1036_v32 }
 0x6fc   : > { %2013 = vmatprep.mubr.msk.bf16.mxu1 %vm2168_vm0, %v2167_v0  ;;  %2012 = vmatpush3.bf16.msra.mxu1 %v1161_v14 }
 0x6fd   : > { %2023 = vmatprep.subr.bf16.mxu1 %v2167_v0 }
 0x7b3   : > { %v974_v36 = vpop.f32.mrf.mxu1 }
 0x7b5   : > { %v1991_v37 = vpop.f32.mrf.mxu1 }
 0x7b7   : > { %v977_v38 = vpop.f32.mrf.mxu1 }
 0x7b8   : > { %v981_v39 = vpack.c.bf16 %v977_v38, %v974_v36 }
 0x7b9   : > { %v1992_v40 = vpop.f32.mrf.mxu1 }
 0x7ba   : > { %1996 = vmatmul.mubr.msk.bf16.vlgmr.msra.gmra.mxu0 %vm341_vm1, %v981_v39 }
 0x7bb   : > { %v1079_v41 = vpop.f32.mrf.mxu1  ;;  %2007 = vmatprep.mubr.msk.bf16.mxu0 %vm2168_vm0, %v2167_v0 }
 0x7bc   : > { %v1086_v42 = vsel %vm389_vm2, %v1079_v41, -inf }
 0x7bd   : > { %1087 = vmax.xlane.f32.xlu1 %v1086_v42  ;;  %v2003_v43 = vpop.f32.mrf.mxu1 }
 0x7bf   : > { %v1082_v44 = vpop.f32.mrf.mxu1 }
 0x7c0   : > { %v1089_v45 = vsel %vm389_vm2, %v1082_v44, -inf }
 0x7c1   : > { %1090 = vmax.xlane.f32.xlu0 %v1089_v45  ;;  %v2004_v46 = vpop.f32.mrf.mxu1 }
 0x846   : > { %v1088_v47 = vpop.xlane.xlu1 %1087 }
 0x847   : > { %v1092_v48 = vsub.f32 %v1079_v41, %v1088_v47 }
 0x849   : > { %v1094_v49 = vmul.f32 1.442695, %v1092_v48 }
 0x84a   : > { %v1091_v50 = vpop.xlane.xlu0 %1090 }
 0x84b   : > { %2127 = vpow2.f32 %v1094_v49  ;;  %v1093_v51 = vsub.f32 %v1082_v44, %v1091_v50 }
 0x84d   : > { %v1096_v52 = vmul.f32 1.442695, %v1093_v51 }
 0x84f   : > { %2129 = vpow2.f32 %v1096_v52 }
 0x858   : > { %v2128_v53 = vpop.eup %2127 }
 0x859   : > { %v1098_v54 = vsel %vm389_vm2, %v2128_v53, 0.0 }
 0x85a   : > { %1099 = vadd.xlane.f32.xlu0 %v1098_v54  ;;  %v1863_v54 = vcombine.low %v2396_v13, %v2396_v13 }
 0x85c   : > { %v2130_v55 = vpop.eup %2129 }
 0x85d   : > { %v1101_v56 = vsel %vm389_vm2, %v2130_v55, 0.0 }
 0x85e   : > { %1102 = vadd.xlane.f32.xlu1 %v1101_v56 }
 0x86f   : > { %1208 = vrot.lane.b32.xlu1 %v2234_v1, %s2173_s19 }
 0x870   : > { %1109 = vrot.lane.b32.xlu0 %v2268_v29, %s2172_s18 }
 0x873   : > { %1206 = vrot.lane.b32.xlu1 %v2244_v3, %s2173_s19 }
 0x87a   : > { %v1026_v57 = vpop.f32.mrf.mxu0 }
 0x87b   : > { %v2380_v58 = vadd.f32 %v1026_v57, %v858_v17 }
 0x87c   : > { %v1997_v59 = vpop.f32.mrf.mxu0 }
 0x87e   : > { %v1029_v60 = vpop.f32.mrf.mxu0 }
 0x87f   : > { %v2382_v61 = vadd.f32 %v1029_v60, %v859_v20 }
 0x880   : > { %v1998_v62 = vpop.f32.mrf.mxu0 }
 0x8e3   : > { %v1100_v63 = vpop.xlane.xlu0 %1099 }
 0x8e4   : > { %2131 = vrcp.f32 %v1100_v63 }
 0x8e7   : > { %v1103_v2 = vpop.xlane.xlu1 %1102  ;;  %v1110_v4 = vpop.permute.xlu0 %1109 }
 0x8e8   : > { %2133 = vrcp.f32 %v1103_v2  ;;  %2006 = vmatpush3.bf16.msra.mxu0 %v1110_v4 }
 0x8e9   : > { %2017 = vmatprep.subr.bf16.mxu0 %v2167_v0 }
 0x8eb   : > { %v1209_v7 = vpop.permute.xlu1 %1208 }
 0x8ec   : > { %v1214_v10 = vsel %vm341_vm1, %v1209_v7, 0 }
 0x8ef   : > { %v1207_v12 = vpop.permute.xlu1 %1206 }
 0x8f1   : > { %v2132_v5 = vpop.eup %2131 }
 0x8f2   : > { %v1106_v8 = vmul.f32 %v2132_v5, %v2128_v53 }
 0x8f5   : > { %v2134_v6 = vpop.eup %2133 }
 0x8f6   : > { %v1107_v9 = vmul.f32 %v2134_v6, %v2130_v55  ;;  %v1331_v55 = vrot.slane %v1863_v54, 2 }
 0x8f8   : > { %v1108_v11 = vpack.c.bf16 %v1107_v9, %v1106_v8  ;;  %v1336_v56 = vsel %vm467_vm3, %v1331_v55, 0 }
 0x8fa   : > { %2008 = vmatmul.mubr.msk.bf16.vlgmr.msra.gmra.mxu0 %vm389_vm2, %v1108_v11 }
 0x8fb   : > { %2018 = vmatpush3.bf16.xpose.msra.mxu0 %v1214_v10  ;;  %2019 = vmatprep.mubr.msk.bf16.mxu0 %vm2168_vm0, %v2167_v0 }
 0x8fc   : > { %2029 = vmatprep.subr.bf16.mxu0 %v2167_v0 }
 0x902   : > { %2020 = vmatmul.mubr.msk.bf16.vlgmr.msra.gmra.mxu0 %vm341_vm1, %v1207_v12 }
 0x903   : > { %2031 = vmatprep.mubr.msk.bf16.mxu0 %vm2168_vm0, %v2167_v0  ;;  %2030 = vmatpush3.bf16.msra.mxu0 %v1336_v56 }
 0x904   : > { %2041 = vmatprep.subr.bf16.mxu0 %v2167_v0 }
 0x9ba   : > { %v1149_v15 = vpop.f32.mrf.mxu0 }
 0x9bc   : > { %v2009_v16 = vpop.f32.mrf.mxu0 }
 0x9be   : > { %v1152_v17 = vpop.f32.mrf.mxu0 }
 0x9bf   : > { %v1156_v18 = vpack.c.bf16 %v1152_v17, %v1149_v15 }
 0x9c0   : > { %v2010_v19 = vpop.f32.mrf.mxu0 }
 0x9c1   : > { %2014 = vmatmul.mubr.msk.bf16.vlgmr.msra.gmra.mxu1 %vm341_vm1, %v1156_v18 }
 0x9c2   : > { %v1250_v20 = vpop.f32.mrf.mxu0  ;;  %2025 = vmatprep.mubr.msk.bf16.mxu1 %vm2168_vm0, %v2167_v0 }
 0x9c3   : > { %v1257_v21 = vsel %vm389_vm2, %v1250_v20, -inf }
 0x9c4   : > { %1258 = vmax.xlane.f32.xlu0 %v1257_v21  ;;  %v2021_v22 = vpop.f32.mrf.mxu0 }
 0x9c6   : > { %v1253_v23 = vpop.f32.mrf.mxu0 }
 0x9c7   : > { %v1260_v24 = vsel %vm389_vm2, %v1253_v23, -inf }
 0x9c8   : > { %1261 = vmax.xlane.f32.xlu1 %v1260_v24  ;;  %v2022_v25 = vpop.f32.mrf.mxu0 }
 0x9d9   : > { %1280 = vrot.lane.b32.xlu1 %v2268_v29, %s2173_s19 }
 0x9dd   : > { %1381 = vrot.lane.b32.xlu1 %v2244_v3, %s2174_s24 }
 0xa4d   : > { %v1259_v26 = vpop.xlane.xlu0 %1258 }
 0xa4e   : > { %v1263_v27 = vsub.f32 %v1250_v20, %v1259_v26 }
 0xa50   : > { %v1265_v28 = vmul.f32 1.442695, %v1263_v27 }
 0xa51   : > { %v1262_v30 = vpop.xlane.xlu1 %1261 }
 0xa52   : > { %2135 = vpow2.f32 %v1265_v28  ;;  %v1264_v31 = vsub.f32 %v1253_v23, %v1262_v30 }
 0xa54   : > { %v1267_v32 = vmul.f32 1.442695, %v1264_v31 }
 0xa55   : > { %v1281_v37 = vpop.permute.xlu1 %1280 }
 0xa56   : > { %2137 = vpow2.f32 %v1267_v32  ;;  %2024 = vmatpush3.bf16.msra.mxu1 %v1281_v37 }
 0xa57   : > { %2035 = vmatprep.subr.bf16.mxu1 %v2167_v0 }
 0xa59   : > { %v1382_v53 = vpop.permute.xlu1 %1381 }
 0xa5f   : > { %v2136_v33 = vpop.eup %2135 }
 0xa60   : > { %v1269_v34 = vsel %vm389_vm2, %v2136_v33, 0.0 }
 0xa61   : > { %1270 = vadd.xlane.f32.xlu0 %v1269_v34 }
 0xa63   : > { %v2138_v35 = vpop.eup %2137 }
 0xa64   : > { %v1272_v36 = vsel %vm389_vm2, %v2138_v35, 0.0 }
 0xa65   : > { %1273 = vadd.xlane.f32.xlu0 %v1272_v36 }
 0xa7b   : > { %1383 = vrot.lane.b32.xlu0 %v2234_v1, %s2174_s24 }
 0xa81   : > { %v1197_v38 = vpop.f32.mrf.mxu1 }
 0xa82   : > { %v1204_v39 = vadd.f32 %v1197_v38, %v2380_v58 }
 0xa83   : > { %v2015_v40 = vpop.f32.mrf.mxu1 }
 0xa85   : > { %v1200_v41 = vpop.f32.mrf.mxu1 }
 0xa86   : > { %v1205_v42 = vadd.f32 %v1200_v41, %v2382_v61 }
 0xa87   : > { %v2016_v43 = vpop.f32.mrf.mxu1 }
 0xaea   : > { %v1271_v44 = vpop.xlane.xlu0 %1270 }
 0xaeb   : > { %2139 = vrcp.f32 %v1271_v44 }
 0xaee   : > { %v1274_v45 = vpop.xlane.xlu0 %1273 }
 0xaef   : > { %2141 = vrcp.f32 %v1274_v45 }
 0xaf2   : > { %v1384_v48 = vpop.permute.xlu0 %1383 }
 0xaf3   : > { %v1389_v51 = vsel %vm341_vm1, %v1384_v48, 0 }
 0xaf8   : > { %v2140_v46 = vpop.eup %2139 }
 0xaf9   : > { %v1277_v49 = vmul.f32 %v2140_v46, %v2136_v33  ;;  %v322_v33 = vld [vmem:[%s2488_s4 + $0xc] sm:$0xf] }
 0xafa   : > { %v1507_v34 = vsel %vm467_vm3, %v322_v33, 0  ;;  %v1870_v55 = vcombine.low %v322_v33, %v322_v33 }
 0xafc   : > { %v2142_v47 = vpop.eup %2141 }
 0xafd   : > { %v1278_v50 = vmul.f32 %v2142_v47, %v2138_v35 }
 0xaff   : > { %v1279_v52 = vpack.c.bf16 %v1278_v50, %v1277_v49 }
 0xb01   : > { %2026 = vmatmul.mubr.msk.bf16.vlgmr.msra.gmra.mxu1 %vm389_vm2, %v1279_v52 }
 0xb02   : > { %2036 = vmatpush3.bf16.xpose.msra.mxu1 %v1389_v51  ;;  %2037 = vmatprep.mubr.msk.bf16.mxu1 %vm2168_vm0, %v2167_v0 }
 0xb03   : > { %2047 = vmatprep.subr.bf16.mxu1 %v2167_v0 }
 0xb09   : > { %2038 = vmatmul.mubr.msk.bf16.vlgmr.msra.gmra.mxu1 %vm341_vm1, %v1382_v53 }
 0xb0a   : > { %2049 = vmatprep.mubr.msk.bf16.mxu1 %vm2168_vm0, %v2167_v0  ;;  %2048 = vmatpush3.bf16.msra.mxu1 %v1507_v34 }
 0xb0b   : > { %2059 = vmatprep.subr.bf16.mxu1 %v2167_v0 }
 0xbc1   : > { %v1320_v57 = vpop.f32.mrf.mxu1 }
 0xbc3   : > { %v2027_v58 = vpop.f32.mrf.mxu1 }
 0xbc5   : > { %v1323_v59 = vpop.f32.mrf.mxu1 }
 0xbc6   : > { %v1327_v60 = vpack.c.bf16 %v1323_v59, %v1320_v57  ;;  %v1677_v57 = vrot.slane %v1870_v55, 2 }
 0xbc7   : > { %v2028_v61 = vpop.f32.mrf.mxu1 }
 0xbc8   : > { %2032 = vmatmul.mubr.msk.bf16.vlgmr.msra.gmra.mxu0 %vm341_vm1, %v1327_v60  ;;  %v1682_v60 = vsel %vm467_vm3, %v1677_v57, 0 }
 0xbc9   : > { %v1425_v62 = vpop.f32.mrf.mxu1  ;;  %2043 = vmatprep.mubr.msk.bf16.mxu0 %vm2168_vm0, %v2167_v0 }
 0xbca   : > { %v1432_v63 = vsel %vm389_vm2, %v1425_v62, -inf }
 0xbcb   : > { %1433 = vmax.xlane.f32.xlu1 %v1432_v63  ;;  %v2039_v2 = vpop.f32.mrf.mxu1 }
 0xbcd   : > { %v1428_v4 = vpop.f32.mrf.mxu1 }
 0xbce   : > { %v1435_v5 = vsel %vm389_vm2, %v1428_v4, -inf }
 0xbcf   : > { %1436 = vmax.xlane.f32.xlu0 %v1435_v5  ;;  %v2040_v6 = vpop.f32.mrf.mxu1 }
 0xc54   : > { %v1434_v7 = vpop.xlane.xlu1 %1433 }
 0xc55   : > { %v1438_v8 = vsub.f32 %v1425_v62, %v1434_v7 }
 0xc57   : > { %v1440_v9 = vmul.f32 1.442695, %v1438_v8 }
 0xc58   : > { %v1437_v10 = vpop.xlane.xlu0 %1436 }
 0xc59   : > { %2143 = vpow2.f32 %v1440_v9  ;;  %v1439_v11 = vsub.f32 %v1428_v4, %v1437_v10 }
 0xc5b   : > { %v1442_v12 = vmul.f32 1.442695, %v1439_v11 }
 0xc5d   : > { %2145 = vpow2.f32 %v1442_v12 }
 0xc66   : > { %v2144_v13 = vpop.eup %2143 }
 0xc67   : > { %v1444_v14 = vsel %vm389_vm2, %v2144_v13, 0.0 }
 0xc68   : > { %1445 = vadd.xlane.f32.xlu0 %v1444_v14 }
 0xc6a   : > { %v2146_v15 = vpop.eup %2145 }
 0xc6b   : > { %v1447_v16 = vsel %vm389_vm2, %v2146_v15, 0.0 }
 0xc6c   : > { %1448 = vadd.xlane.f32.xlu1 %v1447_v16  ;;  %v1727_v16 = vld [vmem:[%s291_s7] sm:$0xff] }
 0xc7d   : > { %1554 = vrot.lane.b32.xlu1 %v2234_v1, %s2175_s25 }
 0xc7e   : > { %1455 = vrot.lane.b32.xlu0 %v2268_v29, %s2174_s24 }
 0xc81   : > { %1552 = vrot.lane.b32.xlu1 %v2244_v3, %s2175_s25 }
 0xc88   : > { %v1372_v17 = vpop.f32.mrf.mxu0 }
 0xc89   : > { %v2442_v18 = vadd.f32 %v1372_v17, %v1204_v39 }
 0xc8a   : > { %v2033_v19 = vpop.f32.mrf.mxu0 }
 0xc8c   : > { %v1375_v20 = vpop.f32.mrf.mxu0 }
 0xc8d   : > { %v2444_v21 = vadd.f32 %v1375_v20, %v1205_v42 }
 0xc8e   : > { %v2034_v22 = vpop.f32.mrf.mxu0 }
 0xcf1   : > { %v1446_v23 = vpop.xlane.xlu0 %1445 }
 0xcf2   : > { %2147 = vrcp.f32 %v1446_v23 }
 0xcf5   : > { %v1449_v24 = vpop.xlane.xlu1 %1448  ;;  %v1456_v25 = vpop.permute.xlu0 %1455 }
 0xcf6   : > { %2149 = vrcp.f32 %v1449_v24  ;;  %2042 = vmatpush3.bf16.msra.mxu0 %v1456_v25 }
 0xcf7   : > { %2053 = vmatprep.subr.bf16.mxu0 %v2167_v0 }
 0xcf9   : > { %v1555_v27 = vpop.permute.xlu1 %1554 }
 0xcfa   : > { %v1560_v30 = vsel %vm341_vm1, %v1555_v27, 0 }
 0xcfd   : > { %v1553_v32 = vpop.permute.xlu1 %1552 }
 0xcff   : > { %v2148_v1 = vpop.eup %2147 }
 0xd00   : > { %v1452_v3 = vmul.f32 %v2148_v1, %v2144_v13 }
 0xd03   : > { %v2150_v26 = vpop.eup %2149 }
 0xd04   : > { %v1453_v28 = vmul.f32 %v2150_v26, %v2146_v15 }
 0xd06   : > { %v1454_v31 = vpack.c.bf16 %v1453_v28, %v1452_v3 }
 0xd08   : > { %2044 = vmatmul.mubr.msk.bf16.vlgmr.msra.gmra.mxu0 %vm389_vm2, %v1454_v31 }
 0xd09   : > { %2054 = vmatpush3.bf16.xpose.msra.mxu0 %v1560_v30  ;;  %2055 = vmatprep.mubr.msk.bf16.mxu0 %vm2168_vm0, %v2167_v0 }
 0xd0a   : > { %2065 = vmatprep.subr.bf16.mxu0 %v2167_v0 }
 0xd10   : > { %2056 = vmatmul.mubr.msk.bf16.vlgmr.msra.gmra.mxu0 %vm341_vm1, %v1553_v32 }
 0xd11   : > { %2067 = vmatprep.mubr.msk.bf16.mxu0 %vm2168_vm0, %v2167_v0  ;;  %2066 = vmatpush3.bf16.msra.mxu0 %v1682_v60 }
 0xdc8   : > { %v1495_v35 = vpop.f32.mrf.mxu0 }
 0xdca   : > { %v2045_v36 = vpop.f32.mrf.mxu0 }
 0xdcc   : > { %v1498_v37 = vpop.f32.mrf.mxu0 }
 0xdcd   : > { %v1502_v38 = vpack.c.bf16 %v1498_v37, %v1495_v35 }
 0xdce   : > { %v2046_v39 = vpop.f32.mrf.mxu0 }
 0xdcf   : > { %2050 = vmatmul.mubr.msk.bf16.vlgmr.msra.gmra.mxu1 %vm341_vm1, %v1502_v38 }
 0xdd0   : > { %v1596_v40 = vpop.f32.mrf.mxu0  ;;  %2061 = vmatprep.mubr.msk.bf16.mxu1 %vm2168_vm0, %v2167_v0 }
 0xdd1   : > { %v1603_v41 = vsel %vm389_vm2, %v1596_v40, -inf }
 0xdd2   : > { %1604 = vmax.xlane.f32.xlu0 %v1603_v41  ;;  %v2057_v42 = vpop.f32.mrf.mxu0 }
 0xdd4   : > { %v1599_v43 = vpop.f32.mrf.mxu0 }
 0xdd5   : > { %v1606_v44 = vsel %vm389_vm2, %v1599_v43, -inf }
 0xdd6   : > { %1607 = vmax.xlane.f32.xlu1 %v1606_v44  ;;  %v2058_v45 = vpop.f32.mrf.mxu0 }
 0xde7   : > { %1626 = vrot.lane.b32.xlu1 %v2268_v29, %s2175_s25 }
 0xe5b   : > { %v1605_v46 = vpop.xlane.xlu0 %1604 }
 0xe5c   : > { %v1609_v47 = vsub.f32 %v1596_v40, %v1605_v46 }
 0xe5e   : > { %v1611_v48 = vmul.f32 1.442695, %v1609_v47 }
 0xe5f   : > { %v1608_v49 = vpop.xlane.xlu1 %1607 }
 0xe60   : > { %2151 = vpow2.f32 %v1611_v48  ;;  %v1610_v50 = vsub.f32 %v1599_v43, %v1608_v49 }
 0xe62   : > { %v1613_v51 = vmul.f32 1.442695, %v1610_v50 }
 0xe63   : > { %v1627_v56 = vpop.permute.xlu1 %1626 }
 0xe64   : > { %2153 = vpow2.f32 %v1613_v51  ;;  %2060 = vmatpush3.bf16.msra.mxu1 %v1627_v56 }
 0xe6d   : > { %v2152_v0 = vpop.eup %2151 }
 0xe6e   : > { %v1615_v52 = vsel %vm389_vm2, %v2152_v0, 0.0 }
 0xe6f   : > { %1616 = vadd.xlane.f32.xlu0 %v1615_v52 }
 0xe71   : > { %v2154_v53 = vpop.eup %2153 }
 0xe72   : > { %v1618_v54 = vsel %vm389_vm2, %v2154_v53, 0.0 }
 0xe73   : > { %1619 = vadd.xlane.f32.xlu0 %v1618_v54 }
 0xe8f   : > { %v1543_v29 = vpop.f32.mrf.mxu1 }
 0xe90   : > { %v1550_v58 = vadd.f32 %v1543_v29, %v2442_v18 }
 0xe91   : > { %v2051_v59 = vpop.f32.mrf.mxu1 }
 0xe93   : > { %v1546_v61 = vpop.f32.mrf.mxu1 }
 0xe94   : > { %v1551_v62 = vadd.f32 %v1546_v61, %v2444_v21  ;;  %v1728_v21 = vld [vmem:[%s291_s7 + $0x8] sm:$0xff] }
 0xe95   : > { %v2052_v63 = vpop.f32.mrf.mxu1 }
 0xef8   : > { %v1617_v2 = vpop.xlane.xlu0 %1616 }
 0xef9   : > { %2155 = vrcp.f32 %v1617_v2 }
 0xefc   : > { %v1620_v4 = vpop.xlane.xlu0 %1619 }
 0xefd   : > { %2157 = vrcp.f32 %v1620_v4 }
 0xf06   : > { %v2156_v5 = vpop.eup %2155 }
 0xf07   : > { %v1623_v8 = vmul.f32 %v2156_v5, %v2152_v0 }
 0xf0a   : > { %v2158_v6 = vpop.eup %2157 }
 0xf0b   : > { %v1624_v7 = vmul.f32 %v2158_v6, %v2154_v53 }
 0xf0d   : > { %v1625_v9 = vpack.c.bf16 %v1624_v7, %v1623_v8 }
 0xf0f   : > { %2062 = vmatmul.mubr.msk.bf16.vlgmr.msra.gmra.mxu1 %vm389_vm2, %v1625_v9 }
 0xfcf   : > { %v1666_v10 = vpop.f32.mrf.mxu1 }
 0xfd1   : > { %v2063_v11 = vpop.f32.mrf.mxu1 }
 0xfd3   : > { %v1669_v12 = vpop.f32.mrf.mxu1 }
 0xfd4   : > { %v1673_v13 = vpack.c.bf16 %v1669_v12, %v1666_v10 }
 0xfd5   : > { %v2064_v14 = vpop.f32.mrf.mxu1 }
 0xfd6   : > { %2068 = vmatmul.mubr.msk.bf16.vlgmr.msra.gmra.mxu0 %vm341_vm1, %v1673_v13 }
0x1096   : > { %v1718_v15 = vpop.f32.mrf.mxu0 }
0x1097   : > { %v1725_v17 = vadd.f32 %v1718_v15, %v1550_v58 }
0x1098   : > { %v2069_v18 = vpop.f32.mrf.mxu0 }
0x1099   : > { %v1729_v19 = vadd.f32 %v1727_v16, %v1725_v17 }
0x109a   : > { %v1721_v20 = vpop.f32.mrf.mxu0 }
0x109b   : > { %1732 = vst.msk [vmem:[%s311_s10] sm:$0xff] %vm1731_vm4, %v1729_v19  ;;  %v1726_v22 = vadd.f32 %v1721_v20, %v1551_v62 }
0x109c   : > { %v2070_v23 = vpop.f32.mrf.mxu0 }
0x109d   : > { %v1730_v24 = vadd.f32 %v1728_v21, %v1726_v22 }
0x109f   : > { %1733 = vst.msk [vmem:[%s311_s10 + $0x8] sm:$0xff] %vm1731_vm4, %v1730_v24 }
0x10a0 PF: > { %s16_s21 = sadd.s32 1, %s2165_s21  }
0x10a1   : > { %p13_p4 = scmp.ge.s32.totalorder %s16_s21, 10  }
0x10a3   :  { %15 = sbr.rel (!%p13_p4) target bundleno = 1 (0x1), region = 83 }

// kernel: conformer_block.3
= control target key start
LH: loop header
LB: loop body
LE: loop exit
PB: predicated region body
PF: predicated region fallthrough
CT: control target
= control target key end

     0   :  { %vm73_vm0 = vcmask 261120   ;;  %vm1285_vm1 = vcmask 257024   ;;  %s3351_s0 = inlined_call_operand.vmem [shape: f32[8,16,32], index: 0, kind: input, shape index: {}]   ;;  %s3352_s3 = inlined_call_operand.vmem [shape: bf16[32,128], index: 3, kind: input, shape index: {}]   ;;  %s3353_s1 = inlined_call_operand.vmem [shape: f32[1,32], index: 1, kind: input, shape index: {}]   ;;  %s3354_s2 = inlined_call_operand.vmem [shape: f32[1,32], index: 2, kind: input, shape index: {}]   ;;  %s3355_s5 = inlined_call_operand.vmem [shape: bf16[128,32], index: 5, kind: input, shape index: {}]   ;;  %s3356_s4 = inlined_call_operand.vmem [shape: f32[1,128], index: 4, kind: input, shape index: {}]   ;;  %s3357_s6 = inlined_call_operand.vmem [shape: f32[1,32], index: 6, kind: input, shape index: {}]   ;;  %s3358_s15 = inlined_call_operand.vmem [shape: f32[8,16,32], index: 15, kind: output, shape index: {0}]   ;;  %s3359_s9 = inlined_call_operand.vmem [shape: bf16[32,32], index: 9, kind: input, shape index: {}]   ;;  %s3360_s11 = inlined_call_operand.vmem [shape: bf16[32,32], index: 11, kind: input, shape index: {}]   ;;  %s3361_s13 = inlined_call_operand.vmem [shape: bf16[32,32], index: 13, kind: input, shape index: {}]   ;;  %s3362_s7 = inlined_call_operand.vmem [shape: f32[1,32], index: 7, kind: input, shape index: {}]   ;;  %s3363_s8 = inlined_call_operand.vmem [shape: f32[1,32], index: 8, kind: input, shape index: {}]   ;;  %s3364_s10 = inlined_call_operand.vmem [shape: f32[1,32], index: 10, kind: input, shape index: {}]   ;;  %s3365_s12 = inlined_call_operand.vmem [shape: f32[1,32], index: 12, kind: input, shape index: {}]   ;;  %s3366_s16 = inlined_call_operand.vmem [shape: bf16[8,16,32], index: 16, kind: output, shape index: {1}]   ;;  %s3367_s17 = inlined_call_operand.vmem [shape: bf16[8,16,32], index: 17, kind: output, shape index: {2}]   ;;  %s3368_s14 = inlined_call_operand.vmem [shape: f32[1,32], index: 14, kind: input, shape index: {}]   ;;  %s3369_s18 = inlined_call_operand.vmem [shape: bf16[8,16,32], index: 18, kind: output, shape index: {3}]  }
   0x1   :  { %3372 = sst [smem:[#allocation2_spill]] %s3351_s0 }
   0x2   :  { %3373 = sst [smem:[#allocation3_spill]] %s3352_s3 }
   0x3   :  { %3374 = sst [smem:[#allocation4_spill]] %s3353_s1 }
   0x4   :  { %s3375_s29 = sld [smem:[#allocation2_spill]] }
   0x5   :  { %s3376_s20 = sld [smem:[#allocation3_spill]] }
   0x6   :  { %s3377_s24 = sld [smem:[#allocation4_spill]] }
   0xa   :  { %v55_v0 = vld [vmem:[%s3375_s29] sm:$0xff]  ;;  %v2314_v1 = vld [vmem:[%s3375_s29 + $0x10] sm:$0xff]  ;;  %v56_v2 = vld [vmem:[%s3375_s29 + $0x8] sm:$0xff] }
   0xb   :  { %v74_v3 = vsel %vm73_vm0, %v55_v0, 0.0  ;;  %v80_v4 = vsel %vm73_vm0, %v2314_v1, 0.0  ;;  %v58_v5 = vld [vmem:[%s3375_s29 + $0x18] sm:$0xff]  ;;  %v77_v6 = vsel %vm73_vm0, %v56_v2, 0.0  ;;  %v59_v8 = vld [vmem:[%s3375_s29 + $0x20] sm:$0xff]  ;;  %v60_v9 = vld [vmem:[%s3375_s29 + $0x28] sm:$0xff] }
   0xc   :  { %75 = vadd.xlane.f32.xlu0 %v74_v3  ;;  %81 = vadd.xlane.f32.xlu1 %v80_v4  ;;  %v83_v7 = vsel %vm73_vm0, %v58_v5, 0.0  ;;  %v86_v10 = vsel %vm73_vm0, %v59_v8, 0.0  ;;  %v89_v11 = vsel %vm73_vm0, %v60_v9, 0.0  ;;  %v2338_v12 = vld [vmem:[%s3375_s29 + $0x30] sm:$0xff]  ;;  %v2343_v13 = vld [vmem:[%s3375_s29 + $0x38] sm:$0xff]  ;;  %v2352_v16 = vld [vmem:[%s3375_s29 + $0x40] sm:$0xff] }
   0xd   :  { %v92_v14 = vsel %vm73_vm0, %v2338_v12, 0.0  ;;  %v95_v15 = vsel %vm73_vm0, %v2343_v13, 0.0  ;;  %v2357_v17 = vld [vmem:[%s3375_s29 + $0x48] sm:$0xff]  ;;  %v98_v18 = vsel %vm73_vm0, %v2352_v16, 0.0  ;;  %v2366_v20 = vld [vmem:[%s3375_s29 + $0x50] sm:$0xff]  ;;  %v2371_v21 = vld [vmem:[%s3375_s29 + $0x58] sm:$0xff] }
   0xe   :  { %v101_v19 = vsel %vm73_vm0, %v2357_v17, 0.0  ;;  %v104_v22 = vsel %vm73_vm0, %v2366_v20, 0.0  ;;  %v107_v23 = vsel %vm73_vm0, %v2371_v21, 0.0  ;;  %v2380_v24 = vld [vmem:[%s3375_s29 + $0x60] sm:$0xff]  ;;  %v2385_v25 = vld [vmem:[%s3375_s29 + $0x68] sm:$0xff]  ;;  %v2394_v28 = vld [vmem:[%s3375_s29 + $0x70] sm:$0xff] }
   0xf   :  { %v110_v26 = vsel %vm73_vm0, %v2380_v24, 0.0  ;;  %v113_v27 = vsel %vm73_vm0, %v2385_v25, 0.0  ;;  %v2399_v29 = vld [vmem:[%s3375_s29 + $0x78] sm:$0xff]  ;;  %v116_v30 = vsel %vm73_vm0, %v2394_v28, 0.0 }
  0x10   :  { %78 = vadd.xlane.f32.xlu0 %v77_v6  ;;  %84 = vadd.xlane.f32.xlu1 %v83_v7  ;;  %v119_v31 = vsel %vm73_vm0, %v2399_v29, 0.0 }
  0x14   :  { %87 = vadd.xlane.f32.xlu0 %v86_v10  ;;  %90 = vadd.xlane.f32.xlu1 %v89_v11 }
  0x18   :  { %93 = vadd.xlane.f32.xlu0 %v92_v14  ;;  %96 = vadd.xlane.f32.xlu1 %v95_v15 }
  0x1c   :  { %99 = vadd.xlane.f32.xlu0 %v98_v18  ;;  %102 = vadd.xlane.f32.xlu1 %v101_v19 }
  0x20   :  { %105 = vadd.xlane.f32.xlu0 %v104_v22  ;;  %108 = vadd.xlane.f32.xlu1 %v107_v23 }
  0x24   :  { %111 = vadd.xlane.f32.xlu0 %v110_v26  ;;  %114 = vadd.xlane.f32.xlu1 %v113_v27 }
  0x28   :  { %117 = vadd.xlane.f32.xlu0 %v116_v30  ;;  %120 = vadd.xlane.f32.xlu1 %v119_v31 }
  0x95   :  { %v76_v32 = vpop.xlane.xlu0 %75  ;;  %v82_v33 = vpop.xlane.xlu1 %81 }
  0x96   :  { %v123_v34 = vmul.f32 0.03125, %v76_v32  ;;  %v125_v35 = vmul.f32 0.03125, %v82_v33 }
  0x98   :  { %v2405_v36 = vsub.f32 %v55_v0, %v123_v34  ;;  %v2408_v37 = vsub.f32 %v2314_v1, %v125_v35 }
  0x99   :  { %v79_v38 = vpop.xlane.xlu0 %78  ;;  %v85_v39 = vpop.xlane.xlu1 %84 }
  0x9a   :  { %v124_v40 = vmul.f32 0.03125, %v79_v38  ;;  %v126_v41 = vmul.f32 0.03125, %v85_v39  ;;  %v155_v42 = vmul.f32 %v2405_v36, %v2405_v36  ;;  %v157_v43 = vmul.f32 %v2408_v37, %v2408_v37 }
  0x9c   :  { %v2414_v44 = vsub.f32 %v56_v2, %v124_v40  ;;  %v2416_v45 = vsub.f32 %v58_v5, %v126_v41  ;;  %v171_v46 = vsel %vm73_vm0, %v155_v42, 0.0  ;;  %v177_v49 = vsel %vm73_vm0, %v157_v43, 0.0 }
  0x9d   :  { %172 = vadd.xlane.f32.xlu0 %v171_v46  ;;  %v88_v47 = vpop.xlane.xlu0 %87  ;;  %v91_v48 = vpop.xlane.xlu1 %90 }
  0x9e   :  { %v127_v50 = vmul.f32 0.03125, %v88_v47  ;;  %v128_v51 = vmul.f32 0.03125, %v91_v48  ;;  %v156_v52 = vmul.f32 %v2414_v44, %v2414_v44  ;;  %v158_v53 = vmul.f32 %v2416_v45, %v2416_v45 }
  0xa0   :  { %v2424_v54 = vsub.f32 %v59_v8, %v127_v50  ;;  %v2426_v55 = vsub.f32 %v60_v9, %v128_v51  ;;  %v174_v56 = vsel %vm73_vm0, %v156_v52, 0.0  ;;  %v180_v59 = vsel %vm73_vm0, %v158_v53, 0.0 }
  0xa1   :  { %178 = vadd.xlane.f32.xlu0 %v177_v49  ;;  %175 = vadd.xlane.f32.xlu1 %v174_v56  ;;  %v94_v57 = vpop.xlane.xlu0 %93  ;;  %v97_v58 = vpop.xlane.xlu1 %96 }
  0xa2   :  { %v129_v60 = vmul.f32 0.03125, %v94_v57  ;;  %v130_v61 = vmul.f32 0.03125, %v97_v58  ;;  %v159_v62 = vmul.f32 %v2424_v54, %v2424_v54  ;;  %v160_v63 = vmul.f32 %v2426_v55, %v2426_v55  ;;  %v2056_v57 = vld [vmem:[%s3376_s20] sm:$0xff]  }
  0xa4   :  { %v2435_v0 = vsub.f32 %v2338_v12, %v129_v60  ;;  %v2438_v2 = vsub.f32 %v2343_v13, %v130_v61  ;;  %v183_v3 = vsel %vm73_vm0, %v159_v62, 0.0  ;;  %v186_v6 = vsel %vm73_vm0, %v160_v63, 0.0 }
  0xa5   :  { %181 = vadd.xlane.f32.xlu1 %v180_v59  ;;  %184 = vadd.xlane.f32.xlu0 %v183_v3  ;;  %v100_v4 = vpop.xlane.xlu0 %99  ;;  %v103_v5 = vpop.xlane.xlu1 %102 }
  0xa6   :  { %v131_v7 = vmul.f32 0.03125, %v100_v4  ;;  %v132_v8 = vmul.f32 0.03125, %v103_v5  ;;  %v161_v9 = vmul.f32 %v2435_v0, %v2435_v0  ;;  %v162_v10 = vmul.f32 %v2438_v2, %v2438_v2 }
  0xa8   :  { %v2447_v11 = vsub.f32 %v2352_v16, %v131_v7  ;;  %v2450_v13 = vsub.f32 %v2357_v17, %v132_v8  ;;  %v189_v14 = vsel %vm73_vm0, %v161_v9, 0.0  ;;  %v192_v19 = vsel %vm73_vm0, %v162_v10, 0.0 }
  0xa9   :  { %187 = vadd.xlane.f32.xlu1 %v186_v6  ;;  %190 = vadd.xlane.f32.xlu0 %v189_v14  ;;  %v106_v15 = vpop.xlane.xlu0 %105  ;;  %v109_v18 = vpop.xlane.xlu1 %108 }
  0xaa   :  { %v133_v22 = vmul.f32 0.03125, %v106_v15  ;;  %v134_v23 = vmul.f32 0.03125, %v109_v18  ;;  %v163_v26 = vmul.f32 %v2447_v11, %v2447_v11  ;;  %v164_v16 = vmul.f32 %v2450_v13, %v2450_v13 }
  0xac   :  { %v2459_v27 = vsub.f32 %v2366_v20, %v133_v22  ;;  %v2462_v17 = vsub.f32 %v2371_v21, %v134_v23  ;;  %v195_v30 = vsel %vm73_vm0, %v163_v26, 0.0  ;;  %v198_v33 = vsel %vm73_vm0, %v164_v16, 0.0 }
  0xad   :  { %193 = vadd.xlane.f32.xlu1 %v192_v19  ;;  %196 = vadd.xlane.f32.xlu0 %v195_v30  ;;  %v112_v31 = vpop.xlane.xlu0 %111  ;;  %v115_v32 = vpop.xlane.xlu1 %114 }
  0xae   :  { %v135_v34 = vmul.f32 0.03125, %v112_v31  ;;  %v136_v35 = vmul.f32 0.03125, %v115_v32  ;;  %v165_v38 = vmul.f32 %v2459_v27, %v2459_v27  ;;  %v166_v20 = vmul.f32 %v2462_v17, %v2462_v17 }
  0xb0   :  { %v2471_v39 = vsub.f32 %v2380_v24, %v135_v34  ;;  %v2474_v21 = vsub.f32 %v2385_v25, %v136_v35  ;;  %v201_v40 = vsel %vm73_vm0, %v165_v38, 0.0  ;;  %v204_v43 = vsel %vm73_vm0, %v166_v20, 0.0  ;;  %v2505_v38 = vld [vmem:[%s3377_s24] ss:$0 sm:$0xff] }
  0xb1   :  { %199 = vadd.xlane.f32.xlu1 %v198_v33  ;;  %202 = vadd.xlane.f32.xlu0 %v201_v40  ;;  %v118_v41 = vpop.xlane.xlu0 %117  ;;  %v121_v42 = vpop.xlane.xlu1 %120 }
  0xb2   :  { %v137_v46 = vmul.f32 0.03125, %v118_v41  ;;  %v138_v47 = vmul.f32 0.03125, %v121_v42  ;;  %v167_v48 = vmul.f32 %v2471_v39, %v2471_v39  ;;  %v168_v24 = vmul.f32 %v2474_v21, %v2474_v21 }
  0xb4   :  { %v2483_v49 = vsub.f32 %v2394_v28, %v137_v46  ;;  %v2486_v25 = vsub.f32 %v2399_v29, %v138_v47  ;;  %v207_v50 = vsel %vm73_vm0, %v167_v48, 0.0  ;;  %v210_v51 = vsel %vm73_vm0, %v168_v24, 0.0  ;;  %v2055_v29 = vld [vmem:[%s3376_s20 + $0x8] sm:$0xff]  }
  0xb5   :  { %205 = vadd.xlane.f32.xlu1 %v204_v43  ;;  %208 = vadd.xlane.f32.xlu0 %v207_v50 }
  0xb6   :  { %v169_v52 = vmul.f32 %v2483_v49, %v2483_v49  ;;  %v170_v53 = vmul.f32 %v2486_v25, %v2486_v25  ;;  %1943 = vmatprep.subr.bf16.mxu0 %v2055_v29 }
  0xb7   :  { %1944 = vmatpush3.bf16.msra.mxu0 %v2055_v29 }
  0xb8   :  { %v213_v56 = vsel %vm73_vm0, %v169_v52, 0.0  ;;  %v216_v28 = vsel %vm73_vm0, %v170_v53, 0.0  ;;  %1945 = vmatprep.subr.bf16.mxu0 %v2056_v57 }
  0xb9   :  { %211 = vadd.xlane.f32.xlu1 %v210_v51  ;;  %214 = vadd.xlane.f32.xlu0 %v213_v56  ;;  %v2512_v51 = vld [vmem:[%s3354_s2] ss:$0 sm:$0xff] }
  0xbb   :  { %1946 = vmatpush3.bf16.msra.mxu0 %v2056_v57 }
  0xbd   :  { %217 = vadd.xlane.f32.xlu1 %v216_v28 }
 0x126   :  { %v173_v58 = vpop.xlane.xlu0 %172 }
 0x127   :  { %v219_v59 = vmul.f32 0.03125, %v173_v58 }
 0x129   :  { %v235_v60 = vadd.f32 1e-05, %v219_v59 }
 0x12a   :  { %v176_v61 = vpop.xlane.xlu1 %175  ;;  %v179_v62 = vpop.xlane.xlu0 %178 }
 0x12b   :  { %2071 = vrsqrt.f32 %v235_v60  ;;  %v220_v63 = vmul.f32 0.03125, %v176_v61  ;;  %v221_v3 = vmul.f32 0.03125, %v179_v62 }
 0x12d   :  { %v236_v4 = vadd.f32 1e-05, %v220_v63  ;;  %v237_v5 = vadd.f32 1e-05, %v221_v3 }
 0x12e   :  { %v182_v6 = vpop.xlane.xlu1 %181  ;;  %v185_v7 = vpop.xlane.xlu0 %184 }
 0x12f   :  { %2073 = vrsqrt.f32 %v236_v4  ;;  %v222_v8 = vmul.f32 0.03125, %v182_v6  ;;  %v223_v9 = vmul.f32 0.03125, %v185_v7 }
 0x130   :  { %2075 = vrsqrt.f32 %v237_v5 }
 0x131   :  { %v238_v10 = vadd.f32 1e-05, %v222_v8  ;;  %v239_v14 = vadd.f32 1e-05, %v223_v9 }
 0x132   :  { %v188_v15 = vpop.xlane.xlu1 %187  ;;  %v191_v18 = vpop.xlane.xlu0 %190 }
 0x133   :  { %2077 = vrsqrt.f32 %v238_v10  ;;  %v224_v19 = vmul.f32 0.03125, %v188_v15  ;;  %v225_v22 = vmul.f32 0.03125, %v191_v18 }
 0x134   :  { %2079 = vrsqrt.f32 %v239_v14 }
 0x135   :  { %v240_v23 = vadd.f32 1e-05, %v224_v19  ;;  %v241_v26 = vadd.f32 1e-05, %v225_v22 }
 0x136   :  { %v194_v16 = vpop.xlane.xlu1 %193  ;;  %v197_v30 = vpop.xlane.xlu0 %196 }
 0x137   :  { %2081 = vrsqrt.f32 %v240_v23  ;;  %v226_v31 = vmul.f32 0.03125, %v194_v16  ;;  %v227_v32 = vmul.f32 0.03125, %v197_v30 }
 0x138   :  { %v2072_v33 = vpop.eup %2071  ;;  %2083 = vrsqrt.f32 %v241_v26 }
 0x139   :  { %v242_v34 = vadd.f32 1e-05, %v226_v31  ;;  %v243_v35 = vadd.f32 1e-05, %v227_v32  ;;  %v267_v20 = vmul.f32 %v2072_v33, %v2405_v36 }
 0x13a   :  { %v200_v40 = vpop.xlane.xlu1 %199  ;;  %v203_v41 = vpop.xlane.xlu0 %202 }
 0x13b   :  { %2085 = vrsqrt.f32 %v242_v34  ;;  %v228_v42 = vmul.f32 0.03125, %v200_v40  ;;  %v229_v43 = vmul.f32 0.03125, %v203_v41  ;;  %v289_v47 = vmul.f32 %v2505_v38, %v267_v20 }
 0x13c   :  { %v2074_v46 = vpop.eup %2073  ;;  %2087 = vrsqrt.f32 %v243_v35 }
 0x13d   :  { %v2076_v48 = vpop.eup %2075  ;;  %v244_v24 = vadd.f32 1e-05, %v228_v42  ;;  %v245_v50 = vadd.f32 1e-05, %v229_v43  ;;  %v268_v52 = vmul.f32 %v2074_v46, %v2414_v44  ;;  %v311_v59 = vadd.f32 %v2512_v51, %v289_v47 }
 0x13e   :  { %v206_v36 = vpop.xlane.xlu1 %205  ;;  %v209_v53 = vpop.xlane.xlu0 %208  ;;  %v269_v56 = vmul.f32 %v2076_v48, %v2408_v37 }
 0x13f   :  { %2089 = vrsqrt.f32 %v244_v24  ;;  %v230_v28 = vmul.f32 0.03125, %v206_v36  ;;  %v231_v29 = vmul.f32 0.03125, %v209_v53  ;;  %v290_v57 = vmul.f32 %v2505_v38, %v268_v52 }
 0x140   :  { %v2078_v58 = vpop.eup %2077  ;;  %2091 = vrsqrt.f32 %v245_v50  ;;  %v291_v37 = vmul.f32 %v2505_v38, %v269_v56 }
 0x141   :  { %v2080_v60 = vpop.eup %2079  ;;  %v246_v61 = vadd.f32 1e-05, %v230_v28  ;;  %v247_v62 = vadd.f32 1e-05, %v231_v29  ;;  %v312_v63 = vadd.f32 %v2512_v51, %v290_v57  ;;  %v270_v44 = vmul.f32 %v2078_v58, %v2416_v45 }
 0x142   :  { %v212_v3 = vpop.xlane.xlu1 %211  ;;  %v215_v4 = vpop.xlane.xlu0 %214  ;;  %v271_v5 = vmul.f32 %v2080_v60, %v2424_v54  ;;  %v313_v54 = vadd.f32 %v2512_v51, %v291_v37 }
 0x143   :  { %2093 = vrsqrt.f32 %v246_v61  ;;  %v232_v6 = vmul.f32 0.03125, %v212_v3  ;;  %v233_v7 = vmul.f32 0.03125, %v215_v4  ;;  %v327_v8 = vpack.c.bf16 %v312_v63, %v311_v59 }
 0x144   :  { %v2082_v9 = vpop.eup %2081  ;;  %2095 = vrsqrt.f32 %v247_v62  ;;  %v292_v10 = vmul.f32 %v2505_v38, %v270_v44  ;;  %v293_v14 = vmul.f32 %v2505_v38, %v271_v5 }
 0x145   :  { %v2084_v15 = vpop.eup %2083  ;;  %v248_v18 = vadd.f32 1e-05, %v232_v6  ;;  %v249_v19 = vadd.f32 1e-05, %v233_v7  ;;  %1947 = vmatprep.mubr.msk.bf16.mxu0 %vm73_vm0, %v327_v8  ;;  %v272_v45 = vmul.f32 %v2082_v9, %v2426_v55 }
 0x146   :  { %v218_v22 = vpop.xlane.xlu1 %217  ;;  %v314_v23 = vadd.f32 %v2512_v51, %v292_v10  ;;  %v273_v26 = vmul.f32 %v2084_v15, %v2435_v0  ;;  %v315_v33 = vadd.f32 %v2512_v51, %v293_v14  ;;  %v2058_v14 = vld [vmem:[%s3355_s5 + $0x30] sm:$0xff]   ;;  %v2061_v15 = vld [vmem:[%s3355_s5 + $0x18] sm:$0xff]  }
 0x147   :  { %2097 = vrsqrt.f32 %v248_v18  ;;  %v234_v16 = vmul.f32 0.03125, %v218_v22  ;;  %v294_v30 = vmul.f32 %v2505_v38, %v272_v45  ;;  %v2062_v18 = vld [vmem:[%s3355_s5 + $0x10] sm:$0xff]   ;;  %v2064_v45 = vld [vmem:[%s3355_s5] sm:$0xff]  }
 0x148   :  { %v2086_v31 = vpop.eup %2085  ;;  %2099 = vrsqrt.f32 %v249_v19  ;;  %v328_v32 = vpack.c.bf16 %v314_v23, %v313_v54  ;;  %v295_v40 = vmul.f32 %v2505_v38, %v273_v26  ;;  %v2063_v19 = vld [vmem:[%s3355_s5 + $0x8] sm:$0xff]   ;;  %v2595_v22 = vld [vmem:[%s3356_s4] ss:$0 sm:$0xff] }
 0x149   :  { %v2088_v34 = vpop.eup %2087  ;;  %v250_v35 = vadd.f32 1e-05, %v234_v16  ;;  %v316_v55 = vadd.f32 %v2512_v51, %v294_v30  ;;  %v274_v20 = vmul.f32 %v2086_v31, %v2438_v2 }
 0x14a   :  { %1948 = vmatmul.mubr.msk.bf16.vlgmr.msra.gmra.mxu0 %vm73_vm0, %v328_v32  ;;  %v275_v0 = vmul.f32 %v2088_v34, %v2447_v11  ;;  %v317_v47 = vadd.f32 %v2512_v51, %v295_v40 }
 0x14b   :  { %2101 = vrsqrt.f32 %v250_v35  ;;  %v329_v41 = vpack.c.bf16 %v316_v55, %v315_v33  ;;  %v296_v42 = vmul.f32 %v2505_v38, %v274_v20 }
 0x14c   :  { %v2090_v43 = vpop.eup %2089  ;;  %v297_v24 = vmul.f32 %v2505_v38, %v275_v0 }
 0x14d   :  { %v2092_v46 = vpop.eup %2091  ;;  %1951 = vmatprep.mubr.msk.bf16.mxu0 %vm73_vm0, %v329_v41  ;;  %v318_v48 = vadd.f32 %v2512_v51, %v296_v42  ;;  %v276_v2 = vmul.f32 %v2090_v43, %v2450_v13 }
 0x14e   :  { %v277_v50 = vmul.f32 %v2092_v46, %v2459_v27  ;;  %v319_v56 = vadd.f32 %v2512_v51, %v297_v24 }
 0x14f   :  { %v330_v52 = vpack.c.bf16 %v318_v48, %v317_v47  ;;  %v298_v11 = vmul.f32 %v2505_v38, %v276_v2 }
 0x150   :  { %v2094_v36 = vpop.eup %2093  ;;  %v299_v57 = vmul.f32 %v2505_v38, %v277_v50 }
 0x151   :  { %v2096_v53 = vpop.eup %2095  ;;  %v320_v28 = vadd.f32 %v2512_v51, %v298_v11  ;;  %v278_v29 = vmul.f32 %v2094_v36, %v2462_v17 }
 0x152   :  { %1952 = vmatmul.mubr.msk.bf16.gmra.mxu0 %vm73_vm0, %v330_v52  ;;  %v279_v13 = vmul.f32 %v2096_v53, %v2471_v39  ;;  %v321_v61 = vadd.f32 %v2512_v51, %v299_v57 }
 0x153   :  { %v331_v58 = vpack.c.bf16 %v320_v28, %v319_v56  ;;  %v300_v27 = vmul.f32 %v2505_v38, %v278_v29 }
 0x154   :  { %v2098_v59 = vpop.eup %2097  ;;  %v301_v17 = vmul.f32 %v2505_v38, %v279_v13 }
 0x155   :  { %v2100_v60 = vpop.eup %2099  ;;  %1955 = vmatprep.mubr.msk.bf16.mxu0 %vm73_vm0, %v331_v58  ;;  %v322_v62 = vadd.f32 %v2512_v51, %v300_v27  ;;  %v280_v63 = vmul.f32 %v2098_v59, %v2474_v21 }
 0x156   :  { %v281_v44 = vmul.f32 %v2100_v60, %v2483_v49  ;;  %v323_v37 = vadd.f32 %v2512_v51, %v301_v17 }
 0x157   :  { %v332_v3 = vpack.c.bf16 %v322_v62, %v321_v61  ;;  %v302_v39 = vmul.f32 %v2505_v38, %v280_v63 }
 0x158   :  { %v2102_v4 = vpop.eup %2101  ;;  %v303_v7 = vmul.f32 %v2505_v38, %v281_v44 }
 0x159   :  { %v324_v5 = vadd.f32 %v2512_v51, %v302_v39  ;;  %v282_v6 = vmul.f32 %v2102_v4, %v2486_v25  ;;  %v2057_v25 = vld [vmem:[%s3355_s5 + $0x38] sm:$0xff]  }
 0x15a   :  { %1956 = vmatmul.mubr.msk.bf16.gmra.mxu0 %vm73_vm0, %v332_v3  ;;  %v325_v49 = vadd.f32 %v2512_v51, %v303_v7  ;;  %1963 = vmatprep.subr.bf16.mxu1 %v2057_v25 }
 0x15b   :  { %v333_v8 = vpack.c.bf16 %v324_v5, %v323_v37  ;;  %v304_v21 = vmul.f32 %v2505_v38, %v282_v6  ;;  %1964 = vmatpush3.bf16.msra.mxu1 %v2057_v25  ;;  %v2059_v38 = vld [vmem:[%s3355_s5 + $0x28] sm:$0xff]  }
 0x15c   :  { %1965 = vmatprep.subr.bf16.mxu1 %v2058_v14 }
 0x15d   :  { %1959 = vmatprep.mubr.msk.bf16.mxu0 %vm73_vm0, %v333_v8  ;;  %v326_v9 = vadd.f32 %v2512_v51, %v304_v21  ;;  %v2060_v51 = vld [vmem:[%s3355_s5 + $0x20] sm:$0xff]  }
 0x15f   :  { %v334_v10 = vpack.c.bf16 %v326_v9, %v325_v49  ;;  %1966 = vmatpush3.bf16.msra.mxu1 %v2058_v14 }
 0x160   :  { %1967 = vmatprep.subr.bf16.mxu1 %v2059_v38 }
 0x162   :  { %1960 = vmatmul.mubr.msk.bf16.gmra.mxu0 %vm73_vm0, %v334_v10 }
 0x163   :  { %1968 = vmatpush3.bf16.msra.mxu1 %v2059_v38 }
 0x164   :  { %1969 = vmatprep.subr.bf16.mxu1 %v2060_v51 }
 0x167   :  { %1970 = vmatpush3.bf16.msra.mxu1 %v2060_v51 }
 0x168   :  { %1971 = vmatprep.subr.bf16.mxu1 %v2061_v15 }
 0x16b   :  { %1972 = vmatpush3.bf16.msra.mxu1 %v2061_v15 }
 0x16c   :  { %1973 = vmatprep.subr.bf16.mxu1 %v2062_v18 }
 0x16f   :  { %1974 = vmatpush3.bf16.msra.mxu1 %v2062_v18 }
 0x170   :  { %1975 = vmatprep.subr.bf16.mxu1 %v2063_v19 }
 0x173   :  { %1976 = vmatpush3.bf16.msra.mxu1 %v2063_v19 }
 0x174   :  { %1977 = vmatprep.subr.bf16.mxu1 %v2064_v45 }
 0x177   :  { %1978 = vmatpush3.bf16.msra.mxu1 %v2064_v45 }
 0x20a   :  { %v1949_v54 = vpop.f32.mrf.mxu0 }
 0x20b   :  { %v2598_v23 = vadd.f32 %v1949_v54, %v2595_v22 }
 0x20c   :  { %v416_v26 = vpop.f32.mrf.mxu0 }
 0x20d   :  { %v1733_v16 = vmul.f32 -1.442695, %v2598_v23  ;;  %v2602_v30 = vadd.f32 %v2595_v22, %v416_v26 }
 0x20e   :  { %v1950_v31 = vpop.f32.mrf.mxu0 }
 0x20f   :  { %2103 = vpow2.f32 %v1733_v16  ;;  %v1731_v32 = vmul.f32 -1.442695, %v2602_v30  ;;  %v2606_v33 = vadd.f32 %v1950_v31, %v2595_v22 }
 0x210   :  { %v419_v34 = vpop.f32.mrf.mxu0 }
 0x211   :  { %2105 = vpow2.f32 %v1731_v32  ;;  %v1734_v35 = vmul.f32 -1.442695, %v2606_v33  ;;  %v2610_v55 = vadd.f32 %v2595_v22, %v419_v34 }
 0x212   :  { %v1953_v20 = vpop.f32.mrf.mxu0 }
 0x213   :  { %2107 = vpow2.f32 %v1734_v35  ;;  %v1732_v40 = vmul.f32 -1.442695, %v2610_v55  ;;  %v2614_v0 = vadd.f32 %v1953_v20, %v2595_v22 }
 0x214   :  { %v432_v41 = vpop.f32.mrf.mxu0 }
 0x215   :  { %2109 = vpow2.f32 %v1732_v40  ;;  %v1737_v42 = vmul.f32 -1.442695, %v2614_v0  ;;  %v2618_v43 = vadd.f32 %v2595_v22, %v432_v41 }
 0x216   :  { %v1954_v46 = vpop.f32.mrf.mxu0 }
 0x217   :  { %2111 = vpow2.f32 %v1737_v42  ;;  %v1735_v47 = vmul.f32 -1.442695, %v2618_v43  ;;  %v2622_v48 = vadd.f32 %v1954_v46, %v2595_v22 }
 0x218   :  { %v435_v2 = vpop.f32.mrf.mxu0 }
 0x219   :  { %2113 = vpow2.f32 %v1735_v47  ;;  %v1738_v24 = vmul.f32 -1.442695, %v2622_v48  ;;  %v2626_v50 = vadd.f32 %v2595_v22, %v435_v2 }
 0x21a   :  { %v1957_v52 = vpop.f32.mrf.mxu0 }
 0x21b   :  { %2115 = vpow2.f32 %v1738_v24  ;;  %v1736_v11 = vmul.f32 -1.442695, %v2626_v50  ;;  %v2630_v36 = vadd.f32 %v1957_v52, %v2595_v22 }
 0x21c   :  { %v2104_v53 = vpop.eup %2103  ;;  %v448_v56 = vpop.f32.mrf.mxu0 }
 0x21d   :  { %v529_v28 = vadd.f32 1.0, %v2104_v53  ;;  %2117 = vpow2.f32 %v1736_v11  ;;  %v1741_v29 = vmul.f32 -1.442695, %v2630_v36  ;;  %v2634_v57 = vadd.f32 %v2595_v22, %v448_v56 }
 0x21e   :  { %v2106_v13 = vpop.eup %2105  ;;  %v1958_v58 = vpop.f32.mrf.mxu0 }
 0x21f   :  { %2119 = vrcp.f32 %v529_v28  ;;  %v527_v27 = vadd.f32 1.0, %v2106_v13  ;;  %v1739_v59 = vmul.f32 -1.442695, %v2634_v57  ;;  %v2638_v60 = vadd.f32 %v1958_v58, %v2595_v22 }
 0x220   :  { %v2108_v61 = vpop.eup %2107  ;;  %2121 = vpow2.f32 %v1741_v29  ;;  %v451_v62 = vpop.f32.mrf.mxu0 }
 0x221   :  { %2123 = vrcp.f32 %v527_v27  ;;  %v530_v63 = vadd.f32 1.0, %v2108_v61  ;;  %v1742_v17 = vmul.f32 -1.442695, %v2638_v60  ;;  %v2642_v44 = vadd.f32 %v2595_v22, %v451_v62 }
 0x222   :  { %v2110_v3 = vpop.eup %2109  ;;  %2125 = vpow2.f32 %v1739_v59  ;;  %v1961_v39 = vpop.f32.mrf.mxu0 }
 0x223   :  { %2127 = vrcp.f32 %v530_v63  ;;  %v528_v4 = vadd.f32 1.0, %v2110_v3  ;;  %v1740_v37 = vmul.f32 -1.442695, %v2642_v44  ;;  %v2646_v5 = vadd.f32 %v1961_v39, %v2595_v22 }
 0x224   :  { %v2112_v6 = vpop.eup %2111  ;;  %2129 = vpow2.f32 %v1742_v17  ;;  %v464_v7 = vpop.f32.mrf.mxu0 }
 0x225   :  { %2131 = vrcp.f32 %v528_v4  ;;  %v533_v8 = vadd.f32 1.0, %v2112_v6  ;;  %v1745_v21 = vmul.f32 -1.442695, %v2646_v5  ;;  %v2650_v49 = vadd.f32 %v2595_v22, %v464_v7 }
 0x226   :  { %v2114_v9 = vpop.eup %2113  ;;  %2133 = vpow2.f32 %v1740_v37  ;;  %v1962_v10 = vpop.f32.mrf.mxu0 }
 0x227   :  { %2135 = vrcp.f32 %v533_v8  ;;  %v531_v25 = vadd.f32 1.0, %v2114_v9  ;;  %v1743_v14 = vmul.f32 -1.442695, %v2650_v49  ;;  %v2654_v38 = vadd.f32 %v1962_v10, %v2595_v22 }
 0x228   :  { %v2116_v51 = vpop.eup %2115  ;;  %2137 = vpow2.f32 %v1745_v21  ;;  %v467_v15 = vpop.f32.mrf.mxu0 }
 0x229   :  { %2139 = vrcp.f32 %v531_v25  ;;  %v534_v18 = vadd.f32 1.0, %v2116_v51  ;;  %v1746_v19 = vmul.f32 -1.442695, %v2654_v38  ;;  %v2658_v45 = vadd.f32 %v2595_v22, %v467_v15 }
 0x22a   :  { %v2118_v54 = vpop.eup %2117  ;;  %2141 = vpow2.f32 %v1743_v14 }
 0x22b   :  { %2143 = vrcp.f32 %v534_v18  ;;  %v532_v26 = vadd.f32 1.0, %v2118_v54  ;;  %v1744_v16 = vmul.f32 -1.442695, %v2658_v45 }
 0x22c   :  { %v2120_v31 = vpop.eup %2119  ;;  %2145 = vpow2.f32 %v1746_v19 }
 0x22d   :  { %v2122_v32 = vpop.eup %2121  ;;  %2147 = vrcp.f32 %v532_v26  ;;  %v577_v53 = vmul.f32 %v2120_v31, %v2598_v23 }
 0x22e   :  { %v2124_v34 = vpop.eup %2123  ;;  %2149 = vpow2.f32 %v1744_v16  ;;  %v537_v42 = vadd.f32 1.0, %v2122_v32  ;;  %v2680_v16 = vld [vmem:[%s3357_s6] ss:$0 sm:$0xff] }
 0x22f   :  { %v2126_v35 = vpop.eup %2125  ;;  %v575_v24 = vmul.f32 %v2124_v34, %v2602_v30 }
 0x230   :  { %v2128_v20 = vpop.eup %2127  ;;  %v535_v40 = vadd.f32 1.0, %v2126_v35 }
 0x231   :  { %v2130_v41 = vpop.eup %2129  ;;  %v578_v22 = vmul.f32 %v2128_v20, %v2606_v33 }
 0x232   :  { %v2132_v46 = vpop.eup %2131  ;;  %v538_v47 = vadd.f32 1.0, %v2130_v41  ;;  %2151 = vrcp.f32 %v535_v40  ;;  %v2201_v41 = vld [vmem:[%s3375_s29 + $0x8] sm:$0xff] }
 0x233   :  { %v2134_v2 = vpop.eup %2133  ;;  %v576_v52 = vmul.f32 %v2132_v46, %v2610_v55  ;;  %v592_v58 = vpack.c.bf16 %v578_v22, %v577_v53 }
 0x234   :  { %v2136_v11 = vpop.eup %2135  ;;  %2153 = vrcp.f32 %v538_v47  ;;  %v536_v56 = vadd.f32 1.0, %v2134_v2 }
 0x235   :  { %v2138_v28 = vpop.eup %2137  ;;  %2155 = vrcp.f32 %v537_v42  ;;  %v591_v29 = vpack.c.bf16 %v576_v52, %v575_v24  ;;  %v581_v39 = vmul.f32 %v2136_v11, %v2614_v0  ;;  %v2202_v11 = vld [vmem:[%s3375_s29 + $0x20] sm:$0xff] }
 0x236   :  { %v2140_v13 = vpop.eup %2139  ;;  %2157 = vrcp.f32 %v536_v56  ;;  %v541_v30 = vadd.f32 1.0, %v2138_v28 }
 0x237   :  { %v2142_v27 = vpop.eup %2141  ;;  %1979 = vmatprep.mubr.bf16.mxu1 %v591_v29  ;;  %v579_v17 = vmul.f32 %v2140_v13, %v2618_v43  ;;  %v2203_v13 = vld [vmem:[%s3375_s29 + $0x38] sm:$0xff] }
 0x238   :  { %v2144_v33 = vpop.eup %2143  ;;  %v539_v59 = vadd.f32 1.0, %v2142_v27  ;;  %1980 = vmatmul.mubr.bf16.vlgmr.msra.gmra.mxu1 %v592_v58 }
 0x239   :  { %v2146_v61 = vpop.eup %2145  ;;  %v582_v55 = vmul.f32 %v2144_v33, %v2622_v48 }
 0x23a   :  { %v2148_v62 = vpop.eup %2147  ;;  %v542_v63 = vadd.f32 1.0, %v2146_v61  ;;  %2159 = vrcp.f32 %v539_v59  ;;  %v2204_v59 = vld [vmem:[%s3375_s29 + $0x28] sm:$0xff] }
 0x23b   :  { %v2150_v23 = vpop.eup %2149  ;;  %v580_v3 = vmul.f32 %v2148_v62, %v2626_v50  ;;  %v594_v6 = vpack.c.bf16 %v582_v55, %v581_v39 }
 0x23c   :  { %2161 = vrcp.f32 %v542_v63  ;;  %v540_v4 = vadd.f32 1.0, %v2150_v23  ;;  %v2205_v23 = vld [vmem:[%s3375_s29 + $0x50] sm:$0xff] }
 0x23d   :  { %2163 = vrcp.f32 %v541_v30  ;;  %v593_v37 = vpack.c.bf16 %v580_v3, %v579_v17 }
 0x23e   :  { %2165 = vrcp.f32 %v540_v4 }
 0x23f   :  { %1983 = vmatprep.mubr.bf16.mxu1 %v593_v37  ;;  %v2152_v7 = vpop.eup %2151 }
 0x240   :  { %1984 = vmatmul.mubr.bf16.gmra.mxu1 %v594_v6  ;;  %v583_v43 = vmul.f32 %v2152_v7, %v2634_v57  ;;  %v2206_v6 = vld [vmem:[%s3375_s29 + $0x40] sm:$0xff] }
 0x241   :  { %v2154_v8 = vpop.eup %2153 }
 0x242   :  { %v2156_v48 = vpop.eup %2155  ;;  %v586_v9 = vmul.f32 %v2154_v8, %v2638_v60 }
 0x243   :  { %v2158_v21 = vpop.eup %2157  ;;  %v585_v0 = vmul.f32 %v2156_v48, %v2630_v36 }
 0x244   :  { %v584_v50 = vmul.f32 %v2158_v21, %v2642_v44  ;;  %v2207_v21 = vld [vmem:[%s3375_s29 + $0x58] sm:$0xff] }
 0x245   :  { %v596_v25 = vpack.c.bf16 %v586_v9, %v585_v0 }
 0x246   :  { %v595_v10 = vpack.c.bf16 %v584_v50, %v583_v43 }
 0x247   :  { %v2160_v14 = vpop.eup %2159 }
 0x248   :  { %1987 = vmatprep.mubr.bf16.mxu1 %v595_v10  ;;  %v587_v54 = vmul.f32 %v2160_v14, %v2650_v49  ;;  %v2208_v10 = vld [vmem:[%s3375_s29 + $0x48] sm:$0xff] }
 0x249   :  { %v2162_v51 = vpop.eup %2161  ;;  %1988 = vmatmul.mubr.bf16.gmra.mxu1 %v596_v25 }
 0x24a   :  { %v2164_v15 = vpop.eup %2163  ;;  %v590_v19 = vmul.f32 %v2162_v51, %v2654_v38 }
 0x24b   :  { %v2166_v18 = vpop.eup %2165  ;;  %v589_v57 = vmul.f32 %v2164_v15, %v2646_v5  ;;  %v2199_v5 = vld [vmem:[%s3375_s29] sm:$0xff] }
 0x24c   :  { %v588_v60 = vmul.f32 %v2166_v18, %v2658_v45  ;;  %v2209_v18 = vld [vmem:[%s3375_s29 + $0x70] sm:$0xff] }
 0x24d   :  { %v598_v44 = vpack.c.bf16 %v590_v19, %v589_v57  ;;  %v2210_v57 = vld [vmem:[%s3375_s29 + $0x60] sm:$0xff] }
 0x24e   :  { %v597_v26 = vpack.c.bf16 %v588_v60, %v587_v54 }
 0x250   :  { %1991 = vmatprep.mubr.bf16.mxu1 %v597_v26 }
 0x251   :  { %1992 = vmatmul.mubr.bf16.gmra.mxu1 %v598_v44 }
 0x2f8   :  { %v1981_v36 = vpop.f32.mrf.mxu1 }
 0x2f9   :  { %v762_v31 = vadd.f32 %v1981_v36, %v2314_v1  ;;  %v2200_v1 = vld [vmem:[%s3375_s29 + $0x18] sm:$0xff] }
 0x2fa   :  { %v697_v32 = vpop.f32.mrf.mxu1 }
 0x2fb   :  { %v2684_v38 = vadd.f32 %v2680_v16, %v762_v31  ;;  %v760_v49 = vadd.f32 %v2199_v5, %v697_v32  ;;  %v2211_v5 = vld [vmem:[%s3375_s29 + $0x78] sm:$0xff] }
 0x2fc   :  { %v1982_v45 = vpop.f32.mrf.mxu1 }
 0x2fd   :  { %801 = vst.msk [vmem:[%s3358_s15 + $0x10] sm:$0xff] %vm73_vm0, %v2684_v38  ;;  %v2695_v34 = vadd.f32 %v2680_v16, %v760_v49  ;;  %v763_v35 = vadd.f32 %v2200_v1, %v1982_v45  ;;  %v823_v56 = vsel %vm73_vm0, %v2684_v38, 0.0 }
 0x2fe   :  { %v700_v20 = vpop.f32.mrf.mxu1 }
 0x2ff   :  { %799 = vst.msk [vmem:[%s3358_s15] sm:$0xff] %vm73_vm0, %v2695_v34  ;;  %v2706_v40 = vadd.f32 %v2680_v16, %v763_v35  ;;  %v761_v42 = vadd.f32 %v2201_v41, %v700_v20  ;;  %v817_v46 = vsel %vm73_vm0, %v2695_v34, 0.0  ;;  %v2212_v35 = vld [vmem:[%s3375_s29 + $0x68] sm:$0xff] }
 0x300   :  { %818 = vadd.xlane.f32.xlu0 %v817_v46  ;;  %v1985_v22 = vpop.f32.mrf.mxu1 }
 0x301   :  { %802 = vst.msk [vmem:[%s3358_s15 + $0x18] sm:$0xff] %vm73_vm0, %v2706_v40  ;;  %v2719_v47 = vadd.f32 %v2680_v16, %v761_v42  ;;  %v766_v2 = vadd.f32 %v1985_v22, %v2338_v12  ;;  %v826_v30 = vsel %vm73_vm0, %v2706_v40, 0.0 }
 0x302   :  { %v713_v24 = vpop.f32.mrf.mxu1 }
 0x303   :  { %800 = vst.msk [vmem:[%s3358_s15 + $0x8] sm:$0xff] %vm73_vm0, %v2719_v47  ;;  %v2728_v52 = vadd.f32 %v2680_v16, %v766_v2  ;;  %v764_v53 = vadd.f32 %v2202_v11, %v713_v24  ;;  %v820_v12 = vsel %vm73_vm0, %v2719_v47, 0.0 }
 0x304   :  { %824 = vadd.xlane.f32.xlu0 %v823_v56  ;;  %821 = vadd.xlane.f32.xlu1 %v820_v12  ;;  %v1986_v28 = vpop.f32.mrf.mxu1 }
 0x305   :  { %805 = vst.msk [vmem:[%s3358_s15 + $0x30] sm:$0xff] %vm73_vm0, %v2728_v52  ;;  %v2743_v29 = vadd.f32 %v2680_v16, %v764_v53  ;;  %v767_v58 = vadd.f32 %v2203_v13, %v1986_v28  ;;  %v835_v39 = vsel %vm73_vm0, %v2728_v52, 0.0 }
 0x306   :  { %v716_v27 = vpop.f32.mrf.mxu1 }
 0x307   :  { %803 = vst.msk [vmem:[%s3358_s15 + $0x20] sm:$0xff] %vm73_vm0, %v2743_v29  ;;  %v2754_v33 = vadd.f32 %v2680_v16, %v767_v58  ;;  %v765_v61 = vadd.f32 %v2204_v59, %v716_v27  ;;  %v829_v62 = vsel %vm73_vm0, %v2743_v29, 0.0 }
 0x308   :  { %827 = vadd.xlane.f32.xlu1 %v826_v30  ;;  %830 = vadd.xlane.f32.xlu0 %v829_v62 }
 0x309   :  { %806 = vst.msk [vmem:[%s3358_s15 + $0x38] sm:$0xff] %vm73_vm0, %v2754_v33  ;;  %v2769_v55 = vadd.f32 %v2680_v16, %v765_v61  ;;  %v1989_v63 = vpop.f32.mrf.mxu1  ;;  %v838_v50 = vsel %vm73_vm0, %v2754_v33, 0.0 }
 0x30a   :  { %v770_v17 = vadd.f32 %v2205_v23, %v1989_v63 }
 0x30b   :  { %804 = vst.msk [vmem:[%s3358_s15 + $0x28] sm:$0xff] %vm73_vm0, %v2769_v55  ;;  %v729_v3 = vpop.f32.mrf.mxu1  ;;  %v832_v4 = vsel %vm73_vm0, %v2769_v55, 0.0 }
 0x30c   :  { %v2784_v37 = vadd.f32 %v2680_v16, %v770_v17  ;;  %v768_v7 = vadd.f32 %v2206_v6, %v729_v3  ;;  %836 = vadd.xlane.f32.xlu0 %v835_v39  ;;  %833 = vadd.xlane.f32.xlu1 %v832_v4 }
 0x30d   :  { %v1990_v8 = vpop.f32.mrf.mxu1 }
 0x30e   :  { %809 = vst.msk [vmem:[%s3358_s15 + $0x50] sm:$0xff] %vm73_vm0, %v2784_v37  ;;  %v2795_v48 = vadd.f32 %v2680_v16, %v768_v7  ;;  %v771_v9 = vadd.f32 %v2207_v21, %v1990_v8  ;;  %v847_v44 = vsel %vm73_vm0, %v2784_v37, 0.0 }
 0x30f   :  { %v732_v43 = vpop.f32.mrf.mxu1 }
 0x310   :  { %807 = vst.msk [vmem:[%s3358_s15 + $0x40] sm:$0xff] %vm73_vm0, %v2795_v48  ;;  %v2808_v0 = vadd.f32 %v2680_v16, %v771_v9  ;;  %v769_v25 = vadd.f32 %v2208_v10, %v732_v43  ;;  %839 = vadd.xlane.f32.xlu1 %v838_v50  ;;  %v841_v14 = vsel %vm73_vm0, %v2795_v48, 0.0 }
 0x311   :  { %842 = vadd.xlane.f32.xlu0 %v841_v14  ;;  %v1993_v51 = vpop.f32.mrf.mxu1 }
 0x312   :  { %810 = vst.msk [vmem:[%s3358_s15 + $0x58] sm:$0xff] %vm73_vm0, %v2808_v0  ;;  %v2821_v15 = vadd.f32 %v2680_v16, %v769_v25  ;;  %v774_v19 = vadd.f32 %v2209_v18, %v1993_v51  ;;  %v850_v41 = vsel %vm73_vm0, %v2808_v0, 0.0 }
 0x313   :  { %v745_v54 = vpop.f32.mrf.mxu1 }
 0x314   :  { %808 = vst.msk [vmem:[%s3358_s15 + $0x48] sm:$0xff] %vm73_vm0, %v2821_v15  ;;  %v2832_v60 = vadd.f32 %v2680_v16, %v774_v19  ;;  %v772_v26 = vadd.f32 %v2210_v57, %v745_v54  ;;  %v844_v36 = vsel %vm73_vm0, %v2821_v15, 0.0 }
 0x315   :  { %848 = vadd.xlane.f32.xlu0 %v847_v44  ;;  %845 = vadd.xlane.f32.xlu1 %v844_v36  ;;  %v1994_v31 = vpop.f32.mrf.mxu1 }
 0x316   :  { %813 = vst.msk [vmem:[%s3358_s15 + $0x70] sm:$0xff] %vm73_vm0, %v2832_v60  ;;  %v2847_v32 = vadd.f32 %v2680_v16, %v772_v26  ;;  %v775_v49 = vadd.f32 %v2211_v5, %v1994_v31  ;;  %v859_v22 = vsel %vm73_vm0, %v2832_v60, 0.0 }
 0x317   :  { %v748_v45 = vpop.f32.mrf.mxu1 }
 0x318   :  { %811 = vst.msk [vmem:[%s3358_s15 + $0x60] sm:$0xff] %vm73_vm0, %v2847_v32  ;;  %v2858_v1 = vadd.f32 %v2680_v16, %v775_v49  ;;  %v773_v20 = vadd.f32 %v2212_v35, %v748_v45  ;;  %v853_v42 = vsel %vm73_vm0, %v2847_v32, 0.0  ;;  %v2065_v45 = vld [vmem:[%s3359_s9 + $0x8] sm:$0xff]  }
 0x319   :  { %851 = vadd.xlane.f32.xlu1 %v850_v41  ;;  %854 = vadd.xlane.f32.xlu0 %v853_v42 }
 0x31a   :  { %814 = vst.msk [vmem:[%s3358_s15 + $0x78] sm:$0xff] %vm73_vm0, %v2858_v1  ;;  %v2873_v46 = vadd.f32 %v2680_v16, %v773_v20  ;;  %v862_v24 = vsel %vm73_vm0, %v2858_v1, 0.0  ;;  %1995 = vmatprep.subr.bf16.mxu0 %v2065_v45 }
 0x31b   :  { %1996 = vmatpush3.bf16.msra.mxu0 %v2065_v45 }
 0x31c   :  { %812 = vst.msk [vmem:[%s3358_s15 + $0x68] sm:$0xff] %vm73_vm0, %v2873_v46  ;;  %v856_v2 = vsel %vm73_vm0, %v2873_v46, 0.0 }
 0x31d   :  { %860 = vadd.xlane.f32.xlu0 %v859_v22  ;;  %857 = vadd.xlane.f32.xlu1 %v856_v2 }
 0x321   :  { %863 = vadd.xlane.f32.xlu1 %v862_v24 }
 0x389   :  { %v819_v16 = vpop.xlane.xlu0 %818 }
 0x38a   :  { %v865_v11 = vmul.f32 0.03125, %v819_v16 }
 0x38c   :  { %v2887_v53 = vsub.f32 %v2695_v34, %v865_v11 }
 0x38d   :  { %v822_v56 = vpop.xlane.xlu1 %821  ;;  %v825_v12 = vpop.xlane.xlu0 %824 }
 0x38e   :  { %v866_v28 = vmul.f32 0.03125, %v822_v56  ;;  %v867_v13 = vmul.f32 0.03125, %v825_v12  ;;  %v897_v58 = vmul.f32 %v2887_v53, %v2887_v53 }
 0x390   :  { %v2892_v27 = vsub.f32 %v2719_v47, %v866_v28  ;;  %v2895_v59 = vsub.f32 %v2684_v38, %v867_v13  ;;  %v913_v61 = vsel %vm73_vm0, %v897_v58, 0.0 }
 0x391   :  { %v828_v30 = vpop.xlane.xlu1 %827  ;;  %914 = vadd.xlane.f32.xlu0 %v913_v61  ;;  %v831_v62 = vpop.xlane.xlu0 %830 }
 0x392   :  { %v868_v34 = vmul.f32 0.03125, %v828_v30  ;;  %v869_v63 = vmul.f32 0.03125, %v831_v62  ;;  %v898_v23 = vmul.f32 %v2892_v27, %v2892_v27  ;;  %v899_v17 = vmul.f32 %v2895_v59, %v2895_v59 }
 0x394   :  { %v2903_v3 = vsub.f32 %v2706_v40, %v868_v34  ;;  %v2906_v47 = vsub.f32 %v2743_v29, %v869_v63  ;;  %v916_v38 = vsel %vm73_vm0, %v898_v23, 0.0  ;;  %v919_v39 = vsel %vm73_vm0, %v899_v17, 0.0 }
 0x395   :  { %v834_v4 = vpop.xlane.xlu1 %833  ;;  %917 = vadd.xlane.f32.xlu1 %v916_v38  ;;  %920 = vadd.xlane.f32.xlu0 %v919_v39  ;;  %v837_v6 = vpop.xlane.xlu0 %836 }
 0x396   :  { %v870_v7 = vmul.f32 0.03125, %v834_v4  ;;  %v871_v8 = vmul.f32 0.03125, %v837_v6  ;;  %v900_v21 = vmul.f32 %v2903_v3, %v2903_v3  ;;  %v901_v40 = vmul.f32 %v2906_v47, %v2906_v47 }
 0x398   :  { %v2915_v9 = vsub.f32 %v2769_v55, %v870_v7  ;;  %v2918_v29 = vsub.f32 %v2728_v52, %v871_v8  ;;  %v922_v43 = vsel %vm73_vm0, %v900_v21, 0.0  ;;  %v925_v50 = vsel %vm73_vm0, %v901_v40, 0.0  ;;  %v2067_v7 = vld [vmem:[%s3360_s11 + $0x8] sm:$0xff]   ;;  %v2068_v8 = vld [vmem:[%s3360_s11] sm:$0xff]  }
 0x399   :  { %v840_v10 = vpop.xlane.xlu1 %839  ;;  %923 = vadd.xlane.f32.xlu1 %v922_v43  ;;  %926 = vadd.xlane.f32.xlu0 %v925_v50  ;;  %v2997_v21 = vld [vmem:[%s3361_s13 + $0x8] sm:$0xff]  }
 0x39a   :  { %v872_v25 = vmul.f32 0.03125, %v840_v10  ;;  %v843_v14 = vpop.xlane.xlu0 %842  ;;  %v902_v51 = vmul.f32 %v2915_v9, %v2915_v9  ;;  %v903_v18 = vmul.f32 %v2918_v29, %v2918_v29  ;;  %2015 = vmatprep.subr.bf16.mxu1 %v2067_v7 }
 0x39b   :  { %v873_v55 = vmul.f32 0.03125, %v843_v14  ;;  %2016 = vmatpush3.bf16.msra.mxu1 %v2067_v7 }
 0x39c   :  { %v2927_v19 = vsub.f32 %v2754_v33, %v872_v25  ;;  %v928_v52 = vsel %vm73_vm0, %v902_v51, 0.0  ;;  %v931_v54 = vsel %vm73_vm0, %v903_v18, 0.0  ;;  %2017 = vmatprep.subr.bf16.mxu1 %v2068_v8 }
 0x39d   :  { %v2932_v57 = vsub.f32 %v2795_v48, %v873_v55  ;;  %929 = vadd.xlane.f32.xlu1 %v928_v52  ;;  %932 = vadd.xlane.f32.xlu0 %v931_v54 }
 0x39e   :  { %v846_v26 = vpop.xlane.xlu1 %845  ;;  %v849_v44 = vpop.xlane.xlu0 %848  ;;  %v904_v36 = vmul.f32 %v2927_v19, %v2927_v19 }
 0x39f   :  { %v874_v31 = vmul.f32 0.03125, %v846_v26  ;;  %v875_v5 = vmul.f32 0.03125, %v849_v44  ;;  %v905_v33 = vmul.f32 %v2932_v57, %v2932_v57  ;;  %2018 = vmatpush3.bf16.msra.mxu1 %v2068_v8 }
 0x3a0   :  { %v934_v49 = vsel %vm73_vm0, %v904_v36, 0.0 }
 0x3a1   :  { %v2943_v48 = vsub.f32 %v2821_v15, %v874_v31  ;;  %v2946_v35 = vsub.f32 %v2784_v37, %v875_v5  ;;  %935 = vadd.xlane.f32.xlu1 %v934_v49  ;;  %v937_v20 = vsel %vm73_vm0, %v905_v33, 0.0 }
 0x3a2   :  { %v852_v41 = vpop.xlane.xlu1 %851  ;;  %938 = vadd.xlane.f32.xlu0 %v937_v20  ;;  %v855_v42 = vpop.xlane.xlu0 %854 }
 0x3a3   :  { %v876_v22 = vmul.f32 0.03125, %v852_v41  ;;  %v877_v2 = vmul.f32 0.03125, %v855_v42  ;;  %v906_v24 = vmul.f32 %v2943_v48, %v2943_v48  ;;  %v907_v16 = vmul.f32 %v2946_v35, %v2946_v35 }
 0x3a5   :  { %v2954_v15 = vsub.f32 %v2808_v0, %v876_v22  ;;  %v2957_v37 = vsub.f32 %v2847_v32, %v877_v2  ;;  %v940_v11 = vsel %vm73_vm0, %v906_v24, 0.0  ;;  %v943_v56 = vsel %vm73_vm0, %v907_v16, 0.0 }
 0x3a6   :  { %941 = vadd.xlane.f32.xlu1 %v940_v11  ;;  %v858_v12 = vpop.xlane.xlu1 %857  ;;  %944 = vadd.xlane.f32.xlu0 %v943_v56  ;;  %v861_v28 = vpop.xlane.xlu0 %860  ;;  %v3003_v11 = vld [vmem:[%s3362_s7] ss:$0 sm:$0xff] }
 0x3a7   :  { %v878_v13 = vmul.f32 0.03125, %v858_v12  ;;  %v879_v58 = vmul.f32 0.03125, %v861_v28  ;;  %v908_v61 = vmul.f32 %v2954_v15, %v2954_v15  ;;  %v909_v0 = vmul.f32 %v2957_v37, %v2957_v37 }
 0x3a9   :  { %v2966_v30 = vsub.f32 %v2873_v46, %v878_v13  ;;  %v2969_v32 = vsub.f32 %v2832_v60, %v879_v58  ;;  %v946_v62 = vsel %vm73_vm0, %v908_v61, 0.0  ;;  %v949_v34 = vsel %vm73_vm0, %v909_v0, 0.0 }
 0x3aa   :  { %947 = vadd.xlane.f32.xlu1 %v946_v62  ;;  %v864_v63 = vpop.xlane.xlu1 %863  ;;  %950 = vadd.xlane.f32.xlu0 %v949_v34 }
 0x3ab   :  { %v880_v23 = vmul.f32 0.03125, %v864_v63  ;;  %v910_v17 = vmul.f32 %v2966_v30, %v2966_v30  ;;  %v911_v38 = vmul.f32 %v2969_v32, %v2969_v32 }
 0x3ad   :  { %v2978_v46 = vsub.f32 %v2858_v1, %v880_v23  ;;  %v952_v60 = vsel %vm73_vm0, %v910_v17, 0.0  ;;  %v955_v39 = vsel %vm73_vm0, %v911_v38, 0.0  ;;  %v2066_v1 = vld [vmem:[%s3359_s9] sm:$0xff]  }
 0x3ae   :  { %953 = vadd.xlane.f32.xlu1 %v952_v60  ;;  %956 = vadd.xlane.f32.xlu0 %v955_v39  ;;  %v3010_v23 = vld [vmem:[%s3363_s8] ss:$0 sm:$0xff] }
 0x3af   :  { %v912_v4 = vmul.f32 %v2978_v46, %v2978_v46  ;;  %1997 = vmatprep.subr.bf16.mxu0 %v2066_v1 }
 0x3b0   :  { %1998 = vmatpush3.bf16.msra.mxu0 %v2066_v1 }
 0x3b1   :  { %v958_v6 = vsel %vm73_vm0, %v912_v4, 0.0  ;;  %2035 = vmatprep.subr.bf16.mxu0 %v2997_v21 }
 0x3b2   :  { %959 = vadd.xlane.f32.xlu1 %v958_v6 }
 0x41a   :  { %v915_v40 = vpop.xlane.xlu0 %914 }
 0x41b   :  { %v961_v43 = vmul.f32 0.03125, %v915_v40 }
 0x41d   :  { %v977_v50 = vadd.f32 1e-05, %v961_v43 }
 0x41e   :  { %v918_v10 = vpop.xlane.xlu1 %917  ;;  %v921_v25 = vpop.xlane.xlu0 %920 }
 0x41f   :  { %2167 = vrsqrt.f32 %v977_v50  ;;  %v962_v14 = vmul.f32 0.03125, %v918_v10  ;;  %v963_v51 = vmul.f32 0.03125, %v921_v25 }
 0x421   :  { %v978_v18 = vadd.f32 1e-05, %v962_v14  ;;  %v979_v55 = vadd.f32 1e-05, %v963_v51 }
 0x422   :  { %v924_v52 = vpop.xlane.xlu1 %923  ;;  %v927_v54 = vpop.xlane.xlu0 %926 }
 0x423   :  { %2169 = vrsqrt.f32 %v978_v18  ;;  %v964_v26 = vmul.f32 0.03125, %v924_v52  ;;  %v965_v44 = vmul.f32 0.03125, %v927_v54 }
 0x424   :  { %2171 = vrsqrt.f32 %v979_v55 }
 0x425   :  { %v980_v36 = vadd.f32 1e-05, %v964_v26  ;;  %v981_v31 = vadd.f32 1e-05, %v965_v44 }
 0x426   :  { %v930_v5 = vpop.xlane.xlu1 %929  ;;  %v933_v33 = vpop.xlane.xlu0 %932 }
 0x427   :  { %2173 = vrsqrt.f32 %v980_v36  ;;  %v966_v49 = vmul.f32 0.03125, %v930_v5  ;;  %v967_v45 = vmul.f32 0.03125, %v933_v33 }
 0x428   :  { %2175 = vrsqrt.f32 %v981_v31 }
 0x429   :  { %v982_v20 = vadd.f32 1e-05, %v966_v49  ;;  %v983_v41 = vadd.f32 1e-05, %v967_v45 }
 0x42a   :  { %v936_v42 = vpop.xlane.xlu1 %935 }
 0x42b   :  { %2177 = vrsqrt.f32 %v982_v20  ;;  %v968_v22 = vmul.f32 0.03125, %v936_v42  ;;  %v939_v2 = vpop.xlane.xlu0 %938 }
 0x42c   :  { %v2168_v24 = vpop.eup %2167  ;;  %2179 = vrsqrt.f32 %v983_v41  ;;  %v969_v16 = vmul.f32 0.03125, %v939_v2 }
 0x42d   :  { %v984_v56 = vadd.f32 1e-05, %v968_v22  ;;  %v1009_v12 = vmul.f32 %v2168_v24, %v2887_v53  ;;  %v2070_v22 = vld [vmem:[%s3361_s13] sm:$0xff]  }
 0x42e   :  { %v985_v28 = vadd.f32 1e-05, %v969_v16 }
 0x42f   :  { %2181 = vrsqrt.f32 %v984_v56  ;;  %v942_v13 = vpop.xlane.xlu1 %941  ;;  %v945_v58 = vpop.xlane.xlu0 %944  ;;  %v1031_v34 = vmul.f32 %v3003_v11, %v1009_v12 }
 0x430   :  { %v2170_v61 = vpop.eup %2169  ;;  %2183 = vrsqrt.f32 %v985_v28  ;;  %v970_v0 = vmul.f32 0.03125, %v942_v13  ;;  %v971_v62 = vmul.f32 0.03125, %v945_v58 }
 0x431   :  { %v2172_v63 = vpop.eup %2171  ;;  %v1010_v17 = vmul.f32 %v2170_v61, %v2892_v27  ;;  %v1053_v40 = vadd.f32 %v3010_v23, %v1031_v34 }
 0x432   :  { %v1011_v53 = vmul.f32 %v2172_v63, %v2895_v59  ;;  %v986_v38 = vadd.f32 1e-05, %v970_v0  ;;  %v987_v60 = vadd.f32 1e-05, %v971_v62 }
 0x433   :  { %v948_v39 = vpop.xlane.xlu1 %947  ;;  %v951_v4 = vpop.xlane.xlu0 %950  ;;  %v1032_v6 = vmul.f32 %v3003_v11, %v1010_v17 }
 0x434   :  { %v2174_v7 = vpop.eup %2173  ;;  %2185 = vrsqrt.f32 %v986_v38  ;;  %v972_v1 = vmul.f32 0.03125, %v948_v39  ;;  %v973_v8 = vmul.f32 0.03125, %v951_v4  ;;  %v1033_v50 = vmul.f32 %v3003_v11, %v1011_v53 }
 0x435   :  { %v2176_v43 = vpop.eup %2175  ;;  %v1012_v10 = vmul.f32 %v2174_v7, %v2903_v3  ;;  %2187 = vrsqrt.f32 %v987_v60  ;;  %v1054_v27 = vadd.f32 %v3010_v23, %v1032_v6 }
 0x436   :  { %v988_v59 = vadd.f32 1e-05, %v972_v1  ;;  %v989_v25 = vadd.f32 1e-05, %v973_v8  ;;  %v1013_v14 = vmul.f32 %v2176_v43, %v2906_v47  ;;  %v1055_v47 = vadd.f32 %v3010_v23, %v1033_v50 }
 0x437   :  { %v1034_v51 = vmul.f32 %v3003_v11, %v1012_v10  ;;  %v954_v18 = vpop.xlane.xlu1 %953  ;;  %v957_v55 = vpop.xlane.xlu0 %956  ;;  %v3021_v52 = vpack.c.bf16 %v1054_v27, %v1053_v40 }
 0x438   :  { %v2178_v54 = vpop.eup %2177  ;;  %2189 = vrsqrt.f32 %v988_v59  ;;  %v974_v26 = vmul.f32 0.03125, %v954_v18  ;;  %v975_v44 = vmul.f32 0.03125, %v957_v55  ;;  %v1035_v36 = vmul.f32 %v3003_v11, %v1013_v14 }
 0x439   :  { %v2180_v3 = vpop.eup %2179  ;;  %2191 = vrsqrt.f32 %v989_v25  ;;  %1999 = vmatprep.mubr.msk.bf16.mxu0 %vm73_vm0, %v3021_v52  ;;  %2019 = vmatprep.mubr.msk.bf16.mxu1 %vm73_vm0, %v3021_v52  ;;  %v1056_v31 = vadd.f32 %v3010_v23, %v1034_v51  ;;  %v1014_v5 = vmul.f32 %v2178_v54, %v2915_v9 }
 0x43a   :  { %v990_v33 = vadd.f32 1e-05, %v974_v26  ;;  %v991_v49 = vadd.f32 1e-05, %v975_v44  ;;  %v1015_v45 = vmul.f32 %v2180_v3, %v2918_v29  ;;  %v1057_v16 = vadd.f32 %v3010_v23, %v1035_v36 }
 0x43b   :  { %v960_v20 = vpop.xlane.xlu1 %959  ;;  %v3032_v41 = vpack.c.bf16 %v1056_v31, %v1055_v47  ;;  %v1036_v42 = vmul.f32 %v3003_v11, %v1014_v5 }
 0x43c   :  { %v2182_v2 = vpop.eup %2181  ;;  %2193 = vrsqrt.f32 %v990_v33  ;;  %v976_v24 = vmul.f32 0.03125, %v960_v20  ;;  %v1037_v12 = vmul.f32 %v3003_v11, %v1015_v45 }
 0x43d   :  { %v2184_v56 = vpop.eup %2183  ;;  %2195 = vrsqrt.f32 %v991_v49  ;;  %2000 = vmatmul.mubr.msk.bf16.vlgmr.msra.gmra.mxu0 %vm73_vm0, %v3032_v41  ;;  %2020 = vmatmul.mubr.msk.bf16.vlgmr.msra.gmra.mxu1 %vm73_vm0, %v3032_v41  ;;  %v1058_v9 = vadd.f32 %v3010_v23, %v1036_v42  ;;  %v1016_v29 = vmul.f32 %v2182_v2, %v2927_v19 }
 0x43e   :  { %v992_v28 = vadd.f32 1e-05, %v976_v24  ;;  %2036 = vmatpush3.bf16.msra.mxu0 %v2997_v21  ;;  %v1017_v13 = vmul.f32 %v2184_v56, %v2932_v57  ;;  %v1059_v62 = vadd.f32 %v3010_v23, %v1037_v12 }
 0x43f   :  { %v1071_v58 = vpack.c.bf16 %v1058_v9, %v1057_v16  ;;  %v1038_v61 = vmul.f32 %v3003_v11, %v1016_v29  ;;  %2037 = vmatprep.subr.bf16.mxu0 %v2070_v22 }
 0x440   :  { %2197 = vrsqrt.f32 %v992_v28  ;;  %v1039_v21 = vmul.f32 %v3003_v11, %v1017_v13 }
 0x441   :  { %v2186_v0 = vpop.eup %2185  ;;  %2003 = vmatprep.mubr.msk.bf16.mxu0 %vm73_vm0, %v1071_v58  ;;  %2023 = vmatprep.mubr.msk.bf16.mxu1 %vm73_vm0, %v1071_v58  ;;  %v1060_v19 = vadd.f32 %v3010_v23, %v1038_v61 }
 0x442   :  { %v2188_v34 = vpop.eup %2187  ;;  %v1018_v63 = vmul.f32 %v2186_v0, %v2943_v48  ;;  %2038 = vmatpush3.bf16.msra.mxu0 %v2070_v22  ;;  %v1061_v39 = vadd.f32 %v3010_v23, %v1039_v21 }
 0x443   :  { %v1072_v57 = vpack.c.bf16 %v1060_v19, %v1059_v62  ;;  %v1019_v17 = vmul.f32 %v2188_v34, %v2946_v35 }
 0x444   :  { %v1040_v53 = vmul.f32 %v3003_v11, %v1018_v63 }
 0x445   :  { %v2190_v38 = vpop.eup %2189  ;;  %2004 = vmatmul.mubr.msk.bf16.gmra.mxu0 %vm73_vm0, %v1072_v57  ;;  %2024 = vmatmul.mubr.msk.bf16.gmra.mxu1 %vm73_vm0, %v1072_v57  ;;  %v1041_v6 = vmul.f32 %v3003_v11, %v1019_v17 }
 0x446   :  { %v2192_v60 = vpop.eup %2191  ;;  %v1062_v4 = vadd.f32 %v3010_v23, %v1040_v53  ;;  %v1020_v48 = vmul.f32 %v2190_v38, %v2954_v15 }
 0x447   :  { %v1021_v7 = vmul.f32 %v2192_v60, %v2957_v37  ;;  %v1063_v50 = vadd.f32 %v3010_v23, %v1041_v6 }
 0x448   :  { %v1073_v1 = vpack.c.bf16 %v1062_v4, %v1061_v39  ;;  %v1042_v35 = vmul.f32 %v3003_v11, %v1020_v48 }
 0x449   :  { %v2194_v8 = vpop.eup %2193  ;;  %v1043_v40 = vmul.f32 %v3003_v11, %v1021_v7 }
 0x44a   :  { %v2196_v43 = vpop.eup %2195  ;;  %2007 = vmatprep.mubr.msk.bf16.mxu0 %vm73_vm0, %v1073_v1  ;;  %2027 = vmatprep.mubr.msk.bf16.mxu1 %vm73_vm0, %v1073_v1  ;;  %v1064_v10 = vadd.f32 %v3010_v23, %v1042_v35  ;;  %v1022_v15 = vmul.f32 %v2194_v8, %v2966_v30 }
 0x44b   :  { %v1023_v27 = vmul.f32 %v2196_v43, %v2969_v32  ;;  %v1065_v14 = vadd.f32 %v3010_v23, %v1043_v40 }
 0x44c   :  { %v1074_v37 = vpack.c.bf16 %v1064_v10, %v1063_v50  ;;  %v1044_v59 = vmul.f32 %v3003_v11, %v1022_v15 }
 0x44d   :  { %v2198_v25 = vpop.eup %2197  ;;  %v1045_v55 = vmul.f32 %v3003_v11, %v1023_v27 }
 0x44e   :  { %2008 = vmatmul.mubr.msk.bf16.gmra.mxu0 %vm73_vm0, %v1074_v37  ;;  %2028 = vmatmul.mubr.msk.bf16.gmra.mxu1 %vm73_vm0, %v1074_v37  ;;  %v1066_v51 = vadd.f32 %v3010_v23, %v1044_v59  ;;  %v1024_v18 = vmul.f32 %v2198_v25, %v2978_v46  ;;  %v3099_v46 = vld [vmem:[%s3364_s10] ss:$0 sm:$0xff] }
 0x44f   :  { %v1067_v32 = vadd.f32 %v3010_v23, %v1045_v55 }
 0x450   :  { %v1075_v54 = vpack.c.bf16 %v1066_v51, %v1065_v14  ;;  %v1046_v30 = vmul.f32 %v3003_v11, %v1024_v18  ;;  %v3104_v11 = vld [vmem:[%s3365_s12] ss:$0 sm:$0xff] }
 0x452   :  { %2011 = vmatprep.mubr.msk.bf16.mxu0 %vm73_vm0, %v1075_v54  ;;  %2031 = vmatprep.mubr.msk.bf16.mxu1 %vm73_vm0, %v1075_v54  ;;  %v1068_v26 = vadd.f32 %v3010_v23, %v1046_v30 }
 0x454   :  { %v1076_v44 = vpack.c.bf16 %v1068_v26, %v1067_v32 }
 0x456   :  { %2012 = vmatmul.mubr.msk.bf16.gmra.mxu0 %vm73_vm0, %v1076_v44  ;;  %2032 = vmatmul.mubr.msk.bf16.gmra.mxu1 %vm73_vm0, %v1076_v44 }
 0x457   :  { %2039 = vmatprep.mubr.msk.bf16.mxu0 %vm73_vm0, %v3021_v52 }
 0x45e   :  { %2040 = vmatmul.mubr.msk.bf16.vlgmr.msra.gmra.mxu0 %vm73_vm0, %v3032_v41 }
 0x45f   :  { %2043 = vmatprep.mubr.msk.bf16.mxu0 %vm73_vm0, %v1071_v58 }
 0x466   :  { %2044 = vmatmul.mubr.msk.bf16.gmra.mxu0 %vm73_vm0, %v1072_v57 }
 0x467   :  { %2047 = vmatprep.mubr.msk.bf16.mxu0 %vm73_vm0, %v1073_v1 }
 0x46e   :  { %2048 = vmatmul.mubr.msk.bf16.gmra.mxu0 %vm73_vm0, %v1074_v37 }
 0x46f   :  { %2051 = vmatprep.mubr.msk.bf16.mxu0 %vm73_vm0, %v1075_v54 }
 0x476   :  { %2052 = vmatmul.mubr.msk.bf16.gmra.mxu0 %vm73_vm0, %v1076_v44 }
 0x4fd   :  { %v2001_v23 = vpop.f32.mrf.mxu0  ;;  %v2021_v52 = vpop.f32.mrf.mxu1 }
 0x4fe   :  { %v1167_v36 = vadd.f32 %v2001_v23, %v3099_v46  ;;  %v1368_v3 = vadd.f32 %v2021_v52, %v3104_v11 }
 0x4ff   :  { %v1158_v47 = vpop.f32.mrf.mxu0  ;;  %v1359_v31 = vpop.f32.mrf.mxu1 }
 0x500   :  { %v1841_v5 = vpack.c.bf16 %v1167_v36, %v1167_v36  ;;  %v1857_v33 = vpack.c.bf16 %v1368_v3, %v1368_v3  ;;  %v1159_v49 = vadd.f32 %v3099_v46, %v1158_v47  ;;  %v1360_v45 = vadd.f32 %v3104_v11, %v1359_v31 }
 0x501   :  { %v2002_v20 = vpop.f32.mrf.mxu0  ;;  %v2022_v41 = vpop.f32.mrf.mxu1 }
 0x502   :  { %1288 = vst.msk [vmem:[%s3366_s16 + $0x8] sm:$0xf] %vm1285_vm1, %v1841_v5  ;;  %1488 = vst.msk [vmem:[%s3367_s17 + $0x8] sm:$0xf] %vm1285_vm1, %v1857_v33  ;;  %v1839_v42 = vpack.c.bf16 %v1159_v49, %v1159_v49  ;;  %v1855_v22 = vpack.c.bf16 %v1360_v45, %v1360_v45  ;;  %v1170_v2 = vadd.f32 %v2002_v20, %v3099_v46 }
 0x503   :  { %v1371_v24 = vadd.f32 %v2022_v41, %v3104_v11  ;;  %v1161_v16 = vpop.f32.mrf.mxu0  ;;  %v1362_v56 = vpop.f32.mrf.mxu1 }
 0x504   :  { %1286 = vst.msk [vmem:[%s3366_s16] sm:$0xf] %vm1285_vm1, %v1839_v42  ;;  %1486 = vst.msk [vmem:[%s3367_s17] sm:$0xf] %vm1285_vm1, %v1855_v22  ;;  %v1842_v9 = vpack.c.bf16 %v1170_v2, %v1170_v2  ;;  %v1162_v12 = vadd.f32 %v3099_v46, %v1161_v16  ;;  %v1363_v28 = vadd.f32 %v3104_v11, %v1362_v56 }
 0x505   :  { %v1858_v29 = vpack.c.bf16 %v1371_v24, %v1371_v24  ;;  %v2005_v13 = vpop.f32.mrf.mxu0  ;;  %v2025_v58 = vpop.f32.mrf.mxu1 }
 0x506   :  { %1289 = vst.msk [vmem:[%s3366_s16 + $0xc] sm:$0xf] %vm1285_vm1, %v1842_v9  ;;  %v1840_v61 = vpack.c.bf16 %v1162_v12, %v1162_v12  ;;  %v1856_v0 = vpack.c.bf16 %v1363_v28, %v1363_v28  ;;  %v1183_v62 = vadd.f32 %v2005_v13, %v3099_v46  ;;  %v1384_v19 = vadd.f32 %v2025_v58, %v3104_v11 }
 0x507   :  { %1489 = vst.msk [vmem:[%s3367_s17 + $0xc] sm:$0xf] %vm1285_vm1, %v1858_v29  ;;  %v1174_v34 = vpop.f32.mrf.mxu0  ;;  %v1375_v63 = vpop.f32.mrf.mxu1 }
 0x508   :  { %1287 = vst.msk [vmem:[%s3366_s16 + $0x4] sm:$0xf] %vm1285_vm1, %v1840_v61  ;;  %1487 = vst.msk [vmem:[%s3367_s17 + $0x4] sm:$0xf] %vm1285_vm1, %v1856_v0  ;;  %v1845_v21 = vpack.c.bf16 %v1183_v62, %v1183_v62  ;;  %v1861_v57 = vpack.c.bf16 %v1384_v19, %v1384_v19  ;;  %v1175_v17 = vadd.f32 %v3099_v46, %v1174_v34  ;;  %v3243_v34 = vld [vmem:[%s3368_s14] ss:$0 sm:$0xff] }
 0x509   :  { %v1376_v53 = vadd.f32 %v3104_v11, %v1375_v63  ;;  %v2006_v38 = vpop.f32.mrf.mxu0  ;;  %v2026_v60 = vpop.f32.mrf.mxu1 }
 0x50a   :  { %1292 = vst.msk [vmem:[%s3366_s16 + $0x18] sm:$0xf] %vm1285_vm1, %v1845_v21  ;;  %1492 = vst.msk [vmem:[%s3367_s17 + $0x18] sm:$0xf] %vm1285_vm1, %v1861_v57  ;;  %v1843_v39 = vpack.c.bf16 %v1175_v17, %v1175_v17  ;;  %v1186_v48 = vadd.f32 %v2006_v38, %v3099_v46  ;;  %v1387_v6 = vadd.f32 %v2026_v60, %v3104_v11 }
 0x50b   :  { %v1859_v4 = vpack.c.bf16 %v1376_v53, %v1376_v53  ;;  %v1177_v7 = vpop.f32.mrf.mxu0  ;;  %v1378_v1 = vpop.f32.mrf.mxu1 }
 0x50c   :  { %1290 = vst.msk [vmem:[%s3366_s16 + $0x10] sm:$0xf] %vm1285_vm1, %v1843_v39  ;;  %v1846_v35 = vpack.c.bf16 %v1186_v48, %v1186_v48  ;;  %v1862_v8 = vpack.c.bf16 %v1387_v6, %v1387_v6  ;;  %v1178_v40 = vadd.f32 %v3099_v46, %v1177_v7  ;;  %v1379_v43 = vadd.f32 %v3104_v11, %v1378_v1 }
 0x50d   :  { %1490 = vst.msk [vmem:[%s3367_s17 + $0x10] sm:$0xf] %vm1285_vm1, %v1859_v4 }
 0x50e   :  { %1293 = vst.msk [vmem:[%s3366_s16 + $0x1c] sm:$0xf] %vm1285_vm1, %v1846_v35  ;;  %1493 = vst.msk [vmem:[%s3367_s17 + $0x1c] sm:$0xf] %vm1285_vm1, %v1862_v8  ;;  %v1844_v50 = vpack.c.bf16 %v1178_v40, %v1178_v40  ;;  %v1860_v10 = vpack.c.bf16 %v1379_v43, %v1379_v43  ;;  %v2009_v15 = vpop.f32.mrf.mxu0  ;;  %v2029_v27 = vpop.f32.mrf.mxu1 }
 0x50f   :  { %v1199_v37 = vadd.f32 %v2009_v15, %v3099_v46  ;;  %v1400_v59 = vadd.f32 %v2029_v27, %v3104_v11 }
 0x510   :  { %1291 = vst.msk [vmem:[%s3366_s16 + $0x14] sm:$0xf] %vm1285_vm1, %v1844_v50  ;;  %1491 = vst.msk [vmem:[%s3367_s17 + $0x14] sm:$0xf] %vm1285_vm1, %v1860_v10  ;;  %v1190_v25 = vpop.f32.mrf.mxu0  ;;  %v1391_v14 = vpop.f32.mrf.mxu1 }
 0x511   :  { %v1849_v51 = vpack.c.bf16 %v1199_v37, %v1199_v37  ;;  %v1865_v18 = vpack.c.bf16 %v1400_v59, %v1400_v59  ;;  %v1191_v55 = vadd.f32 %v3099_v46, %v1190_v25  ;;  %v1392_v54 = vadd.f32 %v3104_v11, %v1391_v14 }
 0x512   :  { %v2010_v30 = vpop.f32.mrf.mxu0  ;;  %v2030_v32 = vpop.f32.mrf.mxu1 }
 0x513   :  { %1296 = vst.msk [vmem:[%s3366_s16 + $0x28] sm:$0xf] %vm1285_vm1, %v1849_v51  ;;  %1496 = vst.msk [vmem:[%s3367_s17 + $0x28] sm:$0xf] %vm1285_vm1, %v1865_v18  ;;  %v1847_v26 = vpack.c.bf16 %v1191_v55, %v1191_v55  ;;  %v1863_v44 = vpack.c.bf16 %v1392_v54, %v1392_v54  ;;  %v1202_v23 = vadd.f32 %v2010_v30, %v3099_v46 }
 0x514   :  { %v1403_v52 = vadd.f32 %v2030_v32, %v3104_v11  ;;  %v1193_v36 = vpop.f32.mrf.mxu0  ;;  %v1394_v3 = vpop.f32.mrf.mxu1 }
 0x515   :  { %1294 = vst.msk [vmem:[%s3366_s16 + $0x20] sm:$0xf] %vm1285_vm1, %v1847_v26  ;;  %1494 = vst.msk [vmem:[%s3367_s17 + $0x20] sm:$0xf] %vm1285_vm1, %v1863_v44  ;;  %v1850_v47 = vpack.c.bf16 %v1202_v23, %v1202_v23  ;;  %v1194_v5 = vadd.f32 %v3099_v46, %v1193_v36  ;;  %v1395_v33 = vadd.f32 %v3104_v11, %v1394_v3 }
 0x516   :  { %v1866_v31 = vpack.c.bf16 %v1403_v52, %v1403_v52  ;;  %v2013_v49 = vpop.f32.mrf.mxu0  ;;  %v2033_v45 = vpop.f32.mrf.mxu1 }
 0x517   :  { %1297 = vst.msk [vmem:[%s3366_s16 + $0x2c] sm:$0xf] %vm1285_vm1, %v1850_v47  ;;  %v1848_v20 = vpack.c.bf16 %v1194_v5, %v1194_v5  ;;  %v1864_v41 = vpack.c.bf16 %v1395_v33, %v1395_v33  ;;  %v1215_v42 = vadd.f32 %v2013_v49, %v3099_v46  ;;  %v1416_v22 = vadd.f32 %v2033_v45, %v3104_v11 }
 0x518   :  { %1497 = vst.msk [vmem:[%s3367_s17 + $0x2c] sm:$0xf] %vm1285_vm1, %v1866_v31  ;;  %v1206_v2 = vpop.f32.mrf.mxu0  ;;  %v1407_v24 = vpop.f32.mrf.mxu1 }
 0x519   :  { %1295 = vst.msk [vmem:[%s3366_s16 + $0x24] sm:$0xf] %vm1285_vm1, %v1848_v20  ;;  %1495 = vst.msk [vmem:[%s3367_s17 + $0x24] sm:$0xf] %vm1285_vm1, %v1864_v41  ;;  %v1853_v16 = vpack.c.bf16 %v1215_v42, %v1215_v42  ;;  %v1869_v56 = vpack.c.bf16 %v1416_v22, %v1416_v22  ;;  %v1207_v9 = vadd.f32 %v3099_v46, %v1206_v2 }
 0x51a   :  { %v1408_v29 = vadd.f32 %v3104_v11, %v1407_v24  ;;  %v2014_v12 = vpop.f32.mrf.mxu0  ;;  %v2034_v28 = vpop.f32.mrf.mxu1 }
 0x51b   :  { %1300 = vst.msk [vmem:[%s3366_s16 + $0x38] sm:$0xf] %vm1285_vm1, %v1853_v16  ;;  %1500 = vst.msk [vmem:[%s3367_s17 + $0x38] sm:$0xf] %vm1285_vm1, %v1869_v56  ;;  %v1851_v13 = vpack.c.bf16 %v1207_v9, %v1207_v9  ;;  %v1218_v61 = vadd.f32 %v2014_v12, %v3099_v46  ;;  %v1419_v0 = vadd.f32 %v2034_v28, %v3104_v11 }
 0x51c   :  { %v1867_v58 = vpack.c.bf16 %v1408_v29, %v1408_v29  ;;  %v1209_v62 = vpop.f32.mrf.mxu0  ;;  %v1410_v19 = vpop.f32.mrf.mxu1 }
 0x51d   :  { %1298 = vst.msk [vmem:[%s3366_s16 + $0x30] sm:$0xf] %vm1285_vm1, %v1851_v13  ;;  %v1854_v63 = vpack.c.bf16 %v1218_v61, %v1218_v61  ;;  %v1870_v21 = vpack.c.bf16 %v1419_v0, %v1419_v0  ;;  %v1210_v57 = vadd.f32 %v3099_v46, %v1209_v62  ;;  %v1411_v17 = vadd.f32 %v3104_v11, %v1410_v19 }
 0x51e   :  { %1498 = vst.msk [vmem:[%s3367_s17 + $0x30] sm:$0xf] %vm1285_vm1, %v1867_v58  ;;  %v2041_v53 = vpop.f32.mrf.mxu0 }
 0x51f   :  { %1301 = vst.msk [vmem:[%s3366_s16 + $0x3c] sm:$0xf] %vm1285_vm1, %v1854_v63  ;;  %1501 = vst.msk [vmem:[%s3367_s17 + $0x3c] sm:$0xf] %vm1285_vm1, %v1870_v21  ;;  %v1852_v38 = vpack.c.bf16 %v1210_v57, %v1210_v57  ;;  %v1868_v60 = vpack.c.bf16 %v1411_v17, %v1411_v17  ;;  %v1568_v39 = vadd.f32 %v2041_v53, %v3243_v34 }
 0x520   :  { %v1559_v4 = vpop.f32.mrf.mxu0 }
 0x521   :  { %1299 = vst.msk [vmem:[%s3366_s16 + $0x34] sm:$0xf] %vm1285_vm1, %v1852_v38  ;;  %1499 = vst.msk [vmem:[%s3367_s17 + $0x34] sm:$0xf] %vm1285_vm1, %v1868_v60  ;;  %v1873_v46 = vpack.c.bf16 %v1568_v39, %v1568_v39  ;;  %v1560_v11 = vadd.f32 %v3243_v34, %v1559_v4 }
 0x522   :  { %v2042_v48 = vpop.f32.mrf.mxu0 }
 0x523   :  { %1688 = vst.msk [vmem:[%s3369_s18 + $0x8] sm:$0xf] %vm1285_vm1, %v1873_v46  ;;  %v1871_v6 = vpack.c.bf16 %v1560_v11, %v1560_v11  ;;  %v1571_v7 = vadd.f32 %v2042_v48, %v3243_v34 }
 0x524   :  { %v1562_v1 = vpop.f32.mrf.mxu0 }
 0x525   :  { %1686 = vst.msk [vmem:[%s3369_s18] sm:$0xf] %vm1285_vm1, %v1871_v6  ;;  %v1874_v35 = vpack.c.bf16 %v1571_v7, %v1571_v7  ;;  %v1563_v8 = vadd.f32 %v3243_v34, %v1562_v1 }
 0x526   :  { %v2045_v40 = vpop.f32.mrf.mxu0 }
 0x527   :  { %1689 = vst.msk [vmem:[%s3369_s18 + $0xc] sm:$0xf] %vm1285_vm1, %v1874_v35  ;;  %v1872_v43 = vpack.c.bf16 %v1563_v8, %v1563_v8  ;;  %v1584_v50 = vadd.f32 %v2045_v40, %v3243_v34 }
 0x528   :  { %v1575_v10 = vpop.f32.mrf.mxu0 }
 0x529   :  { %1687 = vst.msk [vmem:[%s3369_s18 + $0x4] sm:$0xf] %vm1285_vm1, %v1872_v43  ;;  %v1877_v15 = vpack.c.bf16 %v1584_v50, %v1584_v50  ;;  %v1576_v27 = vadd.f32 %v3243_v34, %v1575_v10 }
 0x52a   :  { %v2046_v37 = vpop.f32.mrf.mxu0 }
 0x52b   :  { %1692 = vst.msk [vmem:[%s3369_s18 + $0x18] sm:$0xf] %vm1285_vm1, %v1877_v15  ;;  %v1875_v59 = vpack.c.bf16 %v1576_v27, %v1576_v27  ;;  %v1587_v25 = vadd.f32 %v2046_v37, %v3243_v34 }
 0x52c   :  { %v1578_v14 = vpop.f32.mrf.mxu0 }
 0x52d   :  { %1690 = vst.msk [vmem:[%s3369_s18 + $0x10] sm:$0xf] %vm1285_vm1, %v1875_v59  ;;  %v1878_v51 = vpack.c.bf16 %v1587_v25, %v1587_v25  ;;  %v1579_v18 = vadd.f32 %v3243_v34, %v1578_v14 }
 0x52e   :  { %v2049_v55 = vpop.f32.mrf.mxu0 }
 0x52f   :  { %1693 = vst.msk [vmem:[%s3369_s18 + $0x1c] sm:$0xf] %vm1285_vm1, %v1878_v51  ;;  %v1876_v54 = vpack.c.bf16 %v1579_v18, %v1579_v18  ;;  %v1600_v30 = vadd.f32 %v2049_v55, %v3243_v34 }
 0x530   :  { %v1591_v32 = vpop.f32.mrf.mxu0 }
 0x531   :  { %1691 = vst.msk [vmem:[%s3369_s18 + $0x14] sm:$0xf] %vm1285_vm1, %v1876_v54  ;;  %v1881_v26 = vpack.c.bf16 %v1600_v30, %v1600_v30  ;;  %v1592_v44 = vadd.f32 %v3243_v34, %v1591_v32 }
 0x532   :  { %v2050_v23 = vpop.f32.mrf.mxu0 }
 0x533   :  { %1696 = vst.msk [vmem:[%s3369_s18 + $0x28] sm:$0xf] %vm1285_vm1, %v1881_v26  ;;  %v1879_v52 = vpack.c.bf16 %v1592_v44, %v1592_v44  ;;  %v1603_v36 = vadd.f32 %v2050_v23, %v3243_v34 }
 0x534   :  { %v1594_v3 = vpop.f32.mrf.mxu0 }
 0x535   :  { %1694 = vst.msk [vmem:[%s3369_s18 + $0x20] sm:$0xf] %vm1285_vm1, %v1879_v52  ;;  %v1882_v47 = vpack.c.bf16 %v1603_v36, %v1603_v36  ;;  %v1595_v31 = vadd.f32 %v3243_v34, %v1594_v3 }
 0x536   :  { %v2053_v5 = vpop.f32.mrf.mxu0 }
 0x537   :  { %1697 = vst.msk [vmem:[%s3369_s18 + $0x2c] sm:$0xf] %vm1285_vm1, %v1882_v47  ;;  %v1880_v33 = vpack.c.bf16 %v1595_v31, %v1595_v31  ;;  %v1616_v49 = vadd.f32 %v2053_v5, %v3243_v34 }
 0x538   :  { %v1607_v45 = vpop.f32.mrf.mxu0 }
 0x539   :  { %1695 = vst.msk [vmem:[%s3369_s18 + $0x24] sm:$0xf] %vm1285_vm1, %v1880_v33  ;;  %v1885_v20 = vpack.c.bf16 %v1616_v49, %v1616_v49  ;;  %v1608_v41 = vadd.f32 %v3243_v34, %v1607_v45 }
 0x53a   :  { %v2054_v42 = vpop.f32.mrf.mxu0 }
 0x53b   :  { %1700 = vst.msk [vmem:[%s3369_s18 + $0x38] sm:$0xf] %vm1285_vm1, %v1885_v20  ;;  %v1883_v22 = vpack.c.bf16 %v1608_v41, %v1608_v41  ;;  %v1619_v2 = vadd.f32 %v2054_v42, %v3243_v34 }
 0x53c   :  { %v1610_v24 = vpop.f32.mrf.mxu0 }
 0x53d   :  { %1698 = vst.msk [vmem:[%s3369_s18 + $0x30] sm:$0xf] %vm1285_vm1, %v1883_v22  ;;  %v1886_v16 = vpack.c.bf16 %v1619_v2, %v1619_v2  ;;  %v1611_v56 = vadd.f32 %v3243_v34, %v1610_v24 }
 0x53f   :  { %1701 = vst.msk [vmem:[%s3369_s18 + $0x3c] sm:$0xf] %vm1285_vm1, %v1886_v16  ;;  %v1884_v9 = vpack.c.bf16 %v1611_v56, %v1611_v56 }
 0x541   :  { %1699 = vst.msk [vmem:[%s3369_s18 + $0x34] sm:$0xf] %vm1285_vm1, %v1884_v9 }

// kernel: conformer_block.5
= control target key start
LH: loop header
LB: loop body
LE: loop exit
PB: predicated region body
PF: predicated region fallthrough
CT: control target
= control target key end

     0   :  { %vm87_vm0 = vcmask 261120   ;;  %s2988_s28 = smov 64   ;;  %vm743_vm1 = vcmask 523264   ;;  %s4606_s0 = inlined_call_operand.vmem [shape: f32[8,16,32], index: 0, kind: input, shape index: {}]   ;;  %s4607_s3 = inlined_call_operand.vmem [shape: bf16[32,128], index: 3, kind: input, shape index: {}]   ;;  %s4608_s1 = inlined_call_operand.vmem [shape: f32[1,32], index: 1, kind: input, shape index: {}]   ;;  %s4609_s2 = inlined_call_operand.vmem [shape: f32[1,32], index: 2, kind: input, shape index: {}]   ;;  %s4610_s4 = inlined_call_operand.vmem [shape: f32[1,128], index: 4, kind: input, shape index: {}]   ;;  %s4611_s11 = inlined_call_operand.vmem [shape: bf16[64,32], index: 11, kind: input, shape index: {}]   ;;  %s4612_s10 = inlined_call_operand.vmem [shape: f32[1,64], index: 10, kind: input, shape index: {}]   ;;  %s4613_s5 = inlined_call_operand.vmem [shape: f32[31,64], index: 5, kind: input, shape index: {}]   ;;  %s4614_s7 = inlined_call_operand.vmem [shape: f32[1,64], index: 7, kind: input, shape index: {}]   ;;  %s4615_s6 = inlined_call_operand.vmem [shape: f32[1,64], index: 6, kind: input, shape index: {}]   ;;  %s4616_s9 = inlined_call_operand.vmem [shape: f32[1,64], index: 9, kind: input, shape index: {}]   ;;  %s4617_s8 = inlined_call_operand.vmem [shape: f32[1,64], index: 8, kind: input, shape index: {}]   ;;  %s4618_s12 = inlined_call_operand.vmem [shape: f32[1,32], index: 12, kind: input, shape index: {}]   ;;  %s4619_s15 = inlined_call_operand.vmem [shape: bf16[32,128], index: 15, kind: input, shape index: {}]   ;;  %s4620_s13 = inlined_call_operand.vmem [shape: f32[1,32], index: 13, kind: input, shape index: {}]   ;;  %s4621_s14 = inlined_call_operand.vmem [shape: f32[1,32], index: 14, kind: input, shape index: {}]   ;;  %s4622_s17 = inlined_call_operand.vmem [shape: bf16[128,32], index: 17, kind: input, shape index: {}]   ;;  %s4623_s16 = inlined_call_operand.vmem [shape: f32[1,128], index: 16, kind: input, shape index: {}]   ;;  %s4624_s18 = inlined_call_operand.vmem [shape: f32[1,32], index: 18, kind: input, shape index: {}]   ;;  %s4625_s19 = inlined_call_operand.vmem [shape: f32[1,32], index: 19, kind: input, shape index: {}]   ;;  %s4626_s20 = inlined_call_operand.vmem [shape: f32[1,32], index: 20, kind: input, shape index: {}]   ;;  %s4627_s21 = inlined_call_operand.vmem [shape: f32[8,16,32], index: 21, kind: output, shape index: {}]  }
   0x1   :  { %4643 = sst [smem:[#allocation29_spill]] %s4606_s0 }
   0x2   :  { %4644 = sst [smem:[#allocation30_spill]] %s4607_s3 }
   0x3   :  { %4645 = sst [smem:[#allocation31_spill]] %s4608_s1 }
   0x4   :  { %4646 = sst [smem:[#allocation32_spill]] %s4609_s2 }
   0x5   :  { %4647 = sst [smem:[#allocation33_spill]] %s4610_s4 }
   0x6   :  { %4648 = sst [smem:[#allocation34_spill]] %s4611_s11 }
   0x7   :  { %s4649_s26 = sld [smem:[#allocation29_spill]] }
   0x8   :  { %s4650_s0 = sld [smem:[#allocation30_spill]] }
   0x9   :  { %s4651_s23 = sld [smem:[#allocation31_spill]] }
   0xa   :  { %s4652_s1 = sld [smem:[#allocation32_spill]] }
   0xb   :  { %s4653_s2 = sld [smem:[#allocation33_spill]] }
   0xc   :  { %s4660_s4 = sld [smem:[#allocation34_spill]] }
   0xd   :  { %v69_v0 = vld [vmem:[%s4649_s26] sm:$0xff]  ;;  %v71_v1 = vld [vmem:[%s4649_s26 + $0x10] sm:$0xff]  ;;  %v70_v2 = vld [vmem:[%s4649_s26 + $0x8] sm:$0xff] }
   0xe   :  { %v88_v3 = vsel %vm87_vm0, %v69_v0, 0.0  ;;  %v94_v4 = vsel %vm87_vm0, %v71_v1, 0.0  ;;  %v72_v5 = vld [vmem:[%s4649_s26 + $0x18] sm:$0xff]  ;;  %v91_v6 = vsel %vm87_vm0, %v70_v2, 0.0  ;;  %v73_v8 = vld [vmem:[%s4649_s26 + $0x20] sm:$0xff]  ;;  %v74_v9 = vld [vmem:[%s4649_s26 + $0x28] sm:$0xff] }
   0xf   :  { %89 = vadd.xlane.f32.xlu0 %v88_v3  ;;  %95 = vadd.xlane.f32.xlu1 %v94_v4  ;;  %v97_v7 = vsel %vm87_vm0, %v72_v5, 0.0  ;;  %v100_v10 = vsel %vm87_vm0, %v73_v8, 0.0  ;;  %v103_v11 = vsel %vm87_vm0, %v74_v9, 0.0  ;;  %v3126_v12 = vld [vmem:[%s4649_s26 + $0x30] sm:$0xff]  ;;  %v3131_v13 = vld [vmem:[%s4649_s26 + $0x38] sm:$0xff]  ;;  %v3140_v16 = vld [vmem:[%s4649_s26 + $0x40] sm:$0xff] }
  0x10   :  { %v106_v14 = vsel %vm87_vm0, %v3126_v12, 0.0  ;;  %v109_v15 = vsel %vm87_vm0, %v3131_v13, 0.0  ;;  %v3145_v17 = vld [vmem:[%s4649_s26 + $0x48] sm:$0xff]  ;;  %v112_v18 = vsel %vm87_vm0, %v3140_v16, 0.0  ;;  %v3154_v20 = vld [vmem:[%s4649_s26 + $0x50] sm:$0xff]  ;;  %v3159_v21 = vld [vmem:[%s4649_s26 + $0x58] sm:$0xff] }
  0x11   :  { %v115_v19 = vsel %vm87_vm0, %v3145_v17, 0.0  ;;  %v118_v22 = vsel %vm87_vm0, %v3154_v20, 0.0  ;;  %v121_v23 = vsel %vm87_vm0, %v3159_v21, 0.0  ;;  %v3168_v24 = vld [vmem:[%s4649_s26 + $0x60] sm:$0xff]  ;;  %v3173_v25 = vld [vmem:[%s4649_s26 + $0x68] sm:$0xff]  ;;  %v3182_v28 = vld [vmem:[%s4649_s26 + $0x70] sm:$0xff] }
  0x12   :  { %v124_v26 = vsel %vm87_vm0, %v3168_v24, 0.0  ;;  %v127_v27 = vsel %vm87_vm0, %v3173_v25, 0.0  ;;  %v3187_v29 = vld [vmem:[%s4649_s26 + $0x78] sm:$0xff]  ;;  %v130_v30 = vsel %vm87_vm0, %v3182_v28, 0.0 }
  0x13   :  { %92 = vadd.xlane.f32.xlu0 %v91_v6  ;;  %98 = vadd.xlane.f32.xlu1 %v97_v7  ;;  %v133_v31 = vsel %vm87_vm0, %v3187_v29, 0.0 }
  0x17   :  { %101 = vadd.xlane.f32.xlu0 %v100_v10  ;;  %104 = vadd.xlane.f32.xlu1 %v103_v11 }
  0x1b   :  { %107 = vadd.xlane.f32.xlu0 %v106_v14  ;;  %110 = vadd.xlane.f32.xlu1 %v109_v15 }
  0x1f   :  { %113 = vadd.xlane.f32.xlu0 %v112_v18  ;;  %116 = vadd.xlane.f32.xlu1 %v115_v19 }
  0x23   :  { %119 = vadd.xlane.f32.xlu0 %v118_v22  ;;  %122 = vadd.xlane.f32.xlu1 %v121_v23 }
  0x27   :  { %125 = vadd.xlane.f32.xlu0 %v124_v26  ;;  %128 = vadd.xlane.f32.xlu1 %v127_v27 }
  0x2b   :  { %131 = vadd.xlane.f32.xlu0 %v130_v30  ;;  %134 = vadd.xlane.f32.xlu1 %v133_v31 }
  0x98   :  { %v90_v32 = vpop.xlane.xlu0 %89  ;;  %v96_v33 = vpop.xlane.xlu1 %95 }
  0x99   :  { %v137_v34 = vmul.f32 0.03125, %v90_v32  ;;  %v139_v35 = vmul.f32 0.03125, %v96_v33 }
  0x9b   :  { %v3193_v36 = vsub.f32 %v69_v0, %v137_v34  ;;  %v3195_v37 = vsub.f32 %v71_v1, %v139_v35 }
  0x9c   :  { %v93_v38 = vpop.xlane.xlu0 %92  ;;  %v99_v39 = vpop.xlane.xlu1 %98 }
  0x9d   :  { %v138_v40 = vmul.f32 0.03125, %v93_v38  ;;  %v140_v41 = vmul.f32 0.03125, %v99_v39  ;;  %v169_v42 = vmul.f32 %v3193_v36, %v3193_v36  ;;  %v171_v43 = vmul.f32 %v3195_v37, %v3195_v37 }
  0x9f   :  { %v3201_v44 = vsub.f32 %v70_v2, %v138_v40  ;;  %v3203_v45 = vsub.f32 %v72_v5, %v140_v41  ;;  %v185_v46 = vsel %vm87_vm0, %v169_v42, 0.0  ;;  %v191_v49 = vsel %vm87_vm0, %v171_v43, 0.0 }
  0xa0   :  { %186 = vadd.xlane.f32.xlu0 %v185_v46  ;;  %v102_v47 = vpop.xlane.xlu0 %101  ;;  %v105_v48 = vpop.xlane.xlu1 %104 }
  0xa1   :  { %v141_v50 = vmul.f32 0.03125, %v102_v47  ;;  %v142_v51 = vmul.f32 0.03125, %v105_v48  ;;  %v170_v52 = vmul.f32 %v3201_v44, %v3201_v44  ;;  %v172_v53 = vmul.f32 %v3203_v45, %v3203_v45 }
  0xa3   :  { %v3211_v54 = vsub.f32 %v73_v8, %v141_v50  ;;  %v3213_v55 = vsub.f32 %v74_v9, %v142_v51  ;;  %v188_v56 = vsel %vm87_vm0, %v170_v52, 0.0  ;;  %v194_v59 = vsel %vm87_vm0, %v172_v53, 0.0  ;;  %v2667_v53 = vld [vmem:[%s4650_s0] sm:$0xff]  }
  0xa4   :  { %192 = vadd.xlane.f32.xlu0 %v191_v49  ;;  %189 = vadd.xlane.f32.xlu1 %v188_v56  ;;  %v108_v57 = vpop.xlane.xlu0 %107  ;;  %v111_v58 = vpop.xlane.xlu1 %110 }
  0xa5   :  { %v143_v60 = vmul.f32 0.03125, %v108_v57  ;;  %v144_v61 = vmul.f32 0.03125, %v111_v58  ;;  %v173_v62 = vmul.f32 %v3211_v54, %v3211_v54  ;;  %v174_v63 = vmul.f32 %v3213_v55, %v3213_v55 }
  0xa7   :  { %v3222_v0 = vsub.f32 %v3126_v12, %v143_v60  ;;  %v3225_v1 = vsub.f32 %v3131_v13, %v144_v61  ;;  %v197_v2 = vsel %vm87_vm0, %v173_v62, 0.0  ;;  %v200_v5 = vsel %vm87_vm0, %v174_v63, 0.0 }
  0xa8   :  { %195 = vadd.xlane.f32.xlu1 %v194_v59  ;;  %198 = vadd.xlane.f32.xlu0 %v197_v2  ;;  %v114_v3 = vpop.xlane.xlu0 %113  ;;  %v117_v4 = vpop.xlane.xlu1 %116 }
  0xa9   :  { %v145_v6 = vmul.f32 0.03125, %v114_v3  ;;  %v146_v7 = vmul.f32 0.03125, %v117_v4  ;;  %v175_v8 = vmul.f32 %v3222_v0, %v3222_v0  ;;  %v176_v9 = vmul.f32 %v3225_v1, %v3225_v1 }
  0xab   :  { %v3234_v10 = vsub.f32 %v3140_v16, %v145_v6  ;;  %v3237_v11 = vsub.f32 %v3145_v17, %v146_v7  ;;  %v203_v12 = vsel %vm87_vm0, %v175_v8, 0.0  ;;  %v206_v15 = vsel %vm87_vm0, %v176_v9, 0.0 }
  0xac   :  { %201 = vadd.xlane.f32.xlu1 %v200_v5  ;;  %204 = vadd.xlane.f32.xlu0 %v203_v12  ;;  %v120_v13 = vpop.xlane.xlu0 %119  ;;  %v123_v14 = vpop.xlane.xlu1 %122 }
  0xad   :  { %v147_v18 = vmul.f32 0.03125, %v120_v13  ;;  %v148_v19 = vmul.f32 0.03125, %v123_v14  ;;  %v177_v22 = vmul.f32 %v3234_v10, %v3234_v10  ;;  %v178_v16 = vmul.f32 %v3237_v11, %v3237_v11 }
  0xaf   :  { %v3246_v23 = vsub.f32 %v3154_v20, %v147_v18  ;;  %v3249_v17 = vsub.f32 %v3159_v21, %v148_v19  ;;  %v209_v26 = vsel %vm87_vm0, %v177_v22, 0.0  ;;  %v212_v31 = vsel %vm87_vm0, %v178_v16, 0.0 }
  0xb0   :  { %207 = vadd.xlane.f32.xlu1 %v206_v15  ;;  %210 = vadd.xlane.f32.xlu0 %v209_v26  ;;  %v126_v27 = vpop.xlane.xlu0 %125  ;;  %v129_v30 = vpop.xlane.xlu1 %128 }
  0xb1   :  { %v149_v32 = vmul.f32 0.03125, %v126_v27  ;;  %v150_v33 = vmul.f32 0.03125, %v129_v30  ;;  %v179_v34 = vmul.f32 %v3246_v23, %v3246_v23  ;;  %v180_v20 = vmul.f32 %v3249_v17, %v3249_v17 }
  0xb3   :  { %v3258_v35 = vsub.f32 %v3168_v24, %v149_v32  ;;  %v3261_v21 = vsub.f32 %v3173_v25, %v150_v33  ;;  %v215_v38 = vsel %vm87_vm0, %v179_v34, 0.0  ;;  %v218_v41 = vsel %vm87_vm0, %v180_v20, 0.0  ;;  %v3292_v32 = vld [vmem:[%s4651_s23] ss:$0 sm:$0xff] }
  0xb4   :  { %213 = vadd.xlane.f32.xlu1 %v212_v31  ;;  %216 = vadd.xlane.f32.xlu0 %v215_v38  ;;  %v132_v39 = vpop.xlane.xlu0 %131  ;;  %v135_v40 = vpop.xlane.xlu1 %134 }
  0xb5   :  { %v151_v42 = vmul.f32 0.03125, %v132_v39  ;;  %v152_v43 = vmul.f32 0.03125, %v135_v40  ;;  %v181_v46 = vmul.f32 %v3258_v35, %v3258_v35  ;;  %v182_v24 = vmul.f32 %v3261_v21, %v3261_v21 }
  0xb7   :  { %v3270_v47 = vsub.f32 %v3182_v28, %v151_v42  ;;  %v3273_v25 = vsub.f32 %v3187_v29, %v152_v43  ;;  %v221_v48 = vsel %vm87_vm0, %v181_v46, 0.0  ;;  %v224_v49 = vsel %vm87_vm0, %v182_v24, 0.0  ;;  %v2666_v29 = vld [vmem:[%s4650_s0 + $0x8] sm:$0xff]   ;;  %v3299_v24 = vld [vmem:[%s4652_s1] ss:$0 sm:$0xff] }
  0xb8   :  { %219 = vadd.xlane.f32.xlu1 %v218_v41  ;;  %222 = vadd.xlane.f32.xlu0 %v221_v48 }
  0xb9   :  { %v183_v50 = vmul.f32 %v3270_v47, %v3270_v47  ;;  %v184_v51 = vmul.f32 %v3273_v25, %v3273_v25  ;;  %2569 = vmatprep.subr.bf16.mxu0 %v2666_v29 }
  0xba   :  { %2570 = vmatpush3.bf16.msra.mxu0 %v2666_v29 }
  0xbb   :  { %v227_v52 = vsel %vm87_vm0, %v183_v50, 0.0  ;;  %v230_v28 = vsel %vm87_vm0, %v184_v51, 0.0  ;;  %2571 = vmatprep.subr.bf16.mxu0 %v2667_v53 }
  0xbc   :  { %225 = vadd.xlane.f32.xlu1 %v224_v49  ;;  %228 = vadd.xlane.f32.xlu0 %v227_v52 }
  0xbe   :  { %2572 = vmatpush3.bf16.msra.mxu0 %v2667_v53 }
  0xc0   :  { %231 = vadd.xlane.f32.xlu1 %v230_v28 }
 0x129   :  { %v187_v56 = vpop.xlane.xlu0 %186 }
 0x12a   :  { %v233_v57 = vmul.f32 0.03125, %v187_v56 }
 0x12c   :  { %v249_v58 = vadd.f32 1e-05, %v233_v57 }
 0x12d   :  { %v190_v59 = vpop.xlane.xlu1 %189  ;;  %v193_v60 = vpop.xlane.xlu0 %192 }
 0x12e   :  { %2682 = vrsqrt.f32 %v249_v58  ;;  %v234_v61 = vmul.f32 0.03125, %v190_v59  ;;  %v235_v62 = vmul.f32 0.03125, %v193_v60 }
 0x130   :  { %v250_v63 = vadd.f32 1e-05, %v234_v61  ;;  %v251_v2 = vadd.f32 1e-05, %v235_v62 }
 0x131   :  { %v196_v3 = vpop.xlane.xlu1 %195  ;;  %v199_v4 = vpop.xlane.xlu0 %198 }
 0x132   :  { %2684 = vrsqrt.f32 %v250_v63  ;;  %v236_v5 = vmul.f32 0.03125, %v196_v3  ;;  %v237_v6 = vmul.f32 0.03125, %v199_v4 }
 0x133   :  { %2686 = vrsqrt.f32 %v251_v2 }
 0x134   :  { %v252_v7 = vadd.f32 1e-05, %v236_v5  ;;  %v253_v8 = vadd.f32 1e-05, %v237_v6 }
 0x135   :  { %v202_v9 = vpop.xlane.xlu1 %201  ;;  %v205_v12 = vpop.xlane.xlu0 %204 }
 0x136   :  { %2688 = vrsqrt.f32 %v252_v7  ;;  %v238_v13 = vmul.f32 0.03125, %v202_v9  ;;  %v239_v14 = vmul.f32 0.03125, %v205_v12 }
 0x137   :  { %2690 = vrsqrt.f32 %v253_v8 }
 0x138   :  { %v254_v15 = vadd.f32 1e-05, %v238_v13  ;;  %v255_v18 = vadd.f32 1e-05, %v239_v14 }
 0x139   :  { %v208_v19 = vpop.xlane.xlu1 %207  ;;  %v211_v22 = vpop.xlane.xlu0 %210 }
 0x13a   :  { %2692 = vrsqrt.f32 %v254_v15  ;;  %v240_v16 = vmul.f32 0.03125, %v208_v19  ;;  %v241_v26 = vmul.f32 0.03125, %v211_v22 }
 0x13b   :  { %v2683_v27 = vpop.eup %2682  ;;  %2694 = vrsqrt.f32 %v255_v18 }
 0x13c   :  { %v256_v30 = vadd.f32 1e-05, %v240_v16  ;;  %v257_v31 = vadd.f32 1e-05, %v241_v26  ;;  %v281_v33 = vmul.f32 %v2683_v27, %v3193_v36 }
 0x13d   :  { %v214_v34 = vpop.xlane.xlu1 %213  ;;  %v217_v20 = vpop.xlane.xlu0 %216 }
 0x13e   :  { %2696 = vrsqrt.f32 %v256_v30  ;;  %v242_v38 = vmul.f32 0.03125, %v214_v34  ;;  %v243_v39 = vmul.f32 0.03125, %v217_v20  ;;  %v303_v41 = vmul.f32 %v3292_v32, %v281_v33 }
 0x13f   :  { %v2685_v40 = vpop.eup %2684  ;;  %2698 = vrsqrt.f32 %v257_v31 }
 0x140   :  { %v2687_v42 = vpop.eup %2686  ;;  %v258_v43 = vadd.f32 1e-05, %v242_v38  ;;  %v259_v46 = vadd.f32 1e-05, %v243_v39  ;;  %v282_v48 = vmul.f32 %v2685_v40, %v3201_v44  ;;  %v325_v53 = vadd.f32 %v3299_v24, %v303_v41 }
 0x141   :  { %v220_v36 = vpop.xlane.xlu1 %219  ;;  %v223_v49 = vpop.xlane.xlu0 %222  ;;  %v283_v50 = vmul.f32 %v2687_v42, %v3195_v37 }
 0x142   :  { %2700 = vrsqrt.f32 %v258_v43  ;;  %v244_v51 = vmul.f32 0.03125, %v220_v36  ;;  %v245_v52 = vmul.f32 0.03125, %v223_v49  ;;  %v304_v28 = vmul.f32 %v3292_v32, %v282_v48 }
 0x143   :  { %v2689_v29 = vpop.eup %2688  ;;  %2702 = vrsqrt.f32 %v259_v46  ;;  %v305_v37 = vmul.f32 %v3292_v32, %v283_v50 }
 0x144   :  { %v2691_v56 = vpop.eup %2690  ;;  %v260_v57 = vadd.f32 1e-05, %v244_v51  ;;  %v261_v58 = vadd.f32 1e-05, %v245_v52  ;;  %v326_v59 = vadd.f32 %v3299_v24, %v304_v28  ;;  %v284_v44 = vmul.f32 %v2689_v29, %v3203_v45 }
 0x145   :  { %v226_v60 = vpop.xlane.xlu1 %225  ;;  %v229_v61 = vpop.xlane.xlu0 %228  ;;  %v285_v62 = vmul.f32 %v2691_v56, %v3211_v54  ;;  %v327_v54 = vadd.f32 %v3299_v24, %v305_v37 }
 0x146   :  { %2704 = vrsqrt.f32 %v260_v57  ;;  %v246_v63 = vmul.f32 0.03125, %v226_v60  ;;  %v247_v2 = vmul.f32 0.03125, %v229_v61  ;;  %v341_v3 = vpack.c.bf16 %v326_v59, %v325_v53 }
 0x147   :  { %v2693_v4 = vpop.eup %2692  ;;  %2706 = vrsqrt.f32 %v261_v58  ;;  %v306_v5 = vmul.f32 %v3292_v32, %v284_v44  ;;  %v307_v6 = vmul.f32 %v3292_v32, %v285_v62 }
 0x148   :  { %v2695_v7 = vpop.eup %2694  ;;  %v262_v8 = vadd.f32 1e-05, %v246_v63  ;;  %v263_v9 = vadd.f32 1e-05, %v247_v2  ;;  %2573 = vmatprep.mubr.msk.bf16.mxu0 %vm87_vm0, %v341_v3  ;;  %v286_v45 = vmul.f32 %v2693_v4, %v3213_v55 }
 0x149   :  { %v232_v12 = vpop.xlane.xlu1 %231  ;;  %v328_v13 = vadd.f32 %v3299_v24, %v306_v5  ;;  %v287_v14 = vmul.f32 %v2695_v7, %v3222_v0  ;;  %v329_v16 = vadd.f32 %v3299_v24, %v307_v6 }
 0x14a   :  { %2708 = vrsqrt.f32 %v262_v8  ;;  %v248_v15 = vmul.f32 0.03125, %v232_v12  ;;  %v308_v18 = vmul.f32 %v3292_v32, %v286_v45 }
 0x14b   :  { %v2697_v19 = vpop.eup %2696  ;;  %2710 = vrsqrt.f32 %v263_v9  ;;  %v342_v22 = vpack.c.bf16 %v328_v13, %v327_v54  ;;  %v309_v31 = vmul.f32 %v3292_v32, %v287_v14 }
 0x14c   :  { %v2699_v26 = vpop.eup %2698  ;;  %v264_v27 = vadd.f32 1e-05, %v248_v15  ;;  %v330_v55 = vadd.f32 %v3299_v24, %v308_v18  ;;  %v288_v30 = vmul.f32 %v2697_v19, %v3225_v1 }
 0x14d   :  { %2574 = vmatmul.mubr.msk.bf16.vlgmr.msra.gmra.mxu0 %vm87_vm0, %v342_v22  ;;  %v289_v0 = vmul.f32 %v2699_v26, %v3234_v10  ;;  %v331_v39 = vadd.f32 %v3299_v24, %v309_v31 }
 0x14e   :  { %2712 = vrsqrt.f32 %v264_v27  ;;  %v343_v33 = vpack.c.bf16 %v330_v55, %v329_v16  ;;  %v310_v34 = vmul.f32 %v3292_v32, %v288_v30 }
 0x14f   :  { %v2701_v20 = vpop.eup %2700  ;;  %v311_v41 = vmul.f32 %v3292_v32, %v289_v0 }
 0x150   :  { %v2703_v38 = vpop.eup %2702  ;;  %2577 = vmatprep.mubr.msk.bf16.mxu0 %vm87_vm0, %v343_v33  ;;  %v332_v40 = vadd.f32 %v3299_v24, %v310_v34  ;;  %v290_v1 = vmul.f32 %v2701_v20, %v3237_v11 }
 0x151   :  { %v291_v42 = vmul.f32 %v2703_v38, %v3246_v23  ;;  %v333_v36 = vadd.f32 %v3299_v24, %v311_v41 }
 0x152   :  { %v344_v43 = vpack.c.bf16 %v332_v40, %v331_v39  ;;  %v312_v10 = vmul.f32 %v3292_v32, %v290_v1 }
 0x153   :  { %v2705_v46 = vpop.eup %2704  ;;  %v313_v51 = vmul.f32 %v3292_v32, %v291_v42 }
 0x154   :  { %v2707_v48 = vpop.eup %2706  ;;  %v334_v49 = vadd.f32 %v3299_v24, %v312_v10  ;;  %v292_v50 = vmul.f32 %v2705_v46, %v3249_v17 }
 0x155   :  { %2578 = vmatmul.mubr.msk.bf16.gmra.mxu0 %vm87_vm0, %v344_v43  ;;  %v293_v11 = vmul.f32 %v2707_v48, %v3258_v35  ;;  %v335_v53 = vadd.f32 %v3299_v24, %v313_v51 }
 0x156   :  { %v345_v52 = vpack.c.bf16 %v334_v49, %v333_v36  ;;  %v314_v23 = vmul.f32 %v3292_v32, %v292_v50 }
 0x157   :  { %v2709_v28 = vpop.eup %2708  ;;  %v315_v17 = vmul.f32 %v3292_v32, %v293_v11 }
 0x158   :  { %v2711_v29 = vpop.eup %2710  ;;  %2581 = vmatprep.mubr.msk.bf16.mxu0 %vm87_vm0, %v345_v52  ;;  %v336_v56 = vadd.f32 %v3299_v24, %v314_v23  ;;  %v294_v57 = vmul.f32 %v2709_v28, %v3261_v21 }
 0x159   :  { %v295_v58 = vmul.f32 %v2711_v29, %v3270_v47  ;;  %v337_v60 = vadd.f32 %v3299_v24, %v315_v17 }
 0x15a   :  { %v346_v59 = vpack.c.bf16 %v336_v56, %v335_v53  ;;  %v316_v35 = vmul.f32 %v3292_v32, %v294_v57 }
 0x15b   :  { %v2713_v44 = vpop.eup %2712  ;;  %v317_v62 = vmul.f32 %v3292_v32, %v295_v58 }
 0x15c   :  { %v338_v61 = vadd.f32 %v3299_v24, %v316_v35  ;;  %v296_v37 = vmul.f32 %v2713_v44, %v3273_v25  ;;  %v3358_v25 = vld [vmem:[%s4653_s2] ss:$0 sm:$0xff] }
 0x15d   :  { %2582 = vmatmul.mubr.msk.bf16.gmra.mxu0 %vm87_vm0, %v346_v59  ;;  %v339_v47 = vadd.f32 %v3299_v24, %v317_v62 }
 0x15e   :  { %v347_v63 = vpack.c.bf16 %v338_v61, %v337_v60  ;;  %v318_v21 = vmul.f32 %v3292_v32, %v296_v37 }
 0x160   :  { %2585 = vmatprep.mubr.msk.bf16.mxu0 %vm87_vm0, %v347_v63  ;;  %v340_v2 = vadd.f32 %v3299_v24, %v318_v21 }
 0x162   :  { %v348_v3 = vpack.c.bf16 %v340_v2, %v339_v47 }
 0x165   :  { %2586 = vmatmul.mubr.msk.bf16.gmra.mxu0 %vm87_vm0, %v348_v3 }
 0x20d   :  { %v2575_v4 = vpop.f32.mrf.mxu0 }
 0x20e   :  { %v3361_v5 = vadd.f32 %v2575_v4, %v3358_v25 }
 0x20f   :  { %v430_v6 = vpop.f32.mrf.mxu0 }
 0x210   :  { %v2435_v32 = vmul.f32 -1.442695, %v3361_v5  ;;  %v3365_v7 = vadd.f32 %v3358_v25, %v430_v6 }
 0x211   :  { %v2576_v8 = vpop.f32.mrf.mxu0 }
 0x212   :  { %2714 = vpow2.f32 %v2435_v32  ;;  %v2433_v24 = vmul.f32 -1.442695, %v3365_v7  ;;  %v3369_v9 = vadd.f32 %v2576_v8, %v3358_v25 }
 0x213   :  { %v433_v45 = vpop.f32.mrf.mxu0 }
 0x214   :  { %2716 = vpow2.f32 %v2433_v24  ;;  %v2436_v12 = vmul.f32 -1.442695, %v3369_v9  ;;  %v3373_v54 = vadd.f32 %v3358_v25, %v433_v45 }
 0x215   :  { %v2579_v13 = vpop.f32.mrf.mxu0 }
 0x216   :  { %2718 = vpow2.f32 %v2436_v12  ;;  %v2434_v14 = vmul.f32 -1.442695, %v3373_v54  ;;  %v3377_v15 = vadd.f32 %v2579_v13, %v3358_v25 }
 0x217   :  { %v446_v18 = vpop.f32.mrf.mxu0 }
 0x218   :  { %2720 = vpow2.f32 %v2434_v14  ;;  %v2439_v19 = vmul.f32 -1.442695, %v3377_v15  ;;  %v3381_v22 = vadd.f32 %v3358_v25, %v446_v18 }
 0x219   :  { %v2580_v16 = vpop.f32.mrf.mxu0 }
 0x21a   :  { %2722 = vpow2.f32 %v2439_v19  ;;  %v2437_v26 = vmul.f32 -1.442695, %v3381_v22  ;;  %v3385_v27 = vadd.f32 %v2580_v16, %v3358_v25 }
 0x21b   :  { %v449_v55 = vpop.f32.mrf.mxu0 }
 0x21c   :  { %2724 = vpow2.f32 %v2437_v26  ;;  %v2440_v30 = vmul.f32 -1.442695, %v3385_v27  ;;  %v3389_v31 = vadd.f32 %v3358_v25, %v449_v55 }
 0x21d   :  { %v2583_v0 = vpop.f32.mrf.mxu0 }
 0x21e   :  { %2726 = vpow2.f32 %v2440_v30  ;;  %v2438_v33 = vmul.f32 -1.442695, %v3389_v31  ;;  %v3393_v34 = vadd.f32 %v2583_v0, %v3358_v25 }
 0x21f   :  { %v2715_v20 = vpop.eup %2714  ;;  %v462_v38 = vpop.f32.mrf.mxu0 }
 0x220   :  { %v543_v39 = vadd.f32 1.0, %v2715_v20  ;;  %2728 = vpow2.f32 %v2438_v33  ;;  %v2443_v40 = vmul.f32 -1.442695, %v3393_v34  ;;  %v3397_v1 = vadd.f32 %v3358_v25, %v462_v38 }
 0x221   :  { %v2717_v41 = vpop.eup %2716  ;;  %v2584_v42 = vpop.f32.mrf.mxu0 }
 0x222   :  { %4654 = vst [vmem:[#allocation3_spill] sm:$0xff] %v3397_v1  ;;  %2730 = vrcp.f32 %v543_v39  ;;  %v541_v43 = vadd.f32 1.0, %v2717_v41  ;;  %v2441_v10 = vmul.f32 -1.442695, %v3397_v1  ;;  %v3401_v46 = vadd.f32 %v2584_v42, %v3358_v25 }
 0x223   :  { %v2719_v48 = vpop.eup %2718  ;;  %2732 = vpow2.f32 %v2443_v40  ;;  %v465_v36 = vpop.f32.mrf.mxu0 }
 0x224   :  { %2734 = vrcp.f32 %v541_v43  ;;  %v544_v49 = vadd.f32 1.0, %v2719_v48  ;;  %v2444_v50 = vmul.f32 -1.442695, %v3401_v46  ;;  %v3405_v51 = vadd.f32 %v3358_v25, %v465_v36 }
 0x225   :  { %v2721_v11 = vpop.eup %2720  ;;  %2736 = vpow2.f32 %v2441_v10  ;;  %v2587_v52 = vpop.f32.mrf.mxu0 }
 0x226   :  { %4655 = vst [vmem:[#allocation4_spill] sm:$0xff] %v3405_v51  ;;  %2738 = vrcp.f32 %v544_v49  ;;  %v542_v23 = vadd.f32 1.0, %v2721_v11  ;;  %v2442_v28 = vmul.f32 -1.442695, %v3405_v51  ;;  %v3409_v29 = vadd.f32 %v2587_v52, %v3358_v25 }
 0x227   :  { %v2723_v53 = vpop.eup %2722  ;;  %2740 = vpow2.f32 %v2444_v50  ;;  %v478_v56 = vpop.f32.mrf.mxu0 }
 0x228   :  { %4656 = vst [vmem:[#allocation5_spill] sm:$0xff] %v3409_v29  ;;  %2742 = vrcp.f32 %v542_v23  ;;  %v547_v57 = vadd.f32 1.0, %v2723_v53  ;;  %v2447_v17 = vmul.f32 -1.442695, %v3409_v29  ;;  %v3413_v58 = vadd.f32 %v3358_v25, %v478_v56  ;;  %v2669_v53 = vld [vmem:[%s4660_s4 + $0x10] sm:$0xff]   ;;  %v2670_v56 = vld [vmem:[%s4660_s4 + $0x8] sm:$0xff]  }
 0x229   :  { %v2725_v59 = vpop.eup %2724  ;;  %2744 = vpow2.f32 %v2442_v28  ;;  %v2588_v35 = vpop.f32.mrf.mxu0  ;;  %v2668_v28 = vld [vmem:[%s4660_s4 + $0x18] sm:$0xff]  }
 0x22a   :  { %4657 = vst [vmem:[#allocation6_spill] sm:$0xff] %v3413_v58  ;;  %2746 = vrcp.f32 %v547_v57  ;;  %v545_v44 = vadd.f32 1.0, %v2725_v59  ;;  %v2445_v60 = vmul.f32 -1.442695, %v3413_v58  ;;  %v3417_v61 = vadd.f32 %v2588_v35, %v3358_v25  ;;  %2589 = vmatprep.subr.bf16.mxu1 %v2668_v28  ;;  %v2671_v57 = vld [vmem:[%s4660_s4] sm:$0xff]  }
 0x22b   :  { %v2727_v37 = vpop.eup %2726  ;;  %2748 = vpow2.f32 %v2447_v17  ;;  %v481_v62 = vpop.f32.mrf.mxu0  ;;  %2590 = vmatpush3.bf16.msra.mxu1 %v2668_v28  ;;  %v1059_v17 = vld [vmem:[%s4612_s10] sm:$0x1]  ;;  %v679_v35 = vlaneseq }
 0x22c   :  { %4658 = vst [vmem:[#allocation7_spill] sm:$0xff] %v3417_v61  ;;  %2750 = vrcp.f32 %v545_v44  ;;  %v548_v63 = vadd.f32 1.0, %v2727_v37  ;;  %v2448_v21 = vmul.f32 -1.442695, %v3417_v61  ;;  %v3421_v47 = vadd.f32 %v3358_v25, %v481_v62  ;;  %2591 = vmatprep.subr.bf16.mxu1 %v2669_v53  ;;  %v669_v62 = vld [vmem:[%s4613_s5 + $0x8] sm:$0xff] }
 0x22d   :  { %v2729_v2 = vpop.eup %2728  ;;  %2752 = vpow2.f32 %v2445_v60  ;;  %v1060_v59 = vadd.f32 1e-05, %v1059_v17  ;;  %v680_v44 = vshrl.u32 %v679_v35, 7 }
 0x22e   :  { %4659 = vst [vmem:[#allocation8_spill] sm:$0xff] %v3421_v47  ;;  %2754 = vrcp.f32 %v548_v63  ;;  %v546_v3 = vadd.f32 1.0, %v2729_v2  ;;  %v2446_v4 = vmul.f32 -1.442695, %v3421_v47  ;;  %v670_v63 = vld [vmem:[%s4613_s5 + $0x10] sm:$0xff] }
 0x22f   :  { %v2731_v6 = vpop.eup %2730  ;;  %2756 = vpow2.f32 %v2448_v21  ;;  %2592 = vmatpush3.bf16.msra.mxu1 %v2669_v53  ;;  %v681_v60 = vsub.s32 7, %v680_v44  ;;  %v3455_v37 = vsub.s32 0, %v680_v44  ;;  %v721_v21 = vsub.s32 4, %v680_v44 }
 0x230   :  { %v2733_v32 = vpop.eup %2732  ;;  %609 = vrot.lane.b32.xlu1 %v2731_v6, %s2988_s28  ;;  %2758 = vpow2.f32 %v2446_v4  ;;  %2593 = vmatprep.subr.bf16.mxu1 %v2670_v56  ;;  %v729_v2 = vsub.s32 5, %v680_v44  ;;  %v697_v4 = vsub.s32 1, %v680_v44  ;;  %v705_v6 = vsub.s32 2, %v680_v44 }
 0x231   :  { %v2735_v8 = vpop.eup %2734  ;;  %v551_v24 = vadd.f32 1.0, %v2733_v32  ;;  %2760 = vrcp.f32 %v546_v3  ;;  %4661 = vst [vmem:[#allocation9_spill] sm:$0xff] %v3455_v37  ;;  %v737_v3 = vsub.s32 6, %v680_v44  ;;  %v713_v32 = vsub.s32 3, %v680_v44 }
 0x232   :  { %v2737_v45 = vpop.eup %2736  ;;  %605 = vrot.lane.b32.xlu0 %v2735_v8, %s2988_s28 }
 0x233   :  { %v2739_v25 = vpop.eup %2738  ;;  %2762 = vrcp.f32 %v551_v24  ;;  %v549_v12 = vadd.f32 1.0, %v2737_v45  ;;  %2594 = vmatpush3.bf16.msra.mxu1 %v2670_v56  ;;  %v3463_v24 = vrot.slane %v669_v62, %v681_v60  ;;  %v3466_v45 = vrot.slane %v670_v63, %v3455_v37 }
 0x234   :  { %v2741_v13 = vpop.eup %2740  ;;  %611 = vrot.lane.b32.xlu1 %v2739_v25, %s2988_s28  ;;  %2595 = vmatprep.subr.bf16.mxu1 %v2671_v57  ;;  %v3468_v25 = vrot.slane %v670_v63, %v697_v4 }
 0x235   :  { %v2743_v14 = vpop.eup %2742  ;;  %v552_v18 = vadd.f32 1.0, %v2741_v13  ;;  %2764 = vrcp.f32 %v549_v12 }
 0x236   :  { %v2745_v19 = vpop.eup %2744 }
 0x237   :  { %v2747_v16 = vpop.eup %2746  ;;  %2766 = vrcp.f32 %v552_v18  ;;  %v550_v26 = vadd.f32 1.0, %v2745_v19  ;;  %2596 = vmatpush3.bf16.msra.mxu1 %v2671_v57  ;;  %v3473_v18 = vrot.slane %v669_v62, %v737_v3  ;;  %v3475_v19 = vrot.slane %v669_v62, %v729_v2 }
 0x238   :  { %v2749_v55 = vpop.eup %2748  ;;  %607 = vrot.lane.b32.xlu1 %v2743_v14, %s2988_s28  ;;  %617 = vrot.lane.b32.xlu0 %v2747_v16, %s2988_s28  ;;  %v3471_v14 = vrot.slane %v670_v63, %v705_v6  ;;  %v3477_v16 = vrot.slane %v669_v62, %v721_v21 }
 0x239   :  { %v2751_v30 = vpop.eup %2750  ;;  %2768 = vrcp.f32 %v550_v26  ;;  %v555_v38 = vadd.f32 1.0, %v2749_v55  ;;  %v1058_v55 = vld [vmem:[%s4614_s7] sm:$0x1] }
 0x23a   :  { %v2753_v0 = vpop.eup %2752  ;;  %4662 = vst [vmem:[#allocation10_spill] sm:$0xff] %v3471_v14 }
 0x23b   :  { %v2755_v33 = vpop.eup %2754  ;;  %v553_v20 = vadd.f32 1.0, %v2753_v0  ;;  %v3484_v0 = vrot.slane %v669_v62, %v705_v6 }
 0x23c   :  { %619 = vrot.lane.b32.xlu1 %v2755_v33, %s2988_s28  ;;  %613 = vrot.lane.b32.xlu0 %v2751_v30, %s2988_s28  ;;  %v2757_v39 = vpop.eup %2756  ;;  %v3482_v30 = vrot.slane %v669_v62, %v713_v32  ;;  %v944_v33 = vrot.slane %v669_v62, %v697_v4 }
 0x23d   :  { %2770 = vrcp.f32 %v553_v20  ;;  %v2759_v40 = vpop.eup %2758  ;;  %v556_v10 = vadd.f32 1.0, %v2757_v39  ;;  %v3489_v39 = vrot.slane %v670_v63, %v721_v21 }
 0x23e   :  { %v2761_v41 = vpop.eup %2760  ;;  %v554_v42 = vadd.f32 1.0, %v2759_v40  ;;  %2772 = vrcp.f32 %v555_v38  ;;  %v3487_v38 = vrot.slane %v670_v63, %v713_v32  ;;  %v3491_v40 = vrot.slane %v670_v63, %v729_v2 }
 0x240   :  { %v2763_v43 = vpop.eup %2762  ;;  %615 = vrot.lane.b32.xlu1 %v2761_v41, %s2988_s28  ;;  %2774 = vrcp.f32 %v554_v42  ;;  %4663 = vst [vmem:[#allocation11_spill] sm:$0xff] %v3487_v38  ;;  %4664 = vst [vmem:[#allocation12_spill] sm:$0xff] %v3491_v40  ;;  %v3493_v41 = vrot.slane %v670_v63, %v737_v3 }
 0x241   :  { %625 = vrot.lane.b32.xlu0 %v2763_v43, %s2988_s28  ;;  %2776 = vrcp.f32 %v556_v10 }
 0x242   :  { %v2765_v48 = vpop.eup %2764  ;;  %2778 = vrsqrt.f32 %v1060_v59  ;;  %4665 = vst [vmem:[#allocation13_spill] sm:$0xff] %v3493_v41 }
 0x244   :  { %v2767_v36 = vpop.eup %2766 }
 0x245   :  { %627 = vrot.lane.b32.xlu1 %v2767_v36, %s2988_s28  ;;  %621 = vrot.lane.b32.xlu0 %v2765_v48, %s2988_s28 }
 0x246   :  { %v2769_v49 = vpop.eup %2768 }
 0x249   :  { %623 = vrot.lane.b32.xlu1 %v2769_v49, %s2988_s28 }
 0x24a   :  { %v2771_v50 = vpop.eup %2770 }
 0x24b   :  { %629 = vrot.lane.b32.xlu0 %v2771_v50, %s2988_s28  ;;  %v2773_v11 = vpop.eup %2772 }
 0x24d   :  { %v2775_v52 = vpop.eup %2774 }
 0x24e   :  { %631 = vrot.lane.b32.xlu1 %v2775_v52, %s2988_s28  ;;  %v2777_v23 = vpop.eup %2776 }
 0x24f   :  { %633 = vrot.lane.b32.xlu0 %v2773_v11, %s2988_s28  ;;  %v2779_v13 = vpop.eup %2778  ;;  %v2449_v11 = vld [vmem:[%s4615_s6] ss:$0 sm:$0xff] }
 0x250   :  { %v3498_v48 = vmul.f32 %v2779_v13, %v1058_v55 }
 0x252   :  { %635 = vrot.lane.b32.xlu1 %v2777_v23, %s2988_s28  ;;  %4666 = vst [vmem:[#allocation14_spill] sm:$0xff] %v3498_v48 }
 0x2a2   :  { %v610_v8 = vpop.permute.xlu1 %609 }
 0x2a3   :  { %v655_v12 = vmul.f32 %v610_v8, %v3361_v5  ;;  %v983_v5 = vrot.slane %v669_v62, %v3455_v37 }
 0x2a4   :  { %v606_v26 = vpop.permute.xlu0 %605 }
 0x2a5   :  { %v691_v42 = vmul.f32 %v3466_v45, %v655_v12  ;;  %v754_v43 = vmul.f32 %v3463_v24, %v655_v12  ;;  %v653_v10 = vmul.f32 %v606_v26, %v3365_v7  ;;  %v793_v36 = vmul.f32 %v3473_v18, %v655_v12 }
 0x2a6   :  { %v612_v20 = vpop.permute.xlu1 %611  ;;  %v832_v49 = vmul.f32 %v3475_v19, %v655_v12  ;;  %v871_v50 = vmul.f32 %v3477_v16, %v655_v12  ;;  %v3514_v44 = vmul.f32 %v3482_v30, %v655_v12  ;;  %v3519_v60 = vmul.f32 %v944_v33, %v655_v12 }
 0x2a7   :  { %v656_v52 = vmul.f32 %v612_v20, %v3369_v9  ;;  %v683_v23 = vmul.f32 %v3463_v24, %v653_v10  ;;  %v750_v28 = vmul.f32 %v3473_v18, %v653_v10  ;;  %v789_v7 = vmul.f32 %v3475_v19, %v653_v10 }
 0x2a8   :  { %v828_v53 = vmul.f32 %v3477_v16, %v653_v10  ;;  %v867_v56 = vmul.f32 %v3482_v30, %v653_v10  ;;  %v906_v57 = vmul.f32 %v3484_v0, %v653_v10  ;;  %v945_v17 = vmul.f32 %v944_v33, %v653_v10 }
 0x2a9   :  { %v984_v59 = vmul.f32 %v983_v5, %v653_v10  ;;  %v3517_v9 = vmul.f32 %v3484_v0, %v655_v12  ;;  %v685_v62 = vadd.f32 %v2449_v11, %v683_v23  ;;  %v752_v63 = vadd.f32 %v2449_v11, %v750_v28 }
 0x2aa   :  { %v608_v35 = vpop.permute.xlu1 %607  ;;  %v791_v21 = vadd.f32 %v2449_v11, %v789_v7  ;;  %v830_v2 = vadd.f32 %v2449_v11, %v828_v53  ;;  %v869_v3 = vadd.f32 %v2449_v11, %v867_v56  ;;  %v908_v4 = vadd.f32 %v2449_v11, %v906_v57  ;;  %v618_v13 = vpop.permute.xlu0 %617 }
 0x2ab   :  { %v947_v6 = vadd.f32 %v2449_v11, %v945_v17  ;;  %v986_v32 = vadd.f32 %v2449_v11, %v984_v59  ;;  %v692_v8 = vmul.f32 %v3466_v45, %v656_v52  ;;  %v3523_v26 = vmul.f32 %v3463_v24, %v656_v52 }
 0x2ac   :  { %v3526_v55 = vmul.f32 %v3473_v18, %v656_v52  ;;  %v3529_v12 = vmul.f32 %v3475_v19, %v656_v52  ;;  %v3532_v20 = vmul.f32 %v3477_v16, %v656_v52  ;;  %v3535_v23 = vmul.f32 %v3482_v30, %v656_v52 }
 0x2ad   :  { %v3538_v28 = vmul.f32 %v3484_v0, %v656_v52  ;;  %v3540_v7 = vmul.f32 %v944_v33, %v656_v52  ;;  %v654_v53 = vmul.f32 %v608_v35, %v3373_v54  ;;  %v659_v56 = vmul.f32 %v618_v13, %v3377_v15 }
 0x2ae   :  { %v620_v10 = vpop.permute.xlu1 %619  ;;  %v693_v17 = vadd.f32 %v691_v42, %v685_v62  ;;  %v756_v59 = vadd.f32 %v754_v43, %v752_v63  ;;  %v795_v15 = vadd.f32 %v793_v36, %v791_v21  ;;  %v834_v13 = vadd.f32 %v832_v49, %v830_v2 }
 0x2af   :  { %v660_v57 = vmul.f32 %v620_v10, %v3385_v27  ;;  %v684_v48 = vmul.f32 %v3463_v24, %v654_v53  ;;  %v751_v37 = vmul.f32 %v3473_v18, %v654_v53  ;;  %v790_v41 = vmul.f32 %v3475_v19, %v654_v53 }
 0x2b0   :  { %v829_v61 = vmul.f32 %v3477_v16, %v654_v53  ;;  %v868_v29 = vmul.f32 %v3482_v30, %v654_v53  ;;  %v907_v52 = vmul.f32 %v3484_v0, %v654_v53  ;;  %v946_v47 = vmul.f32 %v944_v33, %v654_v53 }
 0x2b1   :  { %v985_v54 = vmul.f32 %v983_v5, %v654_v53  ;;  %v686_v35 = vadd.f32 %v2449_v11, %v684_v48  ;;  %v873_v27 = vadd.f32 %v871_v50, %v869_v3  ;;  %v753_v42 = vadd.f32 %v2449_v11, %v751_v37  ;;  %v614_v48 = vpop.permute.xlu0 %613 }
 0x2b2   :  { %v792_v43 = vadd.f32 %v2449_v11, %v790_v41  ;;  %v831_v62 = vadd.f32 %v2449_v11, %v829_v61  ;;  %v870_v63 = vadd.f32 %v2449_v11, %v868_v29  ;;  %v909_v10 = vadd.f32 %v2449_v11, %v907_v52 }
 0x2b3   :  { %v948_v40 = vadd.f32 %v2449_v11, %v946_v47  ;;  %v987_v58 = vadd.f32 %v2449_v11, %v985_v54  ;;  %v707_v51 = vmul.f32 %v3471_v14, %v659_v56  ;;  %v762_v1 = vmul.f32 %v3468_v25, %v659_v56  ;;  %v616_v11 = vpop.permute.xlu1 %615 }
 0x2b4   :  { %v801_v38 = vmul.f32 %v3466_v45, %v659_v56  ;;  %v840_v33 = vmul.f32 %v3463_v24, %v659_v56  ;;  %v879_v5 = vmul.f32 %v3473_v18, %v659_v56  ;;  %v3557_v36 = vmul.f32 %v3475_v19, %v659_v56 }
 0x2b5   :  { %v3560_v61 = vmul.f32 %v3477_v16, %v659_v56  ;;  %v3563_v29 = vmul.f32 %v3482_v30, %v659_v56  ;;  %v3566_v47 = vmul.f32 %v3471_v14, %v660_v57  ;;  %v3569_v37 = vmul.f32 %v3468_v25, %v660_v57 }
 0x2b6   :  { %4667 = vst [vmem:[#allocation15_spill] sm:$0xff] %v3557_v36  ;;  %v3572_v41 = vmul.f32 %v3466_v45, %v660_v57  ;;  %v3575_v49 = vmul.f32 %v3463_v24, %v660_v57  ;;  %v3578_v50 = vmul.f32 %v3473_v18, %v660_v57  ;;  %v3581_v21 = vmul.f32 %v3475_v19, %v660_v57 }
 0x2b7   :  { %4668 = vst [vmem:[#allocation16_spill] sm:$0xff] %v3560_v61  ;;  %4669 = vst [vmem:[#allocation17_spill] sm:$0xff] %v3563_v29  ;;  %v3584_v2 = vmul.f32 %v3477_v16, %v660_v57  ;;  %v3587_v3 = vmul.f32 %v3482_v30, %v660_v57  ;;  %v657_v53 = vmul.f32 %v614_v48, %v3381_v22 }
 0x2b8   :  { %4670 = vst [vmem:[#allocation18_spill] sm:$0xff] %v3566_v47  ;;  %4671 = vst [vmem:[#allocation19_spill] sm:$0xff] %v3569_v37  ;;  %v912_v56 = vadd.f32 %v3514_v44, %v908_v4  ;;  %v951_v52 = vadd.f32 %v3517_v9, %v947_v6  ;;  %v990_v54 = vadd.f32 %v3519_v60, %v986_v32  ;;  %v626_v37 = vpop.permute.xlu0 %625  ;;  %v628_v47 = vpop.permute.xlu1 %627 }
 0x2b9   :  { %4672 = vst [vmem:[#allocation20_spill] sm:$0xff] %v3572_v41  ;;  %4673 = vst [vmem:[#allocation21_spill] sm:$0xff] %v3575_v49  ;;  %v694_v49 = vadd.f32 %v692_v8, %v686_v35  ;;  %v758_v41 = vmul.f32 %v3466_v45, %v657_v53  ;;  %v875_v57 = vmul.f32 %v3475_v19, %v657_v53 }
 0x2ba   :  { %4674 = vst [vmem:[#allocation22_spill] sm:$0xff] %v3578_v50  ;;  %4675 = vst [vmem:[#allocation23_spill] sm:$0xff] %v3581_v21  ;;  %v699_v50 = vmul.f32 %v3468_v25, %v657_v53  ;;  %v797_v21 = vmul.f32 %v3463_v24, %v657_v53  ;;  %v953_v22 = vmul.f32 %v3482_v30, %v657_v53 }
 0x2bb   :  { %4676 = vst [vmem:[#allocation24_spill] sm:$0xff] %v3584_v2  ;;  %4677 = vst [vmem:[#allocation25_spill] sm:$0xff] %v3587_v3  ;;  %v836_v2 = vmul.f32 %v3473_v18, %v657_v53  ;;  %v914_v3 = vmul.f32 %v3477_v16, %v657_v53  ;;  %v992_v44 = vmul.f32 %v3484_v0, %v657_v53 }
 0x2bc   :  { %v701_v9 = vadd.f32 %v699_v50, %v693_v17  ;;  %v760_v4 = vadd.f32 %v758_v41, %v756_v59  ;;  %v757_v60 = vadd.f32 %v3523_v26, %v753_v42  ;;  %v796_v6 = vadd.f32 %v3526_v55, %v792_v43  ;;  %v4678_v50 = vld [vmem:[#allocation11_spill] sm:$0xff] }
 0x2bd   :  { %v799_v32 = vadd.f32 %v797_v21, %v795_v15  ;;  %v838_v8 = vadd.f32 %v836_v2, %v834_v13  ;;  %v877_v35 = vadd.f32 %v875_v57, %v873_v27  ;;  %v835_v48 = vadd.f32 %v3529_v12, %v831_v62  ;;  %v4679_v21 = vld [vmem:[#allocation10_spill] sm:$0xff] }
 0x2be   :  { %v916_v29 = vadd.f32 %v914_v3, %v912_v56  ;;  %v955_v61 = vadd.f32 %v953_v22, %v951_v52  ;;  %v994_v36 = vadd.f32 %v992_v44, %v990_v54  ;;  %v874_v14 = vadd.f32 %v3532_v20, %v870_v63 }
 0x2bf   :  { %v913_v53 = vadd.f32 %v3535_v23, %v909_v10  ;;  %v952_v17 = vadd.f32 %v3538_v28, %v948_v40  ;;  %v991_v26 = vadd.f32 %v3540_v7, %v987_v58  ;;  %v658_v55 = vmul.f32 %v616_v11, %v3389_v31 }
 0x2c0   :  { %v663_v59 = vmul.f32 %v626_v37, %v3393_v34  ;;  %v664_v15 = vmul.f32 %v628_v47, %v3401_v46  ;;  %v709_v12 = vadd.f32 %v707_v51, %v701_v9  ;;  %v764_v13 = vadd.f32 %v762_v1, %v760_v4  ;;  %v4685_v9 = vld [vmem:[#allocation3_spill] sm:$0xff] }
 0x2c1   :  { %v700_v27 = vmul.f32 %v3468_v25, %v658_v55  ;;  %v759_v42 = vmul.f32 %v3466_v45, %v658_v55  ;;  %v798_v20 = vmul.f32 %v3463_v24, %v658_v55  ;;  %v837_v23 = vmul.f32 %v3473_v18, %v658_v55 }
 0x2c2   :  { %v876_v40 = vmul.f32 %v3475_v19, %v658_v55  ;;  %v915_v58 = vmul.f32 %v3477_v16, %v658_v55  ;;  %v954_v31 = vmul.f32 %v3482_v30, %v658_v55  ;;  %v993_v34 = vmul.f32 %v3484_v0, %v658_v55 }
 0x2c3   :  { %v702_v28 = vadd.f32 %v700_v27, %v694_v49  ;;  %v803_v46 = vadd.f32 %v801_v38, %v799_v32  ;;  %v842_v51 = vadd.f32 %v840_v33, %v838_v8  ;;  %v881_v1 = vadd.f32 %v879_v5, %v877_v35  ;;  %v622_v38 = vpop.permute.xlu0 %621  ;;  %v4687_v32 = vld [vmem:[#allocation16_spill] sm:$0xff]  ;;  %v4688_v35 = vld [vmem:[#allocation17_spill] sm:$0xff] }
 0x2c4   :  { %v761_v7 = vadd.f32 %v759_v42, %v757_v60  ;;  %v800_v43 = vadd.f32 %v798_v20, %v796_v6  ;;  %v839_v62 = vadd.f32 %v837_v23, %v835_v48  ;;  %v878_v63 = vadd.f32 %v876_v40, %v874_v14  ;;  %v4686_v60 = vld [vmem:[#allocation15_spill] sm:$0xff] }
 0x2c5   :  { %v917_v10 = vadd.f32 %v915_v58, %v913_v53  ;;  %v956_v47 = vadd.f32 %v954_v31, %v952_v17  ;;  %v995_v37 = vadd.f32 %v993_v34, %v991_v26  ;;  %v723_v41 = vmul.f32 %v3489_v39, %v663_v59  ;;  %v4689_v53 = vld [vmem:[#allocation18_spill] sm:$0xff]  ;;  %v624_v58 = vpop.permute.xlu1 %623  ;;  %v4690_v34 = vld [vmem:[#allocation19_spill] sm:$0xff] }
 0x2c6   :  { %v770_v11 = vmul.f32 %v4678_v50, %v663_v59  ;;  %v809_v2 = vmul.f32 %v4679_v21, %v663_v59  ;;  %v848_v30 = vmul.f32 %v3468_v25, %v663_v59  ;;  %v887_v0 = vmul.f32 %v3466_v45, %v663_v59 }
 0x2c7   :  { %v926_v33 = vmul.f32 %v3463_v24, %v663_v59  ;;  %v965_v5 = vmul.f32 %v3473_v18, %v663_v59  ;;  %v3627_v14 = vmul.f32 %v3475_v19, %v663_v59  ;;  %v3630_v49 = vmul.f32 %v3489_v39, %v664_v15 }
 0x2c8   :  { %v3633_v3 = vmul.f32 %v4678_v50, %v664_v15  ;;  %v3636_v56 = vmul.f32 %v4679_v21, %v664_v15  ;;  %v3639_v52 = vmul.f32 %v3468_v25, %v664_v15  ;;  %v3642_v54 = vmul.f32 %v3466_v45, %v664_v15 }
 0x2c9   :  { %v3645_v57 = vmul.f32 %v3463_v24, %v664_v15  ;;  %v3648_v22 = vmul.f32 %v3473_v18, %v664_v15  ;;  %v3651_v44 = vmul.f32 %v3475_v19, %v664_v15  ;;  %v661_v4 = vmul.f32 %v622_v38, %v4685_v9  ;;  %v4691_v38 = vld [vmem:[#allocation20_spill] sm:$0xff] }
 0x2ca   :  { %4680 = vst [vmem:[#allocation11_spill] sm:$0xff] %v3639_v52  ;;  %4681 = vst [vmem:[#allocation10_spill] sm:$0xff] %v3642_v54  ;;  %v920_v6 = vadd.f32 %v4686_v60, %v916_v29  ;;  %v959_v8 = vadd.f32 %v4687_v32, %v955_v61  ;;  %v998_v48 = vadd.f32 %v4688_v35, %v994_v36  ;;  %v4692_v60 = vld [vmem:[#allocation21_spill] sm:$0xff]  ;;  %v4694_v54 = vld [vmem:[#allocation23_spill] sm:$0xff] }
 0x2cb   :  { %4682 = vst [vmem:[#allocation26_spill] sm:$0xff] %v3645_v57  ;;  %4683 = vst [vmem:[#allocation27_spill] sm:$0xff] %v3648_v22  ;;  %v710_v17 = vadd.f32 %v4689_v53, %v702_v28  ;;  %v715_v26 = vmul.f32 %v4678_v50, %v661_v4  ;;  %v766_v55 = vmul.f32 %v4679_v21, %v661_v4  ;;  %v4693_v22 = vld [vmem:[#allocation22_spill] sm:$0xff] }
 0x2cc   :  { %4684 = vst [vmem:[#allocation28_spill] sm:$0xff] %v3651_v44  ;;  %v805_v59 = vmul.f32 %v3468_v25, %v661_v4  ;;  %v844_v27 = vmul.f32 %v3466_v45, %v661_v4  ;;  %v883_v15 = vmul.f32 %v3463_v24, %v661_v4  ;;  %v922_v42 = vmul.f32 %v3473_v18, %v661_v4 }
 0x2cd   :  { %v961_v29 = vmul.f32 %v3475_v19, %v661_v4  ;;  %v1000_v61 = vmul.f32 %v3477_v16, %v661_v4  ;;  %v717_v20 = vadd.f32 %v715_v26, %v709_v12  ;;  %v768_v36 = vadd.f32 %v766_v55, %v764_v13  ;;  %v4695_v4 = vld [vmem:[#allocation24_spill] sm:$0xff]  ;;  %v4696_v13 = vld [vmem:[#allocation25_spill] sm:$0xff] }
 0x2ce   :  { %v807_v23 = vadd.f32 %v805_v59, %v803_v46  ;;  %v846_v40 = vadd.f32 %v844_v27, %v842_v51  ;;  %v885_v31 = vadd.f32 %v883_v15, %v881_v1  ;;  %v765_v28 = vadd.f32 %v4690_v34, %v761_v7  ;;  %v4697_v51 = vld [vmem:[#allocation4_spill] sm:$0xff] }
 0x2cf   :  { %v804_v9 = vadd.f32 %v4691_v38, %v800_v43  ;;  %v843_v32 = vadd.f32 %v4692_v60, %v839_v62  ;;  %v924_v35 = vadd.f32 %v922_v42, %v920_v6  ;;  %v963_v53 = vadd.f32 %v961_v29, %v959_v8  ;;  %v632_v8 = vpop.permute.xlu1 %631 }
 0x2d0   :  { %v1002_v44 = vadd.f32 %v1000_v61, %v998_v48  ;;  %v882_v57 = vadd.f32 %v4693_v22, %v878_v63  ;;  %v921_v52 = vadd.f32 %v4694_v54, %v917_v10  ;;  %v960_v12 = vadd.f32 %v4695_v4, %v956_v47 }
 0x2d1   :  { %v999_v46 = vadd.f32 %v4696_v13, %v995_v37  ;;  %v662_v26 = vmul.f32 %v624_v58, %v4697_v51  ;;  %v725_v1 = vadd.f32 %v723_v41, %v717_v20  ;;  %v772_v55 = vadd.f32 %v770_v11, %v768_v36  ;;  %v630_v41 = vpop.permute.xlu0 %629  ;;  %v4698_v36 = vld [vmem:[#allocation6_spill] sm:$0xff]  ;;  %v4699_v58 = vld [vmem:[#allocation12_spill] sm:$0xff] }
 0x2d2   :  { %v811_v7 = vadd.f32 %v809_v2, %v807_v23  ;;  %v850_v59 = vadd.f32 %v848_v30, %v846_v40  ;;  %v889_v22 = vadd.f32 %v887_v0, %v885_v31  ;;  %v928_v15 = vadd.f32 %v926_v33, %v924_v35  ;;  %v4702_v38 = vld [vmem:[#allocation26_spill] sm:$0xff] }
 0x2d3   :  { %v716_v43 = vmul.f32 %v4678_v50, %v662_v26  ;;  %v767_v62 = vmul.f32 %v4679_v21, %v662_v26  ;;  %v806_v6 = vmul.f32 %v3468_v25, %v662_v26  ;;  %v845_v63 = vmul.f32 %v3466_v45, %v662_v26 }
 0x2d4   :  { %v884_v10 = vmul.f32 %v3463_v24, %v662_v26  ;;  %v923_v47 = vmul.f32 %v3473_v18, %v662_v26  ;;  %v962_v37 = vmul.f32 %v3475_v19, %v662_v26  ;;  %v1001_v54 = vmul.f32 %v3477_v16, %v662_v26  ;;  %v4703_v26 = vld [vmem:[#allocation8_spill] sm:$0xff] }
 0x2d5   :  { %v718_v11 = vadd.f32 %v716_v43, %v710_v17  ;;  %v769_v2 = vadd.f32 %v767_v62, %v765_v28  ;;  %v808_v30 = vadd.f32 %v806_v6, %v804_v9  ;;  %v847_v48 = vadd.f32 %v845_v63, %v843_v32  ;;  %v634_v60 = vpop.permute.xlu0 %633  ;;  %v636_v32 = vpop.permute.xlu1 %635  ;;  %v4704_v62 = vld [vmem:[#allocation27_spill] sm:$0xff]  ;;  %v4705_v6 = vld [vmem:[#allocation28_spill] sm:$0xff] }
 0x2d6   :  { %v886_v27 = vadd.f32 %v884_v10, %v882_v57  ;;  %v967_v42 = vadd.f32 %v965_v5, %v963_v53  ;;  %v925_v29 = vadd.f32 %v923_v47, %v921_v52  ;;  %v964_v61 = vadd.f32 %v962_v37, %v960_v12  ;;  %v4706_v10 = vld [vmem:[#allocation5_spill] sm:$0xff]  ;;  %v4707_v37 = vld [vmem:[#allocation7_spill] sm:$0xff] }
 0x2d7   :  { %v1003_v20 = vadd.f32 %v1001_v54, %v999_v46  ;;  %v665_v23 = vmul.f32 %v630_v41, %v4698_v36  ;;  %v1006_v40 = vadd.f32 %v3627_v14, %v1002_v44  ;;  %v726_v19 = vadd.f32 %v3630_v49, %v718_v11  ;;  %v4708_v36 = vld [vmem:[#allocation13_spill] sm:$0xff] }
 0x2d8   :  { %v773_v16 = vadd.f32 %v3633_v3, %v769_v2  ;;  %v812_v17 = vadd.f32 %v3636_v56, %v808_v30  ;;  %v4700_v3 = vld [vmem:[#allocation11_spill] sm:$0xff]  ;;  %v4701_v56 = vld [vmem:[#allocation10_spill] sm:$0xff]  ;;  %v929_v9 = vadd.f32 %v4702_v38, %v925_v29  ;;  %v666_v43 = vmul.f32 %v632_v8, %v4703_v26 }
 0x2d9   :  { %v731_v0 = vmul.f32 %v4699_v58, %v665_v23  ;;  %v774_v31 = vmul.f32 %v3489_v39, %v665_v23  ;;  %v813_v33 = vmul.f32 %v4678_v50, %v665_v23  ;;  %v852_v5 = vmul.f32 %v4679_v21, %v665_v23 }
 0x2da   :  { %v891_v52 = vmul.f32 %v3468_v25, %v665_v23  ;;  %v930_v57 = vmul.f32 %v3466_v45, %v665_v23  ;;  %v969_v14 = vmul.f32 %v3463_v24, %v665_v23  ;;  %v1008_v49 = vmul.f32 %v3473_v18, %v665_v23 }
 0x2db   :  { %v733_v44 = vadd.f32 %v731_v0, %v725_v1  ;;  %v851_v34 = vadd.f32 %v4700_v3, %v847_v48  ;;  %v890_v28 = vadd.f32 %v4701_v56, %v886_v27  ;;  %v776_v35 = vadd.f32 %v774_v31, %v772_v55 }
 0x2dc   :  { %v815_v53 = vadd.f32 %v813_v33, %v811_v7  ;;  %v854_v4 = vadd.f32 %v852_v5, %v850_v59  ;;  %v893_v12 = vadd.f32 %v891_v52, %v889_v22  ;;  %v932_v13 = vadd.f32 %v930_v57, %v928_v15 }
 0x2dd   :  { %v971_v46 = vadd.f32 %v969_v14, %v967_v42  ;;  %v1010_v51 = vadd.f32 %v1008_v49, %v1006_v40  ;;  %v968_v1 = vadd.f32 %v4704_v62, %v964_v61  ;;  %v1007_v63 = vadd.f32 %v4705_v6, %v1003_v20 }
 0x2de   :  { %v667_v47 = vmul.f32 %v634_v60, %v4706_v10  ;;  %v668_v54 = vmul.f32 %v636_v32, %v4707_v37  ;;  %v732_v41 = vmul.f32 %v4699_v58, %v666_v43  ;;  %v775_v55 = vmul.f32 %v3489_v39, %v666_v43  ;;  %v3758_v37 = vld [vmem:[%s4617_s8] ss:$0 sm:$0xff] }
 0x2df   :  { %v814_v7 = vmul.f32 %v4678_v50, %v666_v43  ;;  %v853_v59 = vmul.f32 %v4679_v21, %v666_v43  ;;  %v892_v11 = vmul.f32 %v3468_v25, %v666_v43  ;;  %v931_v2 = vmul.f32 %v3466_v45, %v666_v43 }
 0x2e0   :  { %v970_v30 = vmul.f32 %v3463_v24, %v666_v43  ;;  %v1009_v22 = vmul.f32 %v3473_v18, %v666_v43  ;;  %v734_v8 = vadd.f32 %v732_v41, %v726_v19  ;;  %v777_v48 = vadd.f32 %v775_v55, %v773_v16 }
 0x2e1   :  { %v816_v27 = vadd.f32 %v814_v7, %v812_v17  ;;  %v855_v15 = vadd.f32 %v853_v59, %v851_v34  ;;  %v894_v42 = vadd.f32 %v892_v11, %v890_v28  ;;  %v933_v29 = vadd.f32 %v931_v2, %v929_v9 }
 0x2e2   :  { %v972_v61 = vadd.f32 %v970_v30, %v968_v1  ;;  %v1011_v20 = vadd.f32 %v1009_v22, %v1007_v63  ;;  %v739_v23 = vmul.f32 %v4708_v36, %v667_v47  ;;  %v778_v40 = vmul.f32 %v4699_v58, %v667_v47 }
 0x2e3   :  { %v817_v0 = vmul.f32 %v3489_v39, %v667_v47  ;;  %v856_v31 = vmul.f32 %v4678_v50, %v667_v47  ;;  %v895_v33 = vmul.f32 %v4679_v21, %v667_v47  ;;  %v934_v18 = vmul.f32 %v3468_v25, %v667_v47 }
 0x2e4   :  { %v973_v19 = vmul.f32 %v3466_v45, %v667_v47  ;;  %v1012_v16 = vmul.f32 %v3463_v24, %v667_v47  ;;  %v741_v17 = vadd.f32 %v739_v23, %v733_v44  ;;  %v780_v5 = vadd.f32 %v778_v40, %v776_v35 }
 0x2e5   :  { %v819_v52 = vadd.f32 %v817_v0, %v815_v53  ;;  %v858_v57 = vadd.f32 %v856_v31, %v854_v4  ;;  %v897_v14 = vadd.f32 %v895_v33, %v893_v12  ;;  %v936_v49 = vadd.f32 %v934_v18, %v932_v13 }
 0x2e6   :  { %v975_v3 = vadd.f32 %v973_v19, %v971_v46  ;;  %v1014_v34 = vadd.f32 %v1012_v16, %v1010_v51  ;;  %744 = vst.msk [vmem:[#allocation2] sm:$0xff] %vm743_vm1, %v741_v17  ;;  %783 = vst.msk [vmem:[#allocation2 + $0x10] sm:$0xff] %vm743_vm1, %v780_v5  ;;  %v740_v56 = vmul.f32 %v4708_v36, %v668_v54 }
 0x2e7   :  { %822 = vst.msk [vmem:[#allocation2 + $0x20] sm:$0xff] %vm743_vm1, %v819_v52  ;;  %861 = vst.msk [vmem:[#allocation2 + $0x30] sm:$0xff] %vm743_vm1, %v858_v57  ;;  %v779_v28 = vmul.f32 %v4699_v58, %v668_v54  ;;  %v818_v44 = vmul.f32 %v3489_v39, %v668_v54  ;;  %v857_v38 = vmul.f32 %v4678_v50, %v668_v54 }
 0x2e8   :  { %900 = vst.msk [vmem:[#allocation2 + $0x40] sm:$0xff] %vm743_vm1, %v897_v14  ;;  %939 = vst.msk [vmem:[#allocation2 + $0x50] sm:$0xff] %vm743_vm1, %v936_v49  ;;  %v896_v9 = vmul.f32 %v4679_v21, %v668_v54  ;;  %v935_v60 = vmul.f32 %v3468_v25, %v668_v54  ;;  %v974_v32 = vmul.f32 %v3466_v45, %v668_v54  ;;  %v4709_v45 = vld [vmem:[#allocation9_spill] sm:$0xff]  ;;  %v4710_v25 = vld [vmem:[#allocation14_spill] sm:$0xff] }
 0x2e9   :  { %978 = vst.msk [vmem:[#allocation2 + $0x60] sm:$0xff] %vm743_vm1, %v975_v3  ;;  %1017 = vst.msk [vmem:[#allocation2 + $0x70] sm:$0xff] %vm743_vm1, %v1014_v34  ;;  %v1013_v58 = vmul.f32 %v3463_v24, %v668_v54  ;;  %v742_v35 = vadd.f32 %v740_v56, %v734_v8  ;;  %v781_v39 = vadd.f32 %v779_v28, %v777_v48  ;;  %v3746_v24 = vld [vmem:[%s4616_s9] ss:$0 sm:$0xff] }
 0x2ea   :  { %v820_v53 = vadd.f32 %v818_v44, %v816_v27  ;;  %v859_v50 = vadd.f32 %v857_v38, %v855_v15  ;;  %v898_v4 = vadd.f32 %v896_v9, %v894_v42  ;;  %v937_v12 = vadd.f32 %v935_v60, %v933_v29 }
 0x2eb   :  { %v976_v13 = vadd.f32 %v974_v32, %v972_v61  ;;  %v1015_v46 = vadd.f32 %v1013_v58, %v1011_v20  ;;  %745 = vst.msk [vmem:[#allocation2 + $0x8] sm:$0xff] %vm743_vm1, %v742_v35  ;;  %784 = vst.msk [vmem:[#allocation2 + $0x18] sm:$0xff] %vm743_vm1, %v781_v39  ;;  %v3750_v21 = vrot.slane %v4710_v25, %v4709_v45 }
 0x2ec   :  { %823 = vst.msk [vmem:[#allocation2 + $0x28] sm:$0xff] %vm743_vm1, %v820_v53  ;;  %862 = vst.msk [vmem:[#allocation2 + $0x38] sm:$0xff] %vm743_vm1, %v859_v50 }
 0x2ed   :  { %901 = vst.msk [vmem:[#allocation2 + $0x48] sm:$0xff] %vm743_vm1, %v898_v4  ;;  %940 = vst.msk [vmem:[#allocation2 + $0x58] sm:$0xff] %vm743_vm1, %v937_v12  ;;  %v1019_v51 = vld [vmem:[#allocation2] sm:$0xff]  ;;  %v1021_v26 = vld [vmem:[#allocation2 + $0x10] sm:$0xff] }
 0x2ee   :  { %979 = vst.msk [vmem:[#allocation2 + $0x68] sm:$0xff] %vm743_vm1, %v976_v13  ;;  %1018 = vst.msk [vmem:[#allocation2 + $0x78] sm:$0xff] %vm743_vm1, %v1015_v46  ;;  %v1023_v43 = vld [vmem:[#allocation2 + $0x20] sm:$0xff]  ;;  %v1042_v62 = vsub.f32 %v1019_v51, %v3746_v24  ;;  %v1044_v1 = vsub.f32 %v1021_v26, %v3746_v24  ;;  %v1025_v63 = vld [vmem:[#allocation2 + $0x30] sm:$0xff] }
 0x2ef   :  { %v1046_v6 = vsub.f32 %v1023_v43, %v3746_v24  ;;  %v1027_v10 = vld [vmem:[#allocation2 + $0x40] sm:$0xff]  ;;  %v1029_v47 = vld [vmem:[#allocation2 + $0x50] sm:$0xff]  ;;  %v1048_v54 = vsub.f32 %v1025_v63, %v3746_v24 }
 0x2f0   :  { %v1050_v41 = vsub.f32 %v1027_v10, %v3746_v24  ;;  %v1052_v55 = vsub.f32 %v1029_v47, %v3746_v24  ;;  %v1031_v7 = vld [vmem:[#allocation2 + $0x60] sm:$0xff]  ;;  %v1069_v59 = vmul.f32 %v3750_v21, %v1042_v62  ;;  %v1071_v11 = vmul.f32 %v3750_v21, %v1044_v1  ;;  %v1033_v45 = vld [vmem:[#allocation2 + $0x70] sm:$0xff] }
 0x2f1   :  { %v1073_v2 = vmul.f32 %v3750_v21, %v1046_v6  ;;  %v1075_v48 = vmul.f32 %v3750_v21, %v1048_v54  ;;  %v1054_v42 = vsub.f32 %v1031_v7, %v3746_v24  ;;  %v1056_v63 = vsub.f32 %v1033_v45, %v3746_v24 }
 0x2f2   :  { %v1020_v30 = vld [vmem:[#allocation2 + $0x8] sm:$0xff]  ;;  %v1022_v22 = vld [vmem:[#allocation2 + $0x18] sm:$0xff]  ;;  %v1077_v27 = vmul.f32 %v3750_v21, %v1050_v41  ;;  %v1079_v15 = vmul.f32 %v3750_v21, %v1052_v55  ;;  %v3772_v61 = vadd.f32 %v3758_v37, %v1069_v59  ;;  %v3776_v36 = vadd.f32 %v3758_v37, %v1071_v11 }
 0x2f3   :  { %v1024_v8 = vld [vmem:[#allocation2 + $0x28] sm:$0xff]  ;;  %v1043_v29 = vsub.f32 %v1020_v30, %v3746_v24  ;;  %v1045_v20 = vsub.f32 %v1022_v22, %v3746_v24  ;;  %v1026_v23 = vld [vmem:[#allocation2 + $0x38] sm:$0xff]  ;;  %v3780_v0 = vadd.f32 %v3758_v37, %v1073_v2  ;;  %v3784_v33 = vadd.f32 %v3758_v37, %v1075_v48 }
 0x2f4   :  { %v1047_v40 = vsub.f32 %v1024_v8, %v3746_v24  ;;  %v1049_v31 = vsub.f32 %v1026_v23, %v3746_v24  ;;  %v1028_v18 = vld [vmem:[#allocation2 + $0x48] sm:$0xff]  ;;  %v2452_v16 = vmul.f32 -1.442695, %v3772_v61  ;;  %v2454_v5 = vmul.f32 -1.442695, %v3776_v36  ;;  %v1030_v9 = vld [vmem:[#allocation2 + $0x58] sm:$0xff] }
 0x2f5   :  { %v1070_v19 = vmul.f32 %v3750_v21, %v1043_v29  ;;  %v1072_v17 = vmul.f32 %v3750_v21, %v1045_v20  ;;  %v2456_v57 = vmul.f32 -1.442695, %v3780_v0  ;;  %v2458_v49 = vmul.f32 -1.442695, %v3784_v33  ;;  %v1032_v35 = vld [vmem:[#allocation2 + $0x68] sm:$0xff]  ;;  %v1034_v39 = vld [vmem:[#allocation2 + $0x78] sm:$0xff] }
 0x2f6   :  { %v1074_v52 = vmul.f32 %v3750_v21, %v1047_v40  ;;  %v1076_v14 = vmul.f32 %v3750_v21, %v1049_v31  ;;  %2780 = vpow2.f32 %v2452_v16  ;;  %v1051_v56 = vsub.f32 %v1028_v18, %v3746_v24 }
 0x2f7   :  { %v3795_v3 = vadd.f32 %v3758_v37, %v1070_v19  ;;  %v3798_v34 = vadd.f32 %v3758_v37, %v1072_v17  ;;  %2782 = vpow2.f32 %v2454_v5  ;;  %v3808_v38 = vadd.f32 %v3758_v37, %v1077_v27 }
 0x2f8   :  { %v3802_v28 = vadd.f32 %v3758_v37, %v1074_v52  ;;  %v3805_v44 = vadd.f32 %v3758_v37, %v1076_v14  ;;  %2784 = vpow2.f32 %v2456_v57  ;;  %v1078_v58 = vmul.f32 %v3750_v21, %v1051_v56 }
 0x2f9   :  { %v2453_v60 = vmul.f32 -1.442695, %v3795_v3  ;;  %v2455_v32 = vmul.f32 -1.442695, %v3798_v34  ;;  %2786 = vpow2.f32 %v2458_v49  ;;  %v2460_v4 = vmul.f32 -1.442695, %v3808_v38 }
 0x2fa   :  { %v2457_v53 = vmul.f32 -1.442695, %v3802_v28  ;;  %v2459_v50 = vmul.f32 -1.442695, %v3805_v44  ;;  %v3817_v12 = vadd.f32 %v3758_v37, %v1078_v58  ;;  %v1053_v13 = vsub.f32 %v1030_v9, %v3746_v24 }
 0x2fb   :  { %2788 = vpow2.f32 %v2453_v60  ;;  %v3821_v46 = vadd.f32 %v3758_v37, %v1079_v15  ;;  %v1055_v25 = vsub.f32 %v1032_v35, %v3746_v24  ;;  %v1081_v51 = vmul.f32 %v3750_v21, %v1054_v42 }
 0x2fc   :  { %2790 = vpow2.f32 %v2455_v32  ;;  %v1057_v26 = vsub.f32 %v1034_v39, %v3746_v24  ;;  %v2461_v43 = vmul.f32 -1.442695, %v3817_v12  ;;  %v1080_v62 = vmul.f32 %v3750_v21, %v1053_v13 }
 0x2fd   :  { %2792 = vpow2.f32 %v2457_v53  ;;  %v1082_v1 = vmul.f32 %v3750_v21, %v1055_v25  ;;  %v3830_v6 = vadd.f32 %v3758_v37, %v1081_v51  ;;  %v2462_v47 = vmul.f32 -1.442695, %v3821_v46 }
 0x2fe   :  { %2794 = vpow2.f32 %v2459_v50  ;;  %v3834_v10 = vadd.f32 %v3758_v37, %v1080_v62  ;;  %v1084_v54 = vmul.f32 %v3750_v21, %v1057_v26  ;;  %v1083_v11 = vmul.f32 %v3750_v21, %v1056_v63 }
 0x2ff   :  { %2796 = vpow2.f32 %v2460_v4  ;;  %v3839_v41 = vadd.f32 %v3758_v37, %v1082_v1  ;;  %v2464_v59 = vmul.f32 -1.442695, %v3830_v6 }
 0x300   :  { %2798 = vpow2.f32 %v2461_v43  ;;  %v2463_v55 = vmul.f32 -1.442695, %v3834_v10  ;;  %v3843_v7 = vadd.f32 %v3758_v37, %v1084_v54  ;;  %v3850_v15 = vadd.f32 %v3758_v37, %v1083_v11 }
 0x301   :  { %v2465_v24 = vmul.f32 -1.442695, %v3839_v41  ;;  %2800 = vpow2.f32 %v2462_v47 }
 0x302   :  { %v2467_v2 = vmul.f32 -1.442695, %v3843_v7  ;;  %2802 = vpow2.f32 %v2463_v55  ;;  %v2466_v18 = vmul.f32 -1.442695, %v3850_v15 }
 0x303   :  { %v2781_v30 = vpop.eup %2780  ;;  %2804 = vpow2.f32 %v2465_v24 }
 0x304   :  { %v2783_v22 = vpop.eup %2782  ;;  %v1156_v8 = vadd.f32 1.0, %v2781_v30  ;;  %2806 = vpow2.f32 %v2464_v59 }
 0x305   :  { %v2785_v48 = vpop.eup %2784  ;;  %v1158_v27 = vadd.f32 1.0, %v2783_v22  ;;  %2808 = vpow2.f32 %v2467_v2 }
 0x306   :  { %v2787_v42 = vpop.eup %2786  ;;  %v1160_v29 = vadd.f32 1.0, %v2785_v48  ;;  %2810 = vrcp.f32 %v1156_v8 }
 0x307   :  { %2812 = vrcp.f32 %v1158_v27  ;;  %v1162_v52 = vadd.f32 1.0, %v2787_v42 }
 0x308   :  { %v2789_v20 = vpop.eup %2788  ;;  %2814 = vrcp.f32 %v1160_v29 }
 0x309   :  { %v2791_v21 = vpop.eup %2790  ;;  %v1157_v23 = vadd.f32 1.0, %v2789_v20 }
 0x30a   :  { %v2793_v40 = vpop.eup %2792  ;;  %v1159_v31 = vadd.f32 1.0, %v2791_v21 }
 0x30b   :  { %v2795_v19 = vpop.eup %2794  ;;  %2816 = vrcp.f32 %v1157_v23  ;;  %v1161_v16 = vadd.f32 1.0, %v2793_v40 }
 0x30c   :  { %v2797_v17 = vpop.eup %2796  ;;  %2818 = vrcp.f32 %v1159_v31  ;;  %v1163_v37 = vadd.f32 1.0, %v2795_v19 }
 0x30d   :  { %v2799_v5 = vpop.eup %2798  ;;  %2820 = vrcp.f32 %v1161_v16  ;;  %v1164_v14 = vadd.f32 1.0, %v2797_v17  ;;  %v2973_v17 = vld [vmem:[%s4649_s26] sm:$0xff] }
 0x30e   :  { %v1165_v57 = vadd.f32 1.0, %v2799_v5  ;;  %2822 = vpow2.f32 %v2466_v18  ;;  %v2801_v49 = vpop.eup %2800 }
 0x30f   :  { %2824 = vrcp.f32 %v1163_v37  ;;  %v2803_v56 = vpop.eup %2802  ;;  %v1166_v50 = vadd.f32 1.0, %v2801_v49 }
 0x310   :  { %2826 = vrcp.f32 %v1165_v57  ;;  %v2805_v9 = vpop.eup %2804  ;;  %v1167_v58 = vadd.f32 1.0, %v2803_v56  ;;  %v2975_v56 = vld [vmem:[%s4649_s26 + $0x8] sm:$0xff] }
 0x311   :  { %2828 = vrcp.f32 %v1162_v52  ;;  %v2807_v60 = vpop.eup %2806  ;;  %v1169_v39 = vadd.f32 1.0, %v2805_v9 }
 0x312   :  { %2830 = vrcp.f32 %v1164_v14  ;;  %v2809_v32 = vpop.eup %2808  ;;  %v1168_v13 = vadd.f32 1.0, %v2807_v60  ;;  %v2974_v14 = vld [vmem:[%s4649_s26 + $0x18] sm:$0xff] }
 0x313   :  { %v2811_v35 = vpop.eup %2810  ;;  %2832 = vrcp.f32 %v1167_v58  ;;  %v1171_v24 = vadd.f32 1.0, %v2809_v32 }
 0x314   :  { %v2813_v53 = vpop.eup %2812  ;;  %v1204_v51 = vmul.f32 %v2811_v35, %v3772_v61  ;;  %2834 = vrcp.f32 %v1169_v39 }
 0x315   :  { %v2815_v4 = vpop.eup %2814  ;;  %v1206_v62 = vmul.f32 %v2813_v53, %v3776_v36  ;;  %2836 = vrcp.f32 %v1166_v50  ;;  %v2976_v53 = vld [vmem:[%s4649_s26 + $0x20] sm:$0xff] }
 0x316   :  { %v1208_v54 = vmul.f32 %v2815_v4, %v3780_v0  ;;  %2838 = vrcp.f32 %v1168_v13 }
 0x317   :  { %2840 = vrcp.f32 %v1171_v24 }
 0x318   :  { %v2817_v45 = vpop.eup %2816 }
 0x319   :  { %v2819_v25 = vpop.eup %2818  ;;  %v1205_v26 = vmul.f32 %v2817_v45, %v3795_v3 }
 0x31a   :  { %v2821_v43 = vpop.eup %2820  ;;  %v1207_v1 = vmul.f32 %v2819_v25, %v3798_v34  ;;  %v2977_v25 = vld [vmem:[%s4649_s26 + $0x30] sm:$0xff] }
 0x31b   :  { %v2823_v63 = vpop.eup %2822  ;;  %v1220_v47 = vpack.c.bf16 %v1205_v26, %v1204_v51  ;;  %v1209_v55 = vmul.f32 %v2821_v43, %v3802_v28 }
 0x31c   :  { %v1221_v59 = vpack.c.bf16 %v1207_v1, %v1206_v62  ;;  %v2825_v11 = vpop.eup %2824  ;;  %v1170_v36 = vadd.f32 1.0, %v2823_v63  ;;  %v2978_v62 = vld [vmem:[%s4649_s26 + $0x38] sm:$0xff]  ;;  %v2979_v63 = vld [vmem:[%s4649_s26 + $0x28] sm:$0xff] }
 0x31d   :  { %2597 = vmatprep.mubr.msk.bf16.mxu1 %vm743_vm1, %v1220_v47  ;;  %v1222_v61 = vpack.c.bf16 %v1209_v55, %v1208_v54  ;;  %v2827_v3 = vpop.eup %2826  ;;  %v1211_v30 = vmul.f32 %v2825_v11, %v3805_v44 }
 0x31e   :  { %2598 = vmatmul.mubr.msk.bf16.vlgmr.msra.gmra.mxu1 %vm743_vm1, %v1221_v59  ;;  %v2829_v2 = vpop.eup %2828  ;;  %v1213_v0 = vmul.f32 %v2827_v3, %v3817_v12  ;;  %2842 = vrcp.f32 %v1170_v36  ;;  %v2980_v3 = vld [vmem:[%s4649_s26 + $0x40] sm:$0xff] }
 0x31f   :  { %2601 = vmatprep.mubr.msk.bf16.mxu1 %vm743_vm1, %v1222_v61  ;;  %v2831_v34 = vpop.eup %2830  ;;  %v1210_v28 = vmul.f32 %v2829_v2, %v3784_v33 }
 0x320   :  { %v1212_v22 = vmul.f32 %v2831_v34, %v3808_v38  ;;  %v2833_v48 = vpop.eup %2832 }
 0x321   :  { %v1223_v8 = vpack.c.bf16 %v1211_v30, %v1210_v28  ;;  %v2835_v42 = vpop.eup %2834  ;;  %v1215_v44 = vmul.f32 %v2833_v48, %v3834_v10 }
 0x322   :  { %v1224_v27 = vpack.c.bf16 %v1213_v0, %v1212_v22  ;;  %v2837_v29 = vpop.eup %2836  ;;  %v1217_v21 = vmul.f32 %v2835_v42, %v3839_v41  ;;  %v2981_v0 = vld [vmem:[%s4649_s26 + $0x50] sm:$0xff] }
 0x323   :  { %v2839_v20 = vpop.eup %2838  ;;  %v1214_v12 = vmul.f32 %v2837_v29, %v3821_v46  ;;  %v2972_v46 = vld [vmem:[%s4649_s26 + $0x10] sm:$0xff]  ;;  %v2983_v29 = vld [vmem:[%s4649_s26 + $0x48] sm:$0xff] }
 0x324   :  { %v1216_v33 = vmul.f32 %v2839_v20, %v3830_v6  ;;  %v2841_v38 = vpop.eup %2840 }
 0x325   :  { %v1225_v23 = vpack.c.bf16 %v1215_v44, %v1214_v12  ;;  %v1219_v18 = vmul.f32 %v2841_v38, %v3843_v7  ;;  %v3886_v7 = vld [vmem:[%s4618_s12] ss:$0 sm:$0xff] }
 0x326   :  { %2602 = vmatmul.mubr.msk.bf16.gmra.mxu1 %vm743_vm1, %v1223_v8  ;;  %v1226_v40 = vpack.c.bf16 %v1217_v21, %v1216_v33 }
 0x327   :  { %2605 = vmatprep.mubr.msk.bf16.mxu1 %vm743_vm1, %v1224_v27  ;;  %v2982_v27 = vld [vmem:[%s4649_s26 + $0x58] sm:$0xff] }
 0x32b   :  { %v2843_v31 = vpop.eup %2842 }
 0x32c   :  { %v1218_v19 = vmul.f32 %v2843_v31, %v3850_v15 }
 0x32e   :  { %2606 = vmatmul.mubr.msk.bf16.gmra.mxu1 %vm743_vm1, %v1225_v23  ;;  %v1227_v16 = vpack.c.bf16 %v1219_v18, %v1218_v19 }
 0x32f   :  { %2609 = vmatprep.mubr.msk.bf16.mxu1 %vm743_vm1, %v1226_v40  ;;  %v2984_v40 = vld [vmem:[%s4649_s26 + $0x60] sm:$0xff] }
 0x336   :  { %2610 = vmatmul.mubr.msk.bf16.gmra.mxu1 %vm743_vm1, %v1227_v16 }
 0x3de   :  { %v2599_v10 = vpop.f32.mrf.mxu1 }
 0x3df   :  { %v1383_v6 = vadd.f32 %v2972_v46, %v2599_v10  ;;  %v2985_v10 = vld [vmem:[%s4649_s26 + $0x70] sm:$0xff] }
 0x3e0   :  { %v1318_v41 = vpop.f32.mrf.mxu1 }
 0x3e1   :  { %v1381_v37 = vadd.f32 %v2973_v17, %v1318_v41  ;;  %v3892_v57 = vadd.f32 %v3886_v7, %v1383_v6 }
 0x3e2   :  { %v2600_v15 = vpop.f32.mrf.mxu1 }
 0x3e3   :  { %v3889_v5 = vadd.f32 %v3886_v7, %v1381_v37  ;;  %v1384_v49 = vadd.f32 %v2974_v14, %v2600_v15  ;;  %v1428_v4 = vsel %vm87_vm0, %v3892_v57, 0.0  ;;  %v2986_v37 = vld [vmem:[%s4649_s26 + $0x78] sm:$0xff] }
 0x3e4   :  { %v1321_v52 = vpop.f32.mrf.mxu1 }
 0x3e5   :  { %v1382_v9 = vadd.f32 %v2975_v56, %v1321_v52  ;;  %v1422_v60 = vsel %vm87_vm0, %v3889_v5, 0.0  ;;  %v3906_v39 = vadd.f32 %v3886_v7, %v1384_v49  ;;  %v2987_v52 = vld [vmem:[%s4649_s26 + $0x68] sm:$0xff] }
 0x3e6   :  { %1423 = vadd.xlane.f32.xlu0 %v1422_v60  ;;  %v2603_v32 = vpop.f32.mrf.mxu1 }
 0x3e7   :  { %v3903_v58 = vadd.f32 %v3886_v7, %v1382_v9  ;;  %v1387_v51 = vadd.f32 %v2977_v25, %v2603_v32  ;;  %v1431_v54 = vsel %vm87_vm0, %v3906_v39, 0.0 }
 0x3e8   :  { %v1334_v35 = vpop.f32.mrf.mxu1 }
 0x3e9   :  { %v1385_v50 = vadd.f32 %v2976_v53, %v1334_v35  ;;  %v1425_v13 = vsel %vm87_vm0, %v3903_v58, 0.0  ;;  %v3933_v24 = vadd.f32 %v3886_v7, %v1387_v51 }
 0x3ea   :  { %1429 = vadd.xlane.f32.xlu0 %v1428_v4  ;;  %1426 = vadd.xlane.f32.xlu1 %v1425_v13  ;;  %v2604_v45 = vpop.f32.mrf.mxu1 }
 0x3eb   :  { %v3919_v43 = vadd.f32 %v3886_v7, %v1385_v50  ;;  %v1388_v1 = vadd.f32 %v2978_v62, %v2604_v45  ;;  %v1440_v8 = vsel %vm87_vm0, %v3933_v24, 0.0 }
 0x3ec   :  { %v1337_v26 = vpop.f32.mrf.mxu1 }
 0x3ed   :  { %v1386_v47 = vadd.f32 %v2979_v63, %v1337_v26  ;;  %v3936_v61 = vadd.f32 %v3886_v7, %v1388_v1  ;;  %v1434_v2 = vsel %vm87_vm0, %v3919_v43, 0.0 }
 0x3ee   :  { %1432 = vadd.xlane.f32.xlu0 %v1431_v54  ;;  %v2607_v55 = vpop.f32.mrf.mxu1 }
 0x3ef   :  { %v3930_v59 = vadd.f32 %v3886_v7, %v1386_v47  ;;  %v1391_v28 = vadd.f32 %v2981_v0, %v2607_v55  ;;  %v1443_v44 = vsel %vm87_vm0, %v3936_v61, 0.0 }
 0x3f0   :  { %v1350_v11 = vpop.f32.mrf.mxu1 }
 0x3f1   :  { %v1389_v36 = vadd.f32 %v2980_v3, %v1350_v11  ;;  %v1437_v34 = vsel %vm87_vm0, %v3930_v59, 0.0  ;;  %v3965_v33 = vadd.f32 %v3886_v7, %v1391_v28 }
 0x3f2   :  { %1435 = vadd.xlane.f32.xlu0 %v1434_v2  ;;  %1438 = vadd.xlane.f32.xlu1 %v1437_v34  ;;  %v2608_v30 = vpop.f32.mrf.mxu1 }
 0x3f3   :  { %v3951_v48 = vadd.f32 %v3886_v7, %v1389_v36  ;;  %v1392_v42 = vadd.f32 %v2982_v27, %v2608_v30  ;;  %v1452_v6 = vsel %vm87_vm0, %v3965_v33, 0.0 }
 0x3f4   :  { %v1353_v22 = vpop.f32.mrf.mxu1 }
 0x3f5   :  { %v1390_v20 = vadd.f32 %v2983_v29, %v1353_v22  ;;  %v3968_v38 = vadd.f32 %v3886_v7, %v1392_v42  ;;  %v1446_v18 = vsel %vm87_vm0, %v3951_v48, 0.0 }
 0x3f6   :  { %1441 = vadd.xlane.f32.xlu0 %v1440_v8  ;;  %1444 = vadd.xlane.f32.xlu1 %v1443_v44  ;;  %v2611_v21 = vpop.f32.mrf.mxu1 }
 0x3f7   :  { %v3962_v12 = vadd.f32 %v3886_v7, %v1390_v20  ;;  %v1395_v41 = vadd.f32 %v2985_v10, %v2611_v21  ;;  %v1455_v49 = vsel %vm87_vm0, %v3968_v38, 0.0 }
 0x3f8   :  { %v1366_v23 = vpop.f32.mrf.mxu1 }
 0x3f9   :  { %v1393_v31 = vadd.f32 %v2984_v40, %v1366_v23  ;;  %v1449_v19 = vsel %vm87_vm0, %v3962_v12, 0.0  ;;  %v3997_v9 = vadd.f32 %v3886_v7, %v1395_v41 }
 0x3fa   :  { %1447 = vadd.xlane.f32.xlu0 %v1446_v18  ;;  %1450 = vadd.xlane.f32.xlu1 %v1449_v19  ;;  %v2612_v16 = vpop.f32.mrf.mxu1 }
 0x3fb   :  { %v3983_v17 = vadd.f32 %v3886_v7, %v1393_v31  ;;  %v1396_v15 = vadd.f32 %v2986_v37, %v2612_v16  ;;  %v1464_v53 = vsel %vm87_vm0, %v3997_v9, 0.0 }
 0x3fc   :  { %v1369_v46 = vpop.f32.mrf.mxu1 }
 0x3fd   :  { %v1394_v14 = vadd.f32 %v2987_v52, %v1369_v46  ;;  %v4000_v60 = vadd.f32 %v3886_v7, %v1396_v15  ;;  %v1458_v32 = vsel %vm87_vm0, %v3983_v17, 0.0 }
 0x3fe   :  { %1453 = vadd.xlane.f32.xlu0 %v1452_v6  ;;  %1456 = vadd.xlane.f32.xlu1 %v1455_v49 }
 0x3ff   :  { %v3994_v56 = vadd.f32 %v3886_v7, %v1394_v14  ;;  %v1467_v50 = vsel %vm87_vm0, %v4000_v60, 0.0 }
 0x401   :  { %v1461_v35 = vsel %vm87_vm0, %v3994_v56, 0.0 }
 0x402   :  { %1459 = vadd.xlane.f32.xlu0 %v1458_v32  ;;  %1462 = vadd.xlane.f32.xlu1 %v1461_v35 }
 0x406   :  { %1465 = vadd.xlane.f32.xlu0 %v1464_v53  ;;  %1468 = vadd.xlane.f32.xlu1 %v1467_v50 }
 0x46f   :  { %v1424_v4 = vpop.xlane.xlu0 %1423 }
 0x470   :  { %v1470_v13 = vmul.f32 0.03125, %v1424_v4  ;;  %v2672_v4 = vld [vmem:[%s4619_s15 + $0x8] sm:$0xff]  }
 0x471   :  { %2613 = vmatprep.subr.bf16.mxu0 %v2672_v4 }
 0x472   :  { %v4011_v7 = vsub.f32 %v3889_v5, %v1470_v13  ;;  %2614 = vmatpush3.bf16.msra.mxu0 %v2672_v4 }
 0x473   :  { %v1430_v45 = vpop.xlane.xlu0 %1429  ;;  %v1427_v25 = vpop.xlane.xlu1 %1426 }
 0x474   :  { %v1472_v51 = vmul.f32 0.03125, %v1430_v45  ;;  %v1471_v26 = vmul.f32 0.03125, %v1427_v25  ;;  %v1502_v62 = vmul.f32 %v4011_v7, %v4011_v7 }
 0x476   :  { %v4016_v1 = vsub.f32 %v3892_v57, %v1472_v51  ;;  %v4019_v63 = vsub.f32 %v3903_v58, %v1471_v26  ;;  %v1518_v47 = vsel %vm87_vm0, %v1502_v62, 0.0 }
 0x477   :  { %v1433_v54 = vpop.xlane.xlu0 %1432  ;;  %1519 = vadd.xlane.f32.xlu0 %v1518_v47 }
 0x478   :  { %v1473_v55 = vmul.f32 0.03125, %v1433_v54  ;;  %v1504_v11 = vmul.f32 %v4016_v1, %v4016_v1  ;;  %v1503_v3 = vmul.f32 %v4019_v63, %v4019_v63 }
 0x47a   :  { %v4027_v36 = vsub.f32 %v3906_v39, %v1473_v55  ;;  %v1524_v2 = vsel %vm87_vm0, %v1504_v11, 0.0  ;;  %v1521_v34 = vsel %vm87_vm0, %v1503_v3, 0.0 }
 0x47b   :  { %v1436_v30 = vpop.xlane.xlu0 %1435  ;;  %v1439_v0 = vpop.xlane.xlu1 %1438  ;;  %1525 = vadd.xlane.f32.xlu0 %v1524_v2  ;;  %1522 = vadd.xlane.f32.xlu1 %v1521_v34 }
 0x47c   :  { %v1474_v28 = vmul.f32 0.03125, %v1436_v30  ;;  %v1475_v22 = vmul.f32 0.03125, %v1439_v0  ;;  %v1505_v8 = vmul.f32 %v4027_v36, %v4027_v36 }
 0x47e   :  { %v4034_v27 = vsub.f32 %v3919_v43, %v1474_v28  ;;  %v4037_v42 = vsub.f32 %v3930_v59, %v1475_v22  ;;  %v1527_v29 = vsel %vm87_vm0, %v1505_v8, 0.0 }
 0x47f   :  { %v1442_v20 = vpop.xlane.xlu0 %1441  ;;  %v1445_v44 = vpop.xlane.xlu1 %1444  ;;  %1528 = vadd.xlane.f32.xlu1 %v1527_v29 }
 0x480   :  { %v1476_v21 = vmul.f32 0.03125, %v1442_v20  ;;  %v1477_v23 = vmul.f32 0.03125, %v1445_v44  ;;  %v1506_v40 = vmul.f32 %v4034_v27, %v4034_v27  ;;  %v1507_v31 = vmul.f32 %v4037_v42, %v4037_v42 }
 0x482   :  { %v4045_v18 = vsub.f32 %v3933_v24, %v1476_v21  ;;  %v4048_v19 = vsub.f32 %v3936_v61, %v1477_v23  ;;  %v1530_v16 = vsel %vm87_vm0, %v1506_v40, 0.0  ;;  %v1533_v10 = vsel %vm87_vm0, %v1507_v31, 0.0 }
 0x483   :  { %v1448_v41 = vpop.xlane.xlu0 %1447  ;;  %v1451_v46 = vpop.xlane.xlu1 %1450  ;;  %1531 = vadd.xlane.f32.xlu0 %v1530_v16  ;;  %1534 = vadd.xlane.f32.xlu1 %v1533_v10 }
 0x484   :  { %v1478_v6 = vmul.f32 0.03125, %v1448_v41  ;;  %v1479_v37 = vmul.f32 0.03125, %v1451_v46  ;;  %v1508_v15 = vmul.f32 %v4045_v18, %v4045_v18  ;;  %v1509_v52 = vmul.f32 %v4048_v19, %v4048_v19 }
 0x486   :  { %v4057_v14 = vsub.f32 %v3951_v48, %v1478_v6  ;;  %v4060_v49 = vsub.f32 %v3962_v12, %v1479_v37  ;;  %v1536_v32 = vsel %vm87_vm0, %v1508_v15, 0.0  ;;  %v1539_v35 = vsel %vm87_vm0, %v1509_v52, 0.0  ;;  %v2673_v52 = vld [vmem:[%s4619_s15] sm:$0xff]  }
 0x487   :  { %v1454_v53 = vpop.xlane.xlu0 %1453  ;;  %v1457_v50 = vpop.xlane.xlu1 %1456  ;;  %1537 = vadd.xlane.f32.xlu0 %v1536_v32  ;;  %1540 = vadd.xlane.f32.xlu1 %v1539_v35 }
 0x488   :  { %v1480_v13 = vmul.f32 0.03125, %v1454_v53  ;;  %v1481_v45 = vmul.f32 0.03125, %v1457_v50  ;;  %v1510_v25 = vmul.f32 %v4057_v14, %v4057_v14  ;;  %v1511_v51 = vmul.f32 %v4060_v49, %v4060_v49  ;;  %2615 = vmatprep.subr.bf16.mxu0 %v2673_v52 }
 0x489   :  { %2616 = vmatpush3.bf16.msra.mxu0 %v2673_v52 }
 0x48a   :  { %v4072_v26 = vsub.f32 %v3965_v33, %v1480_v13  ;;  %v4075_v62 = vsub.f32 %v3968_v38, %v1481_v45  ;;  %v1542_v47 = vsel %vm87_vm0, %v1510_v25, 0.0  ;;  %v1545_v54 = vsel %vm87_vm0, %v1511_v51, 0.0 }
 0x48b   :  { %1543 = vadd.xlane.f32.xlu0 %v1542_v47  ;;  %v1460_v55 = vpop.xlane.xlu0 %1459  ;;  %1546 = vadd.xlane.f32.xlu1 %v1545_v54  ;;  %v1463_v11 = vpop.xlane.xlu1 %1462 }
 0x48c   :  { %v1482_v3 = vmul.f32 0.03125, %v1460_v55  ;;  %v1483_v2 = vmul.f32 0.03125, %v1463_v11  ;;  %v1512_v34 = vmul.f32 %v4072_v26, %v4072_v26  ;;  %v1513_v30 = vmul.f32 %v4075_v62, %v4075_v62 }
 0x48e   :  { %v4084_v0 = vsub.f32 %v3983_v17, %v1482_v3  ;;  %v4087_v28 = vsub.f32 %v3994_v56, %v1483_v2  ;;  %v1548_v22 = vsel %vm87_vm0, %v1512_v34, 0.0  ;;  %v1551_v8 = vsel %vm87_vm0, %v1513_v30, 0.0 }
 0x48f   :  { %1549 = vadd.xlane.f32.xlu0 %v1548_v22  ;;  %v1466_v29 = vpop.xlane.xlu0 %1465  ;;  %1552 = vadd.xlane.f32.xlu1 %v1551_v8  ;;  %v1469_v20 = vpop.xlane.xlu1 %1468 }
 0x490   :  { %v1484_v44 = vmul.f32 0.03125, %v1466_v29  ;;  %v1485_v21 = vmul.f32 0.03125, %v1469_v20  ;;  %v1514_v23 = vmul.f32 %v4084_v0, %v4084_v0  ;;  %v1515_v40 = vmul.f32 %v4087_v28, %v4087_v28 }
 0x492   :  { %v4096_v31 = vsub.f32 %v3997_v9, %v1484_v44  ;;  %v4099_v16 = vsub.f32 %v4000_v60, %v1485_v21  ;;  %v1554_v10 = vsel %vm87_vm0, %v1514_v23, 0.0  ;;  %v1557_v41 = vsel %vm87_vm0, %v1515_v40, 0.0 }
 0x493   :  { %1555 = vadd.xlane.f32.xlu0 %v1554_v10  ;;  %1558 = vadd.xlane.f32.xlu1 %v1557_v41 }
 0x494   :  { %v1516_v46 = vmul.f32 %v4096_v31, %v4096_v31  ;;  %v1517_v6 = vmul.f32 %v4099_v16, %v4099_v16 }
 0x496   :  { %v1560_v37 = vsel %vm87_vm0, %v1516_v46, 0.0  ;;  %v1563_v15 = vsel %vm87_vm0, %v1517_v6, 0.0  ;;  %v4116_v6 = vld [vmem:[%s4620_s13] ss:$0 sm:$0xff] }
 0x497   :  { %1561 = vadd.xlane.f32.xlu0 %v1560_v37  ;;  %1564 = vadd.xlane.f32.xlu1 %v1563_v15 }
 0x500   :  { %v1520_v32 = vpop.xlane.xlu0 %1519 }
 0x501   :  { %v1566_v35 = vmul.f32 0.03125, %v1520_v32 }
 0x503   :  { %v1582_v53 = vadd.f32 1e-05, %v1566_v35 }
 0x504   :  { %v1526_v50 = vpop.xlane.xlu0 %1525  ;;  %v1523_v4 = vpop.xlane.xlu1 %1522 }
 0x505   :  { %2844 = vrsqrt.f32 %v1582_v53  ;;  %v1568_v13 = vmul.f32 0.03125, %v1526_v50  ;;  %v1567_v45 = vmul.f32 0.03125, %v1523_v4 }
 0x507   :  { %v1584_v25 = vadd.f32 1e-05, %v1568_v13  ;;  %v1583_v51 = vadd.f32 1e-05, %v1567_v45 }
 0x508   :  { %v1529_v47 = vpop.xlane.xlu1 %1528 }
 0x509   :  { %2846 = vrsqrt.f32 %v1584_v25  ;;  %v1569_v54 = vmul.f32 0.03125, %v1529_v47  ;;  %v4124_v47 = vld [vmem:[%s4621_s14] ss:$0 sm:$0xff] }
 0x50a   :  { %2848 = vrsqrt.f32 %v1583_v51 }
 0x50b   :  { %v1585_v55 = vadd.f32 1e-05, %v1569_v54 }
 0x50c   :  { %v1532_v11 = vpop.xlane.xlu0 %1531  ;;  %v1535_v3 = vpop.xlane.xlu1 %1534 }
 0x50d   :  { %2850 = vrsqrt.f32 %v1585_v55  ;;  %v1570_v2 = vmul.f32 0.03125, %v1532_v11  ;;  %v1571_v34 = vmul.f32 0.03125, %v1535_v3 }
 0x50f   :  { %v1586_v30 = vadd.f32 1e-05, %v1570_v2  ;;  %v1587_v22 = vadd.f32 1e-05, %v1571_v34 }
 0x510   :  { %v1538_v8 = vpop.xlane.xlu0 %1537  ;;  %v1541_v29 = vpop.xlane.xlu1 %1540 }
 0x511   :  { %2852 = vrsqrt.f32 %v1586_v30  ;;  %v1572_v20 = vmul.f32 0.03125, %v1538_v8  ;;  %v1573_v44 = vmul.f32 0.03125, %v1541_v29 }
 0x512   :  { %v2845_v21 = vpop.eup %2844  ;;  %2854 = vrsqrt.f32 %v1587_v22 }
 0x513   :  { %v1588_v23 = vadd.f32 1e-05, %v1572_v20  ;;  %v1589_v40 = vadd.f32 1e-05, %v1573_v44  ;;  %v1614_v46 = vmul.f32 %v2845_v21, %v4011_v7 }
 0x514   :  { %v1544_v10 = vpop.xlane.xlu0 %1543  ;;  %v1547_v41 = vpop.xlane.xlu1 %1546 }
 0x515   :  { %2856 = vrsqrt.f32 %v1588_v23  ;;  %v1574_v37 = vmul.f32 0.03125, %v1544_v10  ;;  %v1575_v15 = vmul.f32 0.03125, %v1547_v41  ;;  %v1636_v7 = vmul.f32 %v4116_v6, %v1614_v46 }
 0x516   :  { %v2847_v52 = vpop.eup %2846  ;;  %2858 = vrsqrt.f32 %v1589_v40 }
 0x517   :  { %v2849_v32 = vpop.eup %2848  ;;  %v1616_v35 = vmul.f32 %v2847_v52, %v4016_v1  ;;  %v1590_v53 = vadd.f32 1e-05, %v1574_v37  ;;  %v1591_v50 = vadd.f32 1e-05, %v1575_v15  ;;  %v1658_v30 = vadd.f32 %v4124_v47, %v1636_v7 }
 0x518   :  { %v1550_v4 = vpop.xlane.xlu0 %1549  ;;  %v1553_v13 = vpop.xlane.xlu1 %1552  ;;  %v1615_v45 = vmul.f32 %v2849_v32, %v4019_v63 }
 0x519   :  { %2860 = vrsqrt.f32 %v1590_v53  ;;  %v1576_v25 = vmul.f32 0.03125, %v1550_v4  ;;  %v1577_v51 = vmul.f32 0.03125, %v1553_v13  ;;  %v1638_v55 = vmul.f32 %v4116_v6, %v1616_v35 }
 0x51a   :  { %v2851_v54 = vpop.eup %2850  ;;  %2862 = vrsqrt.f32 %v1591_v50  ;;  %v1637_v1 = vmul.f32 %v4116_v6, %v1615_v45 }
 0x51b   :  { %v1617_v11 = vmul.f32 %v2851_v54, %v4027_v36  ;;  %v1592_v3 = vadd.f32 1e-05, %v1576_v25  ;;  %v1593_v63 = vadd.f32 1e-05, %v1577_v51  ;;  %v1660_v23 = vadd.f32 %v4124_v47, %v1638_v55 }
 0x51c   :  { %v1556_v2 = vpop.xlane.xlu0 %1555  ;;  %v1559_v34 = vpop.xlane.xlu1 %1558  ;;  %v1659_v22 = vadd.f32 %v4124_v47, %v1637_v1 }
 0x51d   :  { %v1639_v8 = vmul.f32 %v4116_v6, %v1617_v11  ;;  %2864 = vrsqrt.f32 %v1592_v3  ;;  %v1578_v29 = vmul.f32 0.03125, %v1556_v2  ;;  %v1579_v20 = vmul.f32 0.03125, %v1559_v34 }
 0x51e   :  { %v2853_v44 = vpop.eup %2852  ;;  %2866 = vrsqrt.f32 %v1593_v63  ;;  %v1674_v21 = vpack.c.bf16 %v1659_v22, %v1658_v30 }
 0x51f   :  { %v2855_v40 = vpop.eup %2854  ;;  %v1594_v36 = vadd.f32 1e-05, %v1578_v29  ;;  %v1595_v10 = vadd.f32 1e-05, %v1579_v20  ;;  %v1661_v41 = vadd.f32 %v4124_v47, %v1639_v8  ;;  %v1618_v46 = vmul.f32 %v2853_v44, %v4034_v27 }
 0x520   :  { %2617 = vmatprep.mubr.msk.bf16.mxu0 %vm87_vm0, %v1674_v21  ;;  %v1562_v37 = vpop.xlane.xlu0 %1561  ;;  %v1565_v15 = vpop.xlane.xlu1 %1564  ;;  %v1619_v52 = vmul.f32 %v2855_v40, %v4037_v42 }
 0x521   :  { %2868 = vrsqrt.f32 %v1594_v36  ;;  %v1580_v32 = vmul.f32 0.03125, %v1562_v37  ;;  %v1581_v35 = vmul.f32 0.03125, %v1565_v15  ;;  %v1675_v53 = vpack.c.bf16 %v1661_v41, %v1660_v23 }
 0x522   :  { %v2857_v50 = vpop.eup %2856  ;;  %2870 = vrsqrt.f32 %v1595_v10  ;;  %v1640_v4 = vmul.f32 %v4116_v6, %v1618_v46  ;;  %v1641_v13 = vmul.f32 %v4116_v6, %v1619_v52 }
 0x523   :  { %v2859_v45 = vpop.eup %2858  ;;  %v1596_v7 = vadd.f32 1e-05, %v1580_v32  ;;  %v1597_v25 = vadd.f32 1e-05, %v1581_v35  ;;  %2618 = vmatmul.mubr.msk.bf16.vlgmr.msra.gmra.mxu0 %vm87_vm0, %v1675_v53  ;;  %v1620_v27 = vmul.f32 %v2857_v50, %v4045_v18 }
 0x524   :  { %v1662_v51 = vadd.f32 %v4124_v47, %v1640_v4  ;;  %v1663_v42 = vadd.f32 %v4124_v47, %v1641_v13  ;;  %v1621_v54 = vmul.f32 %v2859_v45, %v4048_v19 }
 0x525   :  { %2872 = vrsqrt.f32 %v1596_v7  ;;  %v1642_v55 = vmul.f32 %v4116_v6, %v1620_v27 }
 0x526   :  { %v2861_v1 = vpop.eup %2860  ;;  %2874 = vrsqrt.f32 %v1597_v25  ;;  %v1676_v11 = vpack.c.bf16 %v1663_v42, %v1662_v51  ;;  %v1643_v3 = vmul.f32 %v4116_v6, %v1621_v54  ;;  %v2678_v42 = vld [vmem:[%s4622_s17 + $0x18] sm:$0xff]   ;;  %v2679_v54 = vld [vmem:[%s4622_s17 + $0x10] sm:$0xff]  }
 0x527   :  { %v2863_v63 = vpop.eup %2862  ;;  %v1664_v2 = vadd.f32 %v4124_v47, %v1642_v55  ;;  %v1622_v34 = vmul.f32 %v2861_v1, %v4057_v14  ;;  %v2680_v55 = vld [vmem:[%s4622_s17 + $0x8] sm:$0xff]   ;;  %v2681_v1 = vld [vmem:[%s4622_s17] sm:$0xff]  }
 0x528   :  { %2621 = vmatprep.mubr.msk.bf16.mxu0 %vm87_vm0, %v1676_v11  ;;  %v1665_v18 = vadd.f32 %v4124_v47, %v1643_v3  ;;  %v1623_v30 = vmul.f32 %v2863_v63, %v4060_v49  ;;  %v4205_v11 = vld [vmem:[%s4623_s16] ss:$0 sm:$0xff] }
 0x529   :  { %v1644_v19 = vmul.f32 %v4116_v6, %v1622_v34 }
 0x52a   :  { %v2865_v22 = vpop.eup %2864  ;;  %v1677_v8 = vpack.c.bf16 %v1665_v18, %v1664_v2  ;;  %v1645_v29 = vmul.f32 %v4116_v6, %v1623_v30 }
 0x52b   :  { %v2867_v20 = vpop.eup %2866  ;;  %v1666_v44 = vadd.f32 %v4124_v47, %v1644_v19  ;;  %v1624_v21 = vmul.f32 %v2865_v22, %v4072_v26 }
 0x52c   :  { %2622 = vmatmul.mubr.msk.bf16.gmra.mxu0 %vm87_vm0, %v1677_v8  ;;  %v1667_v14 = vadd.f32 %v4124_v47, %v1645_v29  ;;  %v1625_v23 = vmul.f32 %v2867_v20, %v4075_v62 }
 0x52d   :  { %v1646_v40 = vmul.f32 %v4116_v6, %v1624_v21 }
 0x52e   :  { %v2869_v49 = vpop.eup %2868  ;;  %v1678_v36 = vpack.c.bf16 %v1667_v14, %v1666_v44  ;;  %v1647_v10 = vmul.f32 %v4116_v6, %v1625_v23 }
 0x52f   :  { %v2871_v41 = vpop.eup %2870  ;;  %v1668_v46 = vadd.f32 %v4124_v47, %v1646_v40  ;;  %v1626_v37 = vmul.f32 %v2869_v49, %v4084_v0 }
 0x530   :  { %2625 = vmatprep.mubr.msk.bf16.mxu0 %vm87_vm0, %v1678_v36  ;;  %v1669_v26 = vadd.f32 %v4124_v47, %v1647_v10  ;;  %v1627_v15 = vmul.f32 %v2871_v41, %v4087_v28 }
 0x531   :  { %v1648_v52 = vmul.f32 %v4116_v6, %v1626_v37 }
 0x532   :  { %v2873_v62 = vpop.eup %2872  ;;  %v1679_v32 = vpack.c.bf16 %v1669_v26, %v1668_v46  ;;  %v1649_v35 = vmul.f32 %v4116_v6, %v1627_v15 }
 0x533   :  { %v2875_v53 = vpop.eup %2874  ;;  %v1670_v50 = vadd.f32 %v4124_v47, %v1648_v52  ;;  %v1628_v4 = vmul.f32 %v2873_v62, %v4096_v31  ;;  %v2674_v31 = vld [vmem:[%s4622_s17 + $0x38] sm:$0xff]  }
 0x534   :  { %2626 = vmatmul.mubr.msk.bf16.gmra.mxu0 %vm87_vm0, %v1679_v32  ;;  %v1671_v0 = vadd.f32 %v4124_v47, %v1649_v35  ;;  %v1629_v13 = vmul.f32 %v2875_v53, %v4099_v16  ;;  %2633 = vmatprep.subr.bf16.mxu1 %v2674_v31  ;;  %v2675_v16 = vld [vmem:[%s4622_s17 + $0x30] sm:$0xff]  }
 0x535   :  { %v1650_v45 = vmul.f32 %v4116_v6, %v1628_v4  ;;  %2634 = vmatpush3.bf16.msra.mxu1 %v2674_v31 }
 0x536   :  { %v1680_v28 = vpack.c.bf16 %v1671_v0, %v1670_v50  ;;  %v1651_v7 = vmul.f32 %v4116_v6, %v1629_v13  ;;  %2635 = vmatprep.subr.bf16.mxu1 %v2675_v16  ;;  %v2676_v6 = vld [vmem:[%s4622_s17 + $0x28] sm:$0xff]  }
 0x537   :  { %v1672_v25 = vadd.f32 %v4124_v47, %v1650_v45 }
 0x538   :  { %2629 = vmatprep.mubr.msk.bf16.mxu0 %vm87_vm0, %v1680_v28  ;;  %v1673_v27 = vadd.f32 %v4124_v47, %v1651_v7  ;;  %v2677_v47 = vld [vmem:[%s4622_s17 + $0x20] sm:$0xff]  }
 0x539   :  { %2636 = vmatpush3.bf16.msra.mxu1 %v2675_v16 }
 0x53a   :  { %v1681_v51 = vpack.c.bf16 %v1673_v27, %v1672_v25  ;;  %2637 = vmatprep.subr.bf16.mxu1 %v2676_v6 }
 0x53c   :  { %2630 = vmatmul.mubr.msk.bf16.gmra.mxu0 %vm87_vm0, %v1681_v51 }
 0x53d   :  { %2638 = vmatpush3.bf16.msra.mxu1 %v2676_v6 }
 0x53e   :  { %2639 = vmatprep.subr.bf16.mxu1 %v2677_v47 }
 0x541   :  { %2640 = vmatpush3.bf16.msra.mxu1 %v2677_v47 }
 0x542   :  { %2641 = vmatprep.subr.bf16.mxu1 %v2678_v42 }
 0x545   :  { %2642 = vmatpush3.bf16.msra.mxu1 %v2678_v42 }
 0x546   :  { %2643 = vmatprep.subr.bf16.mxu1 %v2679_v54 }
 0x549   :  { %2644 = vmatpush3.bf16.msra.mxu1 %v2679_v54 }
 0x54a   :  { %2645 = vmatprep.subr.bf16.mxu1 %v2680_v55 }
 0x54d   :  { %2646 = vmatpush3.bf16.msra.mxu1 %v2680_v55 }
 0x54e   :  { %2647 = vmatprep.subr.bf16.mxu1 %v2681_v1 }
 0x551   :  { %2648 = vmatpush3.bf16.msra.mxu1 %v2681_v1 }
 0x5e3   :  { %v2619_v3 = vpop.f32.mrf.mxu0 }
 0x5e4   :  { %v4208_v63 = vadd.f32 %v2619_v3, %v4205_v11 }
 0x5e5   :  { %v1763_v2 = vpop.f32.mrf.mxu0 }
 0x5e6   :  { %v2496_v34 = vmul.f32 -1.442695, %v4208_v63  ;;  %v4212_v18 = vadd.f32 %v4205_v11, %v1763_v2 }
 0x5e7   :  { %v2620_v30 = vpop.f32.mrf.mxu0 }
 0x5e8   :  { %2876 = vpow2.f32 %v2496_v34  ;;  %v2494_v19 = vmul.f32 -1.442695, %v4212_v18  ;;  %v4216_v22 = vadd.f32 %v2620_v30, %v4205_v11 }
 0x5e9   :  { %v1766_v8 = vpop.f32.mrf.mxu0 }
 0x5ea   :  { %2878 = vpow2.f32 %v2494_v19  ;;  %v2497_v29 = vmul.f32 -1.442695, %v4216_v22  ;;  %v4220_v20 = vadd.f32 %v4205_v11, %v1766_v8 }
 0x5ec   :  { %2880 = vpow2.f32 %v2497_v29  ;;  %v2495_v44 = vmul.f32 -1.442695, %v4220_v20  ;;  %v2623_v21 = vpop.f32.mrf.mxu0 }
 0x5ed   :  { %v4224_v14 = vadd.f32 %v2623_v21, %v4205_v11 }
 0x5ee   :  { %2882 = vpow2.f32 %v2495_v44  ;;  %v1779_v23 = vpop.f32.mrf.mxu0 }
 0x5ef   :  { %v2500_v40 = vmul.f32 -1.442695, %v4224_v14  ;;  %v4228_v49 = vadd.f32 %v4205_v11, %v1779_v23 }
 0x5f0   :  { %v2624_v36 = vpop.f32.mrf.mxu0 }
 0x5f1   :  { %2884 = vpow2.f32 %v2500_v40  ;;  %v2498_v10 = vmul.f32 -1.442695, %v4228_v49  ;;  %v4232_v41 = vadd.f32 %v2624_v36, %v4205_v11 }
 0x5f2   :  { %v1782_v46 = vpop.f32.mrf.mxu0 }
 0x5f3   :  { %2886 = vpow2.f32 %v2498_v10  ;;  %v2501_v37 = vmul.f32 -1.442695, %v4232_v41  ;;  %v4236_v26 = vadd.f32 %v4205_v11, %v1782_v46 }
 0x5f4   :  { %v2627_v15 = vpop.f32.mrf.mxu0 }
 0x5f5   :  { %v2877_v52 = vpop.eup %2876  ;;  %2888 = vpow2.f32 %v2501_v37  ;;  %v2499_v62 = vmul.f32 -1.442695, %v4236_v26  ;;  %v4240_v32 = vadd.f32 %v2627_v15, %v4205_v11 }
 0x5f6   :  { %v1876_v35 = vadd.f32 1.0, %v2877_v52  ;;  %v1795_v53 = vpop.f32.mrf.mxu0 }
 0x5f7   :  { %v2879_v50 = vpop.eup %2878  ;;  %2890 = vpow2.f32 %v2499_v62  ;;  %v2504_v4 = vmul.f32 -1.442695, %v4240_v32  ;;  %v4244_v0 = vadd.f32 %v4205_v11, %v1795_v53 }
 0x5f8   :  { %2892 = vrcp.f32 %v1876_v35  ;;  %v1874_v13 = vadd.f32 1.0, %v2879_v50  ;;  %v2628_v45 = vpop.f32.mrf.mxu0 }
 0x5f9   :  { %v2881_v28 = vpop.eup %2880  ;;  %2894 = vpow2.f32 %v2504_v4  ;;  %v2502_v7 = vmul.f32 -1.442695, %v4244_v0  ;;  %v4248_v25 = vadd.f32 %v2628_v45, %v4205_v11 }
 0x5fa   :  { %2896 = vrcp.f32 %v1874_v13  ;;  %v1877_v27 = vadd.f32 1.0, %v2881_v28  ;;  %v1798_v51 = vpop.f32.mrf.mxu0 }
 0x5fb   :  { %v2883_v31 = vpop.eup %2882  ;;  %2898 = vpow2.f32 %v2502_v7  ;;  %v2505_v16 = vmul.f32 -1.442695, %v4248_v25  ;;  %v4252_v6 = vadd.f32 %v4205_v11, %v1798_v51 }
 0x5fc   :  { %2900 = vrcp.f32 %v1877_v27  ;;  %v1875_v47 = vadd.f32 1.0, %v2883_v31  ;;  %v2631_v42 = vpop.f32.mrf.mxu0 }
 0x5fd   :  { %2902 = vpow2.f32 %v2505_v16  ;;  %v2503_v54 = vmul.f32 -1.442695, %v4252_v6  ;;  %v4256_v55 = vadd.f32 %v2631_v42, %v4205_v11 }
 0x5fe   :  { %v2885_v1 = vpop.eup %2884  ;;  %2904 = vrcp.f32 %v1875_v47  ;;  %v1811_v3 = vpop.f32.mrf.mxu0 }
 0x5ff   :  { %v1880_v2 = vadd.f32 1.0, %v2885_v1  ;;  %2906 = vpow2.f32 %v2503_v54  ;;  %v2508_v34 = vmul.f32 -1.442695, %v4256_v55  ;;  %v4260_v30 = vadd.f32 %v4205_v11, %v1811_v3 }
 0x600   :  { %v2887_v19 = vpop.eup %2886  ;;  %v2632_v8 = vpop.f32.mrf.mxu0 }
 0x601   :  { %2908 = vrcp.f32 %v1880_v2  ;;  %v1878_v29 = vadd.f32 1.0, %v2887_v19  ;;  %v2506_v44 = vmul.f32 -1.442695, %v4260_v30  ;;  %v4264_v21 = vadd.f32 %v2632_v8, %v4205_v11 }
 0x602   :  { %v2889_v23 = vpop.eup %2888  ;;  %2910 = vpow2.f32 %v2508_v34  ;;  %v1814_v40 = vpop.f32.mrf.mxu0 }
 0x603   :  { %2912 = vrcp.f32 %v1878_v29  ;;  %v1881_v36 = vadd.f32 1.0, %v2889_v23  ;;  %v2509_v10 = vmul.f32 -1.442695, %v4264_v21  ;;  %v4268_v46 = vadd.f32 %v4205_v11, %v1814_v40 }
 0x604   :  { %v2891_v37 = vpop.eup %2890  ;;  %2914 = vpow2.f32 %v2506_v44 }
 0x605   :  { %v2893_v15 = vpop.eup %2892  ;;  %2916 = vrcp.f32 %v1881_v36  ;;  %v1879_v52 = vadd.f32 1.0, %v2891_v37  ;;  %v2507_v62 = vmul.f32 -1.442695, %v4268_v46 }
 0x606   :  { %v2895_v35 = vpop.eup %2894  ;;  %2918 = vpow2.f32 %v2509_v10  ;;  %v1924_v47 = vmul.f32 %v2893_v15, %v4208_v63 }
 0x607   :  { %v2897_v53 = vpop.eup %2896  ;;  %2920 = vrcp.f32 %v1879_v52  ;;  %v1884_v28 = vadd.f32 1.0, %v2895_v35 }
 0x608   :  { %v2899_v50 = vpop.eup %2898  ;;  %2922 = vpow2.f32 %v2507_v62  ;;  %v1922_v31 = vmul.f32 %v2897_v53, %v4212_v18 }
 0x609   :  { %v2901_v4 = vpop.eup %2900  ;;  %v1882_v13 = vadd.f32 1.0, %v2899_v50 }
 0x60a   :  { %v2903_v45 = vpop.eup %2902  ;;  %v1925_v11 = vmul.f32 %v2901_v4, %v4216_v22 }
 0x60b   :  { %v2905_v7 = vpop.eup %2904  ;;  %v1885_v27 = vadd.f32 1.0, %v2903_v45  ;;  %2924 = vrcp.f32 %v1882_v13 }
 0x60c   :  { %v2907_v51 = vpop.eup %2906  ;;  %v1923_v16 = vmul.f32 %v2905_v7, %v4220_v20  ;;  %v1939_v2 = vpack.c.bf16 %v1925_v11, %v1924_v47 }
 0x60d   :  { %2926 = vrcp.f32 %v1885_v27  ;;  %v1883_v42 = vadd.f32 1.0, %v2907_v51 }
 0x60e   :  { %v2909_v54 = vpop.eup %2908  ;;  %2928 = vrcp.f32 %v1884_v28  ;;  %v1938_v1 = vpack.c.bf16 %v1923_v16, %v1922_v31  ;;  %v4290_v16 = vld [vmem:[%s4624_s18] ss:$0 sm:$0xff] }
 0x60f   :  { %v2911_v3 = vpop.eup %2910  ;;  %2930 = vrcp.f32 %v1883_v42  ;;  %v1928_v10 = vmul.f32 %v2909_v54, %v4224_v14 }
 0x610   :  { %v2913_v34 = vpop.eup %2912  ;;  %2649 = vmatprep.mubr.bf16.mxu1 %v1938_v1  ;;  %v1888_v29 = vadd.f32 1.0, %v2911_v3 }
 0x611   :  { %v2915_v22 = vpop.eup %2914  ;;  %2650 = vmatmul.mubr.bf16.vlgmr.msra.gmra.mxu1 %v1939_v2  ;;  %v1926_v40 = vmul.f32 %v2913_v34, %v4228_v49 }
 0x612   :  { %v2917_v19 = vpop.eup %2916  ;;  %v1886_v8 = vadd.f32 1.0, %v2915_v22 }
 0x613   :  { %v2919_v18 = vpop.eup %2918  ;;  %v1929_v44 = vmul.f32 %v2917_v19, %v4232_v41 }
 0x614   :  { %v2921_v20 = vpop.eup %2920  ;;  %v1889_v63 = vadd.f32 1.0, %v2919_v18  ;;  %2932 = vrcp.f32 %v1886_v8 }
 0x615   :  { %v2923_v23 = vpop.eup %2922  ;;  %v1927_v36 = vmul.f32 %v2921_v20, %v4236_v26  ;;  %v1941_v52 = vpack.c.bf16 %v1929_v44, %v1928_v10 }
 0x616   :  { %2934 = vrcp.f32 %v1889_v63  ;;  %v1887_v37 = vadd.f32 1.0, %v2923_v23 }
 0x617   :  { %2936 = vrcp.f32 %v1888_v29  ;;  %v1940_v15 = vpack.c.bf16 %v1927_v36, %v1926_v40 }
 0x618   :  { %2938 = vrcp.f32 %v1887_v37  ;;  %v2925_v62 = vpop.eup %2924 }
 0x619   :  { %2653 = vmatprep.mubr.bf16.mxu1 %v1940_v15  ;;  %v1930_v49 = vmul.f32 %v2925_v62, %v4244_v0 }
 0x61a   :  { %v2927_v35 = vpop.eup %2926  ;;  %2654 = vmatmul.mubr.bf16.gmra.mxu1 %v1941_v52 }
 0x61b   :  { %v2929_v41 = vpop.eup %2928  ;;  %v1933_v50 = vmul.f32 %v2927_v35, %v4248_v25 }
 0x61c   :  { %v2931_v53 = vpop.eup %2930  ;;  %v1932_v14 = vmul.f32 %v2929_v41, %v4240_v32 }
 0x61d   :  { %v1931_v26 = vmul.f32 %v2931_v53, %v4252_v6 }
 0x61e   :  { %v1943_v13 = vpack.c.bf16 %v1933_v50, %v1932_v14 }
 0x61f   :  { %v1942_v4 = vpack.c.bf16 %v1931_v26, %v1930_v49 }
 0x621   :  { %2657 = vmatprep.mubr.bf16.mxu1 %v1942_v4  ;;  %v2933_v45 = vpop.eup %2932 }
 0x622   :  { %2658 = vmatmul.mubr.bf16.gmra.mxu1 %v1943_v13  ;;  %v1934_v51 = vmul.f32 %v2933_v45, %v4260_v30 }
 0x623   :  { %v2935_v28 = vpop.eup %2934 }
 0x624   :  { %v2937_v7 = vpop.eup %2936  ;;  %v1937_v27 = vmul.f32 %v2935_v28, %v4264_v21 }
 0x625   :  { %v2939_v11 = vpop.eup %2938  ;;  %v1936_v0 = vmul.f32 %v2937_v7, %v4256_v55 }
 0x626   :  { %v1935_v25 = vmul.f32 %v2939_v11, %v4268_v46 }
 0x627   :  { %v1945_v6 = vpack.c.bf16 %v1937_v27, %v1936_v0 }
 0x628   :  { %v1944_v31 = vpack.c.bf16 %v1935_v25, %v1934_v51 }
 0x62a   :  { %2661 = vmatprep.mubr.bf16.mxu1 %v1944_v31 }
 0x62b   :  { %2662 = vmatmul.mubr.bf16.gmra.mxu1 %v1945_v6 }
 0x6d1   :  { %v2651_v32 = vpop.f32.mrf.mxu1 }
 0x6d2   :  { %v2109_v47 = vadd.f32 %v2651_v32, %v3892_v57 }
 0x6d3   :  { %v2044_v42 = vpop.f32.mrf.mxu1 }
 0x6d4   :  { %v2107_v21 = vadd.f32 %v2044_v42, %v3889_v5  ;;  %v4295_v30 = vadd.f32 %v4290_v16, %v2109_v47 }
 0x6d5   :  { %v2652_v46 = vpop.f32.mrf.mxu1 }
 0x6d6   :  { %v2110_v55 = vadd.f32 %v2652_v46, %v3906_v39  ;;  %v2154_v54 = vsel %vm87_vm0, %v4295_v30, 0.0  ;;  %v4301_v1 = vadd.f32 %v4290_v16, %v2107_v21 }
 0x6d7   :  { %2155 = vadd.xlane.f32.xlu0 %v2154_v54  ;;  %v2047_v3 = vpop.f32.mrf.mxu1 }
 0x6d8   :  { %v2108_v2 = vadd.f32 %v2047_v3, %v3903_v58  ;;  %v4305_v57 = vadd.f32 %v4290_v16, %v2110_v55  ;;  %v2148_v34 = vsel %vm87_vm0, %v4301_v1, 0.0 }
 0x6da   :  { %v2655_v5 = vpop.f32.mrf.mxu1  ;;  %v2157_v39 = vsel %vm87_vm0, %v4305_v57, 0.0  ;;  %v4312_v22 = vadd.f32 %v4290_v16, %v2108_v2 }
 0x6db   :  { %v2113_v19 = vadd.f32 %v2655_v5, %v3933_v24  ;;  %2149 = vadd.xlane.f32.xlu0 %v2148_v34  ;;  %2158 = vadd.xlane.f32.xlu1 %v2157_v39 }
 0x6dc   :  { %v2060_v8 = vpop.f32.mrf.mxu1  ;;  %v2151_v20 = vsel %vm87_vm0, %v4312_v22, 0.0 }
 0x6dd   :  { %v2111_v58 = vadd.f32 %v2060_v8, %v3919_v43  ;;  %v4317_v18 = vadd.f32 %v4290_v16, %v2113_v19 }
 0x6de   :  { %v2656_v29 = vpop.f32.mrf.mxu1 }
 0x6df   :  { %v2114_v44 = vadd.f32 %v2656_v29, %v3936_v61  ;;  %2152 = vadd.xlane.f32.xlu1 %v2151_v20  ;;  %v2166_v63 = vsel %vm87_vm0, %v4317_v18, 0.0  ;;  %v4325_v24 = vadd.f32 %v4290_v16, %v2111_v58 }
 0x6e0   :  { %2167 = vadd.xlane.f32.xlu0 %v2166_v63  ;;  %v2063_v23 = vpop.f32.mrf.mxu1 }
 0x6e1   :  { %v2112_v43 = vadd.f32 %v2063_v23, %v3930_v59  ;;  %v4329_v40 = vadd.f32 %v4290_v16, %v2114_v44  ;;  %v2160_v61 = vsel %vm87_vm0, %v4325_v24, 0.0 }
 0x6e2   :  { %v2659_v36 = vpop.f32.mrf.mxu1 }
 0x6e3   :  { %v2117_v10 = vadd.f32 %v2659_v36, %v3965_v33  ;;  %v2169_v37 = vsel %vm87_vm0, %v4329_v40, 0.0  ;;  %v4337_v15 = vadd.f32 %v4290_v16, %v2112_v43 }
 0x6e4   :  { %2161 = vadd.xlane.f32.xlu0 %v2160_v61  ;;  %2170 = vadd.xlane.f32.xlu1 %v2169_v37  ;;  %v2076_v52 = vpop.f32.mrf.mxu1 }
 0x6e5   :  { %v2115_v59 = vadd.f32 %v2076_v52, %v3951_v48  ;;  %v4341_v62 = vadd.f32 %v4290_v16, %v2117_v10  ;;  %v2163_v41 = vsel %vm87_vm0, %v4337_v15, 0.0 }
 0x6e6   :  { %v2660_v35 = vpop.f32.mrf.mxu1 }
 0x6e7   :  { %v2118_v33 = vadd.f32 %v2660_v35, %v3968_v38  ;;  %v2178_v53 = vsel %vm87_vm0, %v4341_v62, 0.0  ;;  %v4349_v50 = vadd.f32 %v4290_v16, %v2115_v59 }
 0x6e8   :  { %2164 = vadd.xlane.f32.xlu1 %v2163_v41  ;;  %2179 = vadd.xlane.f32.xlu0 %v2178_v53  ;;  %v2079_v49 = vpop.f32.mrf.mxu1 }
 0x6e9   :  { %v2116_v48 = vadd.f32 %v2079_v49, %v3962_v12  ;;  %v4353_v26 = vadd.f32 %v4290_v16, %v2118_v33  ;;  %v2172_v38 = vsel %vm87_vm0, %v4349_v50, 0.0 }
 0x6eb   :  { %v2663_v14 = vpop.f32.mrf.mxu1  ;;  %v2181_v4 = vsel %vm87_vm0, %v4353_v26, 0.0  ;;  %v4360_v13 = vadd.f32 %v4290_v16, %v2116_v48 }
 0x6ec   :  { %2173 = vadd.xlane.f32.xlu0 %v2172_v38  ;;  %2182 = vadd.xlane.f32.xlu1 %v2181_v4  ;;  %v2121_v28 = vadd.f32 %v2663_v14, %v3997_v9 }
 0x6ed   :  { %v2092_v45 = vpop.f32.mrf.mxu1  ;;  %v2175_v11 = vsel %vm87_vm0, %v4360_v13, 0.0 }
 0x6ee   :  { %v2119_v12 = vadd.f32 %v2092_v45, %v3983_v17  ;;  %v4374_v9 = vadd.f32 %v4290_v16, %v2121_v28 }
 0x6ef   :  { %v2664_v7 = vpop.f32.mrf.mxu1 }
 0x6f0   :  { %2176 = vadd.xlane.f32.xlu1 %v2175_v11  ;;  %v4367_v27 = vadd.f32 %v4290_v16, %v2119_v12  ;;  %v2122_v25 = vadd.f32 %v2664_v7, %v4000_v60  ;;  %v2190_v6 = vsel %vm87_vm0, %v4374_v9, 0.0 }
 0x6f1   :  { %v2095_v51 = vpop.f32.mrf.mxu1 }
 0x6f2   :  { %v2120_v0 = vadd.f32 %v2095_v51, %v3994_v56  ;;  %v2184_v31 = vsel %vm87_vm0, %v4367_v27, 0.0  ;;  %v4384_v60 = vadd.f32 %v4290_v16, %v2122_v25 }
 0x6f3   :  { %2185 = vadd.xlane.f32.xlu0 %v2184_v31 }
 0x6f4   :  { %v4377_v17 = vadd.f32 %v4290_v16, %v2120_v0  ;;  %v2193_v56 = vsel %vm87_vm0, %v4384_v60, 0.0 }
 0x6f6   :  { %v2187_v32 = vsel %vm87_vm0, %v4377_v17, 0.0 }
 0x6f7   :  { %2191 = vadd.xlane.f32.xlu0 %v2190_v6  ;;  %2188 = vadd.xlane.f32.xlu1 %v2187_v32 }
 0x6fb   :  { %2194 = vadd.xlane.f32.xlu1 %v2193_v56 }
 0x760   :  { %v2156_v47 = vpop.xlane.xlu0 %2155 }
 0x761   :  { %v2198_v42 = vmul.f32 0.03125, %v2156_v47 }
 0x763   :  { %v4389_v21 = vsub.f32 %v4295_v30, %v2198_v42 }
 0x764   :  { %v2150_v46 = vpop.xlane.xlu0 %2149  ;;  %v2159_v55 = vpop.xlane.xlu1 %2158 }
 0x765   :  { %v2196_v54 = vmul.f32 0.03125, %v2150_v46  ;;  %v2199_v3 = vmul.f32 0.03125, %v2159_v55  ;;  %v2230_v2 = vmul.f32 %v4389_v21, %v4389_v21 }
 0x767   :  { %v4394_v16 = vsub.f32 %v4301_v1, %v2196_v54  ;;  %v4397_v5 = vsub.f32 %v4305_v57, %v2199_v3  ;;  %v2250_v34 = vsel %vm87_vm0, %v2230_v2, 0.0 }
 0x768   :  { %2251 = vadd.xlane.f32.xlu0 %v2250_v34  ;;  %v2153_v39 = vpop.xlane.xlu1 %2152 }
 0x769   :  { %v2168_v19 = vpop.xlane.xlu0 %2167  ;;  %v2197_v30 = vmul.f32 0.03125, %v2153_v39  ;;  %v2228_v8 = vmul.f32 %v4394_v16, %v4394_v16  ;;  %v2231_v58 = vmul.f32 %v4397_v5, %v4397_v5 }
 0x76a   :  { %v2202_v29 = vmul.f32 0.03125, %v2168_v19 }
 0x76b   :  { %v4405_v20 = vsub.f32 %v4312_v22, %v2197_v30  ;;  %v2244_v1 = vsel %vm87_vm0, %v2228_v8, 0.0  ;;  %v2253_v57 = vsel %vm87_vm0, %v2231_v58, 0.0 }
 0x76c   :  { %v4410_v44 = vsub.f32 %v4317_v18, %v2202_v29  ;;  %2245 = vadd.xlane.f32.xlu0 %v2244_v1  ;;  %2254 = vadd.xlane.f32.xlu1 %v2253_v57 }
 0x76d   :  { %v2162_v63 = vpop.xlane.xlu0 %2161  ;;  %v2171_v23 = vpop.xlane.xlu1 %2170  ;;  %v2229_v43 = vmul.f32 %v4405_v20, %v4405_v20 }
 0x76e   :  { %v2200_v36 = vmul.f32 0.03125, %v2162_v63  ;;  %v2203_v10 = vmul.f32 0.03125, %v2171_v23  ;;  %v2234_v22 = vmul.f32 %v4410_v44, %v4410_v44 }
 0x76f   :  { %v2247_v61 = vsel %vm87_vm0, %v2229_v43, 0.0 }
 0x770   :  { %v4418_v37 = vsub.f32 %v4325_v24, %v2200_v36  ;;  %v4421_v18 = vsub.f32 %v4329_v40, %v2203_v10  ;;  %v2262_v52 = vsel %vm87_vm0, %v2234_v22, 0.0  ;;  %2248 = vadd.xlane.f32.xlu1 %v2247_v61 }
 0x771   :  { %v2180_v59 = vpop.xlane.xlu0 %2179  ;;  %2263 = vadd.xlane.f32.xlu0 %v2262_v52  ;;  %v2165_v35 = vpop.xlane.xlu1 %2164 }
 0x772   :  { %v2206_v33 = vmul.f32 0.03125, %v2180_v59  ;;  %v2201_v41 = vmul.f32 0.03125, %v2165_v35  ;;  %v2232_v53 = vmul.f32 %v4418_v37, %v4418_v37  ;;  %v2235_v49 = vmul.f32 %v4421_v18, %v4421_v18 }
 0x774   :  { %v4429_v24 = vsub.f32 %v4341_v62, %v2206_v33  ;;  %v4432_v40 = vsub.f32 %v4337_v15, %v2201_v41  ;;  %v2256_v48 = vsel %vm87_vm0, %v2232_v53, 0.0  ;;  %v2265_v14 = vsel %vm87_vm0, %v2235_v49, 0.0 }
 0x775   :  { %v2174_v38 = vpop.xlane.xlu0 %2173  ;;  %2257 = vadd.xlane.f32.xlu0 %v2256_v48  ;;  %2266 = vadd.xlane.f32.xlu1 %v2265_v14  ;;  %v2183_v4 = vpop.xlane.xlu1 %2182 }
 0x776   :  { %v2204_v45 = vmul.f32 0.03125, %v2174_v38  ;;  %v2207_v28 = vmul.f32 0.03125, %v2183_v4  ;;  %v2238_v12 = vmul.f32 %v4429_v24, %v4429_v24  ;;  %v2233_v62 = vmul.f32 %v4432_v40, %v4432_v40 }
 0x778   :  { %v4441_v7 = vsub.f32 %v4349_v50, %v2204_v45  ;;  %v4444_v15 = vsub.f32 %v4353_v26, %v2207_v28  ;;  %v2274_v11 = vsel %vm87_vm0, %v2238_v12, 0.0  ;;  %v2259_v51 = vsel %vm87_vm0, %v2233_v62, 0.0 }
 0x779   :  { %2275 = vadd.xlane.f32.xlu0 %v2274_v11  ;;  %2260 = vadd.xlane.f32.xlu1 %v2259_v51  ;;  %v2177_v25 = vpop.xlane.xlu1 %2176 }
 0x77a   :  { %v2205_v0 = vmul.f32 0.03125, %v2177_v25  ;;  %v2236_v31 = vmul.f32 %v4441_v7, %v4441_v7  ;;  %v2239_v6 = vmul.f32 %v4444_v15, %v4444_v15  ;;  %v4487_v25 = vld [vmem:[%s4625_s19] ss:$0 sm:$0xff] }
 0x77c   :  { %v4453_v50 = vsub.f32 %v4360_v13, %v2205_v0  ;;  %v2186_v32 = vpop.xlane.xlu0 %2185  ;;  %v2268_v26 = vsel %vm87_vm0, %v2236_v31, 0.0  ;;  %v2277_v56 = vsel %vm87_vm0, %v2239_v6, 0.0 }
 0x77d   :  { %v2208_v47 = vmul.f32 0.03125, %v2186_v32  ;;  %2269 = vadd.xlane.f32.xlu0 %v2268_v26  ;;  %2278 = vadd.xlane.f32.xlu1 %v2277_v56  ;;  %v4493_v32 = vld [vmem:[%s4626_s20] ss:$0 sm:$0xff] }
 0x77e   :  { %v2237_v42 = vmul.f32 %v4453_v50, %v4453_v50 }
 0x77f   :  { %v4460_v46 = vsub.f32 %v4367_v27, %v2208_v47 }
 0x780   :  { %v2192_v55 = vpop.xlane.xlu0 %2191  ;;  %v2189_v54 = vpop.xlane.xlu1 %2188  ;;  %v2271_v3 = vsel %vm87_vm0, %v2237_v42, 0.0 }
 0x781   :  { %v2210_v13 = vmul.f32 0.03125, %v2192_v55  ;;  %v2209_v2 = vmul.f32 0.03125, %v2189_v54  ;;  %2272 = vadd.xlane.f32.xlu1 %v2271_v3  ;;  %v2240_v34 = vmul.f32 %v4460_v46, %v4460_v46 }
 0x783   :  { %v4466_v39 = vsub.f32 %v4374_v9, %v2210_v13  ;;  %v4469_v19 = vsub.f32 %v4377_v17, %v2209_v2  ;;  %v2280_v30 = vsel %vm87_vm0, %v2240_v34, 0.0 }
 0x784   :  { %2281 = vadd.xlane.f32.xlu0 %v2280_v30  ;;  %v2195_v27 = vpop.xlane.xlu1 %2194 }
 0x785   :  { %v2211_v8 = vmul.f32 0.03125, %v2195_v27  ;;  %v2242_v58 = vmul.f32 %v4466_v39, %v4466_v39  ;;  %v2241_v29 = vmul.f32 %v4469_v19, %v4469_v19 }
 0x787   :  { %v4477_v1 = vsub.f32 %v4384_v60, %v2211_v8  ;;  %v2286_v9 = vsel %vm87_vm0, %v2242_v58, 0.0  ;;  %v2283_v57 = vsel %vm87_vm0, %v2241_v29, 0.0 }
 0x788   :  { %2287 = vadd.xlane.f32.xlu0 %v2286_v9  ;;  %2284 = vadd.xlane.f32.xlu1 %v2283_v57 }
 0x789   :  { %v2243_v17 = vmul.f32 %v4477_v1, %v4477_v1 }
 0x78b   :  { %v2289_v63 = vsel %vm87_vm0, %v2243_v17, 0.0 }
 0x78c   :  { %2290 = vadd.xlane.f32.xlu1 %v2289_v63 }
 0x7f1   :  { %v2252_v23 = vpop.xlane.xlu0 %2251 }
 0x7f2   :  { %v2294_v43 = vmul.f32 0.03125, %v2252_v23 }
 0x7f4   :  { %v2310_v36 = vadd.f32 1e-05, %v2294_v43 }
 0x7f5   :  { %v2246_v10 = vpop.xlane.xlu0 %2245  ;;  %v2255_v22 = vpop.xlane.xlu1 %2254 }
 0x7f6   :  { %2940 = vrsqrt.f32 %v2310_v36  ;;  %v2292_v60 = vmul.f32 0.03125, %v2246_v10  ;;  %v2295_v61 = vmul.f32 0.03125, %v2255_v22 }
 0x7f8   :  { %v2308_v52 = vadd.f32 1e-05, %v2292_v60  ;;  %v2311_v59 = vadd.f32 1e-05, %v2295_v61 }
 0x7f9   :  { %v2249_v35 = vpop.xlane.xlu1 %2248 }
 0x7fa   :  { %2942 = vrsqrt.f32 %v2308_v52  ;;  %v2264_v33 = vpop.xlane.xlu0 %2263  ;;  %v2293_v41 = vmul.f32 0.03125, %v2249_v35 }
 0x7fb   :  { %2944 = vrsqrt.f32 %v2311_v59  ;;  %v2298_v53 = vmul.f32 0.03125, %v2264_v33 }
 0x7fc   :  { %v2309_v49 = vadd.f32 1e-05, %v2293_v41 }
 0x7fd   :  { %v2314_v48 = vadd.f32 1e-05, %v2298_v53 }
 0x7fe   :  { %2946 = vrsqrt.f32 %v2309_v49  ;;  %v2258_v14 = vpop.xlane.xlu0 %2257  ;;  %v2267_v38 = vpop.xlane.xlu1 %2266 }
 0x7ff   :  { %2948 = vrsqrt.f32 %v2314_v48  ;;  %v2296_v4 = vmul.f32 0.03125, %v2258_v14  ;;  %v2299_v45 = vmul.f32 0.03125, %v2267_v38 }
 0x801   :  { %v2312_v28 = vadd.f32 1e-05, %v2296_v4  ;;  %v2315_v12 = vadd.f32 1e-05, %v2299_v45 }
 0x802   :  { %v2276_v62 = vpop.xlane.xlu0 %2275  ;;  %v2261_v11 = vpop.xlane.xlu1 %2260 }
 0x803   :  { %v2941_v51 = vpop.eup %2940  ;;  %2950 = vrsqrt.f32 %v2312_v28  ;;  %v2302_v0 = vmul.f32 0.03125, %v2276_v62  ;;  %v2297_v31 = vmul.f32 0.03125, %v2261_v11 }
 0x804   :  { %v2342_v6 = vmul.f32 %v2941_v51, %v4389_v21  ;;  %2952 = vrsqrt.f32 %v2315_v12 }
 0x805   :  { %v2318_v26 = vadd.f32 1e-05, %v2302_v0  ;;  %v2313_v56 = vadd.f32 1e-05, %v2297_v31 }
 0x806   :  { %v2364_v47 = vmul.f32 %v4487_v25, %v2342_v6  ;;  %v2270_v42 = vpop.xlane.xlu0 %2269  ;;  %v2279_v55 = vpop.xlane.xlu1 %2278 }
 0x807   :  { %v2943_v54 = vpop.eup %2942  ;;  %2954 = vrsqrt.f32 %v2318_v26  ;;  %v2300_v3 = vmul.f32 0.03125, %v2270_v42  ;;  %v2303_v13 = vmul.f32 0.03125, %v2279_v55 }
 0x808   :  { %v2945_v2 = vpop.eup %2944  ;;  %v2386_v34 = vadd.f32 %v4493_v32, %v2364_v47  ;;  %v2340_v21 = vmul.f32 %v2943_v54, %v4394_v16  ;;  %2956 = vrsqrt.f32 %v2313_v56 }
 0x809   :  { %v2343_v30 = vmul.f32 %v2945_v2, %v4397_v5  ;;  %v2316_v27 = vadd.f32 1e-05, %v2300_v3  ;;  %v2319_v8 = vadd.f32 1e-05, %v2303_v13 }
 0x80a   :  { %2402 = vst.msk [vmem:[%s4627_s21 + $0x10] sm:$0xff] %vm87_vm0, %v2386_v34  ;;  %v2362_v58 = vmul.f32 %v4487_v25, %v2340_v21  ;;  %v2273_v29 = vpop.xlane.xlu1 %2272 }
 0x80b   :  { %v2947_v9 = vpop.eup %2946  ;;  %v2365_v57 = vmul.f32 %v4487_v25, %v2343_v30  ;;  %2958 = vrsqrt.f32 %v2316_v27  ;;  %v2301_v17 = vmul.f32 0.03125, %v2273_v29 }
 0x80c   :  { %v2949_v63 = vpop.eup %2948  ;;  %v2384_v16 = vadd.f32 %v4493_v32, %v2362_v58  ;;  %v2341_v5 = vmul.f32 %v2947_v9, %v4405_v20  ;;  %2960 = vrsqrt.f32 %v2319_v8 }
 0x80d   :  { %v2387_v23 = vadd.f32 %v4493_v32, %v2365_v57  ;;  %v2346_v43 = vmul.f32 %v2949_v63, %v4410_v44  ;;  %v2317_v36 = vadd.f32 1e-05, %v2301_v17  ;;  %v2282_v10 = vpop.xlane.xlu0 %2281 }
 0x80e   :  { %2400 = vst.msk [vmem:[%s4627_s21] sm:$0xff] %vm87_vm0, %v2384_v16  ;;  %v2363_v22 = vmul.f32 %v4487_v25, %v2341_v5  ;;  %v2304_v60 = vmul.f32 0.03125, %v2282_v10 }
 0x80f   :  { %2403 = vst.msk [vmem:[%s4627_s21 + $0x18] sm:$0xff] %vm87_vm0, %v2387_v23  ;;  %v2368_v20 = vmul.f32 %v4487_v25, %v2346_v43  ;;  %2962 = vrsqrt.f32 %v2317_v36 }
 0x810   :  { %v2951_v61 = vpop.eup %2950  ;;  %v2385_v44 = vadd.f32 %v4493_v32, %v2363_v22  ;;  %v2320_v52 = vadd.f32 1e-05, %v2304_v60 }
 0x811   :  { %v2953_v59 = vpop.eup %2952  ;;  %v2390_v35 = vadd.f32 %v4493_v32, %v2368_v20  ;;  %v2344_v33 = vmul.f32 %v2951_v61, %v4418_v37  ;;  %v2288_v41 = vpop.xlane.xlu0 %2287 }
 0x812   :  { %v2285_v53 = vpop.xlane.xlu1 %2284  ;;  %2401 = vst.msk [vmem:[%s4627_s21 + $0x8] sm:$0xff] %vm87_vm0, %v2385_v44  ;;  %v2347_v49 = vmul.f32 %v2953_v59, %v4421_v18  ;;  %2964 = vrsqrt.f32 %v2320_v52  ;;  %v2306_v48 = vmul.f32 0.03125, %v2288_v41 }
 0x813   :  { %v2305_v14 = vmul.f32 0.03125, %v2285_v53  ;;  %2406 = vst.msk [vmem:[%s4627_s21 + $0x30] sm:$0xff] %vm87_vm0, %v2390_v35  ;;  %v2366_v38 = vmul.f32 %v4487_v25, %v2344_v33 }
 0x814   :  { %v2955_v37 = vpop.eup %2954  ;;  %v2369_v4 = vmul.f32 %v4487_v25, %v2347_v49  ;;  %v2322_v45 = vadd.f32 1e-05, %v2306_v48 }
 0x815   :  { %v2321_v28 = vadd.f32 1e-05, %v2305_v14  ;;  %v2957_v12 = vpop.eup %2956  ;;  %v2388_v62 = vadd.f32 %v4493_v32, %v2366_v38  ;;  %v2350_v18 = vmul.f32 %v2955_v37, %v4429_v24 }
 0x816   :  { %v2291_v11 = vpop.xlane.xlu1 %2290  ;;  %v2391_v51 = vadd.f32 %v4493_v32, %v2369_v4  ;;  %v2345_v0 = vmul.f32 %v2957_v12, %v4432_v40  ;;  %2966 = vrsqrt.f32 %v2322_v45 }
 0x817   :  { %v2307_v31 = vmul.f32 0.03125, %v2291_v11  ;;  %2404 = vst.msk [vmem:[%s4627_s21 + $0x20] sm:$0xff] %vm87_vm0, %v2388_v62  ;;  %v2372_v6 = vmul.f32 %v4487_v25, %v2350_v18  ;;  %2968 = vrsqrt.f32 %v2321_v28 }
 0x818   :  { %v2959_v26 = vpop.eup %2958  ;;  %2407 = vst.msk [vmem:[%s4627_s21 + $0x38] sm:$0xff] %vm87_vm0, %v2391_v51  ;;  %v2367_v24 = vmul.f32 %v4487_v25, %v2345_v0 }
 0x819   :  { %v2323_v56 = vadd.f32 1e-05, %v2307_v31  ;;  %v2961_v40 = vpop.eup %2960  ;;  %v2394_v47 = vadd.f32 %v4493_v32, %v2372_v6  ;;  %v2348_v42 = vmul.f32 %v2959_v26, %v4441_v7 }
 0x81a   :  { %v2389_v55 = vadd.f32 %v4493_v32, %v2367_v24  ;;  %v2351_v54 = vmul.f32 %v2961_v40, %v4444_v15 }
 0x81b   :  { %2970 = vrsqrt.f32 %v2323_v56  ;;  %2410 = vst.msk [vmem:[%s4627_s21 + $0x50] sm:$0xff] %vm87_vm0, %v2394_v47  ;;  %v2370_v3 = vmul.f32 %v4487_v25, %v2348_v42 }
 0x81c   :  { %v2963_v13 = vpop.eup %2962  ;;  %2405 = vst.msk [vmem:[%s4627_s21 + $0x28] sm:$0xff] %vm87_vm0, %v2389_v55  ;;  %v2373_v7 = vmul.f32 %v4487_v25, %v2351_v54 }
 0x81d   :  { %v2392_v2 = vadd.f32 %v4493_v32, %v2370_v3  ;;  %v2349_v15 = vmul.f32 %v2963_v13, %v4453_v50 }
 0x81e   :  { %v2395_v34 = vadd.f32 %v4493_v32, %v2373_v7 }
 0x81f   :  { %v2965_v21 = vpop.eup %2964  ;;  %2408 = vst.msk [vmem:[%s4627_s21 + $0x40] sm:$0xff] %vm87_vm0, %v2392_v2  ;;  %v2371_v30 = vmul.f32 %v4487_v25, %v2349_v15 }
 0x820   :  { %2411 = vst.msk [vmem:[%s4627_s21 + $0x58] sm:$0xff] %vm87_vm0, %v2395_v34  ;;  %v2352_v27 = vmul.f32 %v2965_v21, %v4460_v46 }
 0x821   :  { %v2393_v8 = vadd.f32 %v4493_v32, %v2371_v30 }
 0x822   :  { %v2374_v50 = vmul.f32 %v4487_v25, %v2352_v27 }
 0x823   :  { %v2967_v58 = vpop.eup %2966  ;;  %2409 = vst.msk [vmem:[%s4627_s21 + $0x48] sm:$0xff] %vm87_vm0, %v2393_v8 }
 0x824   :  { %v2969_v29 = vpop.eup %2968  ;;  %v2396_v9 = vadd.f32 %v4493_v32, %v2374_v50  ;;  %v2354_v57 = vmul.f32 %v2967_v58, %v4466_v39 }
 0x825   :  { %v2353_v17 = vmul.f32 %v2969_v29, %v4469_v19 }
 0x826   :  { %2412 = vst.msk [vmem:[%s4627_s21 + $0x60] sm:$0xff] %vm87_vm0, %v2396_v9  ;;  %v2376_v46 = vmul.f32 %v4487_v25, %v2354_v57 }
 0x827   :  { %v2375_v16 = vmul.f32 %v4487_v25, %v2353_v17 }
 0x828   :  { %v2971_v63 = vpop.eup %2970  ;;  %v2398_v5 = vadd.f32 %v4493_v32, %v2376_v46 }
 0x829   :  { %v2355_v23 = vmul.f32 %v2971_v63, %v4477_v1  ;;  %v2397_v43 = vadd.f32 %v4493_v32, %v2375_v16 }
 0x82a   :  { %2414 = vst.msk [vmem:[%s4627_s21 + $0x70] sm:$0xff] %vm87_vm0, %v2398_v5 }
 0x82b   :  { %v2377_v39 = vmul.f32 %v4487_v25, %v2355_v23  ;;  %2413 = vst.msk [vmem:[%s4627_s21 + $0x68] sm:$0xff] %vm87_vm0, %v2397_v43 }
 0x82d   :  { %v2399_v19 = vadd.f32 %v4493_v32, %v2377_v39 }
 0x82f   :  { %2415 = vst.msk [vmem:[%s4627_s21 + $0x78] sm:$0xff] %vm87_vm0, %v2399_v19 }

</bundles_post_ra>
